<compile_context>
chip_gen: v7x
topology: tpu7x:2x2x1
jax: 0.10.0
libtpu: 0.0.40
codegen_flags: <defaults>
</compile_context>

<pallas_src>
import jax
import jax.numpy as jnp
from jax.experimental import pallas as pl
from jax.experimental.pallas import tpu as pltpu

# Small-but-consistent configuration (module defaults are h=w=16, c=64, noise=100, seq=8;
# we shrink h/w/c and lane-align the noise dim for the TPU kernel demo).
H, W, C = 8, 8, 4
SEQ = 8
NOISE_DIM = 128                 # module default 100; 128 keeps the feature dim lane-aligned
HID1, HID2 = 512, 2048          # architectural constants from the module
IN_DIM = H * W * C              # 256
OUT_DIM = SEQ * H * W * C       # 2048
D0 = IN_DIM + NOISE_DIM         # 384
TN = 1024                       # W3 output-column tile (use 512 on v5e if preferred)


# ---------------------------------------------------------------------------
# Fused Pallas kernel
# ---------------------------------------------------------------------------
def _fused_mlp_kernel(x_ref, n_ref, w1_ref, b1_ref, w2_ref, b2_ref,
                      w3_ref, b3_ref, o_ref, hid_ref):
    """Grid over W3 output-column tiles; layers 1+2 computed once into VMEM scratch."""

    @pl.when(pl.program_id(0) == 0)
    def _():
        # fc:  l1 = relu([x | noise] @ W1 + b1), W1 sliced at the aligned 256 boundary.
        l1 = jnp.dot(x_ref[...], w1_ref[:IN_DIM, :],
                     preferred_element_type=jnp.float32)
        l1 = l1 + jnp.dot(n_ref[...], w1_ref[IN_DIM:, :],
                          preferred_element_type=jnp.float32)
        l1 = jnp.maximum(l1 + b1_ref[...], 0.0)
        # decoder layer 2: relu(l1 @ W2 + b2)
        l2 = jnp.dot(l1.astype(w2_ref.dtype), w2_ref[...],
                     preferred_element_type=jnp.float32) + b2_ref[...]
        hid_ref[...] = jnp.maximum(l2, 0.0)

    # Every grid step: one W3 column tile; tanh stays fused (EUP slot, hidden under DMA).
    acc = jnp.dot(hid_ref[...].astype(w3_ref.dtype), w3_ref[...],
                  preferred_element_type=jnp.float32) + b3_ref[...]
    o_ref[...] = jnp.tanh(acc)


def _fused_forward(x_pad, n_pad, w1, b1, w2, b2, w3, b3, *, tn=TN):
    """Full MLP for a padded batch: relu(relu([x|n]@W1+b1)@W2+b2) @ W3 + b3 -> tanh."""
    bp = x_pad.shape[0]
    nt = OUT_DIM // tn
    return pl.pallas_call(
        _fused_mlp_kernel,
        out_shape=jax.ShapeDtypeStruct((bp, OUT_DIM), jnp.float32),
        grid=(nt,),
        in_specs=[
            pl.BlockSpec((bp, IN_DIM), lambda j: (0, 0)),
            pl.BlockSpec((bp, NOISE_DIM), lambda j: (0, 0)),
            pl.BlockSpec((D0, HID1), lambda j: (0, 0)),
            pl.BlockSpec((1, HID1), lambda j: (0, 0)),
            pl.BlockSpec((HID1, HID2), lambda j: (0, 0)),
            pl.BlockSpec((1, HID2), lambda j: (0, 0)),
            pl.BlockSpec((HID2, tn), lambda j: (0, j)),   # W3 streamed tile-by-tile
            pl.BlockSpec((1, tn), lambda j: (0, j)),
        ],
        out_specs=pl.BlockSpec((bp, tn), lambda j: (0, j)),
        scratch_shapes=[pltpu.VMEM((bp, HID2), jnp.float32)],  # hidden lives in VMEM
        compiler_params=pltpu.CompilerParams(
            dimension_semantics=("arbitrary",),   # scratch carries across grid steps
            vmem_limit_bytes=32 << 20,            # explicit budget; headroom on v7x (64 MiB)
        ),
    )(x_pad, n_pad, w1, b1, w2, b2, w3, b3)


@jax.jit
def video_generator_forward(x, noise1, noise2, w1, b1, w2, b2, w3, b3):
    """Mirrors VideoGenerator.forward; noise passed explicitly (torch.randn analogue).

    Both noise streams run through ONE fused pallas_call (batch 2B, padded to a
    multiple of 8 sublanes), so weights stream from HBM exactly once.
    """
    B = x.shape[0]
    xf = x.reshape(B, -1).astype(jnp.bfloat16)
    x2 = jnp.concatenate([xf, xf], axis=0)                              # (2B, IN_DIM)
    n2 = jnp.concatenate([noise1, noise2], axis=0).astype(jnp.bfloat16)  # (2B, NOISE_DIM)

    bp = max(8, ((2 * B + 7) // 8) * 8)          # pad batch to 8-sublane multiple
    pad = bp - 2 * B
    x_pad = jnp.pad(x2, ((0, pad), (0, 0)))
    n_pad = jnp.pad(n2, ((0, pad), (0, 0)))

    out = _fused_forward(x_pad, n_pad, w1, b1, w2, b2, w3, b3)[: 2 * B]
    video1 = out[:B].reshape(B, SEQ, H, W, C)
    video2 = out[B:].reshape(B, SEQ, H, W, C)
    return video1, video2


# ---------------------------------------------------------------------------
# Init + pure-JAX reference (same bf16-weight / f32-accum math as the kernel)
# ---------------------------------------------------------------------------
def _init_linear(key, fan_in, fan_out):
    """Matches nn.Linear's default U(-1/sqrt(fan_in), 1/sqrt(fan_in)); W stored (in, out)."""
    kw, kb = jax.random.split(key)
    bound = 1.0 / jnp.sqrt(float(fan_in))
    w = jax.random.uniform(kw, (fan_in, fan_out), jnp.float32, -bound, bound)
    b = jax.random.uniform(kb, (1, fan_out), jnp.float32, -bound, bound)
    return w, b


def _reference_mlp(xf, noise, w1, b1, w2, b2, w3, b3):
    xb = xf.astype(jnp.bfloat16)
    nb = noise.astype(jnp.bfloat16)
    l1 = (jnp.dot(xb, w1[:IN_DIM], preferred_element_type=jnp.float32)
          + jnp.dot(nb, w1[IN_DIM:], preferred_element_type=jnp.float32) + b1)
    l1 = jnp.maximum(l1, 0.0)
    l2 = jnp.dot(l1.astype(jnp.bfloat16), w2, preferred_element_type=jnp.float32) + b2
    l2 = jnp.maximum(l2, 0.0)
    l3 = jnp.dot(l2.astype(jnp.bfloat16), w3, preferred_element_type=jnp.float32) + b3
    return jnp.tanh(l3)


if __name__ == "__main__":
    root = jax.random.PRNGKey(0)
    kx, kn1, kn2, kp1, kp2, kp3 = jax.random.split(root, 6)

    batch = 2
    x = jax.random.normal(kx, (batch, H, W, C), jnp.float32)
    noise1 = jax.random.normal(kn1, (batch, NOISE_DIM), jnp.float32)
    noise2 = jax.random.normal(kn2, (batch, NOISE_DIM), jnp.float32)

    w1, b1 = _init_linear(kp1, D0, HID1)
    w2, b2 = _init_linear(kp2, HID1, HID2)
    w3, b3 = _init_linear(kp3, HID2, OUT_DIM)

    # Cast weights to bf16 ONCE at init (not per-forward); biases stay f32.
    w1b = w1.astype(jnp.bfloat16)
    w2b = w2.astype(jnp.bfloat16)
    w3b = w3.astype(jnp.bfloat16)

    video1, video2 = video_generator_forward(x, noise1, noise2, w1b, b1, w2b, b2, w3b, b3)
    jax.block_until_ready((video1, video2))

    assert video1.shape == (batch, SEQ, H, W, C)
    assert video2.shape == (batch, SEQ, H, W, C)

    # Cross-check against a pure-JAX reference doing the same bf16-weight math.
    xf = x.reshape(batch, -1)
    ref1 = _reference_mlp(xf, noise1, w1b, b1, w2b, b2, w3b, b3)
    ref2 = _reference_mlp(xf, noise2, w1b, b1, w2b, b2, w3b, b3)
    assert jnp.allclose(video1.reshape(batch, -1), ref1, atol=1e-2, rtol=1e-2)
    assert jnp.allclose(video2.reshape(batch, -1), ref2, atol=1e-2, rtol=1e-2)

    print("KERNEL_OK")
</pallas_src>

<mosaic_0001>
module attributes {stable_mosaic.version = 11 : i64} {
  func.func @_fused_mlp_kernel(%arg0: i32, %arg1: memref<8x256xbf16, #tpu.memory_space<vmem>>, %arg2: memref<8x128xbf16, #tpu.memory_space<vmem>>, %arg3: memref<384x512xbf16, #tpu.memory_space<vmem>>, %arg4: memref<1x512xf32, #tpu.memory_space<vmem>>, %arg5: memref<512x2048xbf16, #tpu.memory_space<vmem>>, %arg6: memref<1x2048xf32, #tpu.memory_space<vmem>>, %arg7: memref<2048x1024xbf16, #tpu.memory_space<vmem>>, %arg8: memref<1x1024xf32, #tpu.memory_space<vmem>>, %arg9: memref<8x1024xf32, #tpu.memory_space<vmem>>, %arg10: memref<8x2048xf32, #tpu.memory_space<vmem>>) attributes {dimension_semantics = [#tpu.dimension_semantics<arbitrary>], iteration_bounds = array<i64: 2>, scalar_prefetch = 0 : i64, scratch_operands = 1 : i64, tpu.core_type = #tpu.core_type<tc>, window_params = [{pipeline_mode = #tpu.pipeline_mode<synchronous>, transform_indices = @transform_0, window_bounds = array<i64: 8, 256>}, {pipeline_mode = #tpu.pipeline_mode<synchronous>, transform_indices = @transform_1, window_bounds = array<i64: 8, 128>}, {pipeline_mode = #tpu.pipeline_mode<synchronous>, transform_indices = @transform_2, window_bounds = array<i64: 384, 512>}, {pipeline_mode = #tpu.pipeline_mode<synchronous>, transform_indices = @transform_3, window_bounds = array<i64: 1, 512>}, {pipeline_mode = #tpu.pipeline_mode<synchronous>, transform_indices = @transform_4, window_bounds = array<i64: 512, 2048>}, {pipeline_mode = #tpu.pipeline_mode<synchronous>, transform_indices = @transform_5, window_bounds = array<i64: 1, 2048>}, {transform_indices = @transform_6, window_bounds = array<i64: 2048, 1024>}, {transform_indices = @transform_7, window_bounds = array<i64: 1, 1024>}, {transform_indices = @transform_8, window_bounds = array<i64: 8, 1024>}]} {
    %c0_i32 = arith.constant 0 : i32
    %0 = arith.cmpi eq, %arg0, %c0_i32 : i32
    %1 = arith.extui %0 : i1 to i32
    %c0_i32_0 = arith.constant 0 : i32
    %2 = arith.cmpi ne, %1, %c0_i32_0 : i32
    scf.if %2 {
      %c0_8 = arith.constant 0 : index
      %c0_9 = arith.constant 0 : index
      %12 = vector.load %arg1[%c0_8, %c0_9] : memref<8x256xbf16, #tpu.memory_space<vmem>>, vector<8x256xbf16>
      %c0_10 = arith.constant 0 : index
      %c0_11 = arith.constant 0 : index
      %13 = vector.load %arg3[%c0_10, %c0_11] : memref<384x512xbf16, #tpu.memory_space<vmem>>, vector<256x512xbf16>
      %cst_12 = arith.constant dense<0.000000e+00> : vector<8x512xf32>
      %14 = tpu.matmul %12, %13, %cst_12 {dimension_numbers = #tpu.dot_dimension_numbers<[1], [0], [0], [1], [0, 0, 1, 1], [], []>} : vector<8x256xbf16>, vector<256x512xbf16>, vector<8x512xf32> -> vector<8x512xf32>
      %c0_13 = arith.constant 0 : index
      %c0_14 = arith.constant 0 : index
      %15 = vector.load %arg2[%c0_13, %c0_14] : memref<8x128xbf16, #tpu.memory_space<vmem>>, vector<8x128xbf16>
      %c256 = arith.constant 256 : index
      %c0_15 = arith.constant 0 : index
      %16 = vector.load %arg3[%c256, %c0_15] : memref<384x512xbf16, #tpu.memory_space<vmem>>, vector<128x512xbf16>
      %cst_16 = arith.constant dense<0.000000e+00> : vector<8x512xf32>
      %17 = tpu.matmul %15, %16, %cst_16 {dimension_numbers = #tpu.dot_dimension_numbers<[1], [0], [0], [1], [0, 0, 1, 1], [], []>} : vector<8x128xbf16>, vector<128x512xbf16>, vector<8x512xf32> -> vector<8x512xf32>
      %18 = arith.addf %14, %17 : vector<8x512xf32>
      %c0_17 = arith.constant 0 : index
      %c0_18 = arith.constant 0 : index
      %19 = vector.load %arg4[%c0_17, %c0_18] : memref<1x512xf32, #tpu.memory_space<vmem>>, vector<1x512xf32>
      %20 = vector.broadcast %19 : vector<1x512xf32> to vector<8x512xf32>
      %21 = arith.addf %18, %20 : vector<8x512xf32>
      %cst_19 = arith.constant 0.000000e+00 : f32
      %22 = vector.broadcast %cst_19 : f32 to vector<8x512xf32>
      %23 = arith.maximumf %21, %22 : vector<8x512xf32>
      %24 = arith.truncf %23 : vector<8x512xf32> to vector<8x512xbf16>
      %c0_20 = arith.constant 0 : index
      %c0_21 = arith.constant 0 : index
      %25 = vector.load %arg5[%c0_20, %c0_21] : memref<512x2048xbf16, #tpu.memory_space<vmem>>, vector<512x2048xbf16>
      %cst_22 = arith.constant dense<0.000000e+00> : vector<8x2048xf32>
      %26 = tpu.matmul %24, %25, %cst_22 {dimension_numbers = #tpu.dot_dimension_numbers<[1], [0], [0], [1], [0, 0, 1, 1], [], []>} : vector<8x512xbf16>, vector<512x2048xbf16>, vector<8x2048xf32> -> vector<8x2048xf32>
      %c0_23 = arith.constant 0 : index
      %c0_24 = arith.constant 0 : index
      %27 = vector.load %arg6[%c0_23, %c0_24] : memref<1x2048xf32, #tpu.memory_space<vmem>>, vector<1x2048xf32>
      %28 = vector.broadcast %27 : vector<1x2048xf32> to vector<8x2048xf32>
      %29 = arith.addf %26, %28 : vector<8x2048xf32>
      %cst_25 = arith.constant 0.000000e+00 : f32
      %30 = vector.broadcast %cst_25 : f32 to vector<8x2048xf32>
      %31 = arith.maximumf %29, %30 : vector<8x2048xf32>
      %c0_26 = arith.constant 0 : index
      %c0_27 = arith.constant 0 : index
      %32 = vector.load %arg10[%c0_26, %c0_27] : memref<8x2048xf32, #tpu.memory_space<vmem>>, vector<8x2048xf32>
      tpu.vector_store %arg10[%c0_26, %c0_27], %31 {strides = array<i32>} : memref<8x2048xf32, #tpu.memory_space<vmem>>, vector<8x2048xf32>,
    } else {
    }
    %c0 = arith.constant 0 : index
    %c0_1 = arith.constant 0 : index
    %3 = vector.load %arg10[%c0, %c0_1] : memref<8x2048xf32, #tpu.memory_space<vmem>>, vector<8x2048xf32>
    %4 = arith.truncf %3 : vector<8x2048xf32> to vector<8x2048xbf16>
    %c0_2 = arith.constant 0 : index
    %c0_3 = arith.constant 0 : index
    %5 = vector.load %arg7[%c0_2, %c0_3] : memref<2048x1024xbf16, #tpu.memory_space<vmem>>, vector<2048x1024xbf16>
    %cst = arith.constant dense<0.000000e+00> : vector<8x1024xf32>
    %6 = tpu.matmul %4, %5, %cst {dimension_numbers = #tpu.dot_dimension_numbers<[1], [0], [0], [1], [0, 0, 1, 1], [], []>} : vector<8x2048xbf16>, vector<2048x1024xbf16>, vector<8x1024xf32> -> vector<8x1024xf32>
    %c0_4 = arith.constant 0 : index
    %c0_5 = arith.constant 0 : index
    %7 = vector.load %arg8[%c0_4, %c0_5] : memref<1x1024xf32, #tpu.memory_space<vmem>>, vector<1x1024xf32>
    %8 = vector.broadcast %7 : vector<1x1024xf32> to vector<8x1024xf32>
    %9 = arith.addf %6, %8 : vector<8x1024xf32>
    %10 = math.tanh %9 : vector<8x1024xf32>
    %c0_6 = arith.constant 0 : index
    %c0_7 = arith.constant 0 : index
    %11 = vector.load %arg9[%c0_6, %c0_7] : memref<8x1024xf32, #tpu.memory_space<vmem>>, vector<8x1024xf32>
    tpu.vector_store %arg9[%c0_6, %c0_7], %10 {strides = array<i32>} : memref<8x1024xf32, #tpu.memory_space<vmem>>, vector<8x1024xf32>,
    return
  }
  func.func @transform_0(%arg0: i32) -> (i32, i32) {
    %c0_i32 = arith.constant 0 : i32
    %c0_i32_0 = arith.constant 0 : i32
    %c0_i32_1 = arith.constant 0 : i32
    return %c0_i32, %c0_i32_0 : i32, i32
  }
  func.func @transform_1(%arg0: i32) -> (i32, i32) {
    %c0_i32 = arith.constant 0 : i32
    %c0_i32_0 = arith.constant 0 : i32
    %c0_i32_1 = arith.constant 0 : i32
    return %c0_i32, %c0_i32_0 : i32, i32
  }
  func.func @transform_2(%arg0: i32) -> (i32, i32) {
    %c0_i32 = arith.constant 0 : i32
    %c0_i32_0 = arith.constant 0 : i32
    %c0_i32_1 = arith.constant 0 : i32
    return %c0_i32, %c0_i32_0 : i32, i32
  }
  func.func @transform_3(%arg0: i32) -> (i32, i32) {
    %c0_i32 = arith.constant 0 : i32
    %c0_i32_0 = arith.constant 0 : i32
    %c0_i32_1 = arith.constant 0 : i32
    return %c0_i32, %c0_i32_0 : i32, i32
  }
  func.func @transform_4(%arg0: i32) -> (i32, i32) {
    %c0_i32 = arith.constant 0 : i32
    %c0_i32_0 = arith.constant 0 : i32
    %c0_i32_1 = arith.constant 0 : i32
    return %c0_i32, %c0_i32_0 : i32, i32
  }
  func.func @transform_5(%arg0: i32) -> (i32, i32) {
    %c0_i32 = arith.constant 0 : i32
    %c0_i32_0 = arith.constant 0 : i32
    %c0_i32_1 = arith.constant 0 : i32
    return %c0_i32, %c0_i32_0 : i32, i32
  }
  func.func @transform_6(%arg0: i32) -> (i32, i32) {
    %c0_i32 = arith.constant 0 : i32
    %c0_i32_0 = arith.constant 0 : i32
    return %c0_i32, %arg0 : i32, i32
  }
  func.func @transform_7(%arg0: i32) -> (i32, i32) {
    %c0_i32 = arith.constant 0 : i32
    %c0_i32_0 = arith.constant 0 : i32
    return %c0_i32, %arg0 : i32, i32
  }
  func.func @transform_8(%arg0: i32) -> (i32, i32) {
    %c0_i32 = arith.constant 0 : i32
    %c0_i32_0 = arith.constant 0 : i32
    return %c0_i32, %arg0 : i32, i32
  }
}

</mosaic_0001>

<bundles_post_ra>
// kernel: video_generator_forward.1
= control target key start
LH: loop header
LB: loop body
LE: loop exit
PB: predicated region body
PF: predicated region fallthrough
CT: control target
= control target key end

     0   :  { %s16600_s0 = inlined_call_operand.vmem [shape: bf16[8,256], index: 0, kind: input, shape index: {}]   ;;  %s16601_s1 = inlined_call_operand.vmem [shape: bf16[8,128], index: 1, kind: input, shape index: {}]   ;;  %s16602_s2 = inlined_call_operand.hbm [shape: bf16[384,512], index: 2, kind: input, shape index: {}]   ;;  %s16603_s3 = inlined_call_operand.hbm [shape: f32[1,512], index: 3, kind: input, shape index: {}]   ;;  %s16604_s4 = inlined_call_operand.hbm [shape: bf16[512,2048], index: 4, kind: input, shape index: {}]   ;;  %s16605_s5 = inlined_call_operand.hbm [shape: f32[1,2048], index: 5, kind: input, shape index: {}]   ;;  %s16606_s6 = inlined_call_operand.hbm [shape: bf16[2048,2048], index: 6, kind: input, shape index: {}]   ;;  %s16607_s7 = inlined_call_operand.hbm [shape: f32[1,2048], index: 7, kind: input, shape index: {}]   ;;  %s16608_s8 = inlined_call_operand.vmem [shape: f32[8,2048], index: 8, kind: output, shape index: {}]  }
   0x1   :  { %16620 = sst [smem:[#allocation18_spill]] %s16600_s0 }
   0x2   :  { %16621 = sst [smem:[#allocation19_spill]] %s16601_s1 }
   0x3   :  { %16622 = sst [smem:[#allocation20_spill]] %s16602_s2 }
   0x4   :  { %16623 = sst [smem:[#allocation21_spill]] %s16603_s3 }
   0x5   :  { %13 = vsyncpa [#allocation4], 0 }
   0x6   :  { %14 = vsyncpa [#allocation6], 0 }
   0x7   :  { %15 = vsyncpa [#allocation9], 0  ;;  %s15082_s27 = smov 0   ;;  %s15084_s28 = smov 0  }
   0x8   :  { %s15086_s29 = smov 0   ;;  %s15088_s30 = smov 0  }
   0x9 LB: > { %s15101_s9 = sadd.s32 4294967295, %s15022_s30   ;;  %s15104_s10 = sadd.s32 1, %s15022_s30   ;;  %s15022_s30 = sphi %s15088_s30, %s16651_s30   ;;  %s15018_s29 = sphi %s15086_s29, %s16655_s29   ;;  %s15014_s28 = sphi %s15084_s28, %s16654_s28   ;;  %s15010_s27 = sphi %s15082_s27, %s16653_s27  }
   0xa   : > { %16624 = sst [smem:[#allocation16_spill]] %s15104_s10  ;;  %s151_s11 = ssub.s32 %s15022_s30, %s15104_s10 }
   0xb   : > { %s154_s12 = sadd.s32 1, %s15018_s29  ;;  %p152_p0 = scmp.eq.s32.totalorder %s151_s11, 0 }
   0xc   : > { %p161_p1 = scmp.ne.s32.totalorder %s15018_s29, %s15014_s28  ;;  %p162_p2 = scmp.eq.s32.totalorder %s15022_s30, 0 }
   0xd   : > { %p167_p3 = scmp.ne.s32.totalorder %s15014_s28, %s15010_s27  ;;  %p16609_p5 = scmp.eq.s32.totalorder %s15101_s9, 0 }
   0xe   : > { %s15114_s13 = scalar_select %p152_p0, %s15018_s29, %s154_s12  }
   0xf   : > { %p15116_p4 = por %p162_p2, %p161_p1  ;;  %p12721_p6 = scmp.ge.s32.totalorder %s15022_s30, 1 }
  0x10   : > { %16625 = sst [smem:[#allocation17_spill]] %s15114_s13  ;;  %p230_p7 = scmp.lt.s32.totalorder %s15022_s30, 3 }
  0x11   : > { %p15125_p8 = por %p16609_p5, %p167_p3  ;;  %s15024_s17 = smov [#allocation3]  }
  0x12   : > { %p15130_p10 = pnand %p12721_p6, %p230_p7  ;;  %s248_s18 = sshll.u32 %s15024_s17, 4  ;;  %s249_s18 = int_to_ptr.vmem [resolvable:$true] %s248_s18 }
  0x13   : > { %s16627_s15 = scalar_select %p15125_p8, 1, 0 }
  0x14   : > { %s16628_s16 = scalar_select %p15130_p10, 1, 0 }
  0x15   : > { %p14569_p11 = pneg %p15130_p10  ;;  %p14593_p13 = scmp.lt.s32.totalorder %s15022_s30, 2 }
  0x16   : > { %s16631_s2 = sld [smem:[#allocation20_spill]] }
  0x17   : > { %p15138_p12 = pnand %p14569_p11, %p16609_p5  ;;  %p15145_p0 = pnand %p14593_p13, %p15116_p4 }
  0x19   : > { %s16629_s19 = scalar_select %p15138_p12, 1, 0 }
  0x1a   : > { %s16630_s20 = scalar_select %p15145_p0, 1, 0 }
  0x1b   : > { %p15157_p2 = pneg %p15138_p12 }
  0x1c   : > { %s14804_s23 = scalar_lea.hbm %s16631_s2, 12288 }
  0x1d   : > { %p14805_p1 = scmp.ne.s32.totalorder %s16631_s2, %s14804_s23  ;;  %p14811_p6 = scmp.lt.u32.totalorder %s14804_s23, %s16631_s2 }
  0x1f   : > { %p14807_p3 = pnand %p15157_p2, %p14805_p1 }
  0x21   : > { %p14808_p4 = pneg %p14807_p3 }
  0x23   : > { %p14813_p7 = pnand %p14811_p6, %p14808_p4 }
  0x25   : > { %14816 = shalt.err (!%p14813_p7)
}
  0x26   : > { %s14817_s12 = scalar_lea.vmem %s249_s18, 12288  ;;  %p14825_p5 = scmp.lt.s32.totalorder %s249_s18, %s249_s18 }
  0x27   : > { %p14818_p11 = scmp.ne.s32.totalorder %s249_s18, %s14817_s12  ;;  %p14826_p8 = scmp.lt.s32.totalorder %s14817_s12, %s14817_s12 }
  0x29   : > { %p14820_p13 = pnand %p14818_p11, %p15157_p2  ;;  %p14827_p10 = por %p14826_p8, %p14825_p5 }
  0x2b   : > { %p14821_p9 = pneg %p14820_p13 }
  0x2d   : > { %p14828_p0 = pnand %p14827_p10, %p14821_p9 }
  0x2f   : > { %14831 = shalt.err (!%p14828_p0)
}
  0x30   : > { %s15025_s14 = smov 256   ;;  %s15026_s17 = smov 16  }
  0x31   : > { %14572 = dma.hbm_to_vmem [thread:$0]  (!%p15138_p12), %s16631_s2, 12288, %s249_s18, [#allocation4], %s15025_s14, %s15025_s14, %s15026_s17  }
  0x32   : > { %s15027_s23 = smov [#allocation5]   ;;  %s297_s25 = sand.u32 1, %s15022_s30  }
  0x33   : > { %s262_s24 = sshll.u32 %s15027_s23, 4  ;;  %s16633_s3 = sld [smem:[#allocation21_spill]]  ;;  %s263_s24 = int_to_ptr.vmem [resolvable:$true] %s262_s24 }
  0x39   : > { %s14832_s12 = scalar_lea.hbm %s16633_s3, 64 }
  0x3a   : > { %p14833_p5 = scmp.ne.s32.totalorder %s16633_s3, %s14832_s12  ;;  %p14839_p10 = scmp.lt.u32.totalorder %s14832_s12, %s16633_s3 }
  0x3c   : > { %p14835_p8 = pnand %p14833_p5, %p15157_p2 }
  0x3e   : > { %p14836_p9 = pneg %p14835_p8 }
  0x40   : > { %p14841_p0 = pnand %p14839_p10, %p14836_p9 }
  0x42   : > { %14844 = shalt.err (!%p14841_p0)
}
  0x43   : > { %s14845_s18 = scalar_lea.vmem %s263_s24, 64  ;;  %p14853_p6 = scmp.lt.s32.totalorder %s263_s24, %s263_s24 }
  0x44   : > { %p14846_p1 = scmp.ne.s32.totalorder %s263_s24, %s14845_s18  ;;  %p14854_p7 = scmp.lt.s32.totalorder %s14845_s18, %s14845_s18 }
  0x46   : > { %p14848_p3 = pnand %p14846_p1, %p15157_p2  ;;  %p14855_p11 = por %p14854_p7, %p14853_p6 }
  0x48   : > { %p14849_p4 = pneg %p14848_p3 }
  0x4a   : > { %p14856_p13 = pnand %p14855_p11, %p14849_p4 }
  0x4c   : > { %14859 = shalt.err (!%p14856_p13)
}
  0x4d   : > { %14575 = dma.hbm_to_vmem [thread:$0]  (!%p15138_p12), %s16633_s3, 64, %s263_s24, [#allocation6]  }
  0x4e   : > { %s16617_s0 = sand.u32 1, %s15018_s29   ;;  %s14379_s14 = sshll.u32 %s15022_s30, 9 }
  0x4f   : > { %s12727_s1 = sshll.u32 %s16617_s0, 13  ;;  %s15199_s22 = scalar_lea.hbm %s16606_s6, %s14379_s14 }
  0x50   : > { %s301_s23 = scalar_lea.vmem [#allocation10], %s12727_s1  ;;  %s15203_s11 = scalar_lea.sflag [#allocation4], %s297_s25 }
  0x51   : > { %s308_s27 = sshll.u32 %s301_s23, 4  ;;  %s14860_s24 = scalar_lea.hbm %s15199_s22, 131072  ;;  %s15201_s27 = int_to_ptr.vmem [resolvable:$true] %s308_s27 }
  0x52   : > { %p14861_p5 = scmp.ne.s32.totalorder %s15199_s22, %s14860_s24  ;;  %p16634_p8 = scmp.ne.s32.totalorder %s16630_s20, 0 }
  0x53   : > { %s14865_s10 = scalar_lea.hbm %s16606_s6, 262144  ;;  %p14866_p1 = scmp.lt.u32.totalorder %s15199_s22, %s16606_s6 }
  0x54   : > { %p16618_p9 = pneg %p16634_p8  ;;  %p14867_p3 = scmp.lt.u32.totalorder %s14865_s10, %s14860_s24 }
  0x55   : > { %p14869_p6 = scmp.lt.u32.totalorder %s14860_s24, %s15199_s22 }
  0x56   : > { %p14863_p10 = pnand %p16618_p9, %p14861_p5  ;;  %p14868_p4 = por %p14867_p3, %p14866_p1 }
  0x58   : > { %p14864_p0 = pneg %p14863_p10  ;;  %p14870_p7 = por %p14869_p6, %p14868_p4 }
  0x5a   : > { %p14871_p11 = pnand %p14870_p7, %p14864_p0 }
  0x5c   : > { %14874 = shalt.err (!%p14871_p11)
}
  0x5d   : > { %s14875_s25 = scalar_lea.vmem %s15201_s27, 131072  ;;  %s15028_s1 = smov [#allocation10]  }
  0x5e   : > { %p14876_p13 = scmp.ne.s32.totalorder %s15201_s27, %s14875_s25  ;;  %s14880_s17 = sshll.u32 %s15028_s1, 4  ;;  %s14881_s17 = int_to_ptr.vmem [resolvable:$false] %s14880_s17 }
  0x5f   : > { %s14882_s21 = scalar_lea.vmem %s14881_s17, 262144  ;;  %p14883_p12 = scmp.lt.s32.totalorder %s15201_s27, %s14881_s17 }
  0x60   : > { %p14878_p5 = pnand %p14876_p13, %p16618_p9  ;;  %p14884_p1 = scmp.lt.s32.totalorder %s14882_s21, %s14875_s25 }
  0x62   : > { %p14879_p10 = pneg %p14878_p5  ;;  %p14885_p3 = por %p14884_p1, %p14883_p12 }
  0x64   : > { %p14886_p4 = pnand %p14885_p3, %p14879_p10 }
  0x66   : > { %14889 = shalt.err (!%p14886_p4)
}
  0x67   : > { %s15029_s23 = smov 1024   ;;  %s15030_s24 = smov 512  }
  0x68   : > { %s15031_s12 = smov 32   ;;  %s15032_s18 = smov [#allocation7]  }
  0x69   : > { %14585 = dma.hbm_to_vmem [thread:$0]  (!%p16634_p8), %s15199_s22, 131072, %s15201_s27, %s15203_s11, %s15029_s23, %s15030_s24, %s15031_s12  }
  0x6a   : > { %s272_s10 = sshll.u32 %s15032_s18, 4  ;;  %s15033_s13 = smov [#allocation8]   ;;  %s273_s10 = int_to_ptr.vmem [resolvable:$true] %s272_s10 }
  0x6b   : > { %s286_s14 = sshll.u32 %s15033_s13, 4  ;;  %s14890_s17 = scalar_lea.hbm %s16604_s4, 65536  ;;  %s287_s14 = int_to_ptr.vmem [resolvable:$true] %s286_s14 }
  0x6c   : > { %p14891_p12 = scmp.ne.s32.totalorder %s16604_s4, %s14890_s17  ;;  %p14897_p7 = scmp.lt.u32.totalorder %s14890_s17, %s16604_s4 }
  0x6e   : > { %p14893_p0 = pnand %p14891_p12, %p15157_p2 }
  0x70   : > { %p14894_p6 = pneg %p14893_p0 }
  0x72   : > { %p14899_p11 = pnand %p14897_p7, %p14894_p6 }
  0x74   : > { %14902 = shalt.err (!%p14899_p11)
}
  0x75   : > { %s14903_s22 = scalar_lea.vmem %s273_s10, 65536  ;;  %p14911_p1 = scmp.lt.s32.totalorder %s273_s10, %s273_s10 }
  0x76   : > { %p14904_p13 = scmp.ne.s32.totalorder %s273_s10, %s14903_s22  ;;  %p14912_p3 = scmp.lt.s32.totalorder %s14903_s22, %s14903_s22 }
  0x78   : > { %p14906_p5 = pnand %p14904_p13, %p15157_p2  ;;  %p14913_p4 = por %p14912_p3, %p14911_p1 }
  0x7a   : > { %p14907_p10 = pneg %p14906_p5 }
  0x7c   : > { %p14914_p9 = pnand %p14913_p4, %p14907_p10 }
  0x7e   : > { %14917 = shalt.err (!%p14914_p9)
}
  0x7f   : > { %s15034_s0 = smov 64   ;;  %p16635_p12 = scmp.ne.s32.totalorder %s16629_s19, 0 }
  0x80   : > { %s16636_s2 = sand.u32 1, %s15018_s29   ;;  %s14918_s13 = scalar_lea.hbm %s16605_s5, 256 }
  0x81   : > { %14578 = dma.hbm_to_vmem [thread:$0]  (!%p16635_p12), %s16604_s4, 65536, %s273_s10, [#allocation6], %s15029_s23, %s15029_s23, %s15034_s0  }
  0x82   : > { %s12730_s3 = sshll.u32 %s16636_s2, 3  ;;  %p14919_p9 = scmp.ne.s32.totalorder %s16605_s5, %s14918_s13 }
  0x83   : > { %p14925_p7 = scmp.lt.u32.totalorder %s14918_s13, %s16605_s5 }
  0x84   : > { %p14921_p0 = pnand %p14919_p9, %p15157_p2 }
  0x86   : > { %p14922_p6 = pneg %p14921_p0 }
  0x88   : > { %p14927_p11 = pnand %p14925_p7, %p14922_p6 }
  0x8a   : > { %14930 = shalt.err (!%p14927_p11)
}
  0x8b   : > { %s14931_s23 = scalar_lea.vmem %s287_s14, 256  ;;  %p14939_p1 = scmp.lt.s32.totalorder %s287_s14, %s287_s14 }
  0x8c   : > { %p14932_p13 = scmp.ne.s32.totalorder %s287_s14, %s14931_s23  ;;  %p14940_p3 = scmp.lt.s32.totalorder %s14931_s23, %s14931_s23 }
  0x8e   : > { %p14934_p5 = pnand %p14932_p13, %p15157_p2  ;;  %p14941_p4 = por %p14940_p3, %p14939_p1 }
  0x90   : > { %p14935_p10 = pneg %p14934_p5 }
  0x92   : > { %p14942_p8 = pnand %p14941_p4, %p14935_p10 }
  0x94   : > { %14945 = shalt.err (!%p14942_p8)
}
  0x95   : > { %14581 = dma.hbm_to_vmem [thread:$0]  (!%p16635_p12), %s16605_s5, 256, %s287_s14, [#allocation9]  }
  0x96   : > { %s14380_s0 = sshll.u32 %s15022_s30, 7  ;;  %s322_s2 = scalar_lea.vmem [#allocation11], %s12730_s3 }
  0x97   : > { %s15273_s26 = scalar_lea.hbm %s16607_s7, %s14380_s0  ;;  %s330_s12 = sshll.u32 %s322_s2, 4  ;;  %s331_s12 = int_to_ptr.vmem [resolvable:$true] %s330_s12 }
  0x98   : > { %s14946_s19 = scalar_lea.hbm %s15273_s26, 128  ;;  %p16637_p8 = scmp.ne.s32.totalorder %s16630_s20, 0 }
  0x99   : > { %p14947_p2 = scmp.ne.s32.totalorder %s15273_s26, %s14946_s19  ;;  %s14951_s18 = scalar_lea.hbm %s16607_s7, 256 }
  0x9a   : > { %p16638_p9 = pneg %p16637_p8  ;;  %p14952_p12 = scmp.lt.u32.totalorder %s15273_s26, %s16607_s7 }
  0x9b   : > { %p14953_p7 = scmp.lt.u32.totalorder %s14951_s18, %s14946_s19  ;;  %p14955_p13 = scmp.lt.u32.totalorder %s14946_s19, %s15273_s26 }
  0x9c   : > { %p14949_p0 = pnand %p14947_p2, %p16638_p9 }
  0x9d   : > { %p14954_p11 = por %p14953_p7, %p14952_p12 }
  0x9e   : > { %p14950_p6 = pneg %p14949_p0 }
  0x9f   : > { %p14956_p5 = por %p14955_p13, %p14954_p11 }
  0xa1   : > { %p14957_p10 = pnand %p14956_p5, %p14950_p6 }
  0xa3   : > { %14960 = shalt.err (!%p14957_p10)
}
  0xa4   : > { %s14961_s3 = scalar_lea.vmem %s331_s12, 128  ;;  %p16639_p3 = pmov %p16638_p9 }
  0xa5   : > { %p14962_p1 = scmp.ne.s32.totalorder %s331_s12, %s14961_s3  ;;  %s15035_s25 = smov [#allocation11]  }
  0xa6   : > { %s14966_s17 = sshll.u32 %s15035_s25, 4  ;;  %s14967_s17 = int_to_ptr.vmem [resolvable:$false] %s14966_s17 }
  0xa7   : > { %p14964_p4 = pnand %p14962_p1, %p16639_p3  ;;  %s14968_s21 = scalar_lea.vmem %s14967_s17, 256 }
  0xa8   : > { %p14969_p9 = scmp.lt.s32.totalorder %s331_s12, %s14967_s17  ;;  %p14970_p0 = scmp.lt.s32.totalorder %s14968_s21, %s14961_s3 }
  0xa9   : > { %p14965_p2 = pneg %p14964_p4 }
  0xaa   : > { %p14971_p7 = por %p14970_p0, %p14969_p9 }
  0xac   : > { %p14972_p12 = pnand %p14971_p7, %p14965_p2 }
  0xae   : > { %14975 = shalt.err (!%p14972_p12)
}
  0xaf   : > { %14588 = dma.hbm_to_vmem [thread:$0]  (!%p16637_p8), %s15273_s26, 128, %s331_s12, %s15203_s11  }
  0xb0   : > { %p16640_p6 = scmp.ne.s32.totalorder %s16628_s16, 0 }
  0xb1   : > { %p16641_p11 = scmp.eq.s32.totalorder (!%p16640_p6), %s15101_s9, 0 }
  0xb2   : > { %339 = sbr.rel (%p16640_p6) target bundleno = 2444 (0x98c), region = 52 }
  0xb9   : > { %14993 = dma.done.wait (%p16641_p11), [#allocation4], 12288   ;;  %p16642_p13 = pmov %p16641_p11 }
  0xba   : > { %p16643_p5 = pmov %p16641_p11 }
  0xbb   : > { %14995 = vsyncadd (%p16642_p13), [#allocation4], 4294955008 }
  0xbc   : > { %14997 = dma.done.wait (%p16643_p5), [#allocation6], 65600   ;;  %p16644_p10 = pmov %p16643_p5 }
  0xbd   : > { %p16645_p1 = pmov %p16643_p5 }
  0xbe   : > { %14999 = vsyncadd (%p16644_p10), [#allocation6], 4294901696 }
  0xbf   : > { %15001 = dma.done.wait (%p16645_p1), [#allocation9], 256   ;;  %p16646_p8 = pmov %p16645_p1 }
  0xc0   : > { %s357_s16 = sand.u32 1, %s15101_s9   ;;  %s359_s20 = sand.u32 1, %s15014_s28  }
  0xc1   : > { %15003 = vsyncadd (%p16646_p8), [#allocation9], 4294967040  ;;  %s12738_s11 = sshll.u32 %s359_s20, 13  ;;  %s358_s23 = scalar_lea.sflag [#allocation4], %s357_s16 }
  0xc2   : > { %s15311_s10 = scalar_lea.vmem [#allocation10], %s12738_s11  ;;  %p16647_p3 = scmp.ne.s32.totalorder %s16627_s15, 0 }
  0xc4   : > { %15005 = dma.done.wait (%p16647_p3), %s358_s23, 131200  }
  0xc5   : > { %15007 = vsyncadd (%p16647_p3), %s358_s23, 4294836096  ;;  %s15317_s22 = sshll.u32 %s359_s20, 3  ;;  %s12740_s0 = sshll.u32 %s15101_s9, 3 }
  0xc6   : > { %p411_p4 = scmp.lt.s32.totalorder %s12740_s0, 15  ;;  %s370_s12 = scalar_lea.vmem [#allocation11], %s15317_s22 }
  0xc7   : > { %p16648_p2 = scmp.ne.s32.totalorder %s15101_s9, 0 }
  0xc8   : > { %s16657_s0 = smov (!%p411_p4, %s12740_s0), 15  ;;  %v14641_v0 = vld [vmem:[#allocation3 + $0x204] ss:$16 sps:$4 sm:$0xff] (!%p16648_p2)   ;;  %v14643_v1 = vld [vmem:[#allocation3 + $0x20c] ss:$16 sps:$4 sm:$0xff] (!%p16648_p2)   ;;  %v15036_v2 = vmov (!%p16648_p2), 0  }
  0xc9   : > { %s12741_s27 = sshll.u32 %s16657_s0, 3  ;;  %420 = sbr.rel (%p16648_p2) target bundleno = 1187 (0x4a3), region = 80  ;;  %711 = vmatprep.mubr.bf16.mxu0 (!%p16648_p2), %v15036_v2  ;;  %752 = vmatprep.mubr.bf16.mxu1 (!%p16648_p2), %v15036_v2  ;;  %v14645_v3 = vld [vmem:[#allocation3 + $0x200] ss:$16 sps:$4 sm:$0xff] (!%p16648_p2)   ;;  %v14646_v4 = vld [vmem:[#allocation3 + $0x208] ss:$16 sps:$4 sm:$0xff] (!%p16648_p2)  }
  0xca   : > { %s15323_s2 = scalar_lea.vmem %s16608_s8, %s12741_s27  ;;  %679 = vmatprep.subr.bf16.mxu0 (!%p16648_p2), %v14641_v0  ;;  %720 = vmatprep.subr.bf16.mxu1 (!%p16648_p2), %v14643_v1  ;;  %v14647_v5 = vld [vmem:[#allocation3 + $0x224] ss:$16 sps:$4 sm:$0xff] (!%p16648_p2)   ;;  %v14649_v6 = vld [vmem:[#allocation3 + $0x22c] ss:$16 sps:$4 sm:$0xff] (!%p16648_p2)   ;;  %v14651_v7 = vld [vmem:[#allocation3 + $0x220] ss:$16 sps:$4 sm:$0xff] (!%p16648_p2)  }
  0xcb   : > { %680 = vmatpush1.bf16.msra.mxu0 (!%p16648_p2), %v14645_v3  ;;  %721 = vmatpush1.bf16.msra.mxu1 (!%p16648_p2), %v14646_v4  ;;  %v14652_v8 = vld [vmem:[#allocation3 + $0x228] ss:$16 sps:$4 sm:$0xff] (!%p16648_p2)   ;;  %v14653_v9 = vld [vmem:[#allocation3 + $0x244] ss:$16 sps:$4 sm:$0xff] (!%p16648_p2)   ;;  %v14655_v10 = vld [vmem:[#allocation3 + $0x24c] ss:$16 sps:$4 sm:$0xff] (!%p16648_p2)  }
  0xcc   : > { %681 = vmatprep.subr.bf16.mxu0 (!%p16648_p2), %v14647_v5  ;;  %722 = vmatprep.subr.bf16.mxu1 (!%p16648_p2), %v14649_v6  ;;  %v14657_v11 = vld [vmem:[#allocation3 + $0x240] ss:$16 sps:$4 sm:$0xff] (!%p16648_p2)   ;;  %v14658_v12 = vld [vmem:[#allocation3 + $0x248] ss:$16 sps:$4 sm:$0xff] (!%p16648_p2)   ;;  %v14659_v13 = vld [vmem:[#allocation3 + $0x264] ss:$16 sps:$4 sm:$0xff] (!%p16648_p2)  }
  0xcd   : > { %v14661_v14 = vld [vmem:[#allocation3 + $0x26c] ss:$16 sps:$4 sm:$0xff] (!%p16648_p2)   ;;  %v14663_v15 = vld [vmem:[#allocation3 + $0x260] ss:$16 sps:$4 sm:$0xff] (!%p16648_p2)   ;;  %v14664_v16 = vld [vmem:[#allocation3 + $0x268] ss:$16 sps:$4 sm:$0xff] (!%p16648_p2)  }
  0xce   : > { %v14665_v17 = vld [vmem:[#allocation3 + $0x284] ss:$16 sps:$4 sm:$0xff] (!%p16648_p2)   ;;  %v14667_v18 = vld [vmem:[#allocation3 + $0x28c] ss:$16 sps:$4 sm:$0xff] (!%p16648_p2)   ;;  %v14669_v19 = vld [vmem:[#allocation3 + $0x280] ss:$16 sps:$4 sm:$0xff] (!%p16648_p2)  }
  0xcf   : > { %682 = vmatpush1.bf16.msra.mxu0 (!%p16648_p2), %v14651_v7  ;;  %723 = vmatpush1.bf16.msra.mxu1 (!%p16648_p2), %v14652_v8  ;;  %v14670_v20 = vld [vmem:[#allocation3 + $0x288] ss:$16 sps:$4 sm:$0xff] (!%p16648_p2)   ;;  %v14671_v21 = vld [vmem:[#allocation3 + $0x2a4] ss:$16 sps:$4 sm:$0xff] (!%p16648_p2)   ;;  %v14673_v22 = vld [vmem:[#allocation3 + $0x2ac] ss:$16 sps:$4 sm:$0xff] (!%p16648_p2)  }
  0xd0   : > { %683 = vmatprep.subr.bf16.mxu0 %v14653_v9  ;;  %724 = vmatprep.subr.bf16.mxu1 %v14655_v10  ;;  %v14675_v23 = vld [vmem:[#allocation3 + $0x2a0] ss:$16 sps:$4 sm:$0xff]   ;;  %v14676_v24 = vld [vmem:[#allocation3 + $0x2a8] ss:$16 sps:$4 sm:$0xff]   ;;  %v14677_v25 = vld [vmem:[#allocation3 + $0x2c4] ss:$16 sps:$4 sm:$0xff]  }
  0xd1   : > { %v14679_v26 = vld [vmem:[#allocation3 + $0x2cc] ss:$16 sps:$4 sm:$0xff]   ;;  %v14681_v27 = vld [vmem:[#allocation3 + $0x2c0] ss:$16 sps:$4 sm:$0xff]   ;;  %v14682_v28 = vld [vmem:[#allocation3 + $0x2c8] ss:$16 sps:$4 sm:$0xff]  }
  0xd2   : > { %v14683_v29 = vld [vmem:[#allocation3 + $0x2e4] ss:$16 sps:$4 sm:$0xff]   ;;  %v14685_v30 = vld [vmem:[#allocation3 + $0x2ec] ss:$16 sps:$4 sm:$0xff]   ;;  %v14687_v31 = vld [vmem:[#allocation3 + $0x2e0] ss:$16 sps:$4 sm:$0xff]  }
  0xd3   : > { %684 = vmatpush1.bf16.msra.mxu0 %v14657_v11  ;;  %725 = vmatpush1.bf16.msra.mxu1 %v14658_v12  ;;  %v14688_v32 = vld [vmem:[#allocation3 + $0x2e8] ss:$16 sps:$4 sm:$0xff]   ;;  %v14691_v33 = vld [vmem:[#allocation3 + $0x4] ss:$16 sps:$4 sm:$0xff]   ;;  %v14694_v34 = vld [vmem:[#allocation3 + $0xc] ss:$16 sps:$4 sm:$0xff]  }
  0xd4   : > { %685 = vmatprep.subr.bf16.mxu0 %v14659_v13  ;;  %726 = vmatprep.subr.bf16.mxu1 %v14661_v14  ;;  %s16649_s19 = sld [smem:[#allocation19_spill]]  ;;  %v14689_v36 = vld [vmem:[#allocation3] ss:$16 sps:$4 sm:$0xff]   ;;  %v14692_v37 = vld [vmem:[#allocation3 + $0x8] ss:$16 sps:$4 sm:$0xff]   ;;  %s16650_s18 = sld [smem:[#allocation18_spill]] }
  0xd5   : > { %v14697_v38 = vld [vmem:[#allocation3 + $0x24] ss:$16 sps:$4 sm:$0xff]   ;;  %v14700_v39 = vld [vmem:[#allocation3 + $0x2c] ss:$16 sps:$4 sm:$0xff]   ;;  %v14695_v40 = vld [vmem:[#allocation3 + $0x20] ss:$16 sps:$4 sm:$0xff]  }
  0xd6   : > { %v14698_v41 = vld [vmem:[#allocation3 + $0x28] ss:$16 sps:$4 sm:$0xff]   ;;  %v14703_v42 = vld [vmem:[#allocation3 + $0x44] ss:$16 sps:$4 sm:$0xff]   ;;  %v14706_v43 = vld [vmem:[#allocation3 + $0x4c] ss:$16 sps:$4 sm:$0xff]  }
  0xd7   : > { %686 = vmatpush1.bf16.msra.mxu0 %v14663_v15  ;;  %727 = vmatpush1.bf16.msra.mxu1 %v14664_v16  ;;  %v14701_v44 = vld [vmem:[#allocation3 + $0x40] ss:$16 sps:$4 sm:$0xff]   ;;  %v14704_v45 = vld [vmem:[#allocation3 + $0x48] ss:$16 sps:$4 sm:$0xff]   ;;  %v14709_v46 = vld [vmem:[#allocation3 + $0x64] ss:$16 sps:$4 sm:$0xff]  }
  0xd8   : > { %687 = vmatprep.subr.bf16.mxu0 %v14665_v17  ;;  %728 = vmatprep.subr.bf16.mxu1 %v14667_v18  ;;  %v14712_v47 = vld [vmem:[#allocation3 + $0x6c] ss:$16 sps:$4 sm:$0xff]   ;;  %v14707_v48 = vld [vmem:[#allocation3 + $0x60] ss:$16 sps:$4 sm:$0xff]   ;;  %v14710_v49 = vld [vmem:[#allocation3 + $0x68] ss:$16 sps:$4 sm:$0xff]  }
  0xd9   : > { %v14715_v50 = vld [vmem:[#allocation3 + $0x84] ss:$16 sps:$4 sm:$0xff]   ;;  %v14718_v51 = vld [vmem:[#allocation3 + $0x8c] ss:$16 sps:$4 sm:$0xff]   ;;  %v14713_v52 = vld [vmem:[#allocation3 + $0x80] ss:$16 sps:$4 sm:$0xff]  }
  0xda   : > { %v486_v35 = vld [vmem:[%s16649_s19] sm:$0xf]  ;;  %v14716_v53 = vld [vmem:[#allocation3 + $0x88] ss:$16 sps:$4 sm:$0xff]   ;;  %v14721_v54 = vld [vmem:[#allocation3 + $0xa4] ss:$16 sps:$4 sm:$0xff]  }
  0xdb   : > { %688 = vmatpush1.bf16.msra.mxu0 %v14669_v19  ;;  %729 = vmatpush1.bf16.msra.mxu1 %v14670_v20  ;;  %v14724_v55 = vld [vmem:[#allocation3 + $0xac] ss:$16 sps:$4 sm:$0xff]   ;;  %v14719_v56 = vld [vmem:[#allocation3 + $0xa0] ss:$16 sps:$4 sm:$0xff]   ;;  %v14722_v57 = vld [vmem:[#allocation3 + $0xa8] ss:$16 sps:$4 sm:$0xff]  }
  0xdc   : > { %689 = vmatprep.subr.bf16.mxu0 %v14671_v21  ;;  %730 = vmatprep.subr.bf16.mxu1 %v14673_v22  ;;  %v14727_v58 = vld [vmem:[#allocation3 + $0xc4] ss:$16 sps:$4 sm:$0xff]   ;;  %v14730_v59 = vld [vmem:[#allocation3 + $0xcc] ss:$16 sps:$4 sm:$0xff]   ;;  %v14725_v60 = vld [vmem:[#allocation3 + $0xc0] ss:$16 sps:$4 sm:$0xff]  }
  0xdd   : > { %v14728_v61 = vld [vmem:[#allocation3 + $0xc8] ss:$16 sps:$4 sm:$0xff]   ;;  %v14733_v62 = vld [vmem:[#allocation3 + $0xe4] ss:$16 sps:$4 sm:$0xff]   ;;  %v14736_v63 = vld [vmem:[#allocation3 + $0xec] ss:$16 sps:$4 sm:$0xff]  }
  0xde   : > { %v14731_v0 = vld [vmem:[#allocation3 + $0xe0] ss:$16 sps:$4 sm:$0xff]   ;;  %v14734_v1 = vld [vmem:[#allocation3 + $0xe8] ss:$16 sps:$4 sm:$0xff]   ;;  %v14739_v2 = vld [vmem:[#allocation3 + $0x104] ss:$16 sps:$4 sm:$0xff]  }
  0xdf   : > { %690 = vmatpush1.bf16.msra.mxu0 %v14675_v23  ;;  %731 = vmatpush1.bf16.msra.mxu1 %v14676_v24  ;;  %v14742_v3 = vld [vmem:[#allocation3 + $0x10c] ss:$16 sps:$4 sm:$0xff]   ;;  %v14737_v4 = vld [vmem:[#allocation3 + $0x100] ss:$16 sps:$4 sm:$0xff]   ;;  %v14740_v5 = vld [vmem:[#allocation3 + $0x108] ss:$16 sps:$4 sm:$0xff]  }
  0xe0   : > { %691 = vmatprep.subr.bf16.mxu0 %v14677_v25  ;;  %732 = vmatprep.subr.bf16.mxu1 %v14679_v26  ;;  %v421_v6 = vld [vmem:[%s16650_s18] sm:$0xff]  ;;  %v14748_v8 = vld [vmem:[#allocation3 + $0x12c] ss:$16 sps:$4 sm:$0xff]   ;;  %v14746_v11 = vld [vmem:[#allocation3 + $0x128] ss:$16 sps:$4 sm:$0xff]  }
  0xe1   : > { %v14745_v7 = vld [vmem:[#allocation3 + $0x124] ss:$16 sps:$4 sm:$0xff]   ;;  %v12776_v9 = vcombine.high %v421_v6, %v421_v6  ;;  %v14743_v10 = vld [vmem:[#allocation3 + $0x120] ss:$16 sps:$4 sm:$0xff]   ;;  %v14754_v13 = vld [vmem:[#allocation3 + $0x14c] ss:$16 sps:$4 sm:$0xff]  }
  0xe2   : > { %v14751_v12 = vld [vmem:[#allocation3 + $0x144] ss:$16 sps:$4 sm:$0xff]   ;;  %v14749_v14 = vld [vmem:[#allocation3 + $0x140] ss:$16 sps:$4 sm:$0xff]   ;;  %v14752_v15 = vld [vmem:[#allocation3 + $0x148] ss:$16 sps:$4 sm:$0xff]  }
  0xe3   : > { %692 = vmatpush1.bf16.msra.mxu0 %v14681_v27  ;;  %733 = vmatpush1.bf16.msra.mxu1 %v14682_v28  ;;  %v14757_v16 = vld [vmem:[#allocation3 + $0x164] ss:$16 sps:$4 sm:$0xff]   ;;  %v14760_v17 = vld [vmem:[#allocation3 + $0x16c] ss:$16 sps:$4 sm:$0xff]   ;;  %v14755_v18 = vld [vmem:[#allocation3 + $0x160] ss:$16 sps:$4 sm:$0xff]  }
  0xe4   : > { %693 = vmatprep.subr.bf16.mxu0 %v14683_v29  ;;  %734 = vmatprep.subr.bf16.mxu1 %v14685_v30  ;;  %v14758_v19 = vld [vmem:[#allocation3 + $0x168] ss:$16 sps:$4 sm:$0xff]   ;;  %v14763_v20 = vld [vmem:[#allocation3 + $0x184] ss:$16 sps:$4 sm:$0xff]   ;;  %v14766_v21 = vld [vmem:[#allocation3 + $0x18c] ss:$16 sps:$4 sm:$0xff]  }
  0xe5   : > { %v14761_v22 = vld [vmem:[#allocation3 + $0x180] ss:$16 sps:$4 sm:$0xff]   ;;  %v14764_v23 = vld [vmem:[#allocation3 + $0x188] ss:$16 sps:$4 sm:$0xff]   ;;  %v14769_v24 = vld [vmem:[#allocation3 + $0x1a4] ss:$16 sps:$4 sm:$0xff]  }
  0xe6   : > { %v14772_v25 = vld [vmem:[#allocation3 + $0x1ac] ss:$16 sps:$4 sm:$0xff]   ;;  %v14767_v26 = vld [vmem:[#allocation3 + $0x1a0] ss:$16 sps:$4 sm:$0xff]   ;;  %v14770_v27 = vld [vmem:[#allocation3 + $0x1a8] ss:$16 sps:$4 sm:$0xff]  }
  0xe7   : > { %694 = vmatpush1.bf16.msra.mxu0 %v14687_v31  ;;  %735 = vmatpush1.bf16.msra.mxu1 %v14688_v32  ;;  %v14775_v28 = vld [vmem:[#allocation3 + $0x1c4] ss:$16 sps:$4 sm:$0xff]   ;;  %v14778_v29 = vld [vmem:[#allocation3 + $0x1cc] ss:$16 sps:$4 sm:$0xff]   ;;  %v14773_v30 = vld [vmem:[#allocation3 + $0x1c0] ss:$16 sps:$4 sm:$0xff]  }
  0xe8   : > { %1088 = vmatprep.subr.bf16.mxu0 %v14691_v33  ;;  %1129 = vmatprep.subr.bf16.mxu1 %v14694_v34  ;;  %v14776_v31 = vld [vmem:[#allocation3 + $0x1c8] ss:$16 sps:$4 sm:$0xff]   ;;  %v14781_v32 = vld [vmem:[#allocation3 + $0x1e4] ss:$16 sps:$4 sm:$0xff]   ;;  %v14784_v33 = vld [vmem:[#allocation3 + $0x1ec] ss:$16 sps:$4 sm:$0xff]  }
  0xe9   : > { %v14779_v34 = vld [vmem:[#allocation3 + $0x1e0] ss:$16 sps:$4 sm:$0xff]  }
  0xea   : > { %712 = vmatmul.mubr.bf16.vlgmr.msra.gmra.mrb[0].mxu0 %v486_v35  ;;  %753 = vmatmul.mubr.bf16.vlgmr.msra.gmra.mrb[0].mxu1 %v486_v35  ;;  %v14782_v35 = vld [vmem:[#allocation3 + $0x1e8] ss:$16 sps:$4 sm:$0xff]  }
  0xeb   : > { %1089 = vmatpush1.bf16.msra.mxu0 %v14689_v36  ;;  %1130 = vmatpush1.bf16.msra.mxu1 %v14692_v37  ;;  %v12775_v36 = vcombine.low %v421_v6, %v421_v6  ;;  %v1204_v37 = vld [vmem:[#allocation7] sm:$0xff]  ;;  %v1277_v6 = vld [vmem:[#allocation7 + $0x248] sm:$0xff] }
  0xec   : > { %1090 = vmatprep.subr.bf16.mxu0 %v14697_v38  ;;  %1131 = vmatprep.subr.bf16.mxu1 %v14700_v39  ;;  %v1212_v38 = vld [vmem:[#allocation7 + $0x40] sm:$0xff]  ;;  %v1205_v39 = vld [vmem:[#allocation7 + $0x8] sm:$0xff] }
  0xed   : > { %1120 = vmatprep.mubr.bf16.mxu0 %v12776_v9  ;;  %1161 = vmatprep.mubr.bf16.mxu1 %v12776_v9 }
  0xef   : > { %1091 = vmatpush1.bf16.msra.mxu0 %v14695_v40  ;;  %1132 = vmatpush1.bf16.msra.mxu1 %v14698_v41  ;;  %v12841_v40 = vcombine.low %v1204_v37, %v1212_v38  ;;  %v12842_v41 = vcombine.high %v1204_v37, %v1212_v38  ;;  %v1333_v37 = vld [vmem:[#allocation7 + $0x408] sm:$0xff] }
  0xf0   : > { %1092 = vmatprep.subr.bf16.mxu0 %v14703_v42  ;;  %1133 = vmatprep.subr.bf16.mxu1 %v14706_v43  ;;  %v1213_v42 = vld [vmem:[#allocation7 + $0x48] sm:$0xff]  ;;  %v1220_v43 = vld [vmem:[#allocation7 + $0x80] sm:$0xff] }
  0xf1   : > { %v1341_v38 = vld [vmem:[#allocation7 + $0x448] sm:$0xff] }
  0xf3   : > { %1093 = vmatpush1.bf16.msra.mxu0 %v14701_v44  ;;  %1134 = vmatpush1.bf16.msra.mxu1 %v14704_v45  ;;  %v1228_v44 = vld [vmem:[#allocation7 + $0xc0] sm:$0xff]  ;;  %v12843_v45 = vcombine.low %v1205_v39, %v1213_v42 }
  0xf4   : > { %1094 = vmatprep.subr.bf16.mxu0 %v14709_v46  ;;  %1135 = vmatprep.subr.bf16.mxu1 %v14712_v47  ;;  %v12844_v46 = vcombine.high %v1205_v39, %v1213_v42  ;;  %v12858_v47 = vcombine.high %v1220_v43, %v1228_v44  ;;  %v12972_v42 = vcombine.high %v1333_v37, %v1341_v38 }
  0xf7   : > { %1095 = vmatpush1.bf16.msra.mxu0 %v14707_v48  ;;  %1136 = vmatpush1.bf16.msra.mxu1 %v14710_v49  ;;  %v1221_v48 = vld [vmem:[#allocation7 + $0x88] sm:$0xff] }
  0xf8   : > { %1096 = vmatprep.subr.bf16.mxu0 %v14715_v50  ;;  %1137 = vmatprep.subr.bf16.mxu1 %v14718_v51  ;;  %v1229_v49 = vld [vmem:[#allocation7 + $0xc8] sm:$0xff]  ;;  %v1236_v50 = vld [vmem:[#allocation7 + $0x100] sm:$0xff] }
  0xf9   : > { %v12860_v51 = vcombine.high %v1221_v48, %v1229_v49 }
  0xfb   : > { %1097 = vmatpush1.bf16.msra.mxu0 %v14713_v52  ;;  %1138 = vmatpush1.bf16.msra.mxu1 %v14716_v53  ;;  %v1244_v52 = vld [vmem:[#allocation7 + $0x140] sm:$0xff]  ;;  %v1237_v53 = vld [vmem:[#allocation7 + $0x108] sm:$0xff] }
  0xfc   : > { %1098 = vmatprep.subr.bf16.mxu0 %v14721_v54  ;;  %1139 = vmatprep.subr.bf16.mxu1 %v14724_v55  ;;  %v1245_v54 = vld [vmem:[#allocation7 + $0x148] sm:$0xff]  ;;  %v12857_v55 = vcombine.low %v1220_v43, %v1228_v44  ;;  %v1348_v43 = vld [vmem:[#allocation7 + $0x480] sm:$0xff] }
  0xfd   : > { %v1356_v44 = vld [vmem:[#allocation7 + $0x4c0] sm:$0xff] }
  0xff   : > { %1099 = vmatpush1.bf16.msra.mxu0 %v14719_v56  ;;  %1140 = vmatpush1.bf16.msra.mxu1 %v14722_v57  ;;  %v12859_v56 = vcombine.low %v1221_v48, %v1229_v49  ;;  %v12874_v57 = vcombine.high %v1236_v50, %v1244_v52  ;;  %v12971_v48 = vcombine.low %v1333_v37, %v1341_v38  ;;  %v15334_v37 = vld [vmem:[#allocation7 + $0x800] sm:$0xff] }
 0x100   : > { %1100 = vmatprep.subr.bf16.mxu0 %v14727_v58  ;;  %1141 = vmatprep.subr.bf16.mxu1 %v14730_v59  ;;  %v12876_v58 = vcombine.high %v1237_v53, %v1245_v54  ;;  %v1252_v59 = vld [vmem:[#allocation7 + $0x180] sm:$0xff]  ;;  %v12986_v49 = vcombine.high %v1348_v43, %v1356_v44 }
 0x101   : > { %v15336_v38 = vld [vmem:[#allocation7 + $0x840] sm:$0xff] }
 0x103   : > { %1101 = vmatpush1.bf16.msra.mxu0 %v14725_v60  ;;  %1142 = vmatpush1.bf16.msra.mxu1 %v14728_v61  ;;  %v1260_v60 = vld [vmem:[#allocation7 + $0x1c0] sm:$0xff]  ;;  %v1253_v61 = vld [vmem:[#allocation7 + $0x188] sm:$0xff] }
 0x104   : > { %1102 = vmatprep.subr.bf16.mxu0 %v14733_v62  ;;  %1143 = vmatprep.subr.bf16.mxu1 %v14736_v63  ;;  %v1261_v62 = vld [vmem:[#allocation7 + $0x1c8] sm:$0xff]  ;;  %v12873_v63 = vcombine.low %v1236_v50, %v1244_v52  ;;  %v1372_v52 = vld [vmem:[#allocation7 + $0x540] sm:$0xff] }
 0x107   : > { %1103 = vmatpush1.bf16.msra.mxu0 %v14731_v0  ;;  %1144 = vmatpush1.bf16.msra.mxu1 %v14734_v1  ;;  %v12875_v0 = vcombine.low %v1237_v53, %v1245_v54  ;;  %v12890_v1 = vcombine.high %v1252_v59, %v1260_v60  ;;  %v1365_v53 = vld [vmem:[#allocation7 + $0x508] sm:$0xff] }
 0x108   : > { %1104 = vmatprep.subr.bf16.mxu0 %v14739_v2  ;;  %1145 = vmatprep.subr.bf16.mxu1 %v14742_v3  ;;  %v12892_v2 = vcombine.high %v1253_v61, %v1261_v62  ;;  %v1268_v3 = vld [vmem:[#allocation7 + $0x200] sm:$0xff]  ;;  %v1373_v54 = vld [vmem:[#allocation7 + $0x548] sm:$0xff] }
 0x10b   : > { %1105 = vmatpush1.bf16.msra.mxu0 %v14737_v4  ;;  %1146 = vmatpush1.bf16.msra.mxu1 %v14740_v5  ;;  %v1276_v4 = vld [vmem:[#allocation7 + $0x240] sm:$0xff]  ;;  %v1269_v5 = vld [vmem:[#allocation7 + $0x208] sm:$0xff] }
 0x10c   : > { %1106 = vmatprep.subr.bf16.mxu0 %v14745_v7  ;;  %1147 = vmatprep.subr.bf16.mxu1 %v14748_v8  ;;  %v12889_v7 = vcombine.low %v1252_v59, %v1260_v60  ;;  %v12891_v8 = vcombine.low %v1253_v61, %v1261_v62  ;;  %v12906_v9 = vcombine.high %v1268_v3, %v1276_v4  ;;  %v1380_v59 = vld [vmem:[#allocation7 + $0x580] sm:$0xff]  ;;  %v1381_v61 = vld [vmem:[#allocation7 + $0x588] sm:$0xff] }
 0x10d   : > { %v1388_v60 = vld [vmem:[#allocation7 + $0x5c0] sm:$0xff]  ;;  %v1389_v62 = vld [vmem:[#allocation7 + $0x5c8] sm:$0xff] }
 0x10f   : > { %1107 = vmatpush1.bf16.msra.mxu0 %v14743_v10  ;;  %1148 = vmatpush1.bf16.msra.mxu1 %v14746_v11  ;;  %v12908_v10 = vcombine.high %v1269_v5, %v1277_v6  ;;  %v1284_v11 = vld [vmem:[#allocation7 + $0x280] sm:$0xff] }
 0x110   : > { %1108 = vmatprep.subr.bf16.mxu0 %v14751_v12  ;;  %1149 = vmatprep.subr.bf16.mxu1 %v14754_v13  ;;  %v1292_v12 = vld [vmem:[#allocation7 + $0x2c0] sm:$0xff]  ;;  %v1285_v13 = vld [vmem:[#allocation7 + $0x288] sm:$0xff] }
 0x113   : > { %1109 = vmatpush1.bf16.msra.mxu0 %v14749_v14  ;;  %1150 = vmatpush1.bf16.msra.mxu1 %v14752_v15  ;;  %v1293_v14 = vld [vmem:[#allocation7 + $0x2c8] sm:$0xff]  ;;  %v12905_v15 = vcombine.low %v1268_v3, %v1276_v4  ;;  %v1396_v3 = vld [vmem:[#allocation7 + $0x600] sm:$0xff] }
 0x114   : > { %1110 = vmatprep.subr.bf16.mxu0 %v14757_v16  ;;  %1151 = vmatprep.subr.bf16.mxu1 %v14760_v17  ;;  %v12907_v16 = vcombine.low %v1269_v5, %v1277_v6  ;;  %v12922_v17 = vcombine.high %v1284_v11, %v1292_v12  ;;  %v1404_v4 = vld [vmem:[#allocation7 + $0x640] sm:$0xff]  ;;  %v1397_v5 = vld [vmem:[#allocation7 + $0x608] sm:$0xff] }
 0x115   : > { %v1405_v6 = vld [vmem:[#allocation7 + $0x648] sm:$0xff] }
 0x117   : > { %1111 = vmatpush1.bf16.msra.mxu0 %v14755_v18  ;;  %1152 = vmatpush1.bf16.msra.mxu1 %v14758_v19  ;;  %v12924_v18 = vcombine.high %v1285_v13, %v1293_v14  ;;  %v1300_v19 = vld [vmem:[#allocation7 + $0x300] sm:$0xff] }
 0x118   : > { %1112 = vmatprep.subr.bf16.mxu0 %v14763_v20  ;;  %1153 = vmatprep.subr.bf16.mxu1 %v14766_v21  ;;  %v1308_v20 = vld [vmem:[#allocation7 + $0x340] sm:$0xff]  ;;  %v1301_v21 = vld [vmem:[#allocation7 + $0x308] sm:$0xff] }
 0x11b   : > { %1113 = vmatpush1.bf16.msra.mxu0 %v14761_v22  ;;  %1154 = vmatpush1.bf16.msra.mxu1 %v14764_v23  ;;  %v1309_v22 = vld [vmem:[#allocation7 + $0x348] sm:$0xff]  ;;  %v12921_v23 = vcombine.low %v1284_v11, %v1292_v12  ;;  %v1412_v11 = vld [vmem:[#allocation7 + $0x680] sm:$0xff] }
 0x11c   : > { %1114 = vmatprep.subr.bf16.mxu0 %v14769_v24  ;;  %1155 = vmatprep.subr.bf16.mxu1 %v14772_v25  ;;  %v12923_v24 = vcombine.low %v1285_v13, %v1293_v14  ;;  %v12938_v25 = vcombine.high %v1300_v19, %v1308_v20  ;;  %v1420_v12 = vld [vmem:[#allocation7 + $0x6c0] sm:$0xff]  ;;  %v1413_v13 = vld [vmem:[#allocation7 + $0x688] sm:$0xff] }
 0x11d   : > { %v1421_v14 = vld [vmem:[#allocation7 + $0x6c8] sm:$0xff] }
 0x11f   : > { %1115 = vmatpush1.bf16.msra.mxu0 %v14767_v26  ;;  %1156 = vmatpush1.bf16.msra.mxu1 %v14770_v27  ;;  %v12940_v26 = vcombine.high %v1301_v21, %v1309_v22  ;;  %v1316_v27 = vld [vmem:[#allocation7 + $0x380] sm:$0xff] }
 0x120   : > { %1116 = vmatprep.subr.bf16.mxu0 %v14775_v28  ;;  %1157 = vmatprep.subr.bf16.mxu1 %v14778_v29  ;;  %v1324_v28 = vld [vmem:[#allocation7 + $0x3c0] sm:$0xff]  ;;  %v1317_v29 = vld [vmem:[#allocation7 + $0x388] sm:$0xff] }
 0x121   : > { %v12953_v39 = vcombine.low %v1316_v27, %v1324_v28 }
 0x123   : > { %1117 = vmatpush1.bf16.msra.mxu0 %v14773_v30  ;;  %1158 = vmatpush1.bf16.msra.mxu1 %v14776_v31  ;;  %v1325_v30 = vld [vmem:[#allocation7 + $0x3c8] sm:$0xff]  ;;  %v12937_v31 = vcombine.low %v1300_v19, %v1308_v20  ;;  %v13049_v19 = vcombine.low %v1412_v11, %v1420_v12  ;;  %v13051_v20 = vcombine.low %v1413_v13, %v1421_v14 }
 0x124   : > { %1118 = vmatprep.subr.bf16.mxu0 %v14781_v32  ;;  %1159 = vmatprep.subr.bf16.mxu1 %v14784_v33  ;;  %v12939_v32 = vcombine.low %v1301_v21, %v1309_v22  ;;  %v12954_v33 = vcombine.high %v1316_v27, %v1324_v28  ;;  %v1428_v21 = vld [vmem:[#allocation7 + $0x700] sm:$0xff] }
 0x125   : > { %v1436_v22 = vld [vmem:[#allocation7 + $0x740] sm:$0xff] }
 0x127   : > { %1119 = vmatpush1.bf16.msra.mxu0 %v14779_v34  ;;  %1160 = vmatpush1.bf16.msra.mxu1 %v14782_v35  ;;  %v12956_v34 = vcombine.high %v1317_v29, %v1325_v30  ;;  %v1332_v35 = vld [vmem:[#allocation7 + $0x400] sm:$0xff] }
 0x128   : > { %4360 = vmatprep.subr.bf16.mxu0 %v12842_v41  ;;  %4442 = vmatprep.subr.bf16.mxu1 %v12844_v46  ;;  %v1357_v46 = vld [vmem:[#allocation7 + $0x4c8] sm:$0xff] }
 0x12a   : > { %1121 = vmatmul.mubr.bf16.vlgmr.msra.gmra.mrb[4].mxu0 %v12775_v36  ;;  %1162 = vmatmul.mubr.bf16.vlgmr.msra.gmra.mrb[4].mxu1 %v12775_v36  ;;  %v1340_v36 = vld [vmem:[#allocation7 + $0x440] sm:$0xff] }
 0x12b   : > { %4361 = vmatpush1.bf16.msra.mxu0 %v12841_v40  ;;  %4443 = vmatpush1.bf16.msra.mxu1 %v12843_v45  ;;  %v12955_v40 = vcombine.low %v1317_v29, %v1325_v30  ;;  %v12970_v41 = vcombine.high %v1332_v35, %v1340_v36  ;;  %v1349_v45 = vld [vmem:[#allocation7 + $0x488] sm:$0xff]  ;;  %v1444_v29 = vld [vmem:[#allocation7 + $0x780] sm:$0xff] }
 0x12c   : > { %4362 = vmatprep.subr.bf16.mxu0 %v12858_v47  ;;  %4444 = vmatprep.subr.bf16.mxu1 %v12860_v51  ;;  %v12969_v47 = vcombine.low %v1332_v35, %v1340_v36  ;;  %v12988_v50 = vcombine.high %v1349_v45, %v1357_v46  ;;  %v1364_v51 = vld [vmem:[#allocation7 + $0x500] sm:$0xff] }
 0x12d   : > { %v1452_v30 = vld [vmem:[#allocation7 + $0x7c0] sm:$0xff] }
 0x12f   : > { %4363 = vmatpush1.bf16.msra.mxu0 %v12857_v55  ;;  %4445 = vmatpush1.bf16.msra.mxu1 %v12859_v56  ;;  %v12985_v55 = vcombine.low %v1348_v43, %v1356_v44  ;;  %v12987_v56 = vcombine.low %v1349_v45, %v1357_v46 }
 0x130   : > { %4364 = vmatprep.subr.bf16.mxu0 %v12874_v57  ;;  %4446 = vmatprep.subr.bf16.mxu1 %v12876_v58  ;;  %v13002_v57 = vcombine.high %v1364_v51, %v1372_v52  ;;  %v13004_v58 = vcombine.high %v1365_v53, %v1373_v54 }
 0x133   : > { %4365 = vmatpush1.bf16.msra.mxu0 %v12873_v63  ;;  %4447 = vmatpush1.bf16.msra.mxu1 %v12875_v0  ;;  %v13001_v63 = vcombine.low %v1364_v51, %v1372_v52  ;;  %v13003_v0 = vcombine.low %v1365_v53, %v1373_v54  ;;  %v1172_v53 = vlaneseq }
 0x134   : > { %4366 = vmatprep.subr.bf16.mxu0 %v12890_v1  ;;  %4448 = vmatprep.subr.bf16.mxu1 %v12892_v2  ;;  %v13018_v1 = vcombine.high %v1380_v59, %v1388_v60  ;;  %v13020_v2 = vcombine.high %v1381_v61, %v1389_v62 }
 0x135   : > { %v15346_v54 = vshrl.u32 %v1172_v53, 7  ;;  %v1548_v53 = vld [vmem:[#allocation7 + $0xac0] sm:$0xff] }
 0x137   : > { %4367 = vmatpush1.bf16.msra.mxu0 %v12889_v7  ;;  %4449 = vmatpush1.bf16.msra.mxu1 %v12891_v8  ;;  %v13017_v7 = vcombine.low %v1380_v59, %v1388_v60  ;;  %v13019_v8 = vcombine.low %v1381_v61, %v1389_v62  ;;  %v15358_v59 = vsub.s32 3, %v15346_v54 }
 0x138   : > { %4368 = vmatprep.subr.bf16.mxu0 %v12906_v9  ;;  %4450 = vmatprep.subr.bf16.mxu1 %v12908_v10  ;;  %v13034_v9 = vcombine.high %v1396_v3, %v1404_v4  ;;  %v13036_v10 = vcombine.high %v1397_v5, %v1405_v6 }
 0x13b   : > { %4369 = vmatpush1.bf16.msra.mxu0 %v12905_v15  ;;  %4451 = vmatpush1.bf16.msra.mxu1 %v12907_v16  ;;  %v13033_v15 = vcombine.low %v1396_v3, %v1404_v4  ;;  %v13035_v16 = vcombine.low %v1397_v5, %v1405_v6 }
 0x13c   : > { %4370 = vmatprep.subr.bf16.mxu0 %v12922_v17  ;;  %4452 = vmatprep.subr.bf16.mxu1 %v12924_v18  ;;  %v13050_v17 = vcombine.high %v1412_v11, %v1420_v12  ;;  %v13052_v18 = vcombine.high %v1413_v13, %v1421_v14 }
 0x13f   : > { %4371 = vmatpush1.bf16.msra.mxu0 %v12921_v23  ;;  %4453 = vmatpush1.bf16.msra.mxu1 %v12923_v24  ;;  %v1429_v23 = vld [vmem:[#allocation7 + $0x708] sm:$0xff]  ;;  %v13066_v24 = vcombine.high %v1428_v21, %v1436_v22 }
 0x140   : > { %4372 = vmatprep.subr.bf16.mxu0 %v12938_v25  ;;  %4454 = vmatprep.subr.bf16.mxu1 %v12940_v26  ;;  %v1437_v25 = vld [vmem:[#allocation7 + $0x748] sm:$0xff]  ;;  %v13065_v26 = vcombine.low %v1428_v21, %v1436_v22 }
 0x141   : > { %v13067_v27 = vcombine.low %v1429_v23, %v1437_v25  ;;  %v13068_v28 = vcombine.high %v1429_v23, %v1437_v25  ;;  %v1477_v21 = vld [vmem:[#allocation7 + $0x888] sm:$0xff]  ;;  %v1492_v25 = vld [vmem:[#allocation7 + $0x900] sm:$0xff] }
 0x142   : > { %v1485_v22 = vld [vmem:[#allocation7 + $0x8c8] sm:$0xff] }
 0x143   : > { %4373 = vmatpush1.bf16.msra.mxu0 %v12937_v31  ;;  %4455 = vmatpush1.bf16.msra.mxu1 %v12939_v32  ;;  %v1445_v31 = vld [vmem:[#allocation7 + $0x788] sm:$0xff]  ;;  %v13082_v32 = vcombine.high %v1444_v29, %v1452_v30 }
 0x144   : > { %4374 = vmatprep.subr.bf16.mxu0 %v12954_v33  ;;  %4456 = vmatprep.subr.bf16.mxu1 %v12956_v34  ;;  %v1453_v33 = vld [vmem:[#allocation7 + $0x7c8] sm:$0xff]  ;;  %v13081_v34 = vcombine.low %v1444_v29, %v1452_v30 }
 0x145   : > { %v13083_v35 = vcombine.low %v1445_v31, %v1453_v33  ;;  %v13084_v36 = vcombine.high %v1445_v31, %v1453_v33  ;;  %v1493_v29 = vld [vmem:[#allocation7 + $0x908] sm:$0xff]  ;;  %v13115_v33 = vcombine.low %v1477_v21, %v1485_v22 }
 0x146   : > { %v1501_v30 = vld [vmem:[#allocation7 + $0x948] sm:$0xff] }
 0x147   : > { %4375 = vmatpush1.bf16.msra.mxu0 %v12953_v39  ;;  %4457 = vmatpush1.bf16.msra.mxu1 %v12955_v40  ;;  %v15338_v39 = vld [vmem:[#allocation7 + $0x808] sm:$0xff]  ;;  %v13098_v40 = vcombine.high %v15334_v37, %v15336_v38 }
 0x148   : > { %4376 = vmatprep.subr.bf16.mxu0 %v12970_v41  ;;  %4458 = vmatprep.subr.bf16.mxu1 %v12972_v42  ;;  %v1469_v41 = vld [vmem:[#allocation7 + $0x848] sm:$0xff]  ;;  %v13097_v42 = vcombine.low %v15334_v37, %v15336_v38  ;;  %v1516_v37 = vld [vmem:[#allocation7 + $0x9c0] sm:$0xff] }
 0x149   : > { %v13099_v43 = vcombine.low %v15338_v39, %v1469_v41  ;;  %v13100_v44 = vcombine.high %v15338_v39, %v1469_v41  ;;  %v1509_v38 = vld [vmem:[#allocation7 + $0x988] sm:$0xff]  ;;  %v13131_v41 = vcombine.low %v1493_v29, %v1501_v30 }
 0x14a   : > { %v1517_v39 = vld [vmem:[#allocation7 + $0x9c8] sm:$0xff] }
 0x14b   : > { %4377 = vmatpush1.bf16.msra.mxu0 %v12969_v47  ;;  %4459 = vmatpush1.bf16.msra.mxu1 %v12971_v48 }
 0x14c   : > { %4378 = vmatprep.subr.bf16.mxu0 %v12986_v49  ;;  %4460 = vmatprep.subr.bf16.mxu1 %v12988_v50 }
 0x14f   : > { %4379 = vmatpush1.bf16.msra.mxu0 %v12985_v55  ;;  %4461 = vmatpush1.bf16.msra.mxu1 %v12987_v56  ;;  %v15349_v55 = vsub.s32 0, %v15346_v54  ;;  %v15352_v56 = vsub.s32 2, %v15346_v54 }
 0x150   : > { %4380 = vmatprep.subr.bf16.mxu0 %v13002_v57  ;;  %4462 = vmatprep.subr.bf16.mxu1 %v13004_v58  ;;  %v1170_v57 = vld [vmem:[#allocation5] sm:$0xf]  ;;  %v15355_v58 = vsub.s32 1, %v15346_v54 }
 0x151   : > { %v1175_v60 = vrot.slane %v1170_v57, %v15349_v55  ;;  %v1183_v61 = vrot.slane %v1170_v57, %v15352_v56 }
 0x153   : > { %4381 = vmatpush1.bf16.msra.mxu0 %v13001_v63  ;;  %4463 = vmatpush1.bf16.msra.mxu1 %v13003_v0  ;;  %v1179_v0 = vrot.slane %v1170_v57, %v15355_v58 }
 0x154   : > { %4382 = vmatprep.subr.bf16.mxu0 %v13018_v1  ;;  %4464 = vmatprep.subr.bf16.mxu1 %v13020_v2  ;;  %v1187_v1 = vrot.slane %v1170_v57, %v15358_v59  ;;  %v1541_v57 = vld [vmem:[#allocation7 + $0xa88] sm:$0xff] }
 0x157   : > { %4383 = vmatpush1.bf16.msra.mxu0 %v13017_v7  ;;  %4465 = vmatpush1.bf16.msra.mxu1 %v13019_v8 }
 0x158   : > { %4384 = vmatprep.subr.bf16.mxu0 %v13034_v9  ;;  %4466 = vmatprep.subr.bf16.mxu1 %v13036_v10 }
 0x15b   : > { %4385 = vmatpush1.bf16.msra.mxu0 %v13033_v15  ;;  %4467 = vmatpush1.bf16.msra.mxu1 %v13035_v16 }
 0x15c   : > { %4386 = vmatprep.subr.bf16.mxu0 %v13050_v17  ;;  %4468 = vmatprep.subr.bf16.mxu1 %v13052_v18  ;;  %v1476_v18 = vld [vmem:[#allocation7 + $0x880] sm:$0xff] }
 0x15f   : > { %4387 = vmatpush1.bf16.msra.mxu0 %v13049_v19  ;;  %4469 = vmatpush1.bf16.msra.mxu1 %v13051_v20  ;;  %v1484_v20 = vld [vmem:[#allocation7 + $0x8c0] sm:$0xff] }
 0x160   : > { %4388 = vmatprep.subr.bf16.mxu0 %v13066_v24  ;;  %4470 = vmatprep.subr.bf16.mxu1 %v13068_v28  ;;  %v1500_v28 = vld [vmem:[#allocation7 + $0x940] sm:$0xff] }
 0x163   : > { %4389 = vmatpush1.bf16.msra.mxu0 %v13065_v26  ;;  %4471 = vmatpush1.bf16.msra.mxu1 %v13067_v27  ;;  %v13114_v26 = vcombine.high %v1476_v18, %v1484_v20  ;;  %v13116_v27 = vcombine.high %v1477_v21, %v1485_v22  ;;  %v1597_v21 = vld [vmem:[#allocation7 + $0xc48] sm:$0xff] }
 0x164   : > { %4390 = vmatprep.subr.bf16.mxu0 %v13082_v32  ;;  %4472 = vmatprep.subr.bf16.mxu1 %v13084_v36  ;;  %v13113_v32 = vcombine.low %v1476_v18, %v1484_v20  ;;  %v1508_v36 = vld [vmem:[#allocation7 + $0x980] sm:$0xff]  ;;  %v1589_v20 = vld [vmem:[#allocation7 + $0xc08] sm:$0xff] }
 0x165   : > { %v1588_v18 = vld [vmem:[#allocation7 + $0xc00] sm:$0xff] }
 0x167   : > { %4391 = vmatpush1.bf16.msra.mxu0 %v13081_v34  ;;  %4473 = vmatpush1.bf16.msra.mxu1 %v13083_v35  ;;  %v13130_v34 = vcombine.high %v1492_v25, %v1500_v28  ;;  %v13132_v35 = vcombine.high %v1493_v29, %v1501_v30  ;;  %v1612_v29 = vld [vmem:[#allocation7 + $0xcc0] sm:$0xff]  ;;  %v1605_v30 = vld [vmem:[#allocation7 + $0xc88] sm:$0xff] }
 0x168   : > { %4401 = vmatprep.subr.bf16.mxu0 %v13098_v40  ;;  %4483 = vmatprep.subr.bf16.mxu1 %v13100_v44  ;;  %v13129_v40 = vcombine.low %v1492_v25, %v1500_v28  ;;  %v1524_v44 = vld [vmem:[#allocation7 + $0xa00] sm:$0xff] }
 0x169   : > { %v1604_v28 = vld [vmem:[#allocation7 + $0xc80] sm:$0xff] }
 0x1bd   : > { %v713_v45 = vpop.f32.mrb[0].mxu0  ;;  %v754_v46 = vpop.f32.mrb[0].mxu1 }
 0x1be   : > { %v715_v47 = vpop.f32.mrb[1].mxu0  ;;  %v756_v48 = vpop.f32.mrb[1].mxu1 }
 0x1bf   : > { %v717_v49 = vpop.f32.mrb[2].mxu0  ;;  %v758_v50 = vpop.f32.mrb[2].mxu1 }
 0x1c0   : > { %v718_v51 = vpop.f32.mrb[3].mxu0  ;;  %v759_v52 = vpop.f32.mrb[3].mxu1  ;;  %v13147_v49 = vcombine.low %v1509_v38, %v1517_v39 }
 0x1c1   : > { %v1540_v52 = vld [vmem:[#allocation7 + $0xa80] sm:$0xff] }
 0x1fd   : > { %v1122_v62 = vpop.f32.mrb[4].mxu0  ;;  %v1163_v63 = vpop.f32.mrb[4].mxu1 }
 0x1fe   : > { %v1123_v2 = vadd.f32 %v1122_v62, %v713_v45  ;;  %v1164_v3 = vadd.f32 %v1163_v63, %v754_v46  ;;  %v1124_v4 = vpop.f32.mrb[5].mxu0  ;;  %v1165_v5 = vpop.f32.mrb[5].mxu1  ;;  %v1532_v45 = vld [vmem:[#allocation7 + $0xa40] sm:$0xff]  ;;  %v1525_v46 = vld [vmem:[#allocation7 + $0xa08] sm:$0xff]  ;;  %v13178_v63 = vcombine.high %v1540_v52, %v1548_v53 }
 0x1ff   : > { %v1125_v6 = vadd.f32 %v1124_v4, %v715_v47  ;;  %v1166_v7 = vadd.f32 %v1165_v5, %v756_v48  ;;  %v1126_v8 = vpop.f32.mrb[6].mxu0  ;;  %v1167_v9 = vpop.f32.mrb[6].mxu1  ;;  %v1533_v47 = vld [vmem:[#allocation7 + $0xa48] sm:$0xff]  ;;  %v13145_v48 = vcombine.low %v1508_v36, %v1516_v37  ;;  %v13162_v50 = vcombine.high %v1524_v44, %v1532_v45 }
 0x200   : > { %v1192_v10 = vadd.f32 %v1175_v60, %v1123_v2  ;;  %v15364_v11 = vadd.f32 %v1183_v61, %v1164_v3  ;;  %v1127_v12 = vpop.f32.mrb[7].mxu0  ;;  %v1168_v13 = vpop.f32.mrb[7].mxu1  ;;  %v13164_v51 = vcombine.high %v1525_v46, %v1533_v47  ;;  %v1549_v60 = vld [vmem:[#allocation7 + $0xac8] sm:$0xff]  ;;  %v13161_v61 = vcombine.low %v1524_v44, %v1532_v45  ;;  %v1564_v2 = vld [vmem:[#allocation7 + $0xb40] sm:$0xff] }
 0x201   : > { %v1193_v14 = vadd.f32 %v1179_v0, %v1125_v6  ;;  %v1195_v15 = vadd.f32 %v1187_v1, %v1166_v7  ;;  %v13163_v62 = vcombine.low %v1525_v46, %v1533_v47  ;;  %v13180_v0 = vcombine.high %v1541_v57, %v1549_v60  ;;  %v1556_v1 = vld [vmem:[#allocation7 + $0xb00] sm:$0xff]  ;;  %v1557_v3 = vld [vmem:[#allocation7 + $0xb08] sm:$0xff] }
 0x202   : > { %v1196_v16 = vmax.f32 %v1192_v10, 0.0  ;;  %v1565_v4 = vld [vmem:[#allocation7 + $0xb48] sm:$0xff]  ;;  %v13177_v5 = vcombine.low %v1540_v52, %v1548_v53  ;;  %v13179_v6 = vcombine.low %v1541_v57, %v1549_v60  ;;  %v13194_v7 = vcombine.high %v1556_v1, %v1564_v2  ;;  %v1572_v9 = vld [vmem:[#allocation7 + $0xb80] sm:$0xff] }
 0x203   : > { %v1197_v17 = vmax.f32 %v1193_v14, 0.0  ;;  %v1199_v19 = vmax.f32 %v1195_v15, 0.0  ;;  %v13196_v8 = vcombine.high %v1557_v3, %v1565_v4  ;;  %v1580_v10 = vld [vmem:[#allocation7 + $0xbc0] sm:$0xff]  ;;  %v1573_v12 = vld [vmem:[#allocation7 + $0xb88] sm:$0xff]  ;;  %v13193_v14 = vcombine.low %v1556_v1, %v1564_v2 }
 0x204   : > { %v15368_v24 = vpack.c.bf16 %v1196_v16, %v1196_v16  ;;  %v1581_v13 = vld [vmem:[#allocation7 + $0xbc8] sm:$0xff]  ;;  %v13195_v15 = vcombine.low %v1557_v3, %v1565_v4  ;;  %v13210_v16 = vcombine.high %v1572_v9, %v1580_v10  ;;  %v13209_v22 = vcombine.low %v1572_v9, %v1580_v10  ;;  %v1636_v45 = vld [vmem:[#allocation7 + $0xd80] sm:$0xff] }
 0x205   : > { %v15366_v23 = vpack.c.bf16 %v1197_v17, %v1197_v17  ;;  %v15372_v31 = vpack.c.bf16 %v1199_v19, %v1199_v19  ;;  %v13212_v17 = vcombine.high %v1573_v12, %v1581_v13  ;;  %v1596_v19 = vld [vmem:[#allocation7 + $0xc40] sm:$0xff]  ;;  %v13211_v25 = vcombine.low %v1573_v12, %v1581_v13  ;;  %v1637_v47 = vld [vmem:[#allocation7 + $0xd88] sm:$0xff] }
 0x206   : > { %v1644_v46 = vld [vmem:[#allocation7 + $0xdc0] sm:$0xff]  ;;  %v1653_v60 = vld [vmem:[#allocation7 + $0xe08] sm:$0xff] }
 0x207   : > { %4392 = vmatprep.mubr.bf16.mxu0 %v15366_v23  ;;  %4474 = vmatprep.mubr.bf16.mxu1 %v15366_v23  ;;  %v1652_v53 = vld [vmem:[#allocation7 + $0xe00] sm:$0xff]  ;;  %v1669_v4 = vld [vmem:[#allocation7 + $0xe88] sm:$0xff] }
 0x208   : > { %4393 = vmatmul.mubr.bf16.vlgmr.msra.gmra.mrb[8].mxu0 %v15368_v24  ;;  %4475 = vmatmul.mubr.bf16.vlgmr.msra.gmra.mrb[8].mxu1 %v15368_v24  ;;  %v1660_v57 = vld [vmem:[#allocation7 + $0xe40] sm:$0xff]  ;;  %v1685_v13 = vld [vmem:[#allocation7 + $0xf08] sm:$0xff] }
 0x209   : > { %4402 = vmatpush1.bf16.msra.mxu0 %v13097_v42  ;;  %4484 = vmatpush1.bf16.msra.mxu1 %v13099_v43  ;;  %v13146_v42 = vcombine.high %v1508_v36, %v1516_v37  ;;  %v13148_v43 = vcombine.high %v1509_v38, %v1517_v39  ;;  %v1620_v37 = vld [vmem:[#allocation7 + $0xd00] sm:$0xff]  ;;  %v1621_v39 = vld [vmem:[#allocation7 + $0xd08] sm:$0xff] }
 0x20a   : > { %4433 = vmatprep.mubr.bf16.mxu0 %v15372_v31  ;;  %4515 = vmatprep.mubr.bf16.mxu1 %v15372_v31  ;;  %v1628_v38 = vld [vmem:[#allocation7 + $0xd40] sm:$0xff] }
 0x20b   : > { %4403 = vmatprep.subr.bf16.mxu0 %v13114_v26  ;;  %4485 = vmatprep.subr.bf16.mxu1 %v13116_v27  ;;  %v13226_v26 = vcombine.high %v1588_v18, %v1596_v19  ;;  %v13228_v27 = vcombine.high %v1589_v20, %v1597_v21  ;;  %v1668_v2 = vld [vmem:[#allocation7 + $0xe80] sm:$0xff] }
 0x20c   : > { %v1676_v3 = vld [vmem:[#allocation7 + $0xec0] sm:$0xff] }
 0x20d   : > { %4404 = vmatpush1.bf16.msra.mxu0 %v13113_v32  ;;  %4486 = vmatpush1.bf16.msra.mxu1 %v13115_v33  ;;  %v1613_v32 = vld [vmem:[#allocation7 + $0xcc8] sm:$0xff]  ;;  %v13225_v33 = vcombine.low %v1588_v18, %v1596_v19  ;;  %v1684_v10 = vld [vmem:[#allocation7 + $0xf00] sm:$0xff] }
 0x20e   : > { %4405 = vmatprep.subr.bf16.mxu0 %v13130_v34  ;;  %4487 = vmatprep.subr.bf16.mxu1 %v13132_v35  ;;  %v13227_v34 = vcombine.low %v1589_v20, %v1597_v21  ;;  %v13242_v35 = vcombine.high %v1604_v28, %v1612_v29  ;;  %v13244_v36 = vcombine.high %v1605_v30, %v1613_v32  ;;  %v1692_v12 = vld [vmem:[#allocation7 + $0xf40] sm:$0xff]  ;;  %v1701_v21 = vld [vmem:[#allocation7 + $0xf88] sm:$0xff] }
 0x20f   : > { %v1700_v19 = vld [vmem:[#allocation7 + $0xf80] sm:$0xff] }
 0x210   : > { %v1708_v20 = vld [vmem:[#allocation7 + $0xfc0] sm:$0xff] }
 0x211   : > { %4406 = vmatpush1.bf16.msra.mxu0 %v13129_v40  ;;  %4488 = vmatpush1.bf16.msra.mxu1 %v13131_v41  ;;  %v1629_v40 = vld [vmem:[#allocation7 + $0xd48] sm:$0xff]  ;;  %v13241_v41 = vcombine.low %v1604_v28, %v1612_v29  ;;  %v1206_v29 = vld [vmem:[#allocation7 + $0x10] sm:$0xff] }
 0x212   : > { %4407 = vmatprep.subr.bf16.mxu0 %v13146_v42  ;;  %4489 = vmatprep.subr.bf16.mxu1 %v13148_v43  ;;  %v13243_v42 = vcombine.low %v1605_v30, %v1613_v32  ;;  %v13258_v43 = vcombine.high %v1620_v37, %v1628_v38  ;;  %v13260_v44 = vcombine.high %v1621_v39, %v1629_v40  ;;  %v1214_v30 = vld [vmem:[#allocation7 + $0x50] sm:$0xff]  ;;  %v1207_v32 = vld [vmem:[#allocation7 + $0x18] sm:$0xff] }
 0x215   : > { %4408 = vmatpush1.bf16.msra.mxu0 %v13145_v48  ;;  %4490 = vmatpush1.bf16.msra.mxu1 %v13147_v49  ;;  %v1645_v48 = vld [vmem:[#allocation7 + $0xdc8] sm:$0xff]  ;;  %v13257_v49 = vcombine.low %v1620_v37, %v1628_v38  ;;  %v12846_v37 = vcombine.high %v1206_v29, %v1214_v30 }
 0x216   : > { %4409 = vmatprep.subr.bf16.mxu0 %v13162_v50  ;;  %4491 = vmatprep.subr.bf16.mxu1 %v13164_v51  ;;  %v13259_v50 = vcombine.low %v1621_v39, %v1629_v40  ;;  %v13274_v51 = vcombine.high %v1636_v45, %v1644_v46  ;;  %v13276_v52 = vcombine.high %v1637_v47, %v1645_v48  ;;  %v1222_v39 = vld [vmem:[#allocation7 + $0x90] sm:$0xff] }
 0x217   : > { %v1230_v40 = vld [vmem:[#allocation7 + $0xd0] sm:$0xff] }
 0x219   : > { %4410 = vmatpush1.bf16.msra.mxu0 %v13161_v61  ;;  %4492 = vmatpush1.bf16.msra.mxu1 %v13163_v62  ;;  %v1661_v61 = vld [vmem:[#allocation7 + $0xe48] sm:$0xff]  ;;  %v13273_v62 = vcombine.low %v1636_v45, %v1644_v46  ;;  %v12862_v46 = vcombine.high %v1222_v39, %v1230_v40 }
 0x21a   : > { %4411 = vmatprep.subr.bf16.mxu0 %v13178_v63  ;;  %4493 = vmatprep.subr.bf16.mxu1 %v13180_v0  ;;  %v13275_v63 = vcombine.low %v1637_v47, %v1645_v48  ;;  %v13290_v0 = vcombine.high %v1652_v53, %v1660_v57  ;;  %v13292_v1 = vcombine.high %v1653_v60, %v1661_v61  ;;  %v1238_v48 = vld [vmem:[#allocation7 + $0x110] sm:$0xff] }
 0x21d   : > { %4412 = vmatpush1.bf16.msra.mxu0 %v13177_v5  ;;  %4494 = vmatpush1.bf16.msra.mxu1 %v13179_v6  ;;  %v1677_v5 = vld [vmem:[#allocation7 + $0xec8] sm:$0xff]  ;;  %v13289_v6 = vcombine.low %v1652_v53, %v1660_v57 }
 0x21e   : > { %4413 = vmatprep.subr.bf16.mxu0 %v13194_v7  ;;  %4495 = vmatprep.subr.bf16.mxu1 %v13196_v8  ;;  %v13291_v7 = vcombine.low %v1653_v60, %v1661_v61  ;;  %v13306_v8 = vcombine.high %v1668_v2, %v1676_v3  ;;  %v13308_v9 = vcombine.high %v1669_v4, %v1677_v5  ;;  %v1254_v60 = vld [vmem:[#allocation7 + $0x190] sm:$0xff] }
 0x21f   : > { %v1262_v61 = vld [vmem:[#allocation7 + $0x1d0] sm:$0xff] }
 0x221   : > { %4414 = vmatpush1.bf16.msra.mxu0 %v13193_v14  ;;  %4496 = vmatpush1.bf16.msra.mxu1 %v13195_v15  ;;  %v1693_v14 = vld [vmem:[#allocation7 + $0xf48] sm:$0xff]  ;;  %v13305_v15 = vcombine.low %v1668_v2, %v1676_v3  ;;  %v12894_v2 = vcombine.high %v1254_v60, %v1262_v61 }
 0x222   : > { %4415 = vmatprep.subr.bf16.mxu0 %v13210_v16  ;;  %4497 = vmatprep.subr.bf16.mxu1 %v13212_v17  ;;  %v13307_v16 = vcombine.low %v1669_v4, %v1677_v5  ;;  %v13322_v17 = vcombine.high %v1684_v10, %v1692_v12  ;;  %v13324_v18 = vcombine.high %v1685_v13, %v1693_v14  ;;  %v1270_v4 = vld [vmem:[#allocation7 + $0x210] sm:$0xff] }
 0x223   : > { %v1278_v5 = vld [vmem:[#allocation7 + $0x250] sm:$0xff] }
 0x225   : > { %4416 = vmatpush1.bf16.msra.mxu0 %v13209_v22  ;;  %4498 = vmatpush1.bf16.msra.mxu1 %v13211_v25  ;;  %v1709_v22 = vld [vmem:[#allocation7 + $0xfc8] sm:$0xff]  ;;  %v13321_v25 = vcombine.low %v1684_v10, %v1692_v12  ;;  %v12910_v10 = vcombine.high %v1270_v4, %v1278_v5 }
 0x226   : > { %4417 = vmatprep.subr.bf16.mxu0 %v13226_v26  ;;  %4499 = vmatprep.subr.bf16.mxu1 %v13228_v27  ;;  %v13323_v26 = vcombine.low %v1685_v13, %v1693_v14  ;;  %v13338_v27 = vcombine.high %v1700_v19, %v1708_v20  ;;  %v13340_v28 = vcombine.high %v1701_v21, %v1709_v22  ;;  %v1286_v13 = vld [vmem:[#allocation7 + $0x290] sm:$0xff] }
 0x227   : > { %v1294_v14 = vld [vmem:[#allocation7 + $0x2d0] sm:$0xff] }
 0x229   : > { %4418 = vmatpush1.bf16.msra.mxu0 %v13225_v33  ;;  %4500 = vmatpush1.bf16.msra.mxu1 %v13227_v34  ;;  %v1215_v33 = vld [vmem:[#allocation7 + $0x58] sm:$0xff]  ;;  %v13337_v34 = vcombine.low %v1700_v19, %v1708_v20  ;;  %v12926_v19 = vcombine.high %v1286_v13, %v1294_v14 }
 0x22a   : > { %4419 = vmatprep.subr.bf16.mxu0 %v13242_v35  ;;  %4501 = vmatprep.subr.bf16.mxu1 %v13244_v36  ;;  %v13339_v35 = vcombine.low %v1701_v21, %v1709_v22  ;;  %v1198_v36 = vmax.f32 %v15364_v11, 0.0  ;;  %v12848_v38 = vcombine.high %v1207_v32, %v1215_v33  ;;  %v12847_v45 = vcombine.low %v1207_v32, %v1215_v33  ;;  %v1246_v11 = vld [vmem:[#allocation7 + $0x150] sm:$0xff] }
 0x22b   : > { %v12878_v53 = vcombine.high %v1238_v48, %v1246_v11  ;;  %v1302_v21 = vld [vmem:[#allocation7 + $0x310] sm:$0xff] }
 0x22c   : > { %v1310_v22 = vld [vmem:[#allocation7 + $0x350] sm:$0xff] }
 0x22d   : > { %4420 = vmatpush1.bf16.msra.mxu0 %v13241_v41  ;;  %4502 = vmatpush1.bf16.msra.mxu1 %v13243_v42  ;;  %v1223_v41 = vld [vmem:[#allocation7 + $0x98] sm:$0xff]  ;;  %v1318_v32 = vld [vmem:[#allocation7 + $0x390] sm:$0xff] }
 0x22e   : > { %4421 = vmatprep.subr.bf16.mxu0 %v13258_v43  ;;  %4503 = vmatprep.subr.bf16.mxu1 %v13260_v44  ;;  %v1231_v42 = vld [vmem:[#allocation7 + $0xd8] sm:$0xff]  ;;  %v12845_v43 = vcombine.low %v1206_v29, %v1214_v30  ;;  %v15379_v44 = vpack.c.bf16 %v1198_v36, %v1198_v36  ;;  %v12942_v29 = vcombine.high %v1302_v21, %v1310_v22  ;;  %v1326_v33 = vld [vmem:[#allocation7 + $0x3d0] sm:$0xff] }
 0x22f   : > { %v12864_v47 = vcombine.high %v1223_v41, %v1231_v42  ;;  %v12941_v36 = vcombine.low %v1302_v21, %v1310_v22  ;;  %v1414_v22 = vld [vmem:[#allocation7 + $0x690] sm:$0xff] }
 0x231   : > { %4422 = vmatpush1.bf16.msra.mxu0 %v13257_v49  ;;  %4504 = vmatpush1.bf16.msra.mxu1 %v13259_v50  ;;  %v1239_v49 = vld [vmem:[#allocation7 + $0x118] sm:$0xff] }
 0x232   : > { %4423 = vmatprep.subr.bf16.mxu0 %v13274_v51  ;;  %4505 = vmatprep.subr.bf16.mxu1 %v13276_v52  ;;  %v1247_v50 = vld [vmem:[#allocation7 + $0x158] sm:$0xff]  ;;  %v12861_v51 = vcombine.low %v1222_v39, %v1230_v40  ;;  %v12863_v52 = vcombine.low %v1223_v41, %v1231_v42  ;;  %v1334_v40 = vld [vmem:[#allocation7 + $0x410] sm:$0xff] }
 0x233   : > { %v12880_v57 = vcombine.high %v1239_v49, %v1247_v50  ;;  %v1342_v41 = vld [vmem:[#allocation7 + $0x450] sm:$0xff]  ;;  %v1335_v42 = vld [vmem:[#allocation7 + $0x418] sm:$0xff] }
 0x235   : > { %4424 = vmatpush1.bf16.msra.mxu0 %v13273_v62  ;;  %4506 = vmatpush1.bf16.msra.mxu1 %v13275_v63  ;;  %v1255_v62 = vld [vmem:[#allocation7 + $0x198] sm:$0xff] }
 0x236   : > { %4425 = vmatprep.subr.bf16.mxu0 %v13290_v0  ;;  %4507 = vmatprep.subr.bf16.mxu1 %v13292_v1  ;;  %v1263_v63 = vld [vmem:[#allocation7 + $0x1d8] sm:$0xff]  ;;  %v12877_v0 = vcombine.low %v1238_v48, %v1246_v11  ;;  %v12879_v1 = vcombine.low %v1239_v49, %v1247_v50  ;;  %v1350_v11 = vld [vmem:[#allocation7 + $0x490] sm:$0xff] }
 0x237   : > { %v12896_v3 = vcombine.high %v1255_v62, %v1263_v63  ;;  %v1358_v49 = vld [vmem:[#allocation7 + $0x4d0] sm:$0xff]  ;;  %v1351_v50 = vld [vmem:[#allocation7 + $0x498] sm:$0xff] }
 0x239   : > { %4426 = vmatpush1.bf16.msra.mxu0 %v13289_v6  ;;  %4508 = vmatpush1.bf16.msra.mxu1 %v13291_v7  ;;  %v1271_v6 = vld [vmem:[#allocation7 + $0x218] sm:$0xff] }
 0x23a   : > { %4427 = vmatprep.subr.bf16.mxu0 %v13306_v8  ;;  %4509 = vmatprep.subr.bf16.mxu1 %v13308_v9  ;;  %v1279_v7 = vld [vmem:[#allocation7 + $0x258] sm:$0xff]  ;;  %v12893_v8 = vcombine.low %v1254_v60, %v1262_v61  ;;  %v12895_v9 = vcombine.low %v1255_v62, %v1263_v63  ;;  %v1366_v61 = vld [vmem:[#allocation7 + $0x510] sm:$0xff] }
 0x23b   : > { %v12912_v12 = vcombine.high %v1271_v6, %v1279_v7  ;;  %v1374_v62 = vld [vmem:[#allocation7 + $0x550] sm:$0xff]  ;;  %v1367_v63 = vld [vmem:[#allocation7 + $0x518] sm:$0xff] }
 0x23d   : > { %4428 = vmatpush1.bf16.msra.mxu0 %v13305_v15  ;;  %4510 = vmatpush1.bf16.msra.mxu1 %v13307_v16  ;;  %v1287_v15 = vld [vmem:[#allocation7 + $0x298] sm:$0xff] }
 0x23e   : > { %4429 = vmatprep.subr.bf16.mxu0 %v13322_v17  ;;  %4511 = vmatprep.subr.bf16.mxu1 %v13324_v18  ;;  %v1295_v16 = vld [vmem:[#allocation7 + $0x2d8] sm:$0xff]  ;;  %v12909_v17 = vcombine.low %v1270_v4, %v1278_v5  ;;  %v12911_v18 = vcombine.low %v1271_v6, %v1279_v7  ;;  %v1382_v5 = vld [vmem:[#allocation7 + $0x590] sm:$0xff] }
 0x23f   : > { %v12928_v20 = vcombine.high %v1287_v15, %v1295_v16  ;;  %v1390_v6 = vld [vmem:[#allocation7 + $0x5d0] sm:$0xff]  ;;  %v1383_v7 = vld [vmem:[#allocation7 + $0x598] sm:$0xff] }
 0x241   : > { %4430 = vmatpush1.bf16.msra.mxu0 %v13321_v25  ;;  %4512 = vmatpush1.bf16.msra.mxu1 %v13323_v26  ;;  %v1303_v25 = vld [vmem:[#allocation7 + $0x318] sm:$0xff] }
 0x242   : > { %4431 = vmatprep.subr.bf16.mxu0 %v13338_v27  ;;  %4513 = vmatprep.subr.bf16.mxu1 %v13340_v28  ;;  %v1311_v26 = vld [vmem:[#allocation7 + $0x358] sm:$0xff]  ;;  %v12925_v27 = vcombine.low %v1286_v13, %v1294_v14  ;;  %v12927_v28 = vcombine.low %v1287_v15, %v1295_v16  ;;  %v1398_v14 = vld [vmem:[#allocation7 + $0x610] sm:$0xff] }
 0x243   : > { %v12944_v30 = vcombine.high %v1303_v25, %v1311_v26  ;;  %v1406_v15 = vld [vmem:[#allocation7 + $0x650] sm:$0xff]  ;;  %v1399_v16 = vld [vmem:[#allocation7 + $0x618] sm:$0xff] }
 0x245   : > { %4432 = vmatpush1.bf16.msra.mxu0 %v13337_v34  ;;  %4514 = vmatpush1.bf16.msra.mxu1 %v13339_v35  ;;  %v1319_v34 = vld [vmem:[#allocation7 + $0x398] sm:$0xff] }
 0x246   : > { %4524 = vmatprep.subr.bf16.mxu0 %v12846_v37  ;;  %4606 = vmatprep.subr.bf16.mxu1 %v12848_v38  ;;  %v1327_v35 = vld [vmem:[#allocation7 + $0x3d8] sm:$0xff]  ;;  %v12943_v37 = vcombine.low %v1303_v25, %v1311_v26  ;;  %v12958_v38 = vcombine.high %v1318_v32, %v1326_v33  ;;  %v1422_v25 = vld [vmem:[#allocation7 + $0x6d0] sm:$0xff] }
 0x247   : > { %v12960_v39 = vcombine.high %v1319_v34, %v1327_v35  ;;  %v1415_v26 = vld [vmem:[#allocation7 + $0x698] sm:$0xff] }
 0x248   : > { %4434 = vmatmul.mubr.bf16.vlgmr.msra.gmra.mrb[8].mxu0 %v15379_v44  ;;  %4516 = vmatmul.mubr.bf16.vlgmr.msra.gmra.mrb[8].mxu1 %v15379_v44 }
 0x249   : > { %4525 = vmatpush1.bf16.msra.mxu0 %v12845_v43  ;;  %4556 = vmatprep.mubr.bf16.mxu0 %v15366_v23  ;;  %v1343_v43 = vld [vmem:[#allocation7 + $0x458] sm:$0xff] }
 0x24a   : > { %4607 = vmatpush1.bf16.msra.mxu1 %v12847_v45  ;;  %4638 = vmatprep.mubr.bf16.mxu1 %v15366_v23  ;;  %v12957_v45 = vcombine.low %v1318_v32, %v1326_v33  ;;  %v12976_v48 = vcombine.high %v1335_v42, %v1343_v43  ;;  %v1430_v33 = vld [vmem:[#allocation7 + $0x710] sm:$0xff] }
 0x24b   : > { %4526 = vmatprep.subr.bf16.mxu0 %v12862_v46  ;;  %4608 = vmatprep.subr.bf16.mxu1 %v12864_v47  ;;  %v12959_v46 = vcombine.low %v1319_v34, %v1327_v35  ;;  %v12974_v47 = vcombine.high %v1334_v40, %v1342_v41  ;;  %v1438_v34 = vld [vmem:[#allocation7 + $0x750] sm:$0xff]  ;;  %v1431_v35 = vld [vmem:[#allocation7 + $0x718] sm:$0xff] }
 0x24d   : > { %4527 = vmatpush1.bf16.msra.mxu0 %v12861_v51  ;;  %v1359_v51 = vld [vmem:[#allocation7 + $0x4d8] sm:$0xff] }
 0x24e   : > { %4609 = vmatpush1.bf16.msra.mxu1 %v12863_v52  ;;  %4528 = vmatprep.subr.bf16.mxu0 %v12878_v53  ;;  %v12973_v52 = vcombine.low %v1334_v40, %v1342_v41  ;;  %v12975_v53 = vcombine.low %v1335_v42, %v1343_v43  ;;  %v12992_v60 = vcombine.high %v1351_v50, %v1359_v51  ;;  %v1446_v41 = vld [vmem:[#allocation7 + $0x790] sm:$0xff]  ;;  %v1447_v43 = vld [vmem:[#allocation7 + $0x798] sm:$0xff] }
 0x24f   : > { %4610 = vmatprep.subr.bf16.mxu1 %v12880_v57  ;;  %v12990_v57 = vcombine.high %v1350_v11, %v1358_v49  ;;  %v1454_v42 = vld [vmem:[#allocation7 + $0x7d0] sm:$0xff] }
 0x251   : > { %4529 = vmatpush1.bf16.msra.mxu0 %v12877_v0  ;;  %v1375_v0 = vld [vmem:[#allocation7 + $0x558] sm:$0xff] }
 0x252   : > { %4611 = vmatpush1.bf16.msra.mxu1 %v12879_v1  ;;  %4530 = vmatprep.subr.bf16.mxu0 %v12894_v2  ;;  %v12989_v1 = vcombine.low %v1350_v11, %v1358_v49  ;;  %v12991_v2 = vcombine.low %v1351_v50, %v1359_v51  ;;  %v13008_v4 = vcombine.high %v1367_v63, %v1375_v0  ;;  %v1462_v49 = vld [vmem:[#allocation7 + $0x810] sm:$0xff]  ;;  %v1463_v51 = vld [vmem:[#allocation7 + $0x818] sm:$0xff] }
 0x253   : > { %4612 = vmatprep.subr.bf16.mxu1 %v12896_v3  ;;  %v13006_v3 = vcombine.high %v1366_v61, %v1374_v62  ;;  %v1470_v50 = vld [vmem:[#allocation7 + $0x850] sm:$0xff] }
 0x255   : > { %4531 = vmatpush1.bf16.msra.mxu0 %v12893_v8  ;;  %v1391_v8 = vld [vmem:[#allocation7 + $0x5d8] sm:$0xff] }
 0x256   : > { %4613 = vmatpush1.bf16.msra.mxu1 %v12895_v9  ;;  %4532 = vmatprep.subr.bf16.mxu0 %v12910_v10  ;;  %v13005_v9 = vcombine.low %v1366_v61, %v1374_v62  ;;  %v13007_v10 = vcombine.low %v1367_v63, %v1375_v0  ;;  %v13024_v13 = vcombine.high %v1383_v7, %v1391_v8  ;;  %v1478_v62 = vld [vmem:[#allocation7 + $0x890] sm:$0xff] }
 0x257   : > { %4614 = vmatprep.subr.bf16.mxu1 %v12912_v12  ;;  %v13022_v12 = vcombine.high %v1382_v5, %v1390_v6  ;;  %v1486_v63 = vld [vmem:[#allocation7 + $0x8d0] sm:$0xff]  ;;  %v13101_v0 = vcombine.low %v1462_v49, %v1470_v50 }
 0x259   : > { %4533 = vmatpush1.bf16.msra.mxu0 %v12909_v17  ;;  %v1407_v17 = vld [vmem:[#allocation7 + $0x658] sm:$0xff] }
 0x25a   : > { %4615 = vmatpush1.bf16.msra.mxu1 %v12911_v18  ;;  %4534 = vmatprep.subr.bf16.mxu0 %v12926_v19  ;;  %v13021_v18 = vcombine.low %v1382_v5, %v1390_v6  ;;  %v13023_v19 = vcombine.low %v1383_v7, %v1391_v8  ;;  %v13040_v21 = vcombine.high %v1399_v16, %v1407_v17  ;;  %v1494_v5 = vld [vmem:[#allocation7 + $0x910] sm:$0xff]  ;;  %v1495_v8 = vld [vmem:[#allocation7 + $0x918] sm:$0xff] }
 0x25b   : > { %4616 = vmatprep.subr.bf16.mxu1 %v12928_v20  ;;  %v13038_v20 = vcombine.high %v1398_v14, %v1406_v15  ;;  %v1502_v6 = vld [vmem:[#allocation7 + $0x950] sm:$0xff] }
 0x25d   : > { %4535 = vmatpush1.bf16.msra.mxu0 %v12925_v27  ;;  %v1423_v27 = vld [vmem:[#allocation7 + $0x6d8] sm:$0xff] }
 0x25e   : > { %4617 = vmatpush1.bf16.msra.mxu1 %v12927_v28  ;;  %4536 = vmatprep.subr.bf16.mxu0 %v12942_v29  ;;  %v13037_v28 = vcombine.low %v1398_v14, %v1406_v15  ;;  %v13039_v29 = vcombine.low %v1399_v16, %v1407_v17  ;;  %v13056_v32 = vcombine.high %v1415_v26, %v1423_v27  ;;  %v1510_v15 = vld [vmem:[#allocation7 + $0x990] sm:$0xff]  ;;  %v1511_v17 = vld [vmem:[#allocation7 + $0x998] sm:$0xff] }
 0x25f   : > { %4618 = vmatprep.subr.bf16.mxu1 %v12944_v30  ;;  %v13054_v30 = vcombine.high %v1414_v22, %v1422_v25  ;;  %v1518_v16 = vld [vmem:[#allocation7 + $0x9d0] sm:$0xff] }
 0x261   : > { %4537 = vmatpush1.bf16.msra.mxu0 %v12941_v36  ;;  %v1439_v36 = vld [vmem:[#allocation7 + $0x758] sm:$0xff] }
 0x262   : > { %4619 = vmatpush1.bf16.msra.mxu1 %v12943_v37  ;;  %4538 = vmatprep.subr.bf16.mxu0 %v12958_v38  ;;  %v13053_v37 = vcombine.low %v1414_v22, %v1422_v25  ;;  %v13055_v38 = vcombine.low %v1415_v26, %v1423_v27  ;;  %v13072_v40 = vcombine.high %v1431_v35, %v1439_v36  ;;  %v1526_v25 = vld [vmem:[#allocation7 + $0xa10] sm:$0xff]  ;;  %v1527_v27 = vld [vmem:[#allocation7 + $0xa18] sm:$0xff] }
 0x263   : > { %4620 = vmatprep.subr.bf16.mxu1 %v12960_v39  ;;  %v13070_v39 = vcombine.high %v1430_v33, %v1438_v34  ;;  %v1534_v26 = vld [vmem:[#allocation7 + $0xa50] sm:$0xff] }
 0x265   : > { %4539 = vmatpush1.bf16.msra.mxu0 %v12957_v45  ;;  %v1455_v45 = vld [vmem:[#allocation7 + $0x7d8] sm:$0xff] }
 0x266   : > { %4621 = vmatpush1.bf16.msra.mxu1 %v12959_v46  ;;  %4540 = vmatprep.subr.bf16.mxu0 %v12974_v47  ;;  %v13069_v46 = vcombine.low %v1430_v33, %v1438_v34  ;;  %v13071_v47 = vcombine.low %v1431_v35, %v1439_v36  ;;  %v13088_v11 = vcombine.high %v1447_v43, %v1455_v45  ;;  %v1542_v34 = vld [vmem:[#allocation7 + $0xa90] sm:$0xff]  ;;  %v1543_v36 = vld [vmem:[#allocation7 + $0xa98] sm:$0xff] }
 0x267   : > { %4622 = vmatprep.subr.bf16.mxu1 %v12976_v48  ;;  %v13086_v48 = vcombine.high %v1446_v41, %v1454_v42  ;;  %v1550_v35 = vld [vmem:[#allocation7 + $0xad0] sm:$0xff] }
 0x269   : > { %4541 = vmatpush1.bf16.msra.mxu0 %v12973_v52  ;;  %v1471_v52 = vld [vmem:[#allocation7 + $0x858] sm:$0xff] }
 0x26a   : > { %4623 = vmatpush1.bf16.msra.mxu1 %v12975_v53  ;;  %4542 = vmatprep.subr.bf16.mxu0 %v12990_v57  ;;  %v13085_v53 = vcombine.low %v1446_v41, %v1454_v42  ;;  %v13087_v57 = vcombine.low %v1447_v43, %v1455_v45  ;;  %v13104_v61 = vcombine.high %v1463_v51, %v1471_v52  ;;  %v1558_v42 = vld [vmem:[#allocation7 + $0xb10] sm:$0xff]  ;;  %v1559_v45 = vld [vmem:[#allocation7 + $0xb18] sm:$0xff] }
 0x26b   : > { %4624 = vmatprep.subr.bf16.mxu1 %v12992_v60  ;;  %v13102_v60 = vcombine.high %v1462_v49, %v1470_v50  ;;  %v1566_v43 = vld [vmem:[#allocation7 + $0xb50] sm:$0xff] }
 0x26c   : > { %v1574_v50 = vld [vmem:[#allocation7 + $0xb90] sm:$0xff] }
 0x26d   : > { %4543 = vmatpush1.bf16.msra.mxu0 %v12989_v1  ;;  %v1479_v1 = vld [vmem:[#allocation7 + $0x898] sm:$0xff] }
 0x26e   : > { %4625 = vmatpush1.bf16.msra.mxu1 %v12991_v2  ;;  %4544 = vmatprep.subr.bf16.mxu0 %v13006_v3  ;;  %v1487_v2 = vld [vmem:[#allocation7 + $0x8d8] sm:$0xff]  ;;  %v13103_v3 = vcombine.low %v1463_v51, %v1471_v52  ;;  %v1582_v51 = vld [vmem:[#allocation7 + $0xbd0] sm:$0xff] }
 0x26f   : > { %4626 = vmatprep.subr.bf16.mxu1 %v13008_v4  ;;  %v13118_v4 = vcombine.high %v1478_v62, %v1486_v63  ;;  %v13120_v7 = vcombine.high %v1479_v1, %v1487_v2  ;;  %v1575_v52 = vld [vmem:[#allocation7 + $0xb98] sm:$0xff] }
 0x271   : > { %4545 = vmatpush1.bf16.msra.mxu0 %v13005_v9  ;;  %v1503_v9 = vld [vmem:[#allocation7 + $0x958] sm:$0xff] }
 0x272   : > { %4627 = vmatpush1.bf16.msra.mxu1 %v13007_v10  ;;  %4546 = vmatprep.subr.bf16.mxu0 %v13022_v12  ;;  %v13117_v10 = vcombine.low %v1478_v62, %v1486_v63  ;;  %v13119_v12 = vcombine.low %v1479_v1, %v1487_v2  ;;  %v13136_v14 = vcombine.high %v1495_v8, %v1503_v9  ;;  %v1590_v63 = vld [vmem:[#allocation7 + $0xc10] sm:$0xff]  ;;  %v1591_v1 = vld [vmem:[#allocation7 + $0xc18] sm:$0xff] }
 0x273   : > { %4628 = vmatprep.subr.bf16.mxu1 %v13024_v13  ;;  %v13134_v13 = vcombine.high %v1494_v5, %v1502_v6  ;;  %v1599_v2 = vld [vmem:[#allocation7 + $0xc58] sm:$0xff] }
 0x275   : > { %4547 = vmatpush1.bf16.msra.mxu0 %v13021_v18  ;;  %v1519_v18 = vld [vmem:[#allocation7 + $0x9d8] sm:$0xff] }
 0x276   : > { %4629 = vmatpush1.bf16.msra.mxu1 %v13023_v19  ;;  %4548 = vmatprep.subr.bf16.mxu0 %v13038_v20  ;;  %v13133_v19 = vcombine.low %v1494_v5, %v1502_v6  ;;  %v13135_v20 = vcombine.low %v1495_v8, %v1503_v9  ;;  %v13152_v22 = vcombine.high %v1511_v17, %v1519_v18  ;;  %v1614_v8 = vld [vmem:[#allocation7 + $0xcd0] sm:$0xff]  ;;  %v1607_v9 = vld [vmem:[#allocation7 + $0xc98] sm:$0xff] }
 0x277   : > { %4630 = vmatprep.subr.bf16.mxu1 %v13040_v21  ;;  %v13150_v21 = vcombine.high %v1510_v15, %v1518_v16  ;;  %v13232_v6 = vcombine.high %v1591_v1, %v1599_v2 }
 0x279   : > { %4549 = vmatpush1.bf16.msra.mxu0 %v13037_v28  ;;  %v1535_v28 = vld [vmem:[#allocation7 + $0xa58] sm:$0xff] }
 0x27a   : > { %4631 = vmatpush1.bf16.msra.mxu1 %v13039_v29  ;;  %4550 = vmatprep.subr.bf16.mxu0 %v13054_v30  ;;  %v13149_v29 = vcombine.low %v1510_v15, %v1518_v16  ;;  %v13151_v30 = vcombine.low %v1511_v17, %v1519_v18  ;;  %v13168_v33 = vcombine.high %v1527_v27, %v1535_v28  ;;  %v1622_v16 = vld [vmem:[#allocation7 + $0xd10] sm:$0xff]  ;;  %v1623_v18 = vld [vmem:[#allocation7 + $0xd18] sm:$0xff] }
 0x27b   : > { %4632 = vmatprep.subr.bf16.mxu1 %v13056_v32  ;;  %v13166_v32 = vcombine.high %v1526_v25, %v1534_v26  ;;  %v1630_v17 = vld [vmem:[#allocation7 + $0xd50] sm:$0xff] }
 0x27d   : > { %4551 = vmatpush1.bf16.msra.mxu0 %v13053_v37  ;;  %v1551_v37 = vld [vmem:[#allocation7 + $0xad8] sm:$0xff] }
 0x27e   : > { %4633 = vmatpush1.bf16.msra.mxu1 %v13055_v38  ;;  %4552 = vmatprep.subr.bf16.mxu0 %v13070_v39  ;;  %v13165_v38 = vcombine.low %v1526_v25, %v1534_v26  ;;  %v13167_v39 = vcombine.low %v1527_v27, %v1535_v28  ;;  %v13184_v41 = vcombine.high %v1543_v36, %v1551_v37  ;;  %v1638_v26 = vld [vmem:[#allocation7 + $0xd90] sm:$0xff]  ;;  %v1639_v28 = vld [vmem:[#allocation7 + $0xd98] sm:$0xff] }
 0x27f   : > { %4634 = vmatprep.subr.bf16.mxu1 %v13072_v40  ;;  %v13182_v40 = vcombine.high %v1542_v34, %v1550_v35  ;;  %v1646_v27 = vld [vmem:[#allocation7 + $0xdd0] sm:$0xff] }
 0x281   : > { %4553 = vmatpush1.bf16.msra.mxu0 %v13069_v46  ;;  %v1567_v46 = vld [vmem:[#allocation7 + $0xb58] sm:$0xff] }
 0x282   : > { %4635 = vmatpush1.bf16.msra.mxu1 %v13071_v47  ;;  %4554 = vmatprep.subr.bf16.mxu0 %v13086_v48  ;;  %v13181_v47 = vcombine.low %v1542_v34, %v1550_v35  ;;  %v13183_v48 = vcombine.low %v1543_v36, %v1551_v37  ;;  %v13200_v49 = vcombine.high %v1559_v45, %v1567_v46  ;;  %v1654_v35 = vld [vmem:[#allocation7 + $0xe10] sm:$0xff]  ;;  %v1655_v37 = vld [vmem:[#allocation7 + $0xe18] sm:$0xff] }
 0x283   : > { %4636 = vmatprep.subr.bf16.mxu1 %v13088_v11  ;;  %v13198_v11 = vcombine.high %v1558_v42, %v1566_v43  ;;  %v1662_v36 = vld [vmem:[#allocation7 + $0xe50] sm:$0xff] }
 0x285   : > { %4555 = vmatpush1.bf16.msra.mxu0 %v13085_v53  ;;  %v1583_v53 = vld [vmem:[#allocation7 + $0xbd8] sm:$0xff] }
 0x286   : > { %4637 = vmatpush1.bf16.msra.mxu1 %v13087_v57  ;;  %4565 = vmatprep.subr.bf16.mxu0 %v13102_v60  ;;  %v13197_v57 = vcombine.low %v1558_v42, %v1566_v43  ;;  %v13199_v60 = vcombine.low %v1559_v45, %v1567_v46  ;;  %v13216_v62 = vcombine.high %v1575_v52, %v1583_v53  ;;  %v1670_v43 = vld [vmem:[#allocation7 + $0xe90] sm:$0xff]  ;;  %v1671_v46 = vld [vmem:[#allocation7 + $0xe98] sm:$0xff] }
 0x287   : > { %4647 = vmatprep.subr.bf16.mxu1 %v13104_v61  ;;  %v13214_v61 = vcombine.high %v1574_v50, %v1582_v51  ;;  %v1678_v45 = vld [vmem:[#allocation7 + $0xed0] sm:$0xff] }
 0x288   : > { %4557 = vmatmul.mubr.bf16.vlgmr.msra.gmra.mrb[12].mxu0 %v15368_v24 }
 0x289   : > { %4639 = vmatmul.mubr.bf16.vlgmr.msra.gmra.mrb[12].mxu1 %v15368_v24  ;;  %4566 = vmatpush1.bf16.msra.mxu0 %v13101_v0  ;;  %v1598_v0 = vld [vmem:[#allocation7 + $0xc50] sm:$0xff] }
 0x28a   : > { %4597 = vmatprep.mubr.bf16.mxu0 %v15372_v31  ;;  %4648 = vmatpush1.bf16.msra.mxu1 %v13103_v3  ;;  %v13213_v3 = vcombine.low %v1574_v50, %v1582_v51  ;;  %v13230_v5 = vcombine.high %v1590_v63, %v1598_v0  ;;  %v1686_v51 = vld [vmem:[#allocation7 + $0xf10] sm:$0xff] }
 0x28b   : > { %4679 = vmatprep.mubr.bf16.mxu1 %v15372_v31  ;;  %4567 = vmatprep.subr.bf16.mxu0 %v13118_v4  ;;  %v13215_v4 = vcombine.low %v1575_v52, %v1583_v53  ;;  %v1694_v52 = vld [vmem:[#allocation7 + $0xf50] sm:$0xff]  ;;  %v1687_v53 = vld [vmem:[#allocation7 + $0xf18] sm:$0xff] }
 0x28c   : > { %4649 = vmatprep.subr.bf16.mxu1 %v13120_v7  ;;  %v1606_v7 = vld [vmem:[#allocation7 + $0xc90] sm:$0xff] }
 0x28d   : > { %4568 = vmatpush1.bf16.msra.mxu0 %v13117_v10  ;;  %v1615_v10 = vld [vmem:[#allocation7 + $0xcd8] sm:$0xff] }
 0x28e   : > { %4650 = vmatpush1.bf16.msra.mxu1 %v13119_v12  ;;  %4569 = vmatprep.subr.bf16.mxu0 %v13134_v13  ;;  %v13229_v12 = vcombine.low %v1590_v63, %v1598_v0  ;;  %v13231_v13 = vcombine.low %v1591_v1, %v1599_v2  ;;  %v13248_v15 = vcombine.high %v1607_v9, %v1615_v10  ;;  %v1702_v0 = vld [vmem:[#allocation7 + $0xf90] sm:$0xff]  ;;  %v1703_v2 = vld [vmem:[#allocation7 + $0xf98] sm:$0xff] }
 0x28f   : > { %4651 = vmatprep.subr.bf16.mxu1 %v13136_v14  ;;  %v13246_v14 = vcombine.high %v1606_v7, %v1614_v8  ;;  %v1710_v1 = vld [vmem:[#allocation7 + $0xfd0] sm:$0xff] }
 0x291   : > { %4570 = vmatpush1.bf16.msra.mxu0 %v13133_v19  ;;  %v1631_v19 = vld [vmem:[#allocation7 + $0xd58] sm:$0xff] }
 0x292   : > { %4652 = vmatpush1.bf16.msra.mxu1 %v13135_v20  ;;  %4571 = vmatprep.subr.bf16.mxu0 %v13150_v21  ;;  %v13245_v20 = vcombine.low %v1606_v7, %v1614_v8  ;;  %v13247_v21 = vcombine.low %v1607_v9, %v1615_v10  ;;  %v13264_v25 = vcombine.high %v1623_v18, %v1631_v19  ;;  %v1208_v8 = vld [vmem:[#allocation7 + $0x20] sm:$0xff]  ;;  %v1209_v10 = vld [vmem:[#allocation7 + $0x28] sm:$0xff] }
 0x293   : > { %4653 = vmatprep.subr.bf16.mxu1 %v13152_v22  ;;  %v13262_v22 = vcombine.high %v1622_v16, %v1630_v17  ;;  %v1216_v9 = vld [vmem:[#allocation7 + $0x60] sm:$0xff] }
 0x295   : > { %4572 = vmatpush1.bf16.msra.mxu0 %v13149_v29  ;;  %v1647_v29 = vld [vmem:[#allocation7 + $0xdd8] sm:$0xff] }
 0x296   : > { %4654 = vmatpush1.bf16.msra.mxu1 %v13151_v30  ;;  %4573 = vmatprep.subr.bf16.mxu0 %v13166_v32  ;;  %v13261_v30 = vcombine.low %v1622_v16, %v1630_v17  ;;  %v13263_v32 = vcombine.low %v1623_v18, %v1631_v19  ;;  %v13280_v34 = vcombine.high %v1639_v28, %v1647_v29  ;;  %v1224_v17 = vld [vmem:[#allocation7 + $0xa0] sm:$0xff] }
 0x297   : > { %4655 = vmatprep.subr.bf16.mxu1 %v13168_v33  ;;  %v13278_v33 = vcombine.high %v1638_v26, %v1646_v27  ;;  %v1232_v18 = vld [vmem:[#allocation7 + $0xe0] sm:$0xff]  ;;  %v12849_v19 = vcombine.low %v1208_v8, %v1216_v9 }
 0x299   : > { %4574 = vmatpush1.bf16.msra.mxu0 %v13165_v38  ;;  %v1663_v38 = vld [vmem:[#allocation7 + $0xe58] sm:$0xff] }
 0x29a   : > { %4656 = vmatpush1.bf16.msra.mxu1 %v13167_v39  ;;  %4575 = vmatprep.subr.bf16.mxu0 %v13182_v40  ;;  %v13277_v39 = vcombine.low %v1638_v26, %v1646_v27  ;;  %v13279_v40 = vcombine.low %v1639_v28, %v1647_v29  ;;  %v13296_v42 = vcombine.high %v1655_v37, %v1663_v38  ;;  %v1240_v26 = vld [vmem:[#allocation7 + $0x120] sm:$0xff]  ;;  %v1241_v29 = vld [vmem:[#allocation7 + $0x128] sm:$0xff] }
 0x29b   : > { %4657 = vmatprep.subr.bf16.mxu1 %v13184_v41  ;;  %v13294_v41 = vcombine.high %v1654_v35, %v1662_v36  ;;  %v1248_v27 = vld [vmem:[#allocation7 + $0x160] sm:$0xff] }
 0x29d   : > { %4576 = vmatpush1.bf16.msra.mxu0 %v13181_v47  ;;  %v1679_v47 = vld [vmem:[#allocation7 + $0xed8] sm:$0xff] }
 0x29e   : > { %4658 = vmatpush1.bf16.msra.mxu1 %v13183_v48  ;;  %4577 = vmatprep.subr.bf16.mxu0 %v13198_v11  ;;  %v13293_v48 = vcombine.low %v1654_v35, %v1662_v36  ;;  %v13295_v11 = vcombine.low %v1655_v37, %v1663_v38  ;;  %v13312_v50 = vcombine.high %v1671_v46, %v1679_v47  ;;  %v1256_v36 = vld [vmem:[#allocation7 + $0x1a0] sm:$0xff]  ;;  %v1257_v38 = vld [vmem:[#allocation7 + $0x1a8] sm:$0xff] }
 0x29f   : > { %4659 = vmatprep.subr.bf16.mxu1 %v13200_v49  ;;  %v13310_v49 = vcombine.high %v1670_v43, %v1678_v45  ;;  %v1264_v37 = vld [vmem:[#allocation7 + $0x1e0] sm:$0xff] }
 0x2a1   : > { %4578 = vmatpush1.bf16.msra.mxu0 %v13197_v57  ;;  %v1695_v57 = vld [vmem:[#allocation7 + $0xf58] sm:$0xff] }
 0x2a2   : > { %4660 = vmatpush1.bf16.msra.mxu1 %v13199_v60  ;;  %4579 = vmatprep.subr.bf16.mxu0 %v13214_v61  ;;  %v13309_v60 = vcombine.low %v1670_v43, %v1678_v45  ;;  %v13311_v61 = vcombine.low %v1671_v46, %v1679_v47  ;;  %v13328_v63 = vcombine.high %v1687_v53, %v1695_v57  ;;  %v1272_v45 = vld [vmem:[#allocation7 + $0x220] sm:$0xff]  ;;  %v1273_v47 = vld [vmem:[#allocation7 + $0x228] sm:$0xff] }
 0x2a3   : > { %4661 = vmatprep.subr.bf16.mxu1 %v13216_v62  ;;  %v13326_v62 = vcombine.high %v1686_v51, %v1694_v52  ;;  %v1280_v46 = vld [vmem:[#allocation7 + $0x260] sm:$0xff] }
 0x2a5   : > { %4580 = vmatpush1.bf16.msra.mxu0 %v13213_v3  ;;  %v1711_v3 = vld [vmem:[#allocation7 + $0xfd8] sm:$0xff] }
 0x2a6   : > { %4662 = vmatpush1.bf16.msra.mxu1 %v13215_v4  ;;  %4581 = vmatprep.subr.bf16.mxu0 %v13230_v5  ;;  %v13325_v4 = vcombine.low %v1686_v51, %v1694_v52  ;;  %v13327_v5 = vcombine.low %v1687_v53, %v1695_v57  ;;  %v13344_v7 = vcombine.high %v1703_v2, %v1711_v3  ;;  %v1288_v52 = vld [vmem:[#allocation7 + $0x2a0] sm:$0xff]  ;;  %v1289_v57 = vld [vmem:[#allocation7 + $0x2a8] sm:$0xff] }
 0x2a7   : > { %4663 = vmatprep.subr.bf16.mxu1 %v13232_v6  ;;  %v13342_v6 = vcombine.high %v1702_v0, %v1710_v1  ;;  %v1296_v53 = vld [vmem:[#allocation7 + $0x2e0] sm:$0xff] }
 0x2a9   : > { %4582 = vmatpush1.bf16.msra.mxu0 %v13229_v12  ;;  %v1217_v12 = vld [vmem:[#allocation7 + $0x68] sm:$0xff] }
 0x2aa   : > { %4664 = vmatpush1.bf16.msra.mxu1 %v13231_v13  ;;  %4583 = vmatprep.subr.bf16.mxu0 %v13246_v14  ;;  %v13341_v13 = vcombine.low %v1702_v0, %v1710_v1  ;;  %v13343_v14 = vcombine.low %v1703_v2, %v1711_v3  ;;  %v12852_v16 = vcombine.high %v1209_v10, %v1217_v12  ;;  %v1304_v1 = vld [vmem:[#allocation7 + $0x320] sm:$0xff]  ;;  %v1305_v3 = vld [vmem:[#allocation7 + $0x328] sm:$0xff] }
 0x2ab   : > { %4665 = vmatprep.subr.bf16.mxu1 %v13248_v15  ;;  %v12850_v15 = vcombine.high %v1208_v8, %v1216_v9  ;;  %v1312_v2 = vld [vmem:[#allocation7 + $0x360] sm:$0xff] }
 0x2ac   : > { %v1320_v9 = vld [vmem:[#allocation7 + $0x3a0] sm:$0xff] }
 0x2ad   : > { %4584 = vmatpush1.bf16.msra.mxu0 %v13245_v20  ;;  %v1225_v20 = vld [vmem:[#allocation7 + $0xa8] sm:$0xff] }
 0x2ae   : > { %4666 = vmatpush1.bf16.msra.mxu1 %v13247_v21  ;;  %4585 = vmatprep.subr.bf16.mxu0 %v13262_v22  ;;  %v1233_v21 = vld [vmem:[#allocation7 + $0xe8] sm:$0xff]  ;;  %v12851_v22 = vcombine.low %v1209_v10, %v1217_v12  ;;  %v1328_v10 = vld [vmem:[#allocation7 + $0x3e0] sm:$0xff] }
 0x2af   : > { %4667 = vmatprep.subr.bf16.mxu1 %v13264_v25  ;;  %v12866_v25 = vcombine.high %v1224_v17, %v1232_v18  ;;  %v12868_v28 = vcombine.high %v1225_v20, %v1233_v21  ;;  %v1321_v12 = vld [vmem:[#allocation7 + $0x3a8] sm:$0xff] }
 0x2b1   : > { %4586 = vmatpush1.bf16.msra.mxu0 %v13261_v30  ;;  %v1249_v30 = vld [vmem:[#allocation7 + $0x168] sm:$0xff] }
 0x2b2   : > { %4668 = vmatpush1.bf16.msra.mxu1 %v13263_v32  ;;  %4587 = vmatprep.subr.bf16.mxu0 %v13278_v33  ;;  %v12865_v32 = vcombine.low %v1224_v17, %v1232_v18  ;;  %v12867_v33 = vcombine.low %v1225_v20, %v1233_v21  ;;  %v12884_v35 = vcombine.high %v1241_v29, %v1249_v30  ;;  %v1336_v18 = vld [vmem:[#allocation7 + $0x420] sm:$0xff]  ;;  %v1337_v20 = vld [vmem:[#allocation7 + $0x428] sm:$0xff] }
 0x2b3   : > { %4669 = vmatprep.subr.bf16.mxu1 %v13280_v34  ;;  %v12882_v34 = vcombine.high %v1240_v26, %v1248_v27  ;;  %v1345_v21 = vld [vmem:[#allocation7 + $0x468] sm:$0xff] }
 0x2b5   : > { %4588 = vmatpush1.bf16.msra.mxu0 %v13277_v39  ;;  %v1265_v39 = vld [vmem:[#allocation7 + $0x1e8] sm:$0xff] }
 0x2b6   : > { %4670 = vmatpush1.bf16.msra.mxu1 %v13279_v40  ;;  %4589 = vmatprep.subr.bf16.mxu0 %v13294_v41  ;;  %v12881_v40 = vcombine.low %v1240_v26, %v1248_v27  ;;  %v12883_v41 = vcombine.low %v1241_v29, %v1249_v30  ;;  %v12900_v43 = vcombine.high %v1257_v38, %v1265_v39  ;;  %v1360_v29 = vld [vmem:[#allocation7 + $0x4e0] sm:$0xff]  ;;  %v1353_v30 = vld [vmem:[#allocation7 + $0x4a8] sm:$0xff] }
 0x2b7   : > { %4671 = vmatprep.subr.bf16.mxu1 %v13296_v42  ;;  %v12898_v42 = vcombine.high %v1256_v36, %v1264_v37  ;;  %v12980_v27 = vcombine.high %v1337_v20, %v1345_v21 }
 0x2b9   : > { %4590 = vmatpush1.bf16.msra.mxu0 %v13293_v48  ;;  %v1281_v48 = vld [vmem:[#allocation7 + $0x268] sm:$0xff] }
 0x2ba   : > { %4672 = vmatpush1.bf16.msra.mxu1 %v13295_v11  ;;  %4591 = vmatprep.subr.bf16.mxu0 %v13310_v49  ;;  %v12897_v11 = vcombine.low %v1256_v36, %v1264_v37  ;;  %v12899_v49 = vcombine.low %v1257_v38, %v1265_v39  ;;  %v12916_v51 = vcombine.high %v1273_v47, %v1281_v48  ;;  %v1368_v37 = vld [vmem:[#allocation7 + $0x520] sm:$0xff]  ;;  %v1369_v39 = vld [vmem:[#allocation7 + $0x528] sm:$0xff] }
 0x2bb   : > { %4673 = vmatprep.subr.bf16.mxu1 %v13312_v50  ;;  %v12914_v50 = vcombine.high %v1272_v45, %v1280_v46  ;;  %v1376_v38 = vld [vmem:[#allocation7 + $0x560] sm:$0xff] }
 0x2bd   : > { %4592 = vmatpush1.bf16.msra.mxu0 %v13309_v60  ;;  %v1297_v60 = vld [vmem:[#allocation7 + $0x2e8] sm:$0xff] }
 0x2be   : > { %4674 = vmatpush1.bf16.msra.mxu1 %v13311_v61  ;;  %4593 = vmatprep.subr.bf16.mxu0 %v13326_v62  ;;  %v12913_v61 = vcombine.low %v1272_v45, %v1280_v46  ;;  %v12915_v62 = vcombine.low %v1273_v47, %v1281_v48  ;;  %v12932_v0 = vcombine.high %v1289_v57, %v1297_v60  ;;  %v1384_v46 = vld [vmem:[#allocation7 + $0x5a0] sm:$0xff]  ;;  %v1385_v48 = vld [vmem:[#allocation7 + $0x5a8] sm:$0xff] }
 0x2bf   : > { %4675 = vmatprep.subr.bf16.mxu1 %v13328_v63  ;;  %v12930_v63 = vcombine.high %v1288_v52, %v1296_v53  ;;  %v1392_v47 = vld [vmem:[#allocation7 + $0x5e0] sm:$0xff] }
 0x2c1   : > { %4594 = vmatpush1.bf16.msra.mxu0 %v13325_v4  ;;  %v1313_v4 = vld [vmem:[#allocation7 + $0x368] sm:$0xff] }
 0x2c2   : > { %4676 = vmatpush1.bf16.msra.mxu1 %v13327_v5  ;;  %4595 = vmatprep.subr.bf16.mxu0 %v13342_v6  ;;  %v12929_v5 = vcombine.low %v1288_v52, %v1296_v53  ;;  %v12931_v6 = vcombine.low %v1289_v57, %v1297_v60  ;;  %v12948_v8 = vcombine.high %v1305_v3, %v1313_v4  ;;  %v1400_v53 = vld [vmem:[#allocation7 + $0x620] sm:$0xff]  ;;  %v1401_v60 = vld [vmem:[#allocation7 + $0x628] sm:$0xff] }
 0x2c3   : > { %4677 = vmatprep.subr.bf16.mxu1 %v13344_v7  ;;  %v12946_v7 = vcombine.high %v1304_v1, %v1312_v2  ;;  %v1408_v57 = vld [vmem:[#allocation7 + $0x660] sm:$0xff] }
 0x2c5   : > { %4596 = vmatpush1.bf16.msra.mxu0 %v13341_v13  ;;  %v1329_v13 = vld [vmem:[#allocation7 + $0x3e8] sm:$0xff] }
 0x2c6   : > { %4678 = vmatpush1.bf16.msra.mxu1 %v13343_v14  ;;  %4688 = vmatprep.subr.bf16.mxu0 %v12850_v15  ;;  %v12945_v14 = vcombine.low %v1304_v1, %v1312_v2  ;;  %v12947_v15 = vcombine.low %v1305_v3, %v1313_v4  ;;  %v12964_v17 = vcombine.high %v1321_v12, %v1329_v13  ;;  %v1416_v2 = vld [vmem:[#allocation7 + $0x6a0] sm:$0xff]  ;;  %v1417_v4 = vld [vmem:[#allocation7 + $0x6a8] sm:$0xff] }
 0x2c7   : > { %4770 = vmatprep.subr.bf16.mxu1 %v12852_v16  ;;  %v12962_v16 = vcombine.high %v1320_v9, %v1328_v10  ;;  %v1424_v3 = vld [vmem:[#allocation7 + $0x6e0] sm:$0xff] }
 0x2c8   : > { %4598 = vmatmul.mubr.bf16.vlgmr.msra.gmra.mrb[12].mxu0 %v15379_v44 }
 0x2c9   : > { %4680 = vmatmul.mubr.bf16.vlgmr.msra.gmra.mrb[12].mxu1 %v15379_v44  ;;  %4689 = vmatpush1.bf16.msra.mxu0 %v12849_v19  ;;  %v1344_v19 = vld [vmem:[#allocation7 + $0x460] sm:$0xff] }
 0x2ca   : > { %4720 = vmatprep.mubr.bf16.mxu0 %v15366_v23  ;;  %4771 = vmatpush1.bf16.msra.mxu1 %v12851_v22  ;;  %v12961_v22 = vcombine.low %v1320_v9, %v1328_v10  ;;  %v12978_v26 = vcombine.high %v1336_v18, %v1344_v19  ;;  %v1432_v10 = vld [vmem:[#allocation7 + $0x720] sm:$0xff] }
 0x2cb   : > { %4802 = vmatprep.mubr.bf16.mxu1 %v15366_v23  ;;  %4690 = vmatprep.subr.bf16.mxu0 %v12866_v25  ;;  %v12963_v25 = vcombine.low %v1321_v12, %v1329_v13  ;;  %v1440_v12 = vld [vmem:[#allocation7 + $0x760] sm:$0xff]  ;;  %v1433_v13 = vld [vmem:[#allocation7 + $0x728] sm:$0xff] }
 0x2cc   : > { %4772 = vmatprep.subr.bf16.mxu1 %v12868_v28  ;;  %v1352_v28 = vld [vmem:[#allocation7 + $0x4a0] sm:$0xff] }
 0x2cd   : > { %4691 = vmatpush1.bf16.msra.mxu0 %v12865_v32  ;;  %v1361_v32 = vld [vmem:[#allocation7 + $0x4e8] sm:$0xff] }
 0x2ce   : > { %4773 = vmatpush1.bf16.msra.mxu1 %v12867_v33  ;;  %4692 = vmatprep.subr.bf16.mxu0 %v12882_v34  ;;  %v12977_v33 = vcombine.low %v1336_v18, %v1344_v19  ;;  %v12979_v34 = vcombine.low %v1337_v20, %v1345_v21  ;;  %v12996_v36 = vcombine.high %v1353_v30, %v1361_v32  ;;  %v1448_v19 = vld [vmem:[#allocation7 + $0x7a0] sm:$0xff]  ;;  %v1449_v21 = vld [vmem:[#allocation7 + $0x7a8] sm:$0xff] }
 0x2cf   : > { %4774 = vmatprep.subr.bf16.mxu1 %v12884_v35  ;;  %v12994_v35 = vcombine.high %v1352_v28, %v1360_v29  ;;  %v1456_v20 = vld [vmem:[#allocation7 + $0x7e0] sm:$0xff] }
 0x2d1   : > { %4693 = vmatpush1.bf16.msra.mxu0 %v12881_v40  ;;  %v1377_v40 = vld [vmem:[#allocation7 + $0x568] sm:$0xff] }
 0x2d2   : > { %4775 = vmatpush1.bf16.msra.mxu1 %v12883_v41  ;;  %4694 = vmatprep.subr.bf16.mxu0 %v12898_v42  ;;  %v12993_v41 = vcombine.low %v1352_v28, %v1360_v29  ;;  %v12995_v42 = vcombine.low %v1353_v30, %v1361_v32  ;;  %v13012_v45 = vcombine.high %v1369_v39, %v1377_v40  ;;  %v1464_v29 = vld [vmem:[#allocation7 + $0x820] sm:$0xff]  ;;  %v1465_v32 = vld [vmem:[#allocation7 + $0x828] sm:$0xff] }
 0x2d3   : > { %4776 = vmatprep.subr.bf16.mxu1 %v12900_v43  ;;  %v13010_v43 = vcombine.high %v1368_v37, %v1376_v38  ;;  %v1472_v30 = vld [vmem:[#allocation7 + $0x860] sm:$0xff] }
 0x2d5   : > { %4695 = vmatpush1.bf16.msra.mxu0 %v12897_v11  ;;  %v1393_v11 = vld [vmem:[#allocation7 + $0x5e8] sm:$0xff] }
 0x2d6   : > { %4777 = vmatpush1.bf16.msra.mxu1 %v12899_v49  ;;  %4696 = vmatprep.subr.bf16.mxu0 %v12914_v50  ;;  %v13009_v49 = vcombine.low %v1368_v37, %v1376_v38  ;;  %v13011_v50 = vcombine.low %v1369_v39, %v1377_v40  ;;  %v13028_v52 = vcombine.high %v1385_v48, %v1393_v11  ;;  %v1480_v38 = vld [vmem:[#allocation7 + $0x8a0] sm:$0xff] }
 0x2d7   : > { %4778 = vmatprep.subr.bf16.mxu1 %v12916_v51  ;;  %v13026_v51 = vcombine.high %v1384_v46, %v1392_v47  ;;  %v1488_v39 = vld [vmem:[#allocation7 + $0x8e0] sm:$0xff]  ;;  %v13105_v40 = vcombine.low %v1464_v29, %v1472_v30 }
 0x2d9   : > { %4697 = vmatpush1.bf16.msra.mxu0 %v12913_v61  ;;  %v1409_v61 = vld [vmem:[#allocation7 + $0x668] sm:$0xff] }
 0x2da   : > { %4779 = vmatpush1.bf16.msra.mxu1 %v12915_v62  ;;  %4698 = vmatprep.subr.bf16.mxu0 %v12930_v63  ;;  %v13025_v62 = vcombine.low %v1384_v46, %v1392_v47  ;;  %v13027_v63 = vcombine.low %v1385_v48, %v1393_v11  ;;  %v13044_v1 = vcombine.high %v1401_v60, %v1409_v61  ;;  %v1496_v46 = vld [vmem:[#allocation7 + $0x920] sm:$0xff]  ;;  %v1497_v11 = vld [vmem:[#allocation7 + $0x928] sm:$0xff] }
 0x2db   : > { %4780 = vmatprep.subr.bf16.mxu1 %v12932_v0  ;;  %v13042_v0 = vcombine.high %v1400_v53, %v1408_v57  ;;  %v1504_v47 = vld [vmem:[#allocation7 + $0x960] sm:$0xff] }
 0x2dd   : > { %4699 = vmatpush1.bf16.msra.mxu0 %v12929_v5  ;;  %v1425_v5 = vld [vmem:[#allocation7 + $0x6e8] sm:$0xff] }
 0x2de   : > { %4781 = vmatpush1.bf16.msra.mxu1 %v12931_v6  ;;  %4700 = vmatprep.subr.bf16.mxu0 %v12946_v7  ;;  %v13041_v6 = vcombine.low %v1400_v53, %v1408_v57  ;;  %v13043_v7 = vcombine.low %v1401_v60, %v1409_v61  ;;  %v13060_v9 = vcombine.high %v1417_v4, %v1425_v5  ;;  %v1512_v57 = vld [vmem:[#allocation7 + $0x9a0] sm:$0xff]  ;;  %v1513_v61 = vld [vmem:[#allocation7 + $0x9a8] sm:$0xff] }
 0x2df   : > { %4782 = vmatprep.subr.bf16.mxu1 %v12948_v8  ;;  %v13058_v8 = vcombine.high %v1416_v2, %v1424_v3  ;;  %v1520_v60 = vld [vmem:[#allocation7 + $0x9e0] sm:$0xff] }
 0x2e1   : > { %4701 = vmatpush1.bf16.msra.mxu0 %v12945_v14  ;;  %v1441_v14 = vld [vmem:[#allocation7 + $0x768] sm:$0xff] }
 0x2e2   : > { %4783 = vmatpush1.bf16.msra.mxu1 %v12947_v15  ;;  %4702 = vmatprep.subr.bf16.mxu0 %v12962_v16  ;;  %v13057_v15 = vcombine.low %v1416_v2, %v1424_v3  ;;  %v13059_v16 = vcombine.low %v1417_v4, %v1425_v5  ;;  %v13076_v18 = vcombine.high %v1433_v13, %v1441_v14  ;;  %v1528_v3 = vld [vmem:[#allocation7 + $0xa20] sm:$0xff]  ;;  %v1529_v5 = vld [vmem:[#allocation7 + $0xa28] sm:$0xff] }
 0x2e3   : > { %4784 = vmatprep.subr.bf16.mxu1 %v12964_v17  ;;  %v13074_v17 = vcombine.high %v1432_v10, %v1440_v12  ;;  %v1536_v4 = vld [vmem:[#allocation7 + $0xa60] sm:$0xff] }
 0x2e5   : > { %4703 = vmatpush1.bf16.msra.mxu0 %v12961_v22  ;;  %v1457_v22 = vld [vmem:[#allocation7 + $0x7e8] sm:$0xff] }
 0x2e6   : > { %4785 = vmatpush1.bf16.msra.mxu1 %v12963_v25  ;;  %4704 = vmatprep.subr.bf16.mxu0 %v12978_v26  ;;  %v13073_v25 = vcombine.low %v1432_v10, %v1440_v12  ;;  %v13075_v26 = vcombine.low %v1433_v13, %v1441_v14  ;;  %v13092_v28 = vcombine.high %v1449_v21, %v1457_v22  ;;  %v1544_v12 = vld [vmem:[#allocation7 + $0xaa0] sm:$0xff]  ;;  %v1545_v14 = vld [vmem:[#allocation7 + $0xaa8] sm:$0xff] }
 0x2e7   : > { %4786 = vmatprep.subr.bf16.mxu1 %v12980_v27  ;;  %v13090_v27 = vcombine.high %v1448_v19, %v1456_v20  ;;  %v1552_v13 = vld [vmem:[#allocation7 + $0xae0] sm:$0xff] }
 0x2e9   : > { %4705 = vmatpush1.bf16.msra.mxu0 %v12977_v33  ;;  %v1473_v33 = vld [vmem:[#allocation7 + $0x868] sm:$0xff] }
 0x2ea   : > { %4787 = vmatpush1.bf16.msra.mxu1 %v12979_v34  ;;  %4706 = vmatprep.subr.bf16.mxu0 %v12994_v35  ;;  %v13089_v34 = vcombine.low %v1448_v19, %v1456_v20  ;;  %v13091_v35 = vcombine.low %v1449_v21, %v1457_v22  ;;  %v13108_v37 = vcombine.high %v1465_v32, %v1473_v33  ;;  %v1560_v21 = vld [vmem:[#allocation7 + $0xb20] sm:$0xff] }
 0x2eb   : > { %4788 = vmatprep.subr.bf16.mxu1 %v12996_v36  ;;  %v13106_v36 = vcombine.high %v1464_v29, %v1472_v30  ;;  %v13186_v19 = vcombine.high %v1544_v12, %v1552_v13  ;;  %v1568_v22 = vld [vmem:[#allocation7 + $0xb60] sm:$0xff] }
 0x2ed   : > { %4707 = vmatpush1.bf16.msra.mxu0 %v12993_v41  ;;  %v1481_v41 = vld [vmem:[#allocation7 + $0x8a8] sm:$0xff] }
 0x2ee   : > { %4789 = vmatpush1.bf16.msra.mxu1 %v12995_v42  ;;  %4708 = vmatprep.subr.bf16.mxu0 %v13010_v43  ;;  %v1489_v42 = vld [vmem:[#allocation7 + $0x8e8] sm:$0xff]  ;;  %v13107_v43 = vcombine.low %v1465_v32, %v1473_v33  ;;  %v13185_v32 = vcombine.low %v1544_v12, %v1552_v13 }
 0x2ef   : > { %4790 = vmatprep.subr.bf16.mxu1 %v13012_v45  ;;  %v13122_v45 = vcombine.high %v1480_v38, %v1488_v39  ;;  %v13124_v48 = vcombine.high %v1481_v41, %v1489_v42  ;;  %v1609_v12 = vld [vmem:[#allocation7 + $0xca8] sm:$0xff] }
 0x2f0   : > { %v1617_v13 = vld [vmem:[#allocation7 + $0xce8] sm:$0xff] }
 0x2f1   : > { %4709 = vmatpush1.bf16.msra.mxu0 %v13009_v49  ;;  %v1505_v49 = vld [vmem:[#allocation7 + $0x968] sm:$0xff] }
 0x2f2   : > { %4791 = vmatpush1.bf16.msra.mxu1 %v13011_v50  ;;  %4710 = vmatprep.subr.bf16.mxu0 %v13026_v51  ;;  %v13121_v50 = vcombine.low %v1480_v38, %v1488_v39  ;;  %v13123_v51 = vcombine.low %v1481_v41, %v1489_v42  ;;  %v13140_v53 = vcombine.high %v1497_v11, %v1505_v49  ;;  %v1576_v38 = vld [vmem:[#allocation7 + $0xba0] sm:$0xff] }
 0x2f3   : > { %4792 = vmatprep.subr.bf16.mxu1 %v13028_v52  ;;  %v13138_v52 = vcombine.high %v1496_v46, %v1504_v47  ;;  %v1584_v39 = vld [vmem:[#allocation7 + $0xbe0] sm:$0xff] }
 0x2f5   : > { %4711 = vmatpush1.bf16.msra.mxu0 %v13025_v62  ;;  %v1521_v62 = vld [vmem:[#allocation7 + $0x9e8] sm:$0xff] }
 0x2f6   : > { %4793 = vmatpush1.bf16.msra.mxu1 %v13027_v63  ;;  %4712 = vmatprep.subr.bf16.mxu0 %v13042_v0  ;;  %v13137_v63 = vcombine.low %v1496_v46, %v1504_v47  ;;  %v13139_v0 = vcombine.low %v1497_v11, %v1505_v49  ;;  %v13156_v2 = vcombine.high %v1513_v61, %v1521_v62  ;;  %v1585_v46 = vld [vmem:[#allocation7 + $0xbe8] sm:$0xff] }
 0x2f7   : > { %4794 = vmatprep.subr.bf16.mxu1 %v13044_v1  ;;  %v13154_v1 = vcombine.high %v1512_v57, %v1520_v60 }
 0x2f9   : > { %4713 = vmatpush1.bf16.msra.mxu0 %v13041_v6  ;;  %v1537_v6 = vld [vmem:[#allocation7 + $0xa68] sm:$0xff] }
 0x2fa   : > { %4795 = vmatpush1.bf16.msra.mxu1 %v13043_v7  ;;  %4714 = vmatprep.subr.bf16.mxu0 %v13058_v8  ;;  %v13153_v7 = vcombine.low %v1512_v57, %v1520_v60  ;;  %v13155_v8 = vcombine.low %v1513_v61, %v1521_v62  ;;  %v13172_v10 = vcombine.high %v1529_v5, %v1537_v6 }
 0x2fb   : > { %4796 = vmatprep.subr.bf16.mxu1 %v13060_v9  ;;  %v13170_v9 = vcombine.high %v1528_v3, %v1536_v4  ;;  %v13218_v61 = vcombine.high %v1576_v38, %v1584_v39 }
 0x2fd   : > { %4715 = vmatpush1.bf16.msra.mxu0 %v13057_v15  ;;  %v1553_v15 = vld [vmem:[#allocation7 + $0xae8] sm:$0xff] }
 0x2fe   : > { %4797 = vmatpush1.bf16.msra.mxu1 %v13059_v16  ;;  %4716 = vmatprep.subr.bf16.mxu0 %v13074_v17  ;;  %v13169_v16 = vcombine.low %v1528_v3, %v1536_v4  ;;  %v15397_v17 = vld [vmem:[#allocation8] sm:$0xff]  ;;  %v13188_v20 = vcombine.high %v1545_v14, %v1553_v15  ;;  %v13187_v33 = vcombine.low %v1545_v14, %v1553_v15  ;;  %v1593_v3 = vld [vmem:[#allocation7 + $0xc28] sm:$0xff] }
 0x2ff   : > { %4798 = vmatprep.subr.bf16.mxu1 %v13076_v18  ;;  %v13171_v18 = vcombine.low %v1529_v5, %v1537_v6  ;;  %v1727_v29 = vrot.slane %v15397_v17, %v15355_v58  ;;  %v1735_v30 = vrot.slane %v15397_v17, %v15358_v59  ;;  %v1601_v4 = vld [vmem:[#allocation7 + $0xc68] sm:$0xff]  ;;  %v13217_v5 = vcombine.low %v1576_v38, %v1584_v39  ;;  %v1656_v38 = vld [vmem:[#allocation7 + $0xe20] sm:$0xff] }
 0x300   : > { %v13235_v15 = vcombine.low %v1593_v3, %v1601_v4  ;;  %v1664_v39 = vld [vmem:[#allocation7 + $0xe60] sm:$0xff] }
 0x301   : > { %4717 = vmatpush1.bf16.msra.mxu0 %v13073_v25  ;;  %v1723_v25 = vrot.slane %v15397_v17, %v15349_v55 }
 0x302   : > { %4799 = vmatpush1.bf16.msra.mxu1 %v13075_v26  ;;  %4718 = vmatprep.subr.bf16.mxu0 %v13090_v27  ;;  %v1731_v26 = vrot.slane %v15397_v17, %v15352_v56  ;;  %v1561_v27 = vld [vmem:[#allocation7 + $0xb28] sm:$0xff] }
 0x303   : > { %4800 = vmatprep.subr.bf16.mxu1 %v13092_v28  ;;  %v1569_v28 = vld [vmem:[#allocation7 + $0xb68] sm:$0xff] }
 0x304   : > { %v13203_v60 = vcombine.low %v1561_v27, %v1569_v28 }
 0x305   : > { %4719 = vmatpush1.bf16.msra.mxu0 %v13089_v34  ;;  %v13202_v34 = vcombine.high %v1560_v21, %v1568_v22 }
 0x306   : > { %4801 = vmatpush1.bf16.msra.mxu1 %v13091_v35  ;;  %4729 = vmatprep.subr.bf16.mxu0 %v13106_v36 }
 0x307   : > { %4811 = vmatprep.subr.bf16.mxu1 %v13108_v37  ;;  %v13204_v37 = vcombine.high %v1561_v27, %v1569_v28 }
 0x308   : > { %4721 = vmatmul.mubr.bf16.vlgmr.msra.gmra.mrb[16].mxu0 %v15368_v24 }
 0x309   : > { %4803 = vmatmul.mubr.bf16.vlgmr.msra.gmra.mrb[16].mxu1 %v15368_v24  ;;  %4730 = vmatpush1.bf16.msra.mxu0 %v13105_v40 }
 0x30a   : > { %4761 = vmatprep.mubr.bf16.mxu0 %v15372_v31  ;;  %4812 = vmatpush1.bf16.msra.mxu1 %v13107_v43 }
 0x30b   : > { %4843 = vmatprep.mubr.bf16.mxu1 %v15372_v31  ;;  %4731 = vmatprep.subr.bf16.mxu0 %v13122_v45  ;;  %v1577_v45 = vld [vmem:[#allocation7 + $0xba8] sm:$0xff] }
 0x30c   : > { %4813 = vmatprep.subr.bf16.mxu1 %v13124_v48  ;;  %v13219_v6 = vcombine.low %v1577_v45, %v1585_v46 }
 0x30d   : > { %4732 = vmatpush1.bf16.msra.mxu0 %v13121_v50  ;;  %v13201_v50 = vcombine.low %v1560_v21, %v1568_v22  ;;  %v1625_v21 = vld [vmem:[#allocation7 + $0xd28] sm:$0xff] }
 0x30e   : > { %4814 = vmatpush1.bf16.msra.mxu1 %v13123_v51  ;;  %4733 = vmatprep.subr.bf16.mxu0 %v13138_v52  ;;  %v1633_v22 = vld [vmem:[#allocation7 + $0xd68] sm:$0xff] }
 0x30f   : > { %4815 = vmatprep.subr.bf16.mxu1 %v13140_v53  ;;  %v13268_v28 = vcombine.high %v1625_v21, %v1633_v22 }
 0x311   : > { %4734 = vmatpush1.bf16.msra.mxu0 %v13137_v63 }
 0x312   : > { %4816 = vmatpush1.bf16.msra.mxu1 %v13139_v0  ;;  %4735 = vmatprep.subr.bf16.mxu0 %v13154_v1  ;;  %v13220_v0 = vcombine.high %v1577_v45, %v1585_v46  ;;  %v1592_v1 = vld [vmem:[#allocation7 + $0xc20] sm:$0xff]  ;;  %v13298_v45 = vcombine.high %v1656_v38, %v1664_v39 }
 0x313   : > { %4817 = vmatprep.subr.bf16.mxu1 %v13156_v2  ;;  %v1600_v2 = vld [vmem:[#allocation7 + $0xc60] sm:$0xff] }
 0x314   : > { %v13233_v14 = vcombine.low %v1592_v1, %v1600_v2 }
 0x315   : > { %4736 = vmatpush1.bf16.msra.mxu0 %v13153_v7  ;;  %v13234_v7 = vcombine.high %v1592_v1, %v1600_v2 }
 0x316   : > { %4818 = vmatpush1.bf16.msra.mxu1 %v13155_v8  ;;  %4737 = vmatprep.subr.bf16.mxu0 %v13170_v9  ;;  %v13236_v8 = vcombine.high %v1593_v3, %v1601_v4  ;;  %v1608_v9 = vld [vmem:[#allocation7 + $0xca0] sm:$0xff] }
 0x317   : > { %4819 = vmatprep.subr.bf16.mxu1 %v13172_v10  ;;  %v1616_v10 = vld [vmem:[#allocation7 + $0xce0] sm:$0xff] }
 0x318   : > { %v1704_v3 = vld [vmem:[#allocation7 + $0xfa0] sm:$0xff] }
 0x319   : > { %4738 = vmatpush1.bf16.msra.mxu0 %v13169_v16  ;;  %v13250_v16 = vcombine.high %v1608_v9, %v1616_v10  ;;  %v1712_v4 = vld [vmem:[#allocation7 + $0xfe0] sm:$0xff] }
 0x31a   : > { %4820 = vmatpush1.bf16.msra.mxu1 %v13171_v18  ;;  %4739 = vmatprep.subr.bf16.mxu0 %v13186_v19  ;;  %v13252_v18 = vcombine.high %v1609_v12, %v1617_v13  ;;  %v1624_v19 = vld [vmem:[#allocation7 + $0xd20] sm:$0xff] }
 0x31b   : > { %v4435_v35 = vpop.f32.mrb[8].mxu0  ;;  %v4517_v36 = vpop.f32.mrb[8].mxu1  ;;  %4821 = vmatprep.subr.bf16.mxu1 %v13188_v20  ;;  %v1632_v20 = vld [vmem:[#allocation7 + $0xd60] sm:$0xff] }
 0x31c   : > { %v14381_v40 = vadd.f32 %v4435_v35, %v1723_v25  ;;  %v14383_v41 = vadd.f32 %v4517_v36, %v1731_v26  ;;  %v4437_v42 = vpop.f32.mrb[9].mxu0  ;;  %v4519_v43 = vpop.f32.mrb[9].mxu1  ;;  %v13249_v25 = vcombine.low %v1608_v9, %v1616_v10  ;;  %v13251_v26 = vcombine.low %v1609_v12, %v1617_v13  ;;  %v1210_v12 = vld [vmem:[#allocation7 + $0x30] sm:$0xff] }
 0x31d   : > { %v14382_v47 = vadd.f32 %v4437_v42, %v1727_v29  ;;  %v14384_v48 = vadd.f32 %v4519_v43, %v1735_v30  ;;  %v4439_v11 = vpop.f32.mrb[10].mxu0  ;;  %v4521_v49 = vpop.f32.mrb[10].mxu1  ;;  %4740 = vmatpush1.bf16.msra.mxu0 %v13185_v32  ;;  %v13266_v27 = vcombine.high %v1624_v19, %v1632_v20  ;;  %v1640_v29 = vld [vmem:[#allocation7 + $0xda0] sm:$0xff]  ;;  %v1641_v32 = vld [vmem:[#allocation7 + $0xda8] sm:$0xff]  ;;  %v13267_v35 = vcombine.low %v1625_v21, %v1633_v22  ;;  %v1218_v13 = vld [vmem:[#allocation7 + $0x70] sm:$0xff] }
 0x31e   : > { %v5016_v51 = vmax.f32 %v14381_v40, 0.0  ;;  %v5018_v52 = vmax.f32 %v14383_v41, 0.0  ;;  %4822 = vmatpush1.bf16.msra.mxu1 %v13187_v33  ;;  %v4440_v53 = vpop.f32.mrb[11].mxu0  ;;  %v4522_v57 = vpop.f32.mrb[11].mxu1  ;;  %4741 = vmatprep.subr.bf16.mxu0 %v13202_v34  ;;  %v1648_v30 = vld [vmem:[#allocation7 + $0xde0] sm:$0xff]  ;;  %v1649_v33 = vld [vmem:[#allocation7 + $0xde8] sm:$0xff]  ;;  %v13265_v34 = vcombine.low %v1624_v19, %v1632_v20  ;;  %v13346_v9 = vcombine.high %v1704_v3, %v1712_v4 }
 0x31f   : > { %v5017_v62 = vmax.f32 %v14382_v47, 0.0  ;;  %v5019_v63 = vmax.f32 %v14384_v48, 0.0  ;;  %4823 = vmatprep.subr.bf16.mxu1 %v13204_v37  ;;  %v13282_v36 = vcombine.high %v1640_v29, %v1648_v30  ;;  %v13284_v37 = vcombine.high %v1641_v32, %v1649_v33  ;;  %v1657_v40 = vld [vmem:[#allocation7 + $0xe28] sm:$0xff]  ;;  %v1672_v47 = vld [vmem:[#allocation7 + $0xea0] sm:$0xff]  ;;  %v1226_v21 = vld [vmem:[#allocation7 + $0xb0] sm:$0xff] }
 0x320   : > { %5032 = vst [vmem:[#allocation2] sm:$0xff] %v5016_v51  ;;  %5034 = vst [vmem:[#allocation2 + $0x10] sm:$0xff] %v5018_v52  ;;  %v1665_v41 = vld [vmem:[#allocation7 + $0xe68] sm:$0xff]  ;;  %v13281_v42 = vcombine.low %v1640_v29, %v1648_v30  ;;  %v13283_v43 = vcombine.low %v1641_v32, %v1649_v33  ;;  %v1680_v48 = vld [vmem:[#allocation7 + $0xee0] sm:$0xff]  ;;  %v12854_v19 = vcombine.high %v1210_v12, %v1218_v13 }
 0x321   : > { %5033 = vst [vmem:[#allocation2 + $0x8] sm:$0xff] %v5017_v62  ;;  %5035 = vst [vmem:[#allocation2 + $0x18] sm:$0xff] %v5019_v63  ;;  %4742 = vmatpush1.bf16.msra.mxu0 %v13201_v50  ;;  %v13300_v46 = vcombine.high %v1657_v40, %v1665_v41  ;;  %v1673_v11 = vld [vmem:[#allocation7 + $0xea8] sm:$0xff]  ;;  %v13297_v50 = vcombine.low %v1656_v38, %v1664_v39  ;;  %v13299_v51 = vcombine.low %v1657_v40, %v1665_v41  ;;  %v1688_v57 = vld [vmem:[#allocation7 + $0xf20] sm:$0xff] }
 0x322   : > { %4824 = vmatpush1.bf16.msra.mxu1 %v13203_v60  ;;  %4743 = vmatprep.subr.bf16.mxu0 %v13218_v61  ;;  %v1681_v49 = vld [vmem:[#allocation7 + $0xee8] sm:$0xff]  ;;  %v13314_v52 = vcombine.high %v1672_v47, %v1680_v48  ;;  %v1696_v60 = vld [vmem:[#allocation7 + $0xf60] sm:$0xff]  ;;  %v13313_v63 = vcombine.low %v1672_v47, %v1680_v48  ;;  %v1234_v22 = vld [vmem:[#allocation7 + $0xf0] sm:$0xff] }
 0x323   : > { %4825 = vmatprep.subr.bf16.mxu1 %v13220_v0  ;;  %v13316_v53 = vcombine.high %v1673_v11, %v1681_v49  ;;  %v1689_v61 = vld [vmem:[#allocation7 + $0xf28] sm:$0xff]  ;;  %v13315_v0 = vcombine.low %v1673_v11, %v1681_v49  ;;  %v13330_v1 = vcombine.high %v1688_v57, %v1696_v60  ;;  %v12870_v29 = vcombine.high %v1226_v21, %v1234_v22  ;;  %v1242_v30 = vld [vmem:[#allocation7 + $0x130] sm:$0xff] }
 0x324   : > { %v1697_v62 = vld [vmem:[#allocation7 + $0xf68] sm:$0xff]  ;;  %v1250_v32 = vld [vmem:[#allocation7 + $0x170] sm:$0xff] }
 0x325   : > { %4744 = vmatpush1.bf16.msra.mxu0 %v13217_v5  ;;  %v13332_v2 = vcombine.high %v1689_v61, %v1697_v62  ;;  %v1705_v5 = vld [vmem:[#allocation7 + $0xfa8] sm:$0xff]  ;;  %v12886_v38 = vcombine.high %v1242_v30, %v1250_v32  ;;  %v1258_v40 = vld [vmem:[#allocation7 + $0x1b0] sm:$0xff] }
 0x326   : > { %4826 = vmatpush1.bf16.msra.mxu1 %v13219_v6  ;;  %4745 = vmatprep.subr.bf16.mxu0 %v13234_v7  ;;  %v1713_v6 = vld [vmem:[#allocation7 + $0xfe8] sm:$0xff]  ;;  %v13329_v7 = vcombine.low %v1688_v57, %v1696_v60  ;;  %v1266_v41 = vld [vmem:[#allocation7 + $0x1f0] sm:$0xff] }
 0x327   : > { %4827 = vmatprep.subr.bf16.mxu1 %v13236_v8  ;;  %v13331_v8 = vcombine.low %v1689_v61, %v1697_v62  ;;  %v13348_v10 = vcombine.high %v1705_v5, %v1713_v6  ;;  %v12902_v47 = vcombine.high %v1258_v40, %v1266_v41  ;;  %v1274_v11 = vld [vmem:[#allocation7 + $0x230] sm:$0xff]  ;;  %v1291_v62 = vld [vmem:[#allocation7 + $0x2b8] sm:$0xff] }
 0x328   : > { %v1282_v49 = vld [vmem:[#allocation7 + $0x270] sm:$0xff] }
 0x329   : > { %4746 = vmatpush1.bf16.msra.mxu0 %v13233_v14  ;;  %v1211_v14 = vld [vmem:[#allocation7 + $0x38] sm:$0xff]  ;;  %v1290_v60 = vld [vmem:[#allocation7 + $0x2b0] sm:$0xff] }
 0x32a   : > { %4828 = vmatpush1.bf16.msra.mxu1 %v13235_v15  ;;  %4747 = vmatprep.subr.bf16.mxu0 %v13250_v16  ;;  %v1219_v15 = vld [vmem:[#allocation7 + $0x78] sm:$0xff]  ;;  %v13345_v16 = vcombine.low %v1704_v3, %v1712_v4  ;;  %v1298_v61 = vld [vmem:[#allocation7 + $0x2f0] sm:$0xff] }
 0x32b   : > { %4829 = vmatprep.subr.bf16.mxu1 %v13252_v18  ;;  %v13347_v18 = vcombine.low %v1705_v5, %v1713_v6  ;;  %v12856_v20 = vcombine.high %v1211_v14, %v1219_v15  ;;  %v1306_v4 = vld [vmem:[#allocation7 + $0x330] sm:$0xff]  ;;  %v1307_v6 = vld [vmem:[#allocation7 + $0x338] sm:$0xff] }
 0x32c   : > { %v1314_v5 = vld [vmem:[#allocation7 + $0x370] sm:$0xff] }
 0x32d   : > { %4748 = vmatpush1.bf16.msra.mxu0 %v13249_v25  ;;  %v12853_v25 = vcombine.low %v1210_v12, %v1218_v13  ;;  %v1322_v13 = vld [vmem:[#allocation7 + $0x3b0] sm:$0xff] }
 0x32e   : > { %4830 = vmatpush1.bf16.msra.mxu1 %v13251_v26  ;;  %4749 = vmatprep.subr.bf16.mxu0 %v13266_v27  ;;  %v1227_v26 = vld [vmem:[#allocation7 + $0xb8] sm:$0xff] }
 0x32f   : > { %4831 = vmatprep.subr.bf16.mxu1 %v13268_v28  ;;  %v1235_v27 = vld [vmem:[#allocation7 + $0xf8] sm:$0xff]  ;;  %v12855_v28 = vcombine.low %v1211_v14, %v1219_v15  ;;  %v1330_v14 = vld [vmem:[#allocation7 + $0x3f0] sm:$0xff] }
 0x330   : > { %v12872_v33 = vcombine.high %v1227_v26, %v1235_v27  ;;  %v1323_v15 = vld [vmem:[#allocation7 + $0x3b8] sm:$0xff] }
 0x331   : > { %4750 = vmatpush1.bf16.msra.mxu0 %v13265_v34  ;;  %v1243_v34 = vld [vmem:[#allocation7 + $0x138] sm:$0xff] }
 0x332   : > { %4832 = vmatpush1.bf16.msra.mxu1 %v13267_v35  ;;  %4751 = vmatprep.subr.bf16.mxu0 %v13282_v36  ;;  %v1251_v35 = vld [vmem:[#allocation7 + $0x178] sm:$0xff]  ;;  %v12869_v36 = vcombine.low %v1226_v21, %v1234_v22  ;;  %v1338_v22 = vld [vmem:[#allocation7 + $0x430] sm:$0xff] }
 0x333   : > { %4833 = vmatprep.subr.bf16.mxu1 %v13284_v37  ;;  %v12871_v37 = vcombine.low %v1227_v26, %v1235_v27  ;;  %v12888_v39 = vcombine.high %v1243_v34, %v1251_v35  ;;  %v1339_v26 = vld [vmem:[#allocation7 + $0x438] sm:$0xff] }
 0x334   : > { %v1347_v27 = vld [vmem:[#allocation7 + $0x478] sm:$0xff] }
 0x335   : > { %4752 = vmatpush1.bf16.msra.mxu0 %v13281_v42  ;;  %v1259_v42 = vld [vmem:[#allocation7 + $0x1b8] sm:$0xff] }
 0x336   : > { %4834 = vmatpush1.bf16.msra.mxu1 %v13283_v43  ;;  %4753 = vmatprep.subr.bf16.mxu0 %v13298_v45  ;;  %v1267_v43 = vld [vmem:[#allocation7 + $0x1f8] sm:$0xff]  ;;  %v12885_v45 = vcombine.low %v1242_v30, %v1250_v32  ;;  %v12984_v32 = vcombine.high %v1339_v26, %v1347_v27 }
 0x337   : > { %4835 = vmatprep.subr.bf16.mxu1 %v13300_v46  ;;  %v12887_v46 = vcombine.low %v1243_v34, %v1251_v35  ;;  %v12904_v48 = vcombine.high %v1259_v42, %v1267_v43  ;;  %v1362_v34 = vld [vmem:[#allocation7 + $0x4f0] sm:$0xff]  ;;  %v1355_v35 = vld [vmem:[#allocation7 + $0x4b8] sm:$0xff] }
 0x339   : > { %4754 = vmatpush1.bf16.msra.mxu0 %v13297_v50  ;;  %v1275_v50 = vld [vmem:[#allocation7 + $0x238] sm:$0xff] }
 0x33a   : > { %4836 = vmatpush1.bf16.msra.mxu1 %v13299_v51  ;;  %4755 = vmatprep.subr.bf16.mxu0 %v13314_v52  ;;  %v1283_v51 = vld [vmem:[#allocation7 + $0x278] sm:$0xff]  ;;  %v12903_v52 = vcombine.low %v1259_v42, %v1267_v43  ;;  %v1378_v42 = vld [vmem:[#allocation7 + $0x570] sm:$0xff] }
 0x33b   : > { %4837 = vmatprep.subr.bf16.mxu1 %v13316_v53  ;;  %v12918_v53 = vcombine.high %v1274_v11, %v1282_v49  ;;  %v12920_v57 = vcombine.high %v1275_v50, %v1283_v51  ;;  %v1371_v43 = vld [vmem:[#allocation7 + $0x538] sm:$0xff] }
 0x33d   : > { %4756 = vmatpush1.bf16.msra.mxu0 %v13313_v63  ;;  %v1299_v63 = vld [vmem:[#allocation7 + $0x2f8] sm:$0xff] }
 0x33e   : > { %4838 = vmatpush1.bf16.msra.mxu1 %v13315_v0  ;;  %4757 = vmatprep.subr.bf16.mxu0 %v13330_v1  ;;  %v12917_v0 = vcombine.low %v1274_v11, %v1282_v49  ;;  %v12919_v1 = vcombine.low %v1275_v50, %v1283_v51  ;;  %v12936_v3 = vcombine.high %v1291_v62, %v1299_v63  ;;  %v1386_v49 = vld [vmem:[#allocation7 + $0x5b0] sm:$0xff]  ;;  %v1387_v51 = vld [vmem:[#allocation7 + $0x5b8] sm:$0xff] }
 0x33f   : > { %4839 = vmatprep.subr.bf16.mxu1 %v13332_v2  ;;  %v12934_v2 = vcombine.high %v1290_v60, %v1298_v61  ;;  %v1394_v50 = vld [vmem:[#allocation7 + $0x5f0] sm:$0xff] }
 0x341   : > { %4758 = vmatpush1.bf16.msra.mxu0 %v13329_v7  ;;  %v1315_v7 = vld [vmem:[#allocation7 + $0x378] sm:$0xff] }
 0x342   : > { %4840 = vmatpush1.bf16.msra.mxu1 %v13331_v8  ;;  %4759 = vmatprep.subr.bf16.mxu0 %v13346_v9  ;;  %v12933_v8 = vcombine.low %v1290_v60, %v1298_v61  ;;  %v12935_v9 = vcombine.low %v1291_v62, %v1299_v63  ;;  %v12952_v12 = vcombine.high %v1307_v6, %v1315_v7  ;;  %v1402_v61 = vld [vmem:[#allocation7 + $0x630] sm:$0xff]  ;;  %v1403_v63 = vld [vmem:[#allocation7 + $0x638] sm:$0xff] }
 0x343   : > { %4841 = vmatprep.subr.bf16.mxu1 %v13348_v10  ;;  %v12950_v10 = vcombine.high %v1306_v4, %v1314_v5  ;;  %v1410_v62 = vld [vmem:[#allocation7 + $0x670] sm:$0xff] }
 0x345   : > { %4760 = vmatpush1.bf16.msra.mxu0 %v13345_v16  ;;  %v1331_v16 = vld [vmem:[#allocation7 + $0x3f8] sm:$0xff] }
 0x346   : > { %4842 = vmatpush1.bf16.msra.mxu1 %v13347_v18  ;;  %4852 = vmatprep.subr.bf16.mxu0 %v12854_v19  ;;  %v12949_v18 = vcombine.low %v1306_v4, %v1314_v5  ;;  %v12951_v19 = vcombine.low %v1307_v6, %v1315_v7  ;;  %v12968_v21 = vcombine.high %v1323_v15, %v1331_v16  ;;  %v1418_v5 = vld [vmem:[#allocation7 + $0x6b0] sm:$0xff]  ;;  %v1419_v7 = vld [vmem:[#allocation7 + $0x6b8] sm:$0xff] }
 0x347   : > { %4934 = vmatprep.subr.bf16.mxu1 %v12856_v20  ;;  %v12966_v20 = vcombine.high %v1322_v13, %v1330_v14  ;;  %v1426_v6 = vld [vmem:[#allocation7 + $0x6f0] sm:$0xff] }
 0x348   : > { %4762 = vmatmul.mubr.bf16.vlgmr.msra.gmra.mrb[16].mxu0 %v15379_v44 }
 0x349   : > { %4844 = vmatmul.mubr.bf16.vlgmr.msra.gmra.mrb[16].mxu1 %v15379_v44  ;;  %4853 = vmatpush1.bf16.msra.mxu0 %v12853_v25  ;;  %v1346_v25 = vld [vmem:[#allocation7 + $0x470] sm:$0xff] }
 0x34a   : > { %4884 = vmatprep.mubr.bf16.mxu0 %v15366_v23  ;;  %4935 = vmatpush1.bf16.msra.mxu1 %v12855_v28  ;;  %v12965_v28 = vcombine.low %v1322_v13, %v1330_v14  ;;  %v12982_v30 = vcombine.high %v1338_v22, %v1346_v25  ;;  %v1434_v14 = vld [vmem:[#allocation7 + $0x730] sm:$0xff] }
 0x34b   : > { %4966 = vmatprep.mubr.bf16.mxu1 %v15366_v23  ;;  %4854 = vmatprep.subr.bf16.mxu0 %v12870_v29  ;;  %v12901_v23 = vcombine.low %v1258_v40, %v1266_v41  ;;  %v12967_v29 = vcombine.low %v1323_v15, %v1331_v16  ;;  %v1370_v41 = vld [vmem:[#allocation7 + $0x530] sm:$0xff]  ;;  %v1435_v16 = vld [vmem:[#allocation7 + $0x738] sm:$0xff] }
 0x34c   : > { %4936 = vmatprep.subr.bf16.mxu1 %v12872_v33  ;;  %v1354_v33 = vld [vmem:[#allocation7 + $0x4b0] sm:$0xff] }
 0x34d   : > { %4855 = vmatpush1.bf16.msra.mxu0 %v12869_v36  ;;  %v1363_v36 = vld [vmem:[#allocation7 + $0x4f8] sm:$0xff]  ;;  %v1442_v15 = vld [vmem:[#allocation7 + $0x770] sm:$0xff] }
 0x34e   : > { %4937 = vmatpush1.bf16.msra.mxu1 %v12871_v37  ;;  %4856 = vmatprep.subr.bf16.mxu0 %v12886_v38  ;;  %v12981_v37 = vcombine.low %v1338_v22, %v1346_v25  ;;  %v12983_v38 = vcombine.low %v1339_v26, %v1347_v27  ;;  %v13000_v40 = vcombine.high %v1355_v35, %v1363_v36  ;;  %v1450_v25 = vld [vmem:[#allocation7 + $0x7b0] sm:$0xff]  ;;  %v1451_v27 = vld [vmem:[#allocation7 + $0x7b8] sm:$0xff] }
 0x34f   : > { %4938 = vmatprep.subr.bf16.mxu1 %v12888_v39  ;;  %v12998_v39 = vcombine.high %v1354_v33, %v1362_v34  ;;  %v1458_v26 = vld [vmem:[#allocation7 + $0x7f0] sm:$0xff] }
 0x351   : > { %4857 = vmatpush1.bf16.msra.mxu0 %v12885_v45  ;;  %v1379_v45 = vld [vmem:[#allocation7 + $0x578] sm:$0xff] }
 0x352   : > { %4939 = vmatpush1.bf16.msra.mxu1 %v12887_v46  ;;  %4858 = vmatprep.subr.bf16.mxu0 %v12902_v47  ;;  %v12997_v46 = vcombine.low %v1354_v33, %v1362_v34  ;;  %v12999_v47 = vcombine.low %v1355_v35, %v1363_v36  ;;  %v13016_v11 = vcombine.high %v1371_v43, %v1379_v45  ;;  %v1466_v34 = vld [vmem:[#allocation7 + $0x830] sm:$0xff]  ;;  %v1467_v36 = vld [vmem:[#allocation7 + $0x838] sm:$0xff] }
 0x353   : > { %4940 = vmatprep.subr.bf16.mxu1 %v12904_v48  ;;  %v13014_v48 = vcombine.high %v1370_v41, %v1378_v42  ;;  %v1474_v35 = vld [vmem:[#allocation7 + $0x870] sm:$0xff] }
 0x355   : > { %4859 = vmatpush1.bf16.msra.mxu0 %v12901_v23  ;;  %v1395_v23 = vld [vmem:[#allocation7 + $0x5f8] sm:$0xff] }
 0x356   : > { %4941 = vmatpush1.bf16.msra.mxu1 %v12903_v52  ;;  %4860 = vmatprep.subr.bf16.mxu0 %v12918_v53  ;;  %v13013_v52 = vcombine.low %v1370_v41, %v1378_v42  ;;  %v13015_v53 = vcombine.low %v1371_v43, %v1379_v45  ;;  %v13032_v60 = vcombine.high %v1387_v51, %v1395_v23  ;;  %v1482_v42 = vld [vmem:[#allocation7 + $0x8b0] sm:$0xff] }
 0x357   : > { %4942 = vmatprep.subr.bf16.mxu1 %v12920_v57  ;;  %v13030_v57 = vcombine.high %v1386_v49, %v1394_v50  ;;  %v1490_v43 = vld [vmem:[#allocation7 + $0x8f0] sm:$0xff]  ;;  %v13109_v45 = vcombine.low %v1466_v34, %v1474_v35 }
 0x359   : > { %4861 = vmatpush1.bf16.msra.mxu0 %v12917_v0  ;;  %v1411_v0 = vld [vmem:[#allocation7 + $0x678] sm:$0xff] }
 0x35a   : > { %4943 = vmatpush1.bf16.msra.mxu1 %v12919_v1  ;;  %4862 = vmatprep.subr.bf16.mxu0 %v12934_v2  ;;  %v13029_v1 = vcombine.low %v1386_v49, %v1394_v50  ;;  %v13031_v2 = vcombine.low %v1387_v51, %v1395_v23  ;;  %v13048_v4 = vcombine.high %v1403_v63, %v1411_v0  ;;  %v1498_v49 = vld [vmem:[#allocation7 + $0x930] sm:$0xff]  ;;  %v1499_v23 = vld [vmem:[#allocation7 + $0x938] sm:$0xff] }
 0x35b   : > { %4944 = vmatprep.subr.bf16.mxu1 %v12936_v3  ;;  %v13046_v3 = vcombine.high %v1402_v61, %v1410_v62  ;;  %v1506_v50 = vld [vmem:[#allocation7 + $0x970] sm:$0xff] }
 0x35d   : > { %4863 = vmatpush1.bf16.msra.mxu0 %v12933_v8  ;;  %v1427_v8 = vld [vmem:[#allocation7 + $0x6f8] sm:$0xff] }
 0x35e   : > { %4945 = vmatpush1.bf16.msra.mxu1 %v12935_v9  ;;  %4864 = vmatprep.subr.bf16.mxu0 %v12950_v10  ;;  %v13045_v9 = vcombine.low %v1402_v61, %v1410_v62  ;;  %v13047_v10 = vcombine.low %v1403_v63, %v1411_v0  ;;  %v13064_v13 = vcombine.high %v1419_v7, %v1427_v8  ;;  %v1514_v62 = vld [vmem:[#allocation7 + $0x9b0] sm:$0xff]  ;;  %v1515_v0 = vld [vmem:[#allocation7 + $0x9b8] sm:$0xff] }
 0x35f   : > { %4946 = vmatprep.subr.bf16.mxu1 %v12952_v12  ;;  %v13062_v12 = vcombine.high %v1418_v5, %v1426_v6  ;;  %v1522_v63 = vld [vmem:[#allocation7 + $0x9f0] sm:$0xff] }
 0x361   : > { %4865 = vmatpush1.bf16.msra.mxu0 %v12949_v18  ;;  %v1443_v18 = vld [vmem:[#allocation7 + $0x778] sm:$0xff] }
 0x362   : > { %4947 = vmatpush1.bf16.msra.mxu1 %v12951_v19  ;;  %4866 = vmatprep.subr.bf16.mxu0 %v12966_v20  ;;  %v13061_v19 = vcombine.low %v1418_v5, %v1426_v6  ;;  %v13063_v20 = vcombine.low %v1419_v7, %v1427_v8  ;;  %v13080_v22 = vcombine.high %v1435_v16, %v1443_v18  ;;  %v1530_v5 = vld [vmem:[#allocation7 + $0xa30] sm:$0xff]  ;;  %v1531_v7 = vld [vmem:[#allocation7 + $0xa38] sm:$0xff] }
 0x363   : > { %4948 = vmatprep.subr.bf16.mxu1 %v12968_v21  ;;  %v13078_v21 = vcombine.high %v1434_v14, %v1442_v15  ;;  %v1538_v6 = vld [vmem:[#allocation7 + $0xa70] sm:$0xff]  ;;  %v1539_v8 = vld [vmem:[#allocation7 + $0xa78] sm:$0xff] }
 0x365   : > { %4867 = vmatpush1.bf16.msra.mxu0 %v12965_v28  ;;  %v1459_v28 = vld [vmem:[#allocation7 + $0x7f8] sm:$0xff] }
 0x366   : > { %4949 = vmatpush1.bf16.msra.mxu1 %v12967_v29  ;;  %4868 = vmatprep.subr.bf16.mxu0 %v12982_v30  ;;  %v13077_v29 = vcombine.low %v1434_v14, %v1442_v15  ;;  %v13079_v30 = vcombine.low %v1435_v16, %v1443_v18  ;;  %v13096_v33 = vcombine.high %v1451_v27, %v1459_v28  ;;  %v1554_v14 = vld [vmem:[#allocation7 + $0xaf0] sm:$0xff]  ;;  %v1738_v15 = vsub.s32 4, %v15346_v54  ;;  %v1547_v16 = vld [vmem:[#allocation7 + $0xab8] sm:$0xff] }
 0x367   : > { %4950 = vmatprep.subr.bf16.mxu1 %v12984_v32  ;;  %v13094_v32 = vcombine.high %v1450_v25, %v1458_v26  ;;  %v1555_v18 = vld [vmem:[#allocation7 + $0xaf8] sm:$0xff] }
 0x369   : > { %4869 = vmatpush1.bf16.msra.mxu0 %v12981_v37  ;;  %v1475_v37 = vld [vmem:[#allocation7 + $0x878] sm:$0xff] }
 0x36a   : > { %4951 = vmatpush1.bf16.msra.mxu1 %v12983_v38  ;;  %4870 = vmatprep.subr.bf16.mxu0 %v12998_v39  ;;  %v13093_v38 = vcombine.low %v1450_v25, %v1458_v26  ;;  %v13095_v39 = vcombine.low %v1451_v27, %v1459_v28  ;;  %v13112_v41 = vcombine.high %v1467_v36, %v1475_v37  ;;  %v1750_v25 = vsub.s32 7, %v15346_v54  ;;  %v1562_v28 = vld [vmem:[#allocation7 + $0xb30] sm:$0xff] }
 0x36b   : > { %4952 = vmatprep.subr.bf16.mxu1 %v13000_v40  ;;  %v13110_v40 = vcombine.high %v1466_v34, %v1474_v35  ;;  %v13192_v27 = vcombine.high %v1547_v16, %v1555_v18 }
 0x36d   : > { %4871 = vmatpush1.bf16.msra.mxu0 %v12997_v46  ;;  %v1483_v46 = vld [vmem:[#allocation7 + $0x8b8] sm:$0xff] }
 0x36e   : > { %4953 = vmatpush1.bf16.msra.mxu1 %v12999_v47  ;;  %4872 = vmatprep.subr.bf16.mxu0 %v13014_v48  ;;  %v1491_v47 = vld [vmem:[#allocation7 + $0x8f8] sm:$0xff]  ;;  %v13111_v48 = vcombine.low %v1467_v36, %v1475_v37  ;;  %v1751_v37 = vrot.slane %v15397_v17, %v1750_v25 }
 0x36f   : > { %4954 = vmatprep.subr.bf16.mxu1 %v13016_v11  ;;  %v13126_v11 = vcombine.high %v1482_v42, %v1490_v43  ;;  %v13128_v51 = vcombine.high %v1483_v46, %v1491_v47 }
 0x371   : > { %4873 = vmatpush1.bf16.msra.mxu0 %v13013_v52  ;;  %v1507_v52 = vld [vmem:[#allocation7 + $0x978] sm:$0xff] }
 0x372   : > { %4955 = vmatpush1.bf16.msra.mxu1 %v13015_v53  ;;  %4874 = vmatprep.subr.bf16.mxu0 %v13030_v57  ;;  %v13125_v53 = vcombine.low %v1482_v42, %v1490_v43  ;;  %v13127_v57 = vcombine.low %v1483_v46, %v1491_v47  ;;  %v13144_v61 = vcombine.high %v1499_v23, %v1507_v52  ;;  %v1578_v42 = vld [vmem:[#allocation7 + $0xbb0] sm:$0xff] }
 0x373   : > { %4956 = vmatprep.subr.bf16.mxu1 %v13032_v60  ;;  %v13142_v60 = vcombine.high %v1498_v49, %v1506_v50  ;;  %v1586_v43 = vld [vmem:[#allocation7 + $0xbf0] sm:$0xff] }
 0x375   : > { %4875 = vmatpush1.bf16.msra.mxu0 %v13029_v1  ;;  %v1523_v1 = vld [vmem:[#allocation7 + $0x9f8] sm:$0xff] }
 0x376   : > { %4957 = vmatpush1.bf16.msra.mxu1 %v13031_v2  ;;  %4876 = vmatprep.subr.bf16.mxu0 %v13046_v3  ;;  %v13141_v2 = vcombine.low %v1498_v49, %v1506_v50  ;;  %v13158_v3 = vcombine.high %v1514_v62, %v1522_v63 }
 0x377   : > { %4958 = vmatprep.subr.bf16.mxu1 %v13048_v4  ;;  %v13160_v4 = vcombine.high %v1515_v0, %v1523_v1 }
 0x379   : > { %4877 = vmatpush1.bf16.msra.mxu0 %v13045_v9  ;;  %v13159_v9 = vcombine.low %v1515_v0, %v1523_v1 }
 0x37a   : > { %4959 = vmatpush1.bf16.msra.mxu1 %v13047_v10  ;;  %4878 = vmatprep.subr.bf16.mxu0 %v13062_v12  ;;  %v13174_v10 = vcombine.high %v1530_v5, %v1538_v6  ;;  %v13176_v12 = vcombine.high %v1531_v7, %v1539_v8 }
 0x37b   : > { %4960 = vmatprep.subr.bf16.mxu1 %v13064_v13  ;;  %v1546_v13 = vld [vmem:[#allocation7 + $0xab0] sm:$0xff] }
 0x37c   : > { %v13190_v26 = vcombine.high %v1546_v13, %v1554_v14  ;;  %v13189_v36 = vcombine.low %v1546_v13, %v1554_v14  ;;  %v1611_v13 = vld [vmem:[#allocation7 + $0xcb8] sm:$0xff] }
 0x37d   : > { %4879 = vmatpush1.bf16.msra.mxu0 %v13061_v19  ;;  %v13173_v19 = vcombine.low %v1530_v5, %v1538_v6  ;;  %v1595_v5 = vld [vmem:[#allocation7 + $0xc38] sm:$0xff] }
 0x37e   : > { %4961 = vmatpush1.bf16.msra.mxu1 %v13063_v20  ;;  %4880 = vmatprep.subr.bf16.mxu0 %v13078_v21  ;;  %v1746_v20 = vsub.s32 6, %v15346_v54  ;;  %v1742_v21 = vsub.s32 5, %v15346_v54  ;;  %v1603_v6 = vld [vmem:[#allocation7 + $0xc78] sm:$0xff] }
 0x37f   : > { %4962 = vmatprep.subr.bf16.mxu1 %v13080_v22  ;;  %v13175_v22 = vcombine.low %v1531_v7, %v1539_v8  ;;  %v13221_v7 = vcombine.low %v1578_v42, %v1586_v43  ;;  %v1619_v14 = vld [vmem:[#allocation7 + $0xcf8] sm:$0xff] }
 0x380   : > { %v1747_v34 = vrot.slane %v15397_v17, %v1746_v20  ;;  %v1743_v35 = vrot.slane %v15397_v17, %v1742_v21 }
 0x381   : > { %4881 = vmatpush1.bf16.msra.mxu0 %v13077_v29  ;;  %v1570_v29 = vld [vmem:[#allocation7 + $0xb70] sm:$0xff] }
 0x382   : > { %4963 = vmatpush1.bf16.msra.mxu1 %v13079_v30  ;;  %4882 = vmatprep.subr.bf16.mxu0 %v13094_v32  ;;  %v1739_v30 = vrot.slane %v15397_v17, %v1738_v15  ;;  %v1563_v32 = vld [vmem:[#allocation7 + $0xb38] sm:$0xff] }
 0x383   : > { %4964 = vmatprep.subr.bf16.mxu1 %v13096_v33  ;;  %v1571_v33 = vld [vmem:[#allocation7 + $0xb78] sm:$0xff] }
 0x385   : > { %4883 = vmatpush1.bf16.msra.mxu0 %v13093_v38  ;;  %v13191_v38 = vcombine.low %v1547_v16, %v1555_v18  ;;  %v13239_v18 = vcombine.low %v1595_v5, %v1603_v6 }
 0x386   : > { %4965 = vmatpush1.bf16.msra.mxu1 %v13095_v39  ;;  %4893 = vmatprep.subr.bf16.mxu0 %v13110_v40  ;;  %v13206_v39 = vcombine.high %v1562_v28, %v1570_v29 }
 0x387   : > { %4975 = vmatprep.subr.bf16.mxu1 %v13112_v41  ;;  %v13208_v41 = vcombine.high %v1563_v32, %v1571_v33 }
 0x388   : > { %4885 = vmatmul.mubr.bf16.vlgmr.msra.gmra.mrb[20].mxu0 %v15368_v24 }
 0x389   : > { %4967 = vmatmul.mubr.bf16.vlgmr.msra.gmra.mrb[20].mxu1 %v15368_v24  ;;  %4894 = vmatpush1.bf16.msra.mxu0 %v13109_v45  ;;  %v13143_v24 = vcombine.low %v1499_v23, %v1507_v52  ;;  %v13205_v52 = vcombine.low %v1562_v28, %v1570_v29  ;;  %v1627_v28 = vld [vmem:[#allocation7 + $0xd38] sm:$0xff] }
 0x38a   : > { %4925 = vmatprep.mubr.bf16.mxu0 %v15372_v31  ;;  %4976 = vmatpush1.bf16.msra.mxu1 %v13111_v48  ;;  %v1579_v48 = vld [vmem:[#allocation7 + $0xbb8] sm:$0xff] }
 0x38b   : > { %5007 = vmatprep.mubr.bf16.mxu1 %v15372_v31  ;;  %4895 = vmatprep.subr.bf16.mxu0 %v13126_v11  ;;  %v13157_v31 = vcombine.low %v1514_v62, %v1522_v63  ;;  %v1587_v11 = vld [vmem:[#allocation7 + $0xbf8] sm:$0xff]  ;;  %v13222_v62 = vcombine.high %v1578_v42, %v1586_v43  ;;  %v1658_v43 = vld [vmem:[#allocation7 + $0xe30] sm:$0xff] }
 0x38c   : > { %4977 = vmatprep.subr.bf16.mxu1 %v13128_v51  ;;  %v13223_v8 = vcombine.low %v1579_v48, %v1587_v11  ;;  %v1635_v29 = vld [vmem:[#allocation7 + $0xd78] sm:$0xff] }
 0x38d   : > { %4896 = vmatpush1.bf16.msra.mxu0 %v13125_v53 }
 0x38e   : > { %4978 = vmatpush1.bf16.msra.mxu1 %v13127_v57  ;;  %4897 = vmatprep.subr.bf16.mxu0 %v13142_v60 }
 0x38f   : > { %4979 = vmatprep.subr.bf16.mxu1 %v13144_v61  ;;  %v13207_v61 = vcombine.low %v1563_v32, %v1571_v33  ;;  %v13255_v32 = vcombine.low %v1611_v13, %v1619_v14 }
 0x391   : > { %4898 = vmatpush1.bf16.msra.mxu0 %v13141_v2  ;;  %v13224_v2 = vcombine.high %v1579_v48, %v1587_v11 }
 0x392   : > { %4980 = vmatpush1.bf16.msra.mxu1 %v13143_v24  ;;  %4899 = vmatprep.subr.bf16.mxu0 %v13158_v3  ;;  %v1594_v24 = vld [vmem:[#allocation7 + $0xc30] sm:$0xff] }
 0x393   : > { %4981 = vmatprep.subr.bf16.mxu1 %v13160_v4  ;;  %v1602_v3 = vld [vmem:[#allocation7 + $0xc70] sm:$0xff] }
 0x394   : > { %v13237_v16 = vcombine.low %v1594_v24, %v1602_v3 }
 0x395   : > { %4900 = vmatpush1.bf16.msra.mxu0 %v13157_v31  ;;  %v13238_v31 = vcombine.high %v1594_v24, %v1602_v3 }
 0x396   : > { %4982 = vmatpush1.bf16.msra.mxu1 %v13159_v9  ;;  %4901 = vmatprep.subr.bf16.mxu0 %v13174_v10  ;;  %v13240_v9 = vcombine.high %v1595_v5, %v1603_v6  ;;  %v1610_v10 = vld [vmem:[#allocation7 + $0xcb0] sm:$0xff] }
 0x397   : > { %4983 = vmatprep.subr.bf16.mxu1 %v13176_v12  ;;  %v1618_v12 = vld [vmem:[#allocation7 + $0xcf0] sm:$0xff] }
 0x398   : > { %v1706_v5 = vld [vmem:[#allocation7 + $0xfb0] sm:$0xff] }
 0x399   : > { %4902 = vmatpush1.bf16.msra.mxu0 %v13173_v19  ;;  %v13254_v19 = vcombine.high %v1610_v10, %v1618_v12  ;;  %v1714_v6 = vld [vmem:[#allocation7 + $0xff0] sm:$0xff] }
 0x39a   : > { %4984 = vmatpush1.bf16.msra.mxu1 %v13175_v22  ;;  %4903 = vmatprep.subr.bf16.mxu0 %v13190_v26  ;;  %v13256_v22 = vcombine.high %v1611_v13, %v1619_v14  ;;  %v1626_v26 = vld [vmem:[#allocation7 + $0xd30] sm:$0xff]  ;;  %v13349_v13 = vcombine.low %v1706_v5, %v1714_v6 }
 0x39b   : > { %v4599_v40 = vpop.f32.mrb[12].mxu0  ;;  %4985 = vmatprep.subr.bf16.mxu1 %v13192_v27  ;;  %v1634_v27 = vld [vmem:[#allocation7 + $0xd70] sm:$0xff] }
 0x39c   : > { %v14385_v45 = vadd.f32 %v4599_v40, %v1739_v30  ;;  %v4681_v46 = vpop.f32.mrb[12].mxu1  ;;  %v4601_v47 = vpop.f32.mrb[13].mxu0  ;;  %v13253_v30 = vcombine.low %v1610_v10, %v1618_v12  ;;  %v13270_v33 = vcombine.high %v1626_v26, %v1634_v27  ;;  %v13271_v40 = vcombine.low %v1627_v28, %v1635_v29 }
 0x39d   : > { %v14387_v49 = vadd.f32 %v4681_v46, %v1747_v34  ;;  %v14386_v50 = vadd.f32 %v4601_v47, %v1743_v35  ;;  %v4683_v51 = vpop.f32.mrb[13].mxu1  ;;  %v4603_v23 = vpop.f32.mrb[14].mxu0  ;;  %4904 = vmatpush1.bf16.msra.mxu0 %v13189_v36  ;;  %v13272_v34 = vcombine.high %v1627_v28, %v1635_v29  ;;  %v1642_v35 = vld [vmem:[#allocation7 + $0xdb0] sm:$0xff]  ;;  %v1659_v46 = vld [vmem:[#allocation7 + $0xe38] sm:$0xff]  ;;  %v13350_v10 = vcombine.high %v1706_v5, %v1714_v6 }
 0x39e   : > { %v5020_v17 = vmax.f32 %v14385_v45, 0.0  ;;  %v14388_v53 = vadd.f32 %v4683_v51, %v1751_v37  ;;  %v4685_v57 = vpop.f32.mrb[14].mxu1  ;;  %4986 = vmatpush1.bf16.msra.mxu1 %v13191_v38  ;;  %v4604_v60 = vpop.f32.mrb[15].mxu0  ;;  %4905 = vmatprep.subr.bf16.mxu0 %v13206_v39  ;;  %v1650_v36 = vld [vmem:[#allocation7 + $0xdf0] sm:$0xff]  ;;  %v1643_v37 = vld [vmem:[#allocation7 + $0xdb8] sm:$0xff]  ;;  %v13269_v39 = vcombine.low %v1626_v26, %v1634_v27 }
 0x39f   : > { %v5022_v63 = vmax.f32 %v14387_v49, 0.0  ;;  %v5021_v0 = vmax.f32 %v14386_v50, 0.0  ;;  %v4686_v1 = vpop.f32.mrb[15].mxu1  ;;  %4987 = vmatprep.subr.bf16.mxu1 %v13208_v41  ;;  %v1651_v38 = vld [vmem:[#allocation7 + $0xdf8] sm:$0xff]  ;;  %v13286_v41 = vcombine.high %v1642_v35, %v1650_v36  ;;  %v1666_v45 = vld [vmem:[#allocation7 + $0xe70] sm:$0xff]  ;;  %v13285_v48 = vcombine.low %v1642_v35, %v1650_v36 }
 0x3a0   : > { %5036 = vst [vmem:[#allocation2 + $0x20] sm:$0xff] %v5020_v17  ;;  %v5023_v4 = vmax.f32 %v14388_v53, 0.0  ;;  %v13288_v42 = vcombine.high %v1643_v37, %v1651_v38  ;;  %v1667_v47 = vld [vmem:[#allocation7 + $0xe78] sm:$0xff]  ;;  %v13287_v11 = vcombine.low %v1643_v37, %v1651_v38  ;;  %v13302_v49 = vcombine.high %v1658_v43, %v1666_v45  ;;  %v1674_v51 = vld [vmem:[#allocation7 + $0xeb0] sm:$0xff] }
 0x3a1   : > { %5038 = vst [vmem:[#allocation2 + $0x30] sm:$0xff] %v5022_v63  ;;  %5037 = vst [vmem:[#allocation2 + $0x28] sm:$0xff] %v5021_v0  ;;  %4906 = vmatpush1.bf16.msra.mxu0 %v13205_v52  ;;  %v13304_v50 = vcombine.high %v1659_v46, %v1667_v47  ;;  %v1682_v23 = vld [vmem:[#allocation7 + $0xef0] sm:$0xff]  ;;  %v1675_v52 = vld [vmem:[#allocation7 + $0xeb8] sm:$0xff]  ;;  %v13301_v53 = vcombine.low %v1658_v43, %v1666_v45  ;;  %v13303_v57 = vcombine.low %v1659_v46, %v1667_v47 }
 0x3a2   : > { %5039 = vst [vmem:[#allocation2 + $0x38] sm:$0xff] %v5023_v4  ;;  %4988 = vmatpush1.bf16.msra.mxu1 %v13207_v61  ;;  %4907 = vmatprep.subr.bf16.mxu0 %v13222_v62  ;;  %v1683_v17 = vld [vmem:[#allocation7 + $0xef8] sm:$0xff]  ;;  %v13318_v60 = vcombine.high %v1674_v51, %v1682_v23  ;;  %v1690_v62 = vld [vmem:[#allocation7 + $0xf30] sm:$0xff] }
 0x3a3   : > { %4989 = vmatprep.subr.bf16.mxu1 %v13224_v2  ;;  %v13320_v61 = vcombine.high %v1675_v52, %v1683_v17  ;;  %v1698_v63 = vld [vmem:[#allocation7 + $0xf70] sm:$0xff]  ;;  %v1691_v0 = vld [vmem:[#allocation7 + $0xf38] sm:$0xff]  ;;  %v13317_v2 = vcombine.low %v1674_v51, %v1682_v23  ;;  %v13319_v24 = vcombine.low %v1675_v52, %v1683_v17 }
 0x3a4   : > { %v1699_v1 = vld [vmem:[#allocation7 + $0xf78] sm:$0xff]  ;;  %v13334_v3 = vcombine.high %v1690_v62, %v1698_v63 }
 0x3a5   : > { %4908 = vmatpush1.bf16.msra.mxu0 %v13221_v7  ;;  %v13336_v4 = vcombine.high %v1691_v0, %v1699_v1  ;;  %v1707_v7 = vld [vmem:[#allocation7 + $0xfb8] sm:$0xff] }
 0x3a6   : > { %4990 = vmatpush1.bf16.msra.mxu1 %v13223_v8  ;;  %4909 = vmatprep.subr.bf16.mxu0 %v13238_v31  ;;  %v1715_v8 = vld [vmem:[#allocation7 + $0xff8] sm:$0xff]  ;;  %v13333_v31 = vcombine.low %v1690_v62, %v1698_v63 }
 0x3a7   : > { %4991 = vmatprep.subr.bf16.mxu1 %v13240_v9  ;;  %v13335_v9 = vcombine.low %v1691_v0, %v1699_v1  ;;  %v13352_v12 = vcombine.high %v1707_v7, %v1715_v8  ;;  %v13351_v14 = vcombine.low %v1707_v7, %v1715_v8 }
 0x3a9   : > { %4910 = vmatpush1.bf16.msra.mxu0 %v13237_v16  ;;  %v1717_v16 = vld [vmem:[#allocation8 + $0x8] sm:$0xff] }
 0x3aa   : > { %4992 = vmatpush1.bf16.msra.mxu1 %v13239_v18  ;;  %4911 = vmatprep.subr.bf16.mxu0 %v13254_v19  ;;  %v1755_v18 = vrot.slane %v1717_v16, %v15349_v55  ;;  %v1763_v19 = vrot.slane %v1717_v16, %v15352_v56  ;;  %v1767_v26 = vrot.slane %v1717_v16, %v15358_v59 }
 0x3ab   : > { %4993 = vmatprep.subr.bf16.mxu1 %v13256_v22  ;;  %v1759_v22 = vrot.slane %v1717_v16, %v15355_v58  ;;  %v1771_v58 = vrot.slane %v1717_v16, %v1738_v15  ;;  %v1779_v59 = vrot.slane %v1717_v16, %v1746_v20 }
 0x3ad   : > { %4912 = vmatpush1.bf16.msra.mxu0 %v13253_v30 }
 0x3ae   : > { %4994 = vmatpush1.bf16.msra.mxu1 %v13255_v32  ;;  %4913 = vmatprep.subr.bf16.mxu0 %v13270_v33 }
 0x3af   : > { %4995 = vmatprep.subr.bf16.mxu1 %v13272_v34 }
 0x3b1   : > { %4914 = vmatpush1.bf16.msra.mxu0 %v13269_v39 }
 0x3b2   : > { %4996 = vmatpush1.bf16.msra.mxu1 %v13271_v40  ;;  %4915 = vmatprep.subr.bf16.mxu0 %v13286_v41  ;;  %v1775_v41 = vrot.slane %v1717_v16, %v1742_v21 }
 0x3b3   : > { %4997 = vmatprep.subr.bf16.mxu1 %v13288_v42  ;;  %v1783_v42 = vrot.slane %v1717_v16, %v1750_v25 }
 0x3b5   : > { %4916 = vmatpush1.bf16.msra.mxu0 %v13285_v48 }
 0x3b6   : > { %4998 = vmatpush1.bf16.msra.mxu1 %v13287_v11  ;;  %4917 = vmatprep.subr.bf16.mxu0 %v13302_v49 }
 0x3b7   : > { %4999 = vmatprep.subr.bf16.mxu1 %v13304_v50 }
 0x3b9   : > { %4918 = vmatpush1.bf16.msra.mxu0 %v13301_v53 }
 0x3ba   : > { %5000 = vmatpush1.bf16.msra.mxu1 %v13303_v57  ;;  %4919 = vmatprep.subr.bf16.mxu0 %v13318_v60 }
 0x3bb   : > { %5001 = vmatprep.subr.bf16.mxu1 %v13320_v61 }
 0x3bd   : > { %4920 = vmatpush1.bf16.msra.mxu0 %v13317_v2 }
 0x3be   : > { %5002 = vmatpush1.bf16.msra.mxu1 %v13319_v24  ;;  %4921 = vmatprep.subr.bf16.mxu0 %v13334_v3 }
 0x3bf   : > { %5003 = vmatprep.subr.bf16.mxu1 %v13336_v4 }
 0x3c1   : > { %4922 = vmatpush1.bf16.msra.mxu0 %v13333_v31 }
 0x3c2   : > { %5004 = vmatpush1.bf16.msra.mxu1 %v13335_v9  ;;  %4923 = vmatprep.subr.bf16.mxu0 %v13350_v10 }
 0x3c3   : > { %5005 = vmatprep.subr.bf16.mxu1 %v13352_v12 }
 0x3c5   : > { %4924 = vmatpush1.bf16.msra.mxu0 %v13349_v13 }
 0x3c6   : > { %5006 = vmatpush1.bf16.msra.mxu1 %v13351_v14 }
 0x3c8   : > { %4926 = vmatmul.mubr.bf16.vlgmr.msra.gmra.mrb[20].mxu0 %v15379_v44 }
 0x3c9   : > { %5008 = vmatmul.mubr.bf16.vlgmr.msra.gmra.mrb[20].mxu1 %v15379_v44 }
 0x41b   : > { %v4763_v27 = vpop.f32.mrb[16].mxu0 }
 0x41c   : > { %v14389_v28 = vadd.f32 %v4763_v27, %v1755_v18  ;;  %v4845_v29 = vpop.f32.mrb[16].mxu1  ;;  %v4765_v30 = vpop.f32.mrb[17].mxu0 }
 0x41d   : > { %v14391_v32 = vadd.f32 %v4845_v29, %v1763_v19  ;;  %v14390_v33 = vadd.f32 %v4765_v30, %v1759_v22  ;;  %v4847_v34 = vpop.f32.mrb[17].mxu1  ;;  %v4767_v35 = vpop.f32.mrb[18].mxu0 }
 0x41e   : > { %v5024_v36 = vmax.f32 %v14389_v28, 0.0  ;;  %v14392_v37 = vadd.f32 %v4847_v34, %v1767_v26  ;;  %v4849_v44 = vpop.f32.mrb[18].mxu1  ;;  %v4768_v38 = vpop.f32.mrb[19].mxu0 }
 0x41f   : > { %v5026_v39 = vmax.f32 %v14391_v32, 0.0  ;;  %v5025_v55 = vmax.f32 %v14390_v33, 0.0  ;;  %v4850_v40 = vpop.f32.mrb[19].mxu1 }
 0x420   : > { %5040 = vst [vmem:[#allocation2 + $0x40] sm:$0xff] %v5024_v36  ;;  %v5027_v56 = vmax.f32 %v14392_v37, 0.0 }
 0x421   : > { %5042 = vst [vmem:[#allocation2 + $0x50] sm:$0xff] %v5026_v39  ;;  %5041 = vst [vmem:[#allocation2 + $0x48] sm:$0xff] %v5025_v55 }
 0x422   : > { %5043 = vst [vmem:[#allocation2 + $0x58] sm:$0xff] %v5027_v56 }
 0x49b   : > { %v4927_v43 = vpop.f32.mrb[20].mxu0 }
 0x49c   : > { %v14393_v45 = vadd.f32 %v4927_v43, %v1771_v58  ;;  %v5009_v46 = vpop.f32.mrb[20].mxu1  ;;  %v4929_v47 = vpop.f32.mrb[21].mxu0 }
 0x49d   : > { %v14395_v48 = vadd.f32 %v5009_v46, %v1779_v59  ;;  %v14394_v11 = vadd.f32 %v4929_v47, %v1775_v41  ;;  %v5011_v49 = vpop.f32.mrb[21].mxu1  ;;  %v4931_v50 = vpop.f32.mrb[22].mxu0 }
 0x49e   : > { %v5028_v51 = vmax.f32 %v14393_v45, 0.0  ;;  %v14396_v23 = vadd.f32 %v5011_v49, %v1783_v42  ;;  %v5013_v15 = vpop.f32.mrb[22].mxu1  ;;  %v4932_v52 = vpop.f32.mrb[23].mxu0 }
 0x49f   : > { %v5030_v17 = vmax.f32 %v14395_v48, 0.0  ;;  %v5029_v20 = vmax.f32 %v14394_v11, 0.0  ;;  %v5014_v53 = vpop.f32.mrb[23].mxu1 }
 0x4a0   : > { %5044 = vst [vmem:[#allocation2 + $0x60] sm:$0xff] %v5028_v51  ;;  %v5031_v21 = vmax.f32 %v14396_v23, 0.0 }
 0x4a1   : > { %5046 = vst [vmem:[#allocation2 + $0x70] sm:$0xff] %v5030_v17  ;;  %5045 = vst [vmem:[#allocation2 + $0x68] sm:$0xff] %v5029_v20 }
 0x4a2   : > { %5047 = vst [vmem:[#allocation2 + $0x78] sm:$0xff] %v5031_v21 }
 0x4a3 PF: > { %v5080_v54 = vld [vmem:[%s15311_s10] sm:$0xff]  ;;  %v5081_v57 = vld [vmem:[%s15311_s10 + $0x8] sm:$0xff]  ;;  %v5049_v11 = vld [vmem:[#allocation2 + $0x8] sm:$0xff] }
 0x4a4   : > { %v5084_v25 = vld [vmem:[%s15311_s10 + $0x20] sm:$0xff]  ;;  %v5085_v61 = vld [vmem:[%s15311_s10 + $0x28] sm:$0xff]  ;;  %v15475_v23 = vpack.c.bf16 %v5049_v11, %v5049_v11 }
 0x4a5   : > { %v13354_v60 = vcombine.high %v5080_v54, %v5084_v25  ;;  %v13353_v62 = vcombine.low %v5080_v54, %v5084_v25  ;;  %v5088_v63 = vld [vmem:[%s15311_s10 + $0x40] sm:$0xff]  ;;  %v13356_v1 = vcombine.high %v5081_v57, %v5085_v61  ;;  %v13355_v2 = vcombine.low %v5081_v57, %v5085_v61  ;;  %v5089_v3 = vld [vmem:[%s15311_s10 + $0x48] sm:$0xff] }
 0x4a6   : > { %v5092_v0 = vld [vmem:[%s15311_s10 + $0x60] sm:$0xff]  ;;  %v5093_v4 = vld [vmem:[%s15311_s10 + $0x68] sm:$0xff]  ;;  %11298 = vmatprep.mubr.bf16.mxu0 %v15475_v23  ;;  %11626 = vmatprep.mubr.bf16.mxu1 %v15475_v23 }
 0x4a7   : > { %v13362_v24 = vcombine.high %v5088_v63, %v5092_v0  ;;  %v5096_v5 = vld [vmem:[%s15311_s10 + $0x80] sm:$0xff]  ;;  %11266 = vmatprep.subr.bf16.mxu0 %v13354_v60  ;;  %v13364_v6 = vcombine.high %v5089_v3, %v5093_v4  ;;  %v5097_v8 = vld [vmem:[%s15311_s10 + $0x88] sm:$0xff]  ;;  %11594 = vmatprep.subr.bf16.mxu1 %v13356_v1  ;;  %v13361_v9 = vcombine.low %v5088_v63, %v5092_v0 }
 0x4a8   : > { %v5100_v7 = vld [vmem:[%s15311_s10 + $0xa0] sm:$0xff]  ;;  %v5101_v31 = vld [vmem:[%s15311_s10 + $0xa8] sm:$0xff]  ;;  %11267 = vmatpush1.bf16.msra.mxu0 %v13353_v62  ;;  %11595 = vmatpush1.bf16.msra.mxu1 %v13355_v2  ;;  %v13363_v10 = vcombine.low %v5089_v3, %v5093_v4 }
 0x4a9   : > { %11268 = vmatprep.subr.bf16.mxu0 %v13362_v24  ;;  %v13370_v12 = vcombine.high %v5096_v5, %v5100_v7  ;;  %11596 = vmatprep.subr.bf16.mxu1 %v13364_v6  ;;  %v13372_v13 = vcombine.high %v5097_v8, %v5101_v31  ;;  %v5104_v14 = vld [vmem:[%s15311_s10 + $0xc0] sm:$0xff]  ;;  %v5105_v18 = vld [vmem:[%s15311_s10 + $0xc8] sm:$0xff]  ;;  %v13369_v22 = vcombine.low %v5096_v5, %v5100_v7 }
 0x4aa   : > { %v5108_v16 = vld [vmem:[%s15311_s10 + $0xe0] sm:$0xff]  ;;  %v5109_v19 = vld [vmem:[%s15311_s10 + $0xe8] sm:$0xff]  ;;  %v13371_v26 = vcombine.low %v5097_v8, %v5101_v31 }
 0x4ab   : > { %v13378_v27 = vcombine.high %v5104_v14, %v5108_v16  ;;  %v13380_v28 = vcombine.high %v5105_v18, %v5109_v19  ;;  %v5112_v29 = vld [vmem:[%s15311_s10 + $0x100] sm:$0xff]  ;;  %v5113_v32 = vld [vmem:[%s15311_s10 + $0x108] sm:$0xff]  ;;  %v13377_v34 = vcombine.low %v5104_v14, %v5108_v16  ;;  %v13379_v35 = vcombine.low %v5105_v18, %v5109_v19 }
 0x4ac   : > { %11269 = vmatpush1.bf16.msra.mxu0 %v13361_v9  ;;  %11597 = vmatpush1.bf16.msra.mxu1 %v13363_v10  ;;  %v5116_v30 = vld [vmem:[%s15311_s10 + $0x120] sm:$0xff]  ;;  %v5117_v33 = vld [vmem:[%s15311_s10 + $0x128] sm:$0xff] }
 0x4ad   : > { %11270 = vmatprep.subr.bf16.mxu0 %v13370_v12  ;;  %11598 = vmatprep.subr.bf16.mxu1 %v13372_v13  ;;  %v13386_v36 = vcombine.high %v5112_v29, %v5116_v30  ;;  %v13388_v37 = vcombine.high %v5113_v32, %v5117_v33  ;;  %v5120_v44 = vld [vmem:[%s15311_s10 + $0x140] sm:$0xff]  ;;  %v5121_v39 = vld [vmem:[%s15311_s10 + $0x148] sm:$0xff]  ;;  %v13385_v40 = vcombine.low %v5112_v29, %v5116_v30 }
 0x4ae   : > { %v5124_v38 = vld [vmem:[%s15311_s10 + $0x160] sm:$0xff]  ;;  %v5125_v55 = vld [vmem:[%s15311_s10 + $0x168] sm:$0xff]  ;;  %v13387_v56 = vcombine.low %v5113_v32, %v5117_v33 }
 0x4af   : > { %v13394_v58 = vcombine.high %v5120_v44, %v5124_v38  ;;  %v13396_v59 = vcombine.high %v5121_v39, %v5125_v55  ;;  %v5128_v41 = vld [vmem:[%s15311_s10 + $0x180] sm:$0xff]  ;;  %v5129_v43 = vld [vmem:[%s15311_s10 + $0x188] sm:$0xff]  ;;  %v13393_v46 = vcombine.low %v5120_v44, %v5124_v38  ;;  %v13395_v47 = vcombine.low %v5121_v39, %v5125_v55 }
 0x4b0   : > { %11271 = vmatpush1.bf16.msra.mxu0 %v13369_v22  ;;  %11599 = vmatpush1.bf16.msra.mxu1 %v13371_v26  ;;  %v5132_v42 = vld [vmem:[%s15311_s10 + $0x1a0] sm:$0xff]  ;;  %v5133_v45 = vld [vmem:[%s15311_s10 + $0x1a8] sm:$0xff] }
 0x4b1   : > { %11272 = vmatprep.subr.bf16.mxu0 %v13378_v27  ;;  %11600 = vmatprep.subr.bf16.mxu1 %v13380_v28  ;;  %v13402_v48 = vcombine.high %v5128_v41, %v5132_v42  ;;  %v13404_v49 = vcombine.high %v5129_v43, %v5133_v45  ;;  %v5136_v50 = vld [vmem:[%s15311_s10 + $0x1c0] sm:$0xff]  ;;  %v5137_v15 = vld [vmem:[%s15311_s10 + $0x1c8] sm:$0xff]  ;;  %v13401_v17 = vcombine.low %v5128_v41, %v5132_v42 }
 0x4b2   : > { %v5140_v51 = vld [vmem:[%s15311_s10 + $0x1e0] sm:$0xff]  ;;  %v5141_v52 = vld [vmem:[%s15311_s10 + $0x1e8] sm:$0xff]  ;;  %v13403_v20 = vcombine.low %v5129_v43, %v5133_v45 }
 0x4b3   : > { %v13410_v53 = vcombine.high %v5136_v50, %v5140_v51  ;;  %v13412_v21 = vcombine.high %v5137_v15, %v5141_v52  ;;  %v5144_v54 = vld [vmem:[%s15311_s10 + $0x200] sm:$0xff]  ;;  %v5145_v57 = vld [vmem:[%s15311_s10 + $0x208] sm:$0xff]  ;;  %v13409_v61 = vcombine.low %v5136_v50, %v5140_v51  ;;  %v13411_v62 = vcombine.low %v5137_v15, %v5141_v52 }
 0x4b4   : > { %11273 = vmatpush1.bf16.msra.mxu0 %v13377_v34  ;;  %11601 = vmatpush1.bf16.msra.mxu1 %v13379_v35  ;;  %v5148_v25 = vld [vmem:[%s15311_s10 + $0x220] sm:$0xff]  ;;  %v5149_v60 = vld [vmem:[%s15311_s10 + $0x228] sm:$0xff] }
 0x4b5   : > { %11274 = vmatprep.subr.bf16.mxu0 %v13386_v36  ;;  %11602 = vmatprep.subr.bf16.mxu1 %v13388_v37  ;;  %v13418_v63 = vcombine.high %v5144_v54, %v5148_v25  ;;  %v13420_v0 = vcombine.high %v5145_v57, %v5149_v60  ;;  %v5152_v1 = vld [vmem:[%s15311_s10 + $0x240] sm:$0xff]  ;;  %v5153_v24 = vld [vmem:[%s15311_s10 + $0x248] sm:$0xff]  ;;  %v13417_v4 = vcombine.low %v5144_v54, %v5148_v25 }
 0x4b6   : > { %v5156_v2 = vld [vmem:[%s15311_s10 + $0x260] sm:$0xff]  ;;  %v5157_v3 = vld [vmem:[%s15311_s10 + $0x268] sm:$0xff]  ;;  %v13419_v5 = vcombine.low %v5145_v57, %v5149_v60 }
 0x4b7   : > { %v13426_v6 = vcombine.high %v5152_v1, %v5156_v2  ;;  %v13428_v7 = vcombine.high %v5153_v24, %v5157_v3  ;;  %v5160_v8 = vld [vmem:[%s15311_s10 + $0x280] sm:$0xff]  ;;  %v5161_v9 = vld [vmem:[%s15311_s10 + $0x288] sm:$0xff]  ;;  %v13425_v12 = vcombine.low %v5152_v1, %v5156_v2  ;;  %v13427_v13 = vcombine.low %v5153_v24, %v5157_v3 }
 0x4b8   : > { %11275 = vmatpush1.bf16.msra.mxu0 %v13385_v40  ;;  %11603 = vmatpush1.bf16.msra.mxu1 %v13387_v56  ;;  %v5164_v31 = vld [vmem:[%s15311_s10 + $0x2a0] sm:$0xff]  ;;  %v5165_v10 = vld [vmem:[%s15311_s10 + $0x2a8] sm:$0xff] }
 0x4b9   : > { %11276 = vmatprep.subr.bf16.mxu0 %v13394_v58  ;;  %11604 = vmatprep.subr.bf16.mxu1 %v13396_v59  ;;  %v13434_v14 = vcombine.high %v5160_v8, %v5164_v31  ;;  %v13436_v16 = vcombine.high %v5161_v9, %v5165_v10  ;;  %v5168_v18 = vld [vmem:[%s15311_s10 + $0x2c0] sm:$0xff]  ;;  %v5169_v22 = vld [vmem:[%s15311_s10 + $0x2c8] sm:$0xff]  ;;  %v13433_v27 = vcombine.low %v5160_v8, %v5164_v31 }
 0x4ba   : > { %v5172_v19 = vld [vmem:[%s15311_s10 + $0x2e0] sm:$0xff]  ;;  %v5173_v26 = vld [vmem:[%s15311_s10 + $0x2e8] sm:$0xff]  ;;  %v13435_v28 = vcombine.low %v5161_v9, %v5165_v10 }
 0x4bb   : > { %v13442_v29 = vcombine.high %v5168_v18, %v5172_v19  ;;  %v13444_v30 = vcombine.high %v5169_v22, %v5173_v26  ;;  %v5176_v32 = vld [vmem:[%s15311_s10 + $0x300] sm:$0xff]  ;;  %v5177_v34 = vld [vmem:[%s15311_s10 + $0x308] sm:$0xff]  ;;  %v13441_v36 = vcombine.low %v5168_v18, %v5172_v19  ;;  %v13443_v37 = vcombine.low %v5169_v22, %v5173_v26 }
 0x4bc   : > { %11277 = vmatpush1.bf16.msra.mxu0 %v13393_v46  ;;  %11605 = vmatpush1.bf16.msra.mxu1 %v13395_v47  ;;  %v5180_v33 = vld [vmem:[%s15311_s10 + $0x320] sm:$0xff]  ;;  %v5181_v35 = vld [vmem:[%s15311_s10 + $0x328] sm:$0xff] }
 0x4bd   : > { %11278 = vmatprep.subr.bf16.mxu0 %v13402_v48  ;;  %11606 = vmatprep.subr.bf16.mxu1 %v13404_v49  ;;  %v13450_v44 = vcombine.high %v5176_v32, %v5180_v33  ;;  %v13452_v38 = vcombine.high %v5177_v34, %v5181_v35  ;;  %v5184_v39 = vld [vmem:[%s15311_s10 + $0x340] sm:$0xff]  ;;  %v5185_v40 = vld [vmem:[%s15311_s10 + $0x348] sm:$0xff]  ;;  %v13449_v58 = vcombine.low %v5176_v32, %v5180_v33 }
 0x4be   : > { %v5188_v55 = vld [vmem:[%s15311_s10 + $0x360] sm:$0xff]  ;;  %v5189_v56 = vld [vmem:[%s15311_s10 + $0x368] sm:$0xff]  ;;  %v13451_v59 = vcombine.low %v5177_v34, %v5181_v35 }
 0x4bf   : > { %v13458_v41 = vcombine.high %v5184_v39, %v5188_v55  ;;  %v13460_v42 = vcombine.high %v5185_v40, %v5189_v56  ;;  %v5192_v43 = vld [vmem:[%s15311_s10 + $0x380] sm:$0xff]  ;;  %v5193_v46 = vld [vmem:[%s15311_s10 + $0x388] sm:$0xff]  ;;  %v13457_v48 = vcombine.low %v5184_v39, %v5188_v55  ;;  %v13459_v11 = vcombine.low %v5185_v40, %v5189_v56 }
 0x4c0   : > { %11279 = vmatpush1.bf16.msra.mxu0 %v13401_v17  ;;  %11607 = vmatpush1.bf16.msra.mxu1 %v13403_v20  ;;  %v5196_v45 = vld [vmem:[%s15311_s10 + $0x3a0] sm:$0xff]  ;;  %v5197_v47 = vld [vmem:[%s15311_s10 + $0x3a8] sm:$0xff] }
 0x4c1   : > { %11280 = vmatprep.subr.bf16.mxu0 %v13410_v53  ;;  %11608 = vmatprep.subr.bf16.mxu1 %v13412_v21  ;;  %v13466_v49 = vcombine.high %v5192_v43, %v5196_v45  ;;  %v13468_v50 = vcombine.high %v5193_v46, %v5197_v47  ;;  %v5200_v51 = vld [vmem:[%s15311_s10 + $0x3c0] sm:$0xff]  ;;  %v5201_v52 = vld [vmem:[%s15311_s10 + $0x3c8] sm:$0xff]  ;;  %v13465_v20 = vcombine.low %v5192_v43, %v5196_v45 }
 0x4c2   : > { %v5204_v15 = vld [vmem:[%s15311_s10 + $0x3e0] sm:$0xff]  ;;  %v5205_v17 = vld [vmem:[%s15311_s10 + $0x3e8] sm:$0xff]  ;;  %v13467_v53 = vcombine.low %v5193_v46, %v5197_v47 }
 0x4c3   : > { %v13474_v21 = vcombine.high %v5200_v51, %v5204_v15  ;;  %v13476_v54 = vcombine.high %v5201_v52, %v5205_v17  ;;  %v5208_v25 = vld [vmem:[%s15311_s10 + $0x400] sm:$0xff]  ;;  %v5209_v60 = vld [vmem:[%s15311_s10 + $0x408] sm:$0xff] }
 0x4c4   : > { %11281 = vmatpush1.bf16.msra.mxu0 %v13409_v61  ;;  %11609 = vmatpush1.bf16.msra.mxu1 %v13411_v62  ;;  %v5212_v57 = vld [vmem:[%s15311_s10 + $0x420] sm:$0xff]  ;;  %v5213_v61 = vld [vmem:[%s15311_s10 + $0x428] sm:$0xff]  ;;  %v13473_v62 = vcombine.low %v5200_v51, %v5204_v15 }
 0x4c5   : > { %11282 = vmatprep.subr.bf16.mxu0 %v13418_v63  ;;  %11610 = vmatprep.subr.bf16.mxu1 %v13420_v0  ;;  %v5048_v63 = vld [vmem:[#allocation2] sm:$0xff]  ;;  %v13475_v0 = vcombine.low %v5201_v52, %v5205_v17  ;;  %v13482_v1 = vcombine.high %v5208_v25, %v5212_v57  ;;  %v13484_v2 = vcombine.high %v5209_v60, %v5213_v61  ;;  %v5216_v24 = vld [vmem:[%s15311_s10 + $0x440] sm:$0xff] }
 0x4c6   : > { %v5220_v3 = vld [vmem:[%s15311_s10 + $0x460] sm:$0xff]  ;;  %v13481_v8 = vcombine.low %v5208_v25, %v5212_v57  ;;  %v13483_v31 = vcombine.low %v5209_v60, %v5213_v61  ;;  %v5229_v18 = vld [vmem:[%s15311_s10 + $0x4a8] sm:$0xff] }
 0x4c7   : > { %v13490_v9 = vcombine.high %v5216_v24, %v5220_v3  ;;  %v13489_v19 = vcombine.low %v5216_v24, %v5220_v3  ;;  %v5237_v32 = vld [vmem:[%s15311_s10 + $0x4e8] sm:$0xff] }
 0x4c8   : > { %11283 = vmatpush1.bf16.msra.mxu0 %v13417_v4  ;;  %11611 = vmatpush1.bf16.msra.mxu1 %v13419_v5  ;;  %v15519_v4 = vpack.c.bf16 %v5048_v63, %v5048_v63  ;;  %v5217_v5 = vld [vmem:[%s15311_s10 + $0x448] sm:$0xff]  ;;  %v5272_v63 = vld [vmem:[%s15311_s10 + $0x600] sm:$0xff] }
 0x4c9   : > { %11284 = vmatprep.subr.bf16.mxu0 %v13426_v6  ;;  %11612 = vmatprep.subr.bf16.mxu1 %v13428_v7  ;;  %v5221_v6 = vld [vmem:[%s15311_s10 + $0x468] sm:$0xff] }
 0x4ca   : > { %v5051_v7 = vld [vmem:[#allocation2 + $0x18] sm:$0xff]  ;;  %v13492_v10 = vcombine.high %v5217_v5, %v5221_v6  ;;  %v13491_v22 = vcombine.low %v5217_v5, %v5221_v6 }
 0x4cb   : > { %v5245_v39 = vld [vmem:[%s15311_s10 + $0x528] sm:$0xff] }
 0x4cc   : > { %11285 = vmatpush1.bf16.msra.mxu0 %v13425_v12  ;;  %11613 = vmatpush1.bf16.msra.mxu1 %v13427_v13  ;;  %v5224_v12 = vld [vmem:[%s15311_s10 + $0x480] sm:$0xff]  ;;  %v5253_v43 = vld [vmem:[%s15311_s10 + $0x568] sm:$0xff] }
 0x4cd   : > { %11286 = vmatprep.subr.bf16.mxu0 %v13434_v14  ;;  %11614 = vmatprep.subr.bf16.mxu1 %v13436_v16  ;;  %v5228_v13 = vld [vmem:[%s15311_s10 + $0x4a0] sm:$0xff]  ;;  %v15525_v14 = vpack.c.bf16 %v5051_v7, %v5051_v7  ;;  %v5225_v16 = vld [vmem:[%s15311_s10 + $0x488] sm:$0xff] }
 0x4ce   : > { %v13498_v26 = vcombine.high %v5224_v12, %v5228_v13  ;;  %v13497_v33 = vcombine.low %v5224_v12, %v5228_v13  ;;  %v13499_v34 = vcombine.low %v5225_v16, %v5229_v18  ;;  %v5261_v51 = vld [vmem:[%s15311_s10 + $0x5a8] sm:$0xff]  ;;  %v5280_v7 = vld [vmem:[%s15311_s10 + $0x640] sm:$0xff] }
 0x4cf   : > { %v5269_v25 = vld [vmem:[%s15311_s10 + $0x5e8] sm:$0xff] }
 0x4d0   : > { %11287 = vmatpush1.bf16.msra.mxu0 %v13433_v27  ;;  %11615 = vmatpush1.bf16.msra.mxu1 %v13435_v28  ;;  %v13500_v27 = vcombine.high %v5225_v16, %v5229_v18  ;;  %v5232_v28 = vld [vmem:[%s15311_s10 + $0x4c0] sm:$0xff] }
 0x4d1   : > { %11288 = vmatprep.subr.bf16.mxu0 %v13442_v29  ;;  %11616 = vmatprep.subr.bf16.mxu1 %v13444_v30  ;;  %v5236_v29 = vld [vmem:[%s15311_s10 + $0x4e0] sm:$0xff]  ;;  %v5233_v30 = vld [vmem:[%s15311_s10 + $0x4c8] sm:$0xff] }
 0x4d2   : > { %v13506_v35 = vcombine.high %v5232_v28, %v5236_v29  ;;  %v13505_v55 = vcombine.low %v5232_v28, %v5236_v29  ;;  %v13507_v40 = vcombine.low %v5233_v30, %v5237_v32  ;;  %v5288_v18 = vld [vmem:[%s15311_s10 + $0x680] sm:$0xff] }
 0x4d4   : > { %11289 = vmatpush1.bf16.msra.mxu0 %v13441_v36  ;;  %11617 = vmatpush1.bf16.msra.mxu1 %v13443_v37  ;;  %v13508_v36 = vcombine.high %v5233_v30, %v5237_v32  ;;  %v5240_v37 = vld [vmem:[%s15311_s10 + $0x500] sm:$0xff] }
 0x4d5   : > { %11290 = vmatprep.subr.bf16.mxu0 %v13450_v44  ;;  %11618 = vmatprep.subr.bf16.mxu1 %v13452_v38  ;;  %v5244_v44 = vld [vmem:[%s15311_s10 + $0x520] sm:$0xff]  ;;  %v5241_v38 = vld [vmem:[%s15311_s10 + $0x508] sm:$0xff] }
 0x4d6   : > { %v13514_v56 = vcombine.high %v5240_v37, %v5244_v44  ;;  %v13513_v45 = vcombine.low %v5240_v37, %v5244_v44  ;;  %v13515_v46 = vcombine.low %v5241_v38, %v5245_v39  ;;  %v5296_v32 = vld [vmem:[%s15311_s10 + $0x6c0] sm:$0xff] }
 0x4d8   : > { %11291 = vmatpush1.bf16.msra.mxu0 %v13449_v58  ;;  %11619 = vmatpush1.bf16.msra.mxu1 %v13451_v59  ;;  %v13516_v58 = vcombine.high %v5241_v38, %v5245_v39  ;;  %v5248_v59 = vld [vmem:[%s15311_s10 + $0x540] sm:$0xff] }
 0x4d9   : > { %11292 = vmatprep.subr.bf16.mxu0 %v13458_v41  ;;  %11620 = vmatprep.subr.bf16.mxu1 %v13460_v42  ;;  %v5252_v41 = vld [vmem:[%s15311_s10 + $0x560] sm:$0xff]  ;;  %v5249_v42 = vld [vmem:[%s15311_s10 + $0x548] sm:$0xff] }
 0x4da   : > { %v13522_v47 = vcombine.high %v5248_v59, %v5252_v41  ;;  %v13521_v15 = vcombine.low %v5248_v59, %v5252_v41  ;;  %v13523_v52 = vcombine.low %v5249_v42, %v5253_v43  ;;  %v5304_v39 = vld [vmem:[%s15311_s10 + $0x700] sm:$0xff] }
 0x4dc   : > { %11293 = vmatpush1.bf16.msra.mxu0 %v13457_v48  ;;  %11621 = vmatpush1.bf16.msra.mxu1 %v13459_v11  ;;  %v13524_v48 = vcombine.high %v5249_v42, %v5253_v43  ;;  %v5256_v11 = vld [vmem:[%s15311_s10 + $0x580] sm:$0xff] }
 0x4dd   : > { %11294 = vmatprep.subr.bf16.mxu0 %v13466_v49  ;;  %11622 = vmatprep.subr.bf16.mxu1 %v13468_v50  ;;  %v5260_v49 = vld [vmem:[%s15311_s10 + $0x5a0] sm:$0xff]  ;;  %v5257_v50 = vld [vmem:[%s15311_s10 + $0x588] sm:$0xff] }
 0x4de   : > { %v13530_v17 = vcombine.high %v5256_v11, %v5260_v49  ;;  %v13529_v57 = vcombine.low %v5256_v11, %v5260_v49  ;;  %v13531_v60 = vcombine.low %v5257_v50, %v5261_v51  ;;  %v5312_v43 = vld [vmem:[%s15311_s10 + $0x740] sm:$0xff] }
 0x4e0   : > { %11295 = vmatpush1.bf16.msra.mxu0 %v13465_v20  ;;  %11623 = vmatpush1.bf16.msra.mxu1 %v13467_v53  ;;  %v13532_v20 = vcombine.high %v5257_v50, %v5261_v51  ;;  %v5264_v53 = vld [vmem:[%s15311_s10 + $0x5c0] sm:$0xff] }
 0x4e1   : > { %11296 = vmatprep.subr.bf16.mxu0 %v13474_v21  ;;  %11624 = vmatprep.subr.bf16.mxu1 %v13476_v54  ;;  %v5268_v21 = vld [vmem:[%s15311_s10 + $0x5e0] sm:$0xff]  ;;  %v5265_v54 = vld [vmem:[%s15311_s10 + $0x5c8] sm:$0xff] }
 0x4e2   : > { %v13538_v61 = vcombine.high %v5264_v53, %v5268_v21  ;;  %v13537_v24 = vcombine.low %v5264_v53, %v5268_v21  ;;  %v13539_v3 = vcombine.low %v5265_v54, %v5269_v25  ;;  %v5320_v51 = vld [vmem:[%s15311_s10 + $0x780] sm:$0xff] }
 0x4e4   : > { %11297 = vmatpush1.bf16.msra.mxu0 %v13473_v62  ;;  %11625 = vmatpush1.bf16.msra.mxu1 %v13475_v0  ;;  %v13540_v62 = vcombine.high %v5265_v54, %v5269_v25  ;;  %v5276_v0 = vld [vmem:[%s15311_s10 + $0x620] sm:$0xff] }
 0x4e5   : > { %11307 = vmatprep.subr.bf16.mxu0 %v13482_v1  ;;  %11635 = vmatprep.subr.bf16.mxu1 %v13484_v2  ;;  %v5273_v1 = vld [vmem:[%s15311_s10 + $0x608] sm:$0xff]  ;;  %v13546_v5 = vcombine.high %v5272_v63, %v5276_v0  ;;  %v5328_v25 = vld [vmem:[%s15311_s10 + $0x7c0] sm:$0xff] }
 0x4e6   : > { %v5277_v2 = vld [vmem:[%s15311_s10 + $0x628] sm:$0xff] }
 0x4e7   : > { %11299 = vmatmul.mubr.bf16.vlgmr.msra.gmra.mrb[0].mxu0 %v15519_v4  ;;  %11627 = vmatmul.mubr.bf16.vlgmr.msra.gmra.mrb[0].mxu1 %v15519_v4  ;;  %v13548_v6 = vcombine.high %v5273_v1, %v5277_v2  ;;  %v13547_v12 = vcombine.low %v5273_v1, %v5277_v2  ;;  %v5336_v2 = vld [vmem:[%s15311_s10 + $0x800] sm:$0xff] }
 0x4e8   : > { %11308 = vmatpush1.bf16.msra.mxu0 %v13481_v8  ;;  %11636 = vmatpush1.bf16.msra.mxu1 %v13483_v31  ;;  %v5284_v8 = vld [vmem:[%s15311_s10 + $0x660] sm:$0xff]  ;;  %v5281_v31 = vld [vmem:[%s15311_s10 + $0x648] sm:$0xff] }
 0x4e9   : > { %11309 = vmatprep.subr.bf16.mxu0 %v13490_v9  ;;  %11637 = vmatprep.subr.bf16.mxu1 %v13492_v10  ;;  %v5285_v9 = vld [vmem:[%s15311_s10 + $0x668] sm:$0xff]  ;;  %v13545_v10 = vcombine.low %v5272_v63, %v5276_v0  ;;  %v13554_v13 = vcombine.high %v5280_v7, %v5284_v8 }
 0x4ea   : > { %11339 = vmatprep.mubr.bf16.mxu0 %v15525_v14  ;;  %11667 = vmatprep.mubr.bf16.mxu1 %v15525_v14  ;;  %v13556_v16 = vcombine.high %v5281_v31, %v5285_v9  ;;  %v13555_v28 = vcombine.low %v5281_v31, %v5285_v9 }
 0x4ec   : > { %11310 = vmatpush1.bf16.msra.mxu0 %v13489_v19  ;;  %11638 = vmatpush1.bf16.msra.mxu1 %v13491_v22  ;;  %v5292_v19 = vld [vmem:[%s15311_s10 + $0x6a0] sm:$0xff]  ;;  %v5289_v22 = vld [vmem:[%s15311_s10 + $0x688] sm:$0xff] }
 0x4ed   : > { %11311 = vmatprep.subr.bf16.mxu0 %v13498_v26  ;;  %11639 = vmatprep.subr.bf16.mxu1 %v13500_v27  ;;  %v5293_v26 = vld [vmem:[%s15311_s10 + $0x6a8] sm:$0xff]  ;;  %v13553_v27 = vcombine.low %v5280_v7, %v5284_v8  ;;  %v13562_v29 = vcombine.high %v5288_v18, %v5292_v19  ;;  %v5050_v7 = vld [vmem:[#allocation2 + $0x10] sm:$0xff] }
 0x4ee   : > { %v13564_v30 = vcombine.high %v5289_v22, %v5293_v26  ;;  %v13563_v37 = vcombine.low %v5289_v22, %v5293_v26 }
 0x4f0   : > { %11312 = vmatpush1.bf16.msra.mxu0 %v13497_v33  ;;  %11640 = vmatpush1.bf16.msra.mxu1 %v13499_v34  ;;  %v5300_v33 = vld [vmem:[%s15311_s10 + $0x6e0] sm:$0xff]  ;;  %v5297_v34 = vld [vmem:[%s15311_s10 + $0x6c8] sm:$0xff] }
 0x4f1   : > { %11313 = vmatprep.subr.bf16.mxu0 %v13506_v35  ;;  %11641 = vmatprep.subr.bf16.mxu1 %v13508_v36  ;;  %v5301_v35 = vld [vmem:[%s15311_s10 + $0x6e8] sm:$0xff]  ;;  %v13561_v36 = vcombine.low %v5288_v18, %v5292_v19  ;;  %v13570_v44 = vcombine.high %v5296_v32, %v5300_v33  ;;  %v5053_v19 = vld [vmem:[#allocation2 + $0x28] sm:$0xff] }
 0x4f2   : > { %v13572_v38 = vcombine.high %v5297_v34, %v5301_v35  ;;  %v13571_v59 = vcombine.low %v5297_v34, %v5301_v35  ;;  %v5349_v18 = vld [vmem:[%s15311_s10 + $0x868] sm:$0xff] }
 0x4f3   : > { %v5357_v34 = vld [vmem:[%s15311_s10 + $0x8a8] sm:$0xff] }
 0x4f4   : > { %11314 = vmatpush1.bf16.msra.mxu0 %v13505_v55  ;;  %11642 = vmatpush1.bf16.msra.mxu1 %v13507_v40  ;;  %v5308_v55 = vld [vmem:[%s15311_s10 + $0x720] sm:$0xff]  ;;  %v5305_v40 = vld [vmem:[%s15311_s10 + $0x708] sm:$0xff] }
 0x4f5   : > { %11315 = vmatprep.subr.bf16.mxu0 %v13514_v56  ;;  %11643 = vmatprep.subr.bf16.mxu1 %v13516_v58  ;;  %v5309_v56 = vld [vmem:[%s15311_s10 + $0x728] sm:$0xff]  ;;  %v13569_v58 = vcombine.low %v5296_v32, %v5300_v33  ;;  %v13578_v41 = vcombine.high %v5304_v39, %v5308_v55  ;;  %v15597_v32 = vpack.c.bf16 %v5053_v19, %v5053_v19 }
 0x4f6   : > { %v13580_v42 = vcombine.high %v5305_v40, %v5309_v56  ;;  %v13579_v11 = vcombine.low %v5305_v40, %v5309_v56  ;;  %v5353_v33 = vld [vmem:[%s15311_s10 + $0x888] sm:$0xff] }
 0x4f7   : > { %v5365_v40 = vld [vmem:[%s15311_s10 + $0x8e8] sm:$0xff] }
 0x4f8   : > { %11316 = vmatpush1.bf16.msra.mxu0 %v13513_v45  ;;  %11644 = vmatpush1.bf16.msra.mxu1 %v13515_v46  ;;  %v5316_v45 = vld [vmem:[%s15311_s10 + $0x760] sm:$0xff]  ;;  %v5313_v46 = vld [vmem:[%s15311_s10 + $0x748] sm:$0xff] }
 0x4f9   : > { %11317 = vmatprep.subr.bf16.mxu0 %v13522_v47  ;;  %11645 = vmatprep.subr.bf16.mxu1 %v13524_v48  ;;  %v5317_v47 = vld [vmem:[%s15311_s10 + $0x768] sm:$0xff]  ;;  %v13577_v48 = vcombine.low %v5304_v39, %v5308_v55  ;;  %v13586_v49 = vcombine.high %v5312_v43, %v5316_v45  ;;  %v5364_v39 = vld [vmem:[%s15311_s10 + $0x8e0] sm:$0xff] }
 0x4fa   : > { %v13588_v50 = vcombine.high %v5313_v46, %v5317_v47  ;;  %v13587_v53 = vcombine.low %v5313_v46, %v5317_v47  ;;  %v5361_v55 = vld [vmem:[%s15311_s10 + $0x8c8] sm:$0xff] }
 0x4fb   : > { %v5373_v46 = vld [vmem:[%s15311_s10 + $0x928] sm:$0xff] }
 0x4fc   : > { %11318 = vmatpush1.bf16.msra.mxu0 %v13521_v15  ;;  %11646 = vmatpush1.bf16.msra.mxu1 %v13523_v52  ;;  %v5324_v15 = vld [vmem:[%s15311_s10 + $0x7a0] sm:$0xff]  ;;  %v5321_v52 = vld [vmem:[%s15311_s10 + $0x788] sm:$0xff] }
 0x4fd   : > { %11319 = vmatprep.subr.bf16.mxu0 %v13530_v17  ;;  %11647 = vmatprep.subr.bf16.mxu1 %v13532_v20  ;;  %v5325_v17 = vld [vmem:[%s15311_s10 + $0x7a8] sm:$0xff]  ;;  %v13585_v20 = vcombine.low %v5312_v43, %v5316_v45  ;;  %v13594_v21 = vcombine.high %v5320_v51, %v5324_v15  ;;  %v5372_v43 = vld [vmem:[%s15311_s10 + $0x920] sm:$0xff] }
 0x4fe   : > { %v13596_v54 = vcombine.high %v5321_v52, %v5325_v17  ;;  %v13595_v63 = vcombine.low %v5321_v52, %v5325_v17  ;;  %v5369_v45 = vld [vmem:[%s15311_s10 + $0x908] sm:$0xff] }
 0x4ff   : > { %v5381_v52 = vld [vmem:[%s15311_s10 + $0x968] sm:$0xff] }
 0x500   : > { %11320 = vmatpush1.bf16.msra.mxu0 %v13529_v57  ;;  %11648 = vmatpush1.bf16.msra.mxu1 %v13531_v60  ;;  %v5332_v57 = vld [vmem:[%s15311_s10 + $0x7e0] sm:$0xff]  ;;  %v5329_v60 = vld [vmem:[%s15311_s10 + $0x7c8] sm:$0xff] }
 0x501   : > { %11321 = vmatprep.subr.bf16.mxu0 %v13538_v61  ;;  %11649 = vmatprep.subr.bf16.mxu1 %v13540_v62  ;;  %v5333_v61 = vld [vmem:[%s15311_s10 + $0x7e8] sm:$0xff]  ;;  %v13593_v62 = vcombine.low %v5320_v51, %v5324_v15  ;;  %v13602_v0 = vcombine.high %v5328_v25, %v5332_v57  ;;  %v5380_v51 = vld [vmem:[%s15311_s10 + $0x960] sm:$0xff] }
 0x502   : > { %v13604_v1 = vcombine.high %v5329_v60, %v5333_v61  ;;  %v13603_v8 = vcombine.low %v5329_v60, %v5333_v61  ;;  %v5377_v15 = vld [vmem:[%s15311_s10 + $0x948] sm:$0xff] }
 0x503   : > { %v5389_v60 = vld [vmem:[%s15311_s10 + $0x9a8] sm:$0xff] }
 0x504   : > { %11322 = vmatpush1.bf16.msra.mxu0 %v13537_v24  ;;  %11650 = vmatpush1.bf16.msra.mxu1 %v13539_v3  ;;  %v5340_v24 = vld [vmem:[%s15311_s10 + $0x820] sm:$0xff]  ;;  %v5337_v3 = vld [vmem:[%s15311_s10 + $0x808] sm:$0xff] }
 0x505   : > { %11323 = vmatprep.subr.bf16.mxu0 %v13546_v5  ;;  %11651 = vmatprep.subr.bf16.mxu1 %v13548_v6  ;;  %v5341_v5 = vld [vmem:[%s15311_s10 + $0x828] sm:$0xff]  ;;  %v13601_v6 = vcombine.low %v5328_v25, %v5332_v57  ;;  %v13610_v31 = vcombine.high %v5336_v2, %v5340_v24  ;;  %v13609_v22 = vcombine.low %v5336_v2, %v5340_v24  ;;  %v5388_v25 = vld [vmem:[%s15311_s10 + $0x9a0] sm:$0xff] }
 0x506   : > { %v13612_v9 = vcombine.high %v5337_v3, %v5341_v5  ;;  %v13611_v26 = vcombine.low %v5337_v3, %v5341_v5  ;;  %v5385_v57 = vld [vmem:[%s15311_s10 + $0x988] sm:$0xff]  ;;  %v5396_v2 = vld [vmem:[%s15311_s10 + $0x9e0] sm:$0xff] }
 0x507   : > { %v5393_v24 = vld [vmem:[%s15311_s10 + $0x9c8] sm:$0xff] }
 0x508   : > { %11324 = vmatpush1.bf16.msra.mxu0 %v13545_v10  ;;  %11652 = vmatpush1.bf16.msra.mxu1 %v13547_v12  ;;  %v5344_v10 = vld [vmem:[%s15311_s10 + $0x840] sm:$0xff]  ;;  %v5397_v3 = vld [vmem:[%s15311_s10 + $0x9e8] sm:$0xff] }
 0x509   : > { %11325 = vmatprep.subr.bf16.mxu0 %v13554_v13  ;;  %11653 = vmatprep.subr.bf16.mxu1 %v13556_v16  ;;  %v5348_v12 = vld [vmem:[%s15311_s10 + $0x860] sm:$0xff]  ;;  %v15591_v13 = vpack.c.bf16 %v5050_v7, %v5050_v7  ;;  %v5345_v16 = vld [vmem:[%s15311_s10 + $0x848] sm:$0xff] }
 0x50a   : > { %v13617_v35 = vcombine.low %v5344_v10, %v5348_v12 }
 0x50c   : > { %11326 = vmatpush1.bf16.msra.mxu0 %v13553_v27  ;;  %11654 = vmatpush1.bf16.msra.mxu1 %v13555_v28  ;;  %v13618_v27 = vcombine.high %v5344_v10, %v5348_v12  ;;  %v13620_v28 = vcombine.high %v5345_v16, %v5349_v18  ;;  %v5401_v10 = vld [vmem:[%s15311_s10 + $0xa08] sm:$0xff] }
 0x50d   : > { %11327 = vmatprep.subr.bf16.mxu0 %v13562_v29  ;;  %11655 = vmatprep.subr.bf16.mxu1 %v13564_v30  ;;  %v5352_v29 = vld [vmem:[%s15311_s10 + $0x880] sm:$0xff]  ;;  %v5405_v12 = vld [vmem:[%s15311_s10 + $0xa28] sm:$0xff] }
 0x50e   : > { %v5356_v30 = vld [vmem:[%s15311_s10 + $0x8a0] sm:$0xff] }
 0x50f   : > { %v13625_v56 = vcombine.low %v5352_v29, %v5356_v30 }
 0x510   : > { %11328 = vmatpush1.bf16.msra.mxu0 %v13561_v36  ;;  %11656 = vmatpush1.bf16.msra.mxu1 %v13563_v37  ;;  %v13619_v36 = vcombine.low %v5345_v16, %v5349_v18  ;;  %v13626_v37 = vcombine.high %v5352_v29, %v5356_v30  ;;  %v13667_v18 = vcombine.low %v5393_v24, %v5397_v3  ;;  %v5413_v29 = vld [vmem:[%s15311_s10 + $0xa68] sm:$0xff] }
 0x511   : > { %11329 = vmatprep.subr.bf16.mxu0 %v13570_v44  ;;  %11657 = vmatprep.subr.bf16.mxu1 %v13572_v38  ;;  %v13628_v44 = vcombine.high %v5353_v33, %v5357_v34  ;;  %v5360_v38 = vld [vmem:[%s15311_s10 + $0x8c0] sm:$0xff] }
 0x512   : > { %v13633_v47 = vcombine.low %v5360_v38, %v5364_v39 }
 0x514   : > { %11330 = vmatpush1.bf16.msra.mxu0 %v13569_v58  ;;  %11658 = vmatpush1.bf16.msra.mxu1 %v13571_v59  ;;  %v13627_v58 = vcombine.low %v5353_v33, %v5357_v34  ;;  %v13634_v59 = vcombine.high %v5360_v38, %v5364_v39  ;;  %v13675_v33 = vcombine.low %v5401_v10, %v5405_v12  ;;  %v5421_v38 = vld [vmem:[%s15311_s10 + $0xaa8] sm:$0xff] }
 0x515   : > { %11331 = vmatprep.subr.bf16.mxu0 %v13578_v41  ;;  %11659 = vmatprep.subr.bf16.mxu1 %v13580_v42  ;;  %v13636_v41 = vcombine.high %v5361_v55, %v5365_v40  ;;  %v5368_v42 = vld [vmem:[%s15311_s10 + $0x900] sm:$0xff] }
 0x516   : > { %v13641_v17 = vcombine.low %v5368_v42, %v5372_v43 }
 0x518   : > { %11332 = vmatpush1.bf16.msra.mxu0 %v13577_v48  ;;  %11660 = vmatpush1.bf16.msra.mxu1 %v13579_v11  ;;  %v13635_v48 = vcombine.low %v5361_v55, %v5365_v40  ;;  %v13642_v11 = vcombine.high %v5368_v42, %v5372_v43  ;;  %v5429_v42 = vld [vmem:[%s15311_s10 + $0xae8] sm:$0xff] }
 0x519   : > { %11333 = vmatprep.subr.bf16.mxu0 %v13586_v49  ;;  %11661 = vmatprep.subr.bf16.mxu1 %v13588_v50  ;;  %v13644_v49 = vcombine.high %v5369_v45, %v5373_v46  ;;  %v5376_v50 = vld [vmem:[%s15311_s10 + $0x940] sm:$0xff] }
 0x51a   : > { %v13649_v61 = vcombine.low %v5376_v50, %v5380_v51 }
 0x51c   : > { %11334 = vmatpush1.bf16.msra.mxu0 %v13585_v20  ;;  %11662 = vmatpush1.bf16.msra.mxu1 %v13587_v53  ;;  %v13643_v20 = vcombine.low %v5369_v45, %v5373_v46  ;;  %v13650_v53 = vcombine.high %v5376_v50, %v5380_v51  ;;  %v5437_v50 = vld [vmem:[%s15311_s10 + $0xb28] sm:$0xff] }
 0x51d   : > { %11335 = vmatprep.subr.bf16.mxu0 %v13594_v21  ;;  %11663 = vmatprep.subr.bf16.mxu1 %v13596_v54  ;;  %v13652_v21 = vcombine.high %v5377_v15, %v5381_v52  ;;  %v5384_v54 = vld [vmem:[%s15311_s10 + $0x980] sm:$0xff] }
 0x51e   : > { %v13657_v5 = vcombine.low %v5384_v54, %v5388_v25 }
 0x520   : > { %11336 = vmatpush1.bf16.msra.mxu0 %v13593_v62  ;;  %11664 = vmatpush1.bf16.msra.mxu1 %v13595_v63  ;;  %v13651_v62 = vcombine.low %v5377_v15, %v5381_v52  ;;  %v13658_v63 = vcombine.high %v5384_v54, %v5388_v25  ;;  %v5445_v54 = vld [vmem:[%s15311_s10 + $0xb68] sm:$0xff] }
 0x521   : > { %11337 = vmatprep.subr.bf16.mxu0 %v13602_v0  ;;  %11665 = vmatprep.subr.bf16.mxu1 %v13604_v1  ;;  %v13660_v0 = vcombine.high %v5385_v57, %v5389_v60  ;;  %v5392_v1 = vld [vmem:[%s15311_s10 + $0x9c0] sm:$0xff] }
 0x522   : > { %v13666_v7 = vcombine.high %v5392_v1, %v5396_v2  ;;  %v13665_v16 = vcombine.low %v5392_v1, %v5396_v2  ;;  %v5453_v1 = vld [vmem:[%s15311_s10 + $0xba8] sm:$0xff] }
 0x524   : > { %11338 = vmatpush1.bf16.msra.mxu0 %v13601_v6  ;;  %11666 = vmatpush1.bf16.msra.mxu1 %v13603_v8  ;;  %v13659_v6 = vcombine.low %v5385_v57, %v5389_v60  ;;  %v13668_v8 = vcombine.high %v5393_v24, %v5397_v3 }
 0x525   : > { %11348 = vmatprep.subr.bf16.mxu0 %v13610_v31  ;;  %11676 = vmatprep.subr.bf16.mxu1 %v13612_v9  ;;  %v5400_v31 = vld [vmem:[%s15311_s10 + $0xa00] sm:$0xff] }
 0x526   : > { %v5404_v9 = vld [vmem:[%s15311_s10 + $0xa20] sm:$0xff] }
 0x527   : > { %11340 = vmatmul.mubr.bf16.vlgmr.msra.gmra.mrb[0].mxu0 %v15591_v13  ;;  %11668 = vmatmul.mubr.bf16.vlgmr.msra.gmra.mrb[0].mxu1 %v15591_v13  ;;  %v13674_v19 = vcombine.high %v5400_v31, %v5404_v9  ;;  %v13673_v30 = vcombine.low %v5400_v31, %v5404_v9  ;;  %v5461_v31 = vld [vmem:[%s15311_s10 + $0xbe8] sm:$0xff] }
 0x528   : > { %11349 = vmatpush1.bf16.msra.mxu0 %v13609_v22  ;;  %11677 = vmatpush1.bf16.msra.mxu1 %v13611_v26  ;;  %v13676_v22 = vcombine.high %v5401_v10, %v5405_v12  ;;  %v5408_v26 = vld [vmem:[%s15311_s10 + $0xa40] sm:$0xff] }
 0x529   : > { %11350 = vmatprep.subr.bf16.mxu0 %v13618_v27  ;;  %11678 = vmatprep.subr.bf16.mxu1 %v13620_v28  ;;  %v5412_v27 = vld [vmem:[%s15311_s10 + $0xa60] sm:$0xff]  ;;  %v5409_v28 = vld [vmem:[%s15311_s10 + $0xa48] sm:$0xff] }
 0x52a   : > { %11380 = vmatprep.mubr.bf16.mxu0 %v15597_v32  ;;  %11708 = vmatprep.mubr.bf16.mxu1 %v15597_v32  ;;  %v13682_v34 = vcombine.high %v5408_v26, %v5412_v27  ;;  %v13681_v39 = vcombine.low %v5408_v26, %v5412_v27  ;;  %v13683_v55 = vcombine.low %v5409_v28, %v5413_v29  ;;  %v5469_v26 = vld [vmem:[%s15311_s10 + $0xc28] sm:$0xff] }
 0x52c   : > { %11351 = vmatpush1.bf16.msra.mxu0 %v13617_v35  ;;  %11679 = vmatpush1.bf16.msra.mxu1 %v13619_v36  ;;  %v13684_v35 = vcombine.high %v5409_v28, %v5413_v29  ;;  %v5416_v36 = vld [vmem:[%s15311_s10 + $0xa80] sm:$0xff]  ;;  %v5052_v28 = vld [vmem:[#allocation2 + $0x20] sm:$0xff] }
 0x52d   : > { %11352 = vmatprep.subr.bf16.mxu0 %v13626_v37  ;;  %11680 = vmatprep.subr.bf16.mxu1 %v13628_v44  ;;  %v5420_v37 = vld [vmem:[%s15311_s10 + $0xaa0] sm:$0xff]  ;;  %v5417_v44 = vld [vmem:[%s15311_s10 + $0xa88] sm:$0xff] }
 0x52e   : > { %v13690_v40 = vcombine.high %v5416_v36, %v5420_v37  ;;  %v13689_v43 = vcombine.low %v5416_v36, %v5420_v37  ;;  %v13691_v45 = vcombine.low %v5417_v44, %v5421_v38  ;;  %v15663_v36 = vpack.c.bf16 %v5052_v28, %v5052_v28  ;;  %v5473_v37 = vld [vmem:[%s15311_s10 + $0xc48] sm:$0xff] }
 0x530   : > { %11353 = vmatpush1.bf16.msra.mxu0 %v13625_v56  ;;  %11681 = vmatpush1.bf16.msra.mxu1 %v13627_v58  ;;  %v13692_v56 = vcombine.high %v5417_v44, %v5421_v38  ;;  %v5424_v58 = vld [vmem:[%s15311_s10 + $0xac0] sm:$0xff]  ;;  %v5477_v44 = vld [vmem:[%s15311_s10 + $0xc68] sm:$0xff] }
 0x531   : > { %11354 = vmatprep.subr.bf16.mxu0 %v13634_v59  ;;  %11682 = vmatprep.subr.bf16.mxu1 %v13636_v41  ;;  %v5428_v59 = vld [vmem:[%s15311_s10 + $0xae0] sm:$0xff]  ;;  %v5425_v41 = vld [vmem:[%s15311_s10 + $0xac8] sm:$0xff] }
 0x532   : > { %v13698_v46 = vcombine.high %v5424_v58, %v5428_v59  ;;  %v13697_v51 = vcombine.low %v5424_v58, %v5428_v59  ;;  %v13699_v15 = vcombine.low %v5425_v41, %v5429_v42  ;;  %v5055_v38 = vld [vmem:[#allocation2 + $0x38] sm:$0xff] }
 0x533   : > { %v5480_v58 = vld [vmem:[%s15311_s10 + $0xc80] sm:$0xff] }
 0x534   : > { %11355 = vmatpush1.bf16.msra.mxu0 %v13633_v47  ;;  %11683 = vmatpush1.bf16.msra.mxu1 %v13635_v48  ;;  %v13700_v47 = vcombine.high %v5425_v41, %v5429_v42  ;;  %v5432_v48 = vld [vmem:[%s15311_s10 + $0xb00] sm:$0xff]  ;;  %v15669_v41 = vpack.c.bf16 %v5055_v38, %v5055_v38  ;;  %v5481_v42 = vld [vmem:[%s15311_s10 + $0xc88] sm:$0xff] }
 0x535   : > { %11356 = vmatprep.subr.bf16.mxu0 %v13642_v11  ;;  %11684 = vmatprep.subr.bf16.mxu1 %v13644_v49  ;;  %v5436_v11 = vld [vmem:[%s15311_s10 + $0xb20] sm:$0xff]  ;;  %v5433_v49 = vld [vmem:[%s15311_s10 + $0xb08] sm:$0xff] }
 0x536   : > { %v13706_v52 = vcombine.high %v5432_v48, %v5436_v11  ;;  %v13705_v25 = vcombine.low %v5432_v48, %v5436_v11  ;;  %v13707_v57 = vcombine.low %v5433_v49, %v5437_v50  ;;  %v5484_v59 = vld [vmem:[%s15311_s10 + $0xca0] sm:$0xff] }
 0x537   : > { %v5488_v11 = vld [vmem:[%s15311_s10 + $0xcc0] sm:$0xff] }
 0x538   : > { %11357 = vmatpush1.bf16.msra.mxu0 %v13641_v17  ;;  %11685 = vmatpush1.bf16.msra.mxu1 %v13643_v20  ;;  %v13708_v17 = vcombine.high %v5433_v49, %v5437_v50  ;;  %v5440_v20 = vld [vmem:[%s15311_s10 + $0xb40] sm:$0xff]  ;;  %v5489_v50 = vld [vmem:[%s15311_s10 + $0xcc8] sm:$0xff] }
 0x539   : > { %11358 = vmatprep.subr.bf16.mxu0 %v13650_v53  ;;  %11686 = vmatprep.subr.bf16.mxu1 %v13652_v21  ;;  %v5444_v53 = vld [vmem:[%s15311_s10 + $0xb60] sm:$0xff]  ;;  %v5441_v21 = vld [vmem:[%s15311_s10 + $0xb48] sm:$0xff] }
 0x53a   : > { %v13714_v60 = vcombine.high %v5440_v20, %v5444_v53  ;;  %v13713_v2 = vcombine.low %v5440_v20, %v5444_v53  ;;  %v13715_v24 = vcombine.low %v5441_v21, %v5445_v54  ;;  %v5492_v49 = vld [vmem:[%s15311_s10 + $0xce0] sm:$0xff] }
 0x53b   : > { %v5496_v53 = vld [vmem:[%s15311_s10 + $0xd00] sm:$0xff] }
 0x53c   : > { %11359 = vmatpush1.bf16.msra.mxu0 %v13649_v61  ;;  %11687 = vmatpush1.bf16.msra.mxu1 %v13651_v62  ;;  %v13716_v61 = vcombine.high %v5441_v21, %v5445_v54  ;;  %v5448_v62 = vld [vmem:[%s15311_s10 + $0xb80] sm:$0xff]  ;;  %v5497_v54 = vld [vmem:[%s15311_s10 + $0xd08] sm:$0xff] }
 0x53d   : > { %11360 = vmatprep.subr.bf16.mxu0 %v13658_v63  ;;  %11688 = vmatprep.subr.bf16.mxu1 %v13660_v0  ;;  %v5452_v63 = vld [vmem:[%s15311_s10 + $0xba0] sm:$0xff]  ;;  %v5449_v0 = vld [vmem:[%s15311_s10 + $0xb88] sm:$0xff] }
 0x53e   : > { %v13722_v3 = vcombine.high %v5448_v62, %v5452_v63  ;;  %v13721_v9 = vcombine.low %v5448_v62, %v5452_v63  ;;  %v13723_v10 = vcombine.low %v5449_v0, %v5453_v1  ;;  %v5500_v21 = vld [vmem:[%s15311_s10 + $0xd20] sm:$0xff] }
 0x53f   : > { %v5504_v63 = vld [vmem:[%s15311_s10 + $0xd40] sm:$0xff] }
 0x540   : > { %11361 = vmatpush1.bf16.msra.mxu0 %v13657_v5  ;;  %11689 = vmatpush1.bf16.msra.mxu1 %v13659_v6  ;;  %v13724_v5 = vcombine.high %v5449_v0, %v5453_v1  ;;  %v5456_v6 = vld [vmem:[%s15311_s10 + $0xbc0] sm:$0xff]  ;;  %v5505_v1 = vld [vmem:[%s15311_s10 + $0xd48] sm:$0xff] }
 0x541   : > { %11362 = vmatprep.subr.bf16.mxu0 %v13666_v7  ;;  %11690 = vmatprep.subr.bf16.mxu1 %v13668_v8  ;;  %v5460_v7 = vld [vmem:[%s15311_s10 + $0xbe0] sm:$0xff]  ;;  %v5457_v8 = vld [vmem:[%s15311_s10 + $0xbc8] sm:$0xff] }
 0x542   : > { %v13730_v12 = vcombine.high %v5456_v6, %v5460_v7  ;;  %v13729_v27 = vcombine.low %v5456_v6, %v5460_v7  ;;  %v13731_v29 = vcombine.low %v5457_v8, %v5461_v31  ;;  %v5508_v0 = vld [vmem:[%s15311_s10 + $0xd60] sm:$0xff] }
 0x543   : > { %v5512_v7 = vld [vmem:[%s15311_s10 + $0xd80] sm:$0xff] }
 0x544   : > { %11363 = vmatpush1.bf16.msra.mxu0 %v13665_v16  ;;  %11691 = vmatpush1.bf16.msra.mxu1 %v13667_v18  ;;  %v13732_v16 = vcombine.high %v5457_v8, %v5461_v31  ;;  %v5464_v18 = vld [vmem:[%s15311_s10 + $0xc00] sm:$0xff]  ;;  %v5513_v31 = vld [vmem:[%s15311_s10 + $0xd88] sm:$0xff] }
 0x545   : > { %11364 = vmatprep.subr.bf16.mxu0 %v13674_v19  ;;  %11692 = vmatprep.subr.bf16.mxu1 %v13676_v22  ;;  %v5468_v19 = vld [vmem:[%s15311_s10 + $0xc20] sm:$0xff]  ;;  %v5465_v22 = vld [vmem:[%s15311_s10 + $0xc08] sm:$0xff] }
 0x546   : > { %v5516_v8 = vld [vmem:[%s15311_s10 + $0xda0] sm:$0xff] }
 0x547   : > { %v13785_v28 = vcombine.low %v5512_v7, %v5516_v8 }
 0x548   : > { %11365 = vmatpush1.bf16.msra.mxu0 %v13673_v30  ;;  %11693 = vmatpush1.bf16.msra.mxu1 %v13675_v33  ;;  %v13738_v30 = vcombine.high %v5464_v18, %v5468_v19  ;;  %v13740_v33 = vcombine.high %v5465_v22, %v5469_v26 }
 0x549   : > { %11366 = vmatprep.subr.bf16.mxu0 %v13682_v34  ;;  %11694 = vmatprep.subr.bf16.mxu1 %v13684_v35  ;;  %v5472_v34 = vld [vmem:[%s15311_s10 + $0xc40] sm:$0xff] }
 0x54a   : > { %v5476_v35 = vld [vmem:[%s15311_s10 + $0xc60] sm:$0xff] }
 0x54c   : > { %11367 = vmatpush1.bf16.msra.mxu0 %v13681_v39  ;;  %11695 = vmatpush1.bf16.msra.mxu1 %v13683_v55  ;;  %v13737_v39 = vcombine.low %v5464_v18, %v5468_v19  ;;  %v13739_v55 = vcombine.low %v5465_v22, %v5469_v26  ;;  %v5520_v19 = vld [vmem:[%s15311_s10 + $0xdc0] sm:$0xff]  ;;  %v5521_v26 = vld [vmem:[%s15311_s10 + $0xdc8] sm:$0xff] }
 0x54d   : > { %11368 = vmatprep.subr.bf16.mxu0 %v13690_v40  ;;  %11696 = vmatprep.subr.bf16.mxu1 %v13692_v56  ;;  %v13746_v40 = vcombine.high %v5472_v34, %v5476_v35  ;;  %v13748_v56 = vcombine.high %v5473_v37, %v5477_v44  ;;  %v5524_v22 = vld [vmem:[%s15311_s10 + $0xde0] sm:$0xff] }
 0x54e   : > { %v13793_v38 = vcombine.low %v5520_v19, %v5524_v22 }
 0x550   : > { %11369 = vmatpush1.bf16.msra.mxu0 %v13689_v43  ;;  %11697 = vmatpush1.bf16.msra.mxu1 %v13691_v45  ;;  %v5485_v43 = vld [vmem:[%s15311_s10 + $0xca8] sm:$0xff]  ;;  %v13745_v45 = vcombine.low %v5472_v34, %v5476_v35  ;;  %v5528_v34 = vld [vmem:[%s15311_s10 + $0xe00] sm:$0xff] }
 0x551   : > { %11370 = vmatprep.subr.bf16.mxu0 %v13698_v46  ;;  %11698 = vmatprep.subr.bf16.mxu1 %v13700_v47  ;;  %v13747_v46 = vcombine.low %v5473_v37, %v5477_v44  ;;  %v13754_v47 = vcombine.high %v5480_v58, %v5484_v59  ;;  %v13756_v48 = vcombine.high %v5481_v42, %v5485_v43  ;;  %v5532_v35 = vld [vmem:[%s15311_s10 + $0xe20] sm:$0xff]  ;;  %v5529_v37 = vld [vmem:[%s15311_s10 + $0xe08] sm:$0xff] }
 0x552   : > { %v5533_v44 = vld [vmem:[%s15311_s10 + $0xe28] sm:$0xff] }
 0x554   : > { %11371 = vmatpush1.bf16.msra.mxu0 %v13697_v51  ;;  %11699 = vmatpush1.bf16.msra.mxu1 %v13699_v15  ;;  %v5493_v51 = vld [vmem:[%s15311_s10 + $0xce8] sm:$0xff]  ;;  %v13753_v15 = vcombine.low %v5480_v58, %v5484_v59  ;;  %v5540_v58 = vld [vmem:[%s15311_s10 + $0xe60] sm:$0xff] }
 0x555   : > { %11372 = vmatprep.subr.bf16.mxu0 %v13706_v52  ;;  %11700 = vmatprep.subr.bf16.mxu1 %v13708_v17  ;;  %v13755_v52 = vcombine.low %v5481_v42, %v5485_v43  ;;  %v13762_v17 = vcombine.high %v5488_v11, %v5492_v49  ;;  %v13764_v20 = vcombine.high %v5489_v50, %v5493_v51  ;;  %v5537_v59 = vld [vmem:[%s15311_s10 + $0xe48] sm:$0xff] }
 0x556   : > { %v5541_v42 = vld [vmem:[%s15311_s10 + $0xe68] sm:$0xff]  ;;  %v13801_v43 = vcombine.low %v5528_v34, %v5532_v35 }
 0x558   : > { %11373 = vmatpush1.bf16.msra.mxu0 %v13705_v25  ;;  %11701 = vmatpush1.bf16.msra.mxu1 %v13707_v57  ;;  %v5501_v25 = vld [vmem:[%s15311_s10 + $0xd28] sm:$0xff]  ;;  %v13761_v57 = vcombine.low %v5488_v11, %v5492_v49  ;;  %v5548_v11 = vld [vmem:[%s15311_s10 + $0xea0] sm:$0xff] }
 0x559   : > { %11374 = vmatprep.subr.bf16.mxu0 %v13714_v60  ;;  %11702 = vmatprep.subr.bf16.mxu1 %v13716_v61  ;;  %v13763_v60 = vcombine.low %v5489_v50, %v5493_v51  ;;  %v13770_v61 = vcombine.high %v5496_v53, %v5500_v21  ;;  %v13772_v62 = vcombine.high %v5497_v54, %v5501_v25  ;;  %v5545_v49 = vld [vmem:[%s15311_s10 + $0xe88] sm:$0xff] }
 0x55a   : > { %v5549_v50 = vld [vmem:[%s15311_s10 + $0xea8] sm:$0xff] }
 0x55c   : > { %11375 = vmatpush1.bf16.msra.mxu0 %v13713_v2  ;;  %11703 = vmatpush1.bf16.msra.mxu1 %v13715_v24  ;;  %v5509_v2 = vld [vmem:[%s15311_s10 + $0xd68] sm:$0xff]  ;;  %v13769_v24 = vcombine.low %v5496_v53, %v5500_v21  ;;  %v5556_v53 = vld [vmem:[%s15311_s10 + $0xee0] sm:$0xff] }
 0x55d   : > { %11376 = vmatprep.subr.bf16.mxu0 %v13722_v3  ;;  %11704 = vmatprep.subr.bf16.mxu1 %v13724_v5  ;;  %v13771_v3 = vcombine.low %v5497_v54, %v5501_v25  ;;  %v13778_v5 = vcombine.high %v5504_v63, %v5508_v0  ;;  %v13780_v6 = vcombine.high %v5505_v1, %v5509_v2  ;;  %v5553_v21 = vld [vmem:[%s15311_s10 + $0xec8] sm:$0xff] }
 0x55e   : > { %v5557_v54 = vld [vmem:[%s15311_s10 + $0xee8] sm:$0xff] }
 0x560   : > { %11377 = vmatpush1.bf16.msra.mxu0 %v13721_v9  ;;  %11705 = vmatpush1.bf16.msra.mxu1 %v13723_v10  ;;  %v5517_v9 = vld [vmem:[%s15311_s10 + $0xda8] sm:$0xff]  ;;  %v13777_v10 = vcombine.low %v5504_v63, %v5508_v0  ;;  %v5564_v63 = vld [vmem:[%s15311_s10 + $0xf20] sm:$0xff] }
 0x561   : > { %11378 = vmatprep.subr.bf16.mxu0 %v13730_v12  ;;  %11706 = vmatprep.subr.bf16.mxu1 %v13732_v16  ;;  %v13779_v12 = vcombine.low %v5505_v1, %v5509_v2  ;;  %v13786_v16 = vcombine.high %v5512_v7, %v5516_v8  ;;  %v13788_v18 = vcombine.high %v5513_v31, %v5517_v9  ;;  %v5561_v0 = vld [vmem:[%s15311_s10 + $0xf08] sm:$0xff]  ;;  %v5572_v7 = vld [vmem:[%s15311_s10 + $0xf60] sm:$0xff] }
 0x562   : > { %v5565_v1 = vld [vmem:[%s15311_s10 + $0xf28] sm:$0xff] }
 0x563   : > { %v5569_v8 = vld [vmem:[%s15311_s10 + $0xf48] sm:$0xff] }
 0x564   : > { %11379 = vmatpush1.bf16.msra.mxu0 %v13729_v27  ;;  %11707 = vmatpush1.bf16.msra.mxu1 %v13731_v29  ;;  %v5525_v27 = vld [vmem:[%s15311_s10 + $0xde8] sm:$0xff]  ;;  %v13787_v29 = vcombine.low %v5513_v31, %v5517_v9 }
 0x565   : > { %11389 = vmatprep.subr.bf16.mxu0 %v13738_v30  ;;  %11717 = vmatprep.subr.bf16.mxu1 %v13740_v33  ;;  %v13794_v30 = vcombine.high %v5520_v19, %v5524_v22  ;;  %v13796_v33 = vcombine.high %v5521_v26, %v5525_v27  ;;  %v5573_v31 = vld [vmem:[%s15311_s10 + $0xf68] sm:$0xff]  ;;  %v5580_v19 = vld [vmem:[%s15311_s10 + $0xfa0] sm:$0xff] }
 0x566   : > { %v5577_v22 = vld [vmem:[%s15311_s10 + $0xf88] sm:$0xff] }
 0x567   : > { %11381 = vmatmul.mubr.bf16.vlgmr.msra.gmra.mrb[0].mxu0 %v15663_v36  ;;  %11709 = vmatmul.mubr.bf16.vlgmr.msra.gmra.mrb[0].mxu1 %v15663_v36 }
 0x568   : > { %11390 = vmatpush1.bf16.msra.mxu0 %v13737_v39  ;;  %11718 = vmatpush1.bf16.msra.mxu1 %v13739_v55  ;;  %v13795_v39 = vcombine.low %v5521_v26, %v5525_v27  ;;  %v13802_v55 = vcombine.high %v5528_v34, %v5532_v35  ;;  %v5581_v26 = vld [vmem:[%s15311_s10 + $0xfa8] sm:$0xff]  ;;  %v5588_v34 = vld [vmem:[%s15311_s10 + $0xfe0] sm:$0xff] }
 0x569   : > { %11391 = vmatprep.subr.bf16.mxu0 %v13746_v40  ;;  %11719 = vmatprep.subr.bf16.mxu1 %v13748_v56  ;;  %v13804_v40 = vcombine.high %v5529_v37, %v5533_v44  ;;  %v5536_v56 = vld [vmem:[%s15311_s10 + $0xe40] sm:$0xff]  ;;  %v5585_v35 = vld [vmem:[%s15311_s10 + $0xfc8] sm:$0xff] }
 0x56a   : > { %11421 = vmatprep.mubr.bf16.mxu0 %v15669_v41  ;;  %11749 = vmatprep.mubr.bf16.mxu1 %v15669_v41  ;;  %v13809_v51 = vcombine.low %v5536_v56, %v5540_v58 }
 0x56c   : > { %11392 = vmatpush1.bf16.msra.mxu0 %v13745_v45  ;;  %11720 = vmatpush1.bf16.msra.mxu1 %v13747_v46  ;;  %v13803_v45 = vcombine.low %v5529_v37, %v5533_v44  ;;  %v13810_v46 = vcombine.high %v5536_v56, %v5540_v58  ;;  %v5589_v37 = vld [vmem:[%s15311_s10 + $0xfe8] sm:$0xff]  ;;  %v5596_v56 = vld [vmem:[%s15311_s10 + $0x1020] sm:$0xff] }
 0x56d   : > { %11393 = vmatprep.subr.bf16.mxu0 %v13754_v47  ;;  %11721 = vmatprep.subr.bf16.mxu1 %v13756_v48  ;;  %v13812_v47 = vcombine.high %v5537_v59, %v5541_v42  ;;  %v5544_v48 = vld [vmem:[%s15311_s10 + $0xe80] sm:$0xff]  ;;  %v5593_v58 = vld [vmem:[%s15311_s10 + $0x1008] sm:$0xff] }
 0x56e   : > { %v13817_v25 = vcombine.low %v5544_v48, %v5548_v11 }
 0x570   : > { %11394 = vmatpush1.bf16.msra.mxu0 %v13753_v15  ;;  %11722 = vmatpush1.bf16.msra.mxu1 %v13755_v52  ;;  %v13811_v15 = vcombine.low %v5537_v59, %v5541_v42  ;;  %v13818_v52 = vcombine.high %v5544_v48, %v5548_v11  ;;  %v5597_v59 = vld [vmem:[%s15311_s10 + $0x1028] sm:$0xff]  ;;  %v5600_v48 = vld [vmem:[%s15311_s10 + $0x1040] sm:$0xff] }
 0x571   : > { %11395 = vmatprep.subr.bf16.mxu0 %v13762_v17  ;;  %11723 = vmatprep.subr.bf16.mxu1 %v13764_v20  ;;  %v13820_v17 = vcombine.high %v5545_v49, %v5549_v50  ;;  %v5552_v20 = vld [vmem:[%s15311_s10 + $0xec0] sm:$0xff] }
 0x572   : > { %v13825_v2 = vcombine.low %v5552_v20, %v5556_v53  ;;  %v5604_v11 = vld [vmem:[%s15311_s10 + $0x1060] sm:$0xff] }
 0x574   : > { %11396 = vmatpush1.bf16.msra.mxu0 %v13761_v57  ;;  %11724 = vmatpush1.bf16.msra.mxu1 %v13763_v60  ;;  %v13819_v57 = vcombine.low %v5545_v49, %v5549_v50  ;;  %v13826_v60 = vcombine.high %v5552_v20, %v5556_v53  ;;  %v5601_v50 = vld [vmem:[%s15311_s10 + $0x1048] sm:$0xff]  ;;  %v13874_v20 = vcombine.high %v5600_v48, %v5604_v11 }
 0x575   : > { %11397 = vmatprep.subr.bf16.mxu0 %v13770_v61  ;;  %11725 = vmatprep.subr.bf16.mxu1 %v13772_v62  ;;  %v13828_v61 = vcombine.high %v5553_v21, %v5557_v54  ;;  %v5560_v62 = vld [vmem:[%s15311_s10 + $0xf00] sm:$0xff] }
 0x576   : > { %v13833_v9 = vcombine.low %v5560_v62, %v5564_v63 }
 0x578   : > { %11398 = vmatpush1.bf16.msra.mxu0 %v13769_v24  ;;  %11726 = vmatpush1.bf16.msra.mxu1 %v13771_v3  ;;  %v13827_v24 = vcombine.low %v5553_v21, %v5557_v54  ;;  %v13834_v3 = vcombine.high %v5560_v62, %v5564_v63  ;;  %v5608_v21 = vld [vmem:[%s15311_s10 + $0x1080] sm:$0xff] }
 0x579   : > { %11399 = vmatprep.subr.bf16.mxu0 %v13778_v5  ;;  %11727 = vmatprep.subr.bf16.mxu1 %v13780_v6  ;;  %v13836_v5 = vcombine.high %v5561_v0, %v5565_v1  ;;  %v5568_v6 = vld [vmem:[%s15311_s10 + $0xf40] sm:$0xff] }
 0x57a   : > { %v13841_v27 = vcombine.low %v5568_v6, %v5572_v7  ;;  %v5612_v54 = vld [vmem:[%s15311_s10 + $0x10a0] sm:$0xff] }
 0x57b   : > { %v13882_v63 = vcombine.high %v5608_v21, %v5612_v54 }
 0x57c   : > { %11400 = vmatpush1.bf16.msra.mxu0 %v13777_v10  ;;  %11728 = vmatpush1.bf16.msra.mxu1 %v13779_v12  ;;  %v13835_v10 = vcombine.low %v5561_v0, %v5565_v1  ;;  %v13842_v12 = vcombine.high %v5568_v6, %v5572_v7  ;;  %v5616_v1 = vld [vmem:[%s15311_s10 + $0x10c0] sm:$0xff] }
 0x57d   : > { %11401 = vmatprep.subr.bf16.mxu0 %v13786_v16  ;;  %11729 = vmatprep.subr.bf16.mxu1 %v13788_v18  ;;  %v13844_v16 = vcombine.high %v5569_v8, %v5573_v31  ;;  %v5576_v18 = vld [vmem:[%s15311_s10 + $0xf80] sm:$0xff] }
 0x57e   : > { %v13849_v44 = vcombine.low %v5576_v18, %v5580_v19 }
 0x580   : > { %11402 = vmatpush1.bf16.msra.mxu0 %v13785_v28  ;;  %11730 = vmatpush1.bf16.msra.mxu1 %v13787_v29  ;;  %v13843_v28 = vcombine.low %v5569_v8, %v5573_v31  ;;  %v13850_v29 = vcombine.high %v5576_v18, %v5580_v19  ;;  %v5624_v31 = vld [vmem:[%s15311_s10 + $0x1100] sm:$0xff] }
 0x581   : > { %11403 = vmatprep.subr.bf16.mxu0 %v13794_v30  ;;  %11731 = vmatprep.subr.bf16.mxu1 %v13796_v33  ;;  %v13852_v30 = vcombine.high %v5577_v22, %v5581_v26  ;;  %v5584_v33 = vld [vmem:[%s15311_s10 + $0xfc0] sm:$0xff] }
 0x582   : > { %v13857_v42 = vcombine.low %v5584_v33, %v5588_v34 }
 0x584   : > { %11404 = vmatpush1.bf16.msra.mxu0 %v13793_v38  ;;  %11732 = vmatpush1.bf16.msra.mxu1 %v13795_v39  ;;  %v13851_v38 = vcombine.low %v5577_v22, %v5581_v26  ;;  %v13858_v39 = vcombine.high %v5584_v33, %v5588_v34  ;;  %v5632_v26 = vld [vmem:[%s15311_s10 + $0x1140] sm:$0xff] }
 0x585   : > { %11405 = vmatprep.subr.bf16.mxu0 %v13802_v55  ;;  %11733 = vmatprep.subr.bf16.mxu1 %v13804_v40  ;;  %v13860_v55 = vcombine.high %v5585_v35, %v5589_v37  ;;  %v5592_v40 = vld [vmem:[%s15311_s10 + $0x1000] sm:$0xff] }
 0x588   : > { %11406 = vmatpush1.bf16.msra.mxu0 %v13801_v43  ;;  %11734 = vmatpush1.bf16.msra.mxu1 %v13803_v45  ;;  %v5054_v43 = vld [vmem:[#allocation2 + $0x30] sm:$0xff]  ;;  %v13859_v45 = vcombine.low %v5585_v35, %v5589_v37 }
 0x589   : > { %11407 = vmatprep.subr.bf16.mxu0 %v13810_v46  ;;  %11735 = vmatprep.subr.bf16.mxu1 %v13812_v47  ;;  %v13866_v46 = vcombine.high %v5592_v40, %v5596_v56  ;;  %v13868_v47 = vcombine.high %v5593_v58, %v5597_v59  ;;  %v15735_v49 = vpack.c.bf16 %v5054_v43, %v5054_v43  ;;  %v5640_v37 = vld [vmem:[%s15311_s10 + $0x1180] sm:$0xff]  ;;  %v5649_v43 = vld [vmem:[%s15311_s10 + $0x11c8] sm:$0xff] }
 0x58c   : > { %11408 = vmatpush1.bf16.msra.mxu0 %v13809_v51  ;;  %11736 = vmatpush1.bf16.msra.mxu1 %v13811_v15  ;;  %v5605_v51 = vld [vmem:[%s15311_s10 + $0x1068] sm:$0xff]  ;;  %v5057_v15 = vld [vmem:[#allocation2 + $0x48] sm:$0xff] }
 0x58d   : > { %11409 = vmatprep.subr.bf16.mxu0 %v13818_v52  ;;  %11737 = vmatprep.subr.bf16.mxu1 %v13820_v17  ;;  %v13865_v52 = vcombine.low %v5592_v40, %v5596_v56  ;;  %v13867_v17 = vcombine.low %v5593_v58, %v5597_v59  ;;  %v13876_v53 = vcombine.high %v5601_v50, %v5605_v51  ;;  %v5648_v59 = vld [vmem:[%s15311_s10 + $0x11c0] sm:$0xff] }
 0x58e   : > { %v13875_v62 = vcombine.low %v5601_v50, %v5605_v51  ;;  %v5656_v50 = vld [vmem:[%s15311_s10 + $0x1200] sm:$0xff] }
 0x58f   : > { %v5660_v51 = vld [vmem:[%s15311_s10 + $0x1220] sm:$0xff] }
 0x590   : > { %11410 = vmatpush1.bf16.msra.mxu0 %v13817_v25  ;;  %11738 = vmatpush1.bf16.msra.mxu1 %v13819_v57  ;;  %v15741_v25 = vpack.c.bf16 %v5057_v15, %v5057_v15  ;;  %v5609_v57 = vld [vmem:[%s15311_s10 + $0x1088] sm:$0xff] }
 0x591   : > { %11411 = vmatprep.subr.bf16.mxu0 %v13826_v60  ;;  %11739 = vmatprep.subr.bf16.mxu1 %v13828_v61  ;;  %v5613_v60 = vld [vmem:[%s15311_s10 + $0x10a8] sm:$0xff]  ;;  %v13873_v61 = vcombine.low %v5600_v48, %v5604_v11 }
 0x592   : > { %v13884_v0 = vcombine.high %v5609_v57, %v5613_v60  ;;  %v13883_v6 = vcombine.low %v5609_v57, %v5613_v60  ;;  %v5657_v15 = vld [vmem:[%s15311_s10 + $0x1208] sm:$0xff]  ;;  %v5668_v57 = vld [vmem:[%s15311_s10 + $0x1260] sm:$0xff] }
 0x593   : > { %v5665_v60 = vld [vmem:[%s15311_s10 + $0x1248] sm:$0xff] }
 0x594   : > { %11412 = vmatpush1.bf16.msra.mxu0 %v13825_v2  ;;  %11740 = vmatpush1.bf16.msra.mxu1 %v13827_v24  ;;  %v5620_v2 = vld [vmem:[%s15311_s10 + $0x10e0] sm:$0xff]  ;;  %v5617_v24 = vld [vmem:[%s15311_s10 + $0x10c8] sm:$0xff] }
 0x595   : > { %11413 = vmatprep.subr.bf16.mxu0 %v13834_v3  ;;  %11741 = vmatprep.subr.bf16.mxu1 %v13836_v5  ;;  %v5621_v3 = vld [vmem:[%s15311_s10 + $0x10e8] sm:$0xff]  ;;  %v13881_v5 = vcombine.low %v5608_v21, %v5612_v54  ;;  %v13890_v7 = vcombine.high %v5616_v1, %v5620_v2  ;;  %v5664_v54 = vld [vmem:[%s15311_s10 + $0x1240] sm:$0xff] }
 0x596   : > { %v13892_v8 = vcombine.high %v5617_v24, %v5621_v3  ;;  %v13891_v18 = vcombine.low %v5617_v24, %v5621_v3  ;;  %v5676_v24 = vld [vmem:[%s15311_s10 + $0x12a0] sm:$0xff]  ;;  %v5673_v3 = vld [vmem:[%s15311_s10 + $0x1288] sm:$0xff] }
 0x598   : > { %11414 = vmatpush1.bf16.msra.mxu0 %v13833_v9  ;;  %11742 = vmatpush1.bf16.msra.mxu1 %v13835_v10  ;;  %v5628_v9 = vld [vmem:[%s15311_s10 + $0x1120] sm:$0xff]  ;;  %v5625_v10 = vld [vmem:[%s15311_s10 + $0x1108] sm:$0xff] }
 0x599   : > { %11415 = vmatprep.subr.bf16.mxu0 %v13842_v12  ;;  %11743 = vmatprep.subr.bf16.mxu1 %v13844_v16  ;;  %v5629_v12 = vld [vmem:[%s15311_s10 + $0x1128] sm:$0xff]  ;;  %v13889_v16 = vcombine.low %v5616_v1, %v5620_v2  ;;  %v13898_v19 = vcombine.high %v5624_v31, %v5628_v9  ;;  %v5672_v2 = vld [vmem:[%s15311_s10 + $0x1280] sm:$0xff] }
 0x59a   : > { %v13900_v22 = vcombine.high %v5625_v10, %v5629_v12  ;;  %v13899_v33 = vcombine.low %v5625_v10, %v5629_v12  ;;  %v5684_v10 = vld [vmem:[%s15311_s10 + $0x12e0] sm:$0xff]  ;;  %v5681_v12 = vld [vmem:[%s15311_s10 + $0x12c8] sm:$0xff] }
 0x59c   : > { %11416 = vmatpush1.bf16.msra.mxu0 %v13841_v27  ;;  %11744 = vmatpush1.bf16.msra.mxu1 %v13843_v28  ;;  %v5636_v27 = vld [vmem:[%s15311_s10 + $0x1160] sm:$0xff]  ;;  %v5633_v28 = vld [vmem:[%s15311_s10 + $0x1148] sm:$0xff] }
 0x59d   : > { %11417 = vmatprep.subr.bf16.mxu0 %v13850_v29  ;;  %11745 = vmatprep.subr.bf16.mxu1 %v13852_v30  ;;  %v5637_v29 = vld [vmem:[%s15311_s10 + $0x1168] sm:$0xff]  ;;  %v13897_v30 = vcombine.low %v5624_v31, %v5628_v9  ;;  %v13906_v34 = vcombine.high %v5632_v26, %v5636_v27  ;;  %v5680_v9 = vld [vmem:[%s15311_s10 + $0x12c0] sm:$0xff] }
 0x59e   : > { %v13908_v35 = vcombine.high %v5633_v28, %v5637_v29  ;;  %v13907_v40 = vcombine.low %v5633_v28, %v5637_v29  ;;  %v5692_v28 = vld [vmem:[%s15311_s10 + $0x1320] sm:$0xff]  ;;  %v5689_v29 = vld [vmem:[%s15311_s10 + $0x1308] sm:$0xff] }
 0x5a0   : > { %11418 = vmatpush1.bf16.msra.mxu0 %v13849_v44  ;;  %11746 = vmatpush1.bf16.msra.mxu1 %v13851_v38  ;;  %v5644_v44 = vld [vmem:[%s15311_s10 + $0x11a0] sm:$0xff]  ;;  %v5641_v38 = vld [vmem:[%s15311_s10 + $0x1188] sm:$0xff] }
 0x5a1   : > { %11419 = vmatprep.subr.bf16.mxu0 %v13858_v39  ;;  %11747 = vmatprep.subr.bf16.mxu1 %v13860_v55  ;;  %v5645_v39 = vld [vmem:[%s15311_s10 + $0x11a8] sm:$0xff]  ;;  %v13905_v55 = vcombine.low %v5632_v26, %v5636_v27  ;;  %v13914_v56 = vcombine.high %v5640_v37, %v5644_v44  ;;  %v5688_v27 = vld [vmem:[%s15311_s10 + $0x1300] sm:$0xff] }
 0x5a2   : > { %v13916_v58 = vcombine.high %v5641_v38, %v5645_v39 }
 0x5a4   : > { %11420 = vmatpush1.bf16.msra.mxu0 %v13857_v42  ;;  %11748 = vmatpush1.bf16.msra.mxu1 %v13859_v45  ;;  %v5652_v42 = vld [vmem:[%s15311_s10 + $0x11e0] sm:$0xff]  ;;  %v5653_v45 = vld [vmem:[%s15311_s10 + $0x11e8] sm:$0xff] }
 0x5a5   : > { %11430 = vmatprep.subr.bf16.mxu0 %v13866_v46  ;;  %11758 = vmatprep.subr.bf16.mxu1 %v13868_v47  ;;  %v13913_v46 = vcombine.low %v5640_v37, %v5644_v44  ;;  %v13915_v47 = vcombine.low %v5641_v38, %v5645_v39  ;;  %v13922_v48 = vcombine.high %v5648_v59, %v5652_v42  ;;  %v5696_v44 = vld [vmem:[%s15311_s10 + $0x1340] sm:$0xff]  ;;  %v5697_v39 = vld [vmem:[%s15311_s10 + $0x1348] sm:$0xff] }
 0x5a6   : > { %v13924_v11 = vcombine.high %v5649_v43, %v5653_v45  ;;  %v5700_v38 = vld [vmem:[%s15311_s10 + $0x1360] sm:$0xff] }
 0x5a7   : > { %11422 = vmatmul.mubr.bf16.vlgmr.msra.gmra.mrb[0].mxu0 %v15735_v49  ;;  %11750 = vmatmul.mubr.bf16.vlgmr.msra.gmra.mrb[0].mxu1 %v15735_v49 }
 0x5a8   : > { %11431 = vmatpush1.bf16.msra.mxu0 %v13865_v52  ;;  %11759 = vmatpush1.bf16.msra.mxu1 %v13867_v17  ;;  %v5661_v52 = vld [vmem:[%s15311_s10 + $0x1228] sm:$0xff]  ;;  %v13921_v17 = vcombine.low %v5648_v59, %v5652_v42  ;;  %v5704_v42 = vld [vmem:[%s15311_s10 + $0x1380] sm:$0xff] }
 0x5a9   : > { %11432 = vmatprep.subr.bf16.mxu0 %v13874_v20  ;;  %11760 = vmatprep.subr.bf16.mxu1 %v13876_v53  ;;  %v13923_v20 = vcombine.low %v5649_v43, %v5653_v45  ;;  %v13930_v53 = vcombine.high %v5656_v50, %v5660_v51  ;;  %v13932_v21 = vcombine.high %v5657_v15, %v5661_v52  ;;  %v5708_v43 = vld [vmem:[%s15311_s10 + $0x13a0] sm:$0xff]  ;;  %v5705_v45 = vld [vmem:[%s15311_s10 + $0x1388] sm:$0xff] }
 0x5aa   : > { %11462 = vmatprep.mubr.bf16.mxu0 %v15741_v25  ;;  %11790 = vmatprep.mubr.bf16.mxu1 %v15741_v25 }
 0x5ac   : > { %11433 = vmatpush1.bf16.msra.mxu0 %v13873_v61  ;;  %11761 = vmatpush1.bf16.msra.mxu1 %v13875_v62  ;;  %v5669_v61 = vld [vmem:[%s15311_s10 + $0x1268] sm:$0xff]  ;;  %v13929_v62 = vcombine.low %v5656_v50, %v5660_v51  ;;  %v5712_v51 = vld [vmem:[%s15311_s10 + $0x13c0] sm:$0xff] }
 0x5ad   : > { %11434 = vmatprep.subr.bf16.mxu0 %v13882_v63  ;;  %11762 = vmatprep.subr.bf16.mxu1 %v13884_v0  ;;  %v13931_v63 = vcombine.low %v5657_v15, %v5661_v52  ;;  %v13938_v0 = vcombine.high %v5664_v54, %v5668_v57  ;;  %v13940_v1 = vcombine.high %v5665_v60, %v5669_v61  ;;  %v5716_v15 = vld [vmem:[%s15311_s10 + $0x13e0] sm:$0xff]  ;;  %v5713_v52 = vld [vmem:[%s15311_s10 + $0x13c8] sm:$0xff] }
 0x5b0   : > { %11435 = vmatpush1.bf16.msra.mxu0 %v13881_v5  ;;  %11763 = vmatpush1.bf16.msra.mxu1 %v13883_v6  ;;  %v5677_v5 = vld [vmem:[%s15311_s10 + $0x12a8] sm:$0xff]  ;;  %v13937_v6 = vcombine.low %v5664_v54, %v5668_v57  ;;  %v5720_v57 = vld [vmem:[%s15311_s10 + $0x1400] sm:$0xff] }
 0x5b1   : > { %11436 = vmatprep.subr.bf16.mxu0 %v13890_v7  ;;  %11764 = vmatprep.subr.bf16.mxu1 %v13892_v8  ;;  %v13939_v7 = vcombine.low %v5665_v60, %v5669_v61  ;;  %v13946_v8 = vcombine.high %v5672_v2, %v5676_v24  ;;  %v13948_v31 = vcombine.high %v5673_v3, %v5677_v5  ;;  %v5724_v60 = vld [vmem:[%s15311_s10 + $0x1420] sm:$0xff]  ;;  %v5721_v61 = vld [vmem:[%s15311_s10 + $0x1408] sm:$0xff] }
 0x5b4   : > { %11437 = vmatpush1.bf16.msra.mxu0 %v13889_v16  ;;  %11765 = vmatpush1.bf16.msra.mxu1 %v13891_v18  ;;  %v5685_v16 = vld [vmem:[%s15311_s10 + $0x12e8] sm:$0xff]  ;;  %v13945_v18 = vcombine.low %v5672_v2, %v5676_v24  ;;  %v13994_v2 = vcombine.high %v5720_v57, %v5724_v60 }
 0x5b5   : > { %11438 = vmatprep.subr.bf16.mxu0 %v13898_v19  ;;  %11766 = vmatprep.subr.bf16.mxu1 %v13900_v22  ;;  %v13947_v19 = vcombine.low %v5673_v3, %v5677_v5  ;;  %v13954_v22 = vcombine.high %v5680_v9, %v5684_v10  ;;  %v13956_v26 = vcombine.high %v5681_v12, %v5685_v16  ;;  %v5728_v3 = vld [vmem:[%s15311_s10 + $0x1440] sm:$0xff] }
 0x5b6   : > { %v5732_v5 = vld [vmem:[%s15311_s10 + $0x1460] sm:$0xff] }
 0x5b8   : > { %11439 = vmatpush1.bf16.msra.mxu0 %v13897_v30  ;;  %11767 = vmatpush1.bf16.msra.mxu1 %v13899_v33  ;;  %v5693_v30 = vld [vmem:[%s15311_s10 + $0x1328] sm:$0xff]  ;;  %v13953_v33 = vcombine.low %v5680_v9, %v5684_v10  ;;  %v13993_v9 = vcombine.low %v5720_v57, %v5724_v60 }
 0x5b9   : > { %11440 = vmatprep.subr.bf16.mxu0 %v13906_v34  ;;  %11768 = vmatprep.subr.bf16.mxu1 %v13908_v35  ;;  %v13955_v34 = vcombine.low %v5681_v12, %v5685_v16  ;;  %v13962_v35 = vcombine.high %v5688_v27, %v5692_v28  ;;  %v13964_v37 = vcombine.high %v5689_v29, %v5693_v30  ;;  %v5773_v57 = vld [vmem:[%s15311_s10 + $0x15a8] sm:$0xff] }
 0x5ba   : > { %v14002_v12 = vcombine.high %v5728_v3, %v5732_v5 }
 0x5bc   : > { %11441 = vmatpush1.bf16.msra.mxu0 %v13905_v55  ;;  %11769 = vmatpush1.bf16.msra.mxu1 %v13907_v40  ;;  %v5701_v55 = vld [vmem:[%s15311_s10 + $0x1368] sm:$0xff]  ;;  %v13961_v40 = vcombine.low %v5688_v27, %v5692_v28  ;;  %v14001_v28 = vcombine.low %v5728_v3, %v5732_v5 }
 0x5bd   : > { %11442 = vmatprep.subr.bf16.mxu0 %v13914_v56  ;;  %11770 = vmatprep.subr.bf16.mxu1 %v13916_v58  ;;  %v13963_v56 = vcombine.low %v5689_v29, %v5693_v30  ;;  %v13970_v58 = vcombine.high %v5696_v44, %v5700_v38  ;;  %v13972_v59 = vcombine.high %v5697_v39, %v5701_v55  ;;  %v5741_v27 = vld [vmem:[%s15311_s10 + $0x14a8] sm:$0xff] }
 0x5c0   : > { %11443 = vmatpush1.bf16.msra.mxu0 %v13913_v46  ;;  %11771 = vmatpush1.bf16.msra.mxu1 %v13915_v47  ;;  %v5709_v46 = vld [vmem:[%s15311_s10 + $0x13a8] sm:$0xff]  ;;  %v13969_v47 = vcombine.low %v5696_v44, %v5700_v38 }
 0x5c1   : > { %11444 = vmatprep.subr.bf16.mxu0 %v13922_v48  ;;  %11772 = vmatprep.subr.bf16.mxu1 %v13924_v11  ;;  %v13971_v48 = vcombine.low %v5697_v39, %v5701_v55  ;;  %v13978_v11 = vcombine.high %v5704_v42, %v5708_v43  ;;  %v13980_v50 = vcombine.high %v5705_v45, %v5709_v46  ;;  %v5749_v44 = vld [vmem:[%s15311_s10 + $0x14e8] sm:$0xff] }
 0x5c4   : > { %11445 = vmatpush1.bf16.msra.mxu0 %v13921_v17  ;;  %11773 = vmatpush1.bf16.msra.mxu1 %v13923_v20  ;;  %v5717_v17 = vld [vmem:[%s15311_s10 + $0x13e8] sm:$0xff]  ;;  %v13977_v20 = vcombine.low %v5704_v42, %v5708_v43 }
 0x5c5   : > { %11446 = vmatprep.subr.bf16.mxu0 %v13930_v53  ;;  %11774 = vmatprep.subr.bf16.mxu1 %v13932_v21  ;;  %v13979_v53 = vcombine.low %v5705_v45, %v5709_v46  ;;  %v13986_v21 = vcombine.high %v5712_v51, %v5716_v15  ;;  %v13988_v54 = vcombine.high %v5713_v52, %v5717_v17  ;;  %v5757_v42 = vld [vmem:[%s15311_s10 + $0x1528] sm:$0xff] }
 0x5c8   : > { %11447 = vmatpush1.bf16.msra.mxu0 %v13929_v62  ;;  %11775 = vmatpush1.bf16.msra.mxu1 %v13931_v63  ;;  %v5725_v62 = vld [vmem:[%s15311_s10 + $0x1428] sm:$0xff]  ;;  %v13985_v63 = vcombine.low %v5712_v51, %v5716_v15 }
 0x5c9   : > { %11448 = vmatprep.subr.bf16.mxu0 %v13938_v0  ;;  %11776 = vmatprep.subr.bf16.mxu1 %v13940_v1  ;;  %v5056_v0 = vld [vmem:[#allocation2 + $0x40] sm:$0xff]  ;;  %v13987_v1 = vcombine.low %v5713_v52, %v5717_v17  ;;  %v13996_v24 = vcombine.high %v5721_v61, %v5725_v62  ;;  %v13995_v10 = vcombine.low %v5721_v61, %v5725_v62 }
 0x5ca   : > { %v5765_v51 = vld [vmem:[%s15311_s10 + $0x1568] sm:$0xff] }
 0x5cc   : > { %11449 = vmatpush1.bf16.msra.mxu0 %v13937_v6  ;;  %11777 = vmatpush1.bf16.msra.mxu1 %v13939_v7  ;;  %v15807_v6 = vpack.c.bf16 %v5056_v0, %v5056_v0  ;;  %v5729_v7 = vld [vmem:[%s15311_s10 + $0x1448] sm:$0xff]  ;;  %v5776_v0 = vld [vmem:[%s15311_s10 + $0x15c0] sm:$0xff] }
 0x5cd   : > { %11450 = vmatprep.subr.bf16.mxu0 %v13946_v8  ;;  %11778 = vmatprep.subr.bf16.mxu1 %v13948_v31  ;;  %v5733_v8 = vld [vmem:[%s15311_s10 + $0x1468] sm:$0xff] }
 0x5ce   : > { %v5059_v31 = vld [vmem:[#allocation2 + $0x58] sm:$0xff]  ;;  %v14004_v16 = vcombine.high %v5729_v7, %v5733_v8  ;;  %v14003_v29 = vcombine.low %v5729_v7, %v5733_v8 }
 0x5d0   : > { %11451 = vmatpush1.bf16.msra.mxu0 %v13945_v18  ;;  %11779 = vmatpush1.bf16.msra.mxu1 %v13947_v19  ;;  %v5736_v18 = vld [vmem:[%s15311_s10 + $0x1480] sm:$0xff] }
 0x5d1   : > { %11452 = vmatprep.subr.bf16.mxu0 %v13954_v22  ;;  %11780 = vmatprep.subr.bf16.mxu1 %v13956_v26  ;;  %v5740_v19 = vld [vmem:[%s15311_s10 + $0x14a0] sm:$0xff]  ;;  %v15813_v22 = vpack.c.bf16 %v5059_v31, %v5059_v31  ;;  %v5737_v26 = vld [vmem:[%s15311_s10 + $0x1488] sm:$0xff] }
 0x5d2   : > { %v14010_v30 = vcombine.high %v5736_v18, %v5740_v19  ;;  %v14009_v38 = vcombine.low %v5736_v18, %v5740_v19  ;;  %v14011_v39 = vcombine.low %v5737_v26, %v5741_v27  ;;  %v5784_v31 = vld [vmem:[%s15311_s10 + $0x1600] sm:$0xff] }
 0x5d4   : > { %11453 = vmatpush1.bf16.msra.mxu0 %v13953_v33  ;;  %11781 = vmatpush1.bf16.msra.mxu1 %v13955_v34  ;;  %v14012_v33 = vcombine.high %v5737_v26, %v5741_v27  ;;  %v5744_v34 = vld [vmem:[%s15311_s10 + $0x14c0] sm:$0xff] }
 0x5d5   : > { %11454 = vmatprep.subr.bf16.mxu0 %v13962_v35  ;;  %11782 = vmatprep.subr.bf16.mxu1 %v13964_v37  ;;  %v5748_v35 = vld [vmem:[%s15311_s10 + $0x14e0] sm:$0xff]  ;;  %v5745_v37 = vld [vmem:[%s15311_s10 + $0x14c8] sm:$0xff] }
 0x5d6   : > { %v14018_v55 = vcombine.high %v5744_v34, %v5748_v35  ;;  %v14017_v43 = vcombine.low %v5744_v34, %v5748_v35  ;;  %v14019_v45 = vcombine.low %v5745_v37, %v5749_v44  ;;  %v5792_v27 = vld [vmem:[%s15311_s10 + $0x1640] sm:$0xff] }
 0x5d8   : > { %11455 = vmatpush1.bf16.msra.mxu0 %v13961_v40  ;;  %11783 = vmatpush1.bf16.msra.mxu1 %v13963_v56  ;;  %v14020_v40 = vcombine.high %v5745_v37, %v5749_v44  ;;  %v5752_v56 = vld [vmem:[%s15311_s10 + $0x1500] sm:$0xff] }
 0x5d9   : > { %11456 = vmatprep.subr.bf16.mxu0 %v13970_v58  ;;  %11784 = vmatprep.subr.bf16.mxu1 %v13972_v59  ;;  %v5756_v58 = vld [vmem:[%s15311_s10 + $0x1520] sm:$0xff]  ;;  %v5753_v59 = vld [vmem:[%s15311_s10 + $0x1508] sm:$0xff] }
 0x5da   : > { %v14026_v46 = vcombine.high %v5752_v56, %v5756_v58  ;;  %v14025_v15 = vcombine.low %v5752_v56, %v5756_v58  ;;  %v14027_v52 = vcombine.low %v5753_v59, %v5757_v42  ;;  %v5800_v44 = vld [vmem:[%s15311_s10 + $0x1680] sm:$0xff] }
 0x5dc   : > { %11457 = vmatpush1.bf16.msra.mxu0 %v13969_v47  ;;  %11785 = vmatpush1.bf16.msra.mxu1 %v13971_v48  ;;  %v14028_v47 = vcombine.high %v5753_v59, %v5757_v42  ;;  %v5760_v48 = vld [vmem:[%s15311_s10 + $0x1540] sm:$0xff] }
 0x5dd   : > { %11458 = vmatprep.subr.bf16.mxu0 %v13978_v11  ;;  %11786 = vmatprep.subr.bf16.mxu1 %v13980_v50  ;;  %v5764_v11 = vld [vmem:[%s15311_s10 + $0x1560] sm:$0xff]  ;;  %v5761_v50 = vld [vmem:[%s15311_s10 + $0x1548] sm:$0xff] }
 0x5de   : > { %v14034_v17 = vcombine.high %v5760_v48, %v5764_v11  ;;  %v14033_v60 = vcombine.low %v5760_v48, %v5764_v11  ;;  %v14035_v61 = vcombine.low %v5761_v50, %v5765_v51  ;;  %v5808_v42 = vld [vmem:[%s15311_s10 + $0x16c0] sm:$0xff] }
 0x5e0   : > { %11459 = vmatpush1.bf16.msra.mxu0 %v13977_v20  ;;  %11787 = vmatpush1.bf16.msra.mxu1 %v13979_v53  ;;  %v14036_v20 = vcombine.high %v5761_v50, %v5765_v51  ;;  %v5768_v53 = vld [vmem:[%s15311_s10 + $0x1580] sm:$0xff] }
 0x5e1   : > { %11460 = vmatprep.subr.bf16.mxu0 %v13986_v21  ;;  %11788 = vmatprep.subr.bf16.mxu1 %v13988_v54  ;;  %v5772_v21 = vld [vmem:[%s15311_s10 + $0x15a0] sm:$0xff]  ;;  %v5769_v54 = vld [vmem:[%s15311_s10 + $0x1588] sm:$0xff] }
 0x5e2   : > { %v14042_v62 = vcombine.high %v5768_v53, %v5772_v21  ;;  %v14041_v3 = vcombine.low %v5768_v53, %v5772_v21  ;;  %v14043_v5 = vcombine.low %v5769_v54, %v5773_v57  ;;  %v5816_v51 = vld [vmem:[%s15311_s10 + $0x1700] sm:$0xff] }
 0x5e4   : > { %11461 = vmatpush1.bf16.msra.mxu0 %v13985_v63  ;;  %11789 = vmatpush1.bf16.msra.mxu1 %v13987_v1  ;;  %v14044_v63 = vcombine.high %v5769_v54, %v5773_v57  ;;  %v5780_v1 = vld [vmem:[%s15311_s10 + $0x15e0] sm:$0xff] }
 0x5e5   : > { %11471 = vmatprep.subr.bf16.mxu0 %v13994_v2  ;;  %11799 = vmatprep.subr.bf16.mxu1 %v13996_v24  ;;  %v5777_v2 = vld [vmem:[%s15311_s10 + $0x15c8] sm:$0xff]  ;;  %v14050_v7 = vcombine.high %v5776_v0, %v5780_v1  ;;  %v5824_v57 = vld [vmem:[%s15311_s10 + $0x1740] sm:$0xff] }
 0x5e6   : > { %v5781_v24 = vld [vmem:[%s15311_s10 + $0x15e8] sm:$0xff] }
 0x5e7   : > { %11463 = vmatmul.mubr.bf16.vlgmr.msra.gmra.mrb[0].mxu0 %v15807_v6  ;;  %11791 = vmatmul.mubr.bf16.vlgmr.msra.gmra.mrb[0].mxu1 %v15807_v6  ;;  %v14052_v8 = vcombine.high %v5777_v2, %v5781_v24  ;;  %v14051_v18 = vcombine.low %v5777_v2, %v5781_v24  ;;  %v5832_v24 = vld [vmem:[%s15311_s10 + $0x1780] sm:$0xff] }
 0x5e8   : > { %11472 = vmatpush1.bf16.msra.mxu0 %v13993_v9  ;;  %11800 = vmatpush1.bf16.msra.mxu1 %v13995_v10  ;;  %v5788_v9 = vld [vmem:[%s15311_s10 + $0x1620] sm:$0xff]  ;;  %v5785_v10 = vld [vmem:[%s15311_s10 + $0x1608] sm:$0xff] }
 0x5e9   : > { %11473 = vmatprep.subr.bf16.mxu0 %v14002_v12  ;;  %11801 = vmatprep.subr.bf16.mxu1 %v14004_v16  ;;  %v5789_v12 = vld [vmem:[%s15311_s10 + $0x1628] sm:$0xff]  ;;  %v14049_v16 = vcombine.low %v5776_v0, %v5780_v1  ;;  %v14058_v19 = vcombine.high %v5784_v31, %v5788_v9 }
 0x5ea   : > { %11503 = vmatprep.mubr.bf16.mxu0 %v15813_v22  ;;  %11831 = vmatprep.mubr.bf16.mxu1 %v15813_v22  ;;  %v14060_v26 = vcombine.high %v5785_v10, %v5789_v12  ;;  %v14059_v34 = vcombine.low %v5785_v10, %v5789_v12  ;;  %v5840_v12 = vld [vmem:[%s15311_s10 + $0x17c0] sm:$0xff] }
 0x5ec   : > { %11474 = vmatpush1.bf16.msra.mxu0 %v14001_v28  ;;  %11802 = vmatpush1.bf16.msra.mxu1 %v14003_v29  ;;  %v5796_v28 = vld [vmem:[%s15311_s10 + $0x1660] sm:$0xff]  ;;  %v5793_v29 = vld [vmem:[%s15311_s10 + $0x1648] sm:$0xff] }
 0x5ed   : > { %11475 = vmatprep.subr.bf16.mxu0 %v14010_v30  ;;  %11803 = vmatprep.subr.bf16.mxu1 %v14012_v33  ;;  %v5797_v30 = vld [vmem:[%s15311_s10 + $0x1668] sm:$0xff]  ;;  %v14057_v33 = vcombine.low %v5784_v31, %v5788_v9  ;;  %v14066_v35 = vcombine.high %v5792_v27, %v5796_v28 }
 0x5ee   : > { %v14068_v37 = vcombine.high %v5793_v29, %v5797_v30  ;;  %v14067_v56 = vcombine.low %v5793_v29, %v5797_v30  ;;  %v5848_v30 = vld [vmem:[%s15311_s10 + $0x1800] sm:$0xff] }
 0x5f0   : > { %11476 = vmatpush1.bf16.msra.mxu0 %v14009_v38  ;;  %11804 = vmatpush1.bf16.msra.mxu1 %v14011_v39  ;;  %v5804_v38 = vld [vmem:[%s15311_s10 + $0x16a0] sm:$0xff]  ;;  %v5801_v39 = vld [vmem:[%s15311_s10 + $0x1688] sm:$0xff] }
 0x5f1   : > { %11477 = vmatprep.subr.bf16.mxu0 %v14018_v55  ;;  %11805 = vmatprep.subr.bf16.mxu1 %v14020_v40  ;;  %v5805_v55 = vld [vmem:[%s15311_s10 + $0x16a8] sm:$0xff]  ;;  %v14065_v40 = vcombine.low %v5792_v27, %v5796_v28  ;;  %v14074_v58 = vcombine.high %v5800_v44, %v5804_v38 }
 0x5f2   : > { %v14076_v59 = vcombine.high %v5801_v39, %v5805_v55  ;;  %v14075_v48 = vcombine.low %v5801_v39, %v5805_v55 }
 0x5f4   : > { %11478 = vmatpush1.bf16.msra.mxu0 %v14017_v43  ;;  %11806 = vmatpush1.bf16.msra.mxu1 %v14019_v45  ;;  %v5812_v43 = vld [vmem:[%s15311_s10 + $0x16e0] sm:$0xff]  ;;  %v5809_v45 = vld [vmem:[%s15311_s10 + $0x16c8] sm:$0xff] }
 0x5f5   : > { %11479 = vmatprep.subr.bf16.mxu0 %v14026_v46  ;;  %11807 = vmatprep.subr.bf16.mxu1 %v14028_v47  ;;  %v5813_v46 = vld [vmem:[%s15311_s10 + $0x16e8] sm:$0xff]  ;;  %v14073_v47 = vcombine.low %v5800_v44, %v5804_v38  ;;  %v14082_v11 = vcombine.high %v5808_v42, %v5812_v43  ;;  %v5058_v44 = vld [vmem:[#allocation2 + $0x50] sm:$0xff] }
 0x5f6   : > { %v14084_v50 = vcombine.high %v5809_v45, %v5813_v46  ;;  %v14083_v53 = vcombine.low %v5809_v45, %v5813_v46 }
 0x5f8   : > { %11480 = vmatpush1.bf16.msra.mxu0 %v14025_v15  ;;  %11808 = vmatpush1.bf16.msra.mxu1 %v14027_v52  ;;  %v5820_v15 = vld [vmem:[%s15311_s10 + $0x1720] sm:$0xff]  ;;  %v5817_v52 = vld [vmem:[%s15311_s10 + $0x1708] sm:$0xff] }
 0x5f9   : > { %11481 = vmatprep.subr.bf16.mxu0 %v14034_v17  ;;  %11809 = vmatprep.subr.bf16.mxu1 %v14036_v20  ;;  %v5821_v17 = vld [vmem:[%s15311_s10 + $0x1728] sm:$0xff]  ;;  %v14081_v20 = vcombine.low %v5808_v42, %v5812_v43  ;;  %v14090_v21 = vcombine.high %v5816_v51, %v5820_v15  ;;  %v5061_v43 = vld [vmem:[#allocation2 + $0x68] sm:$0xff] }
 0x5fa   : > { %v14092_v54 = vcombine.high %v5817_v52, %v5821_v17  ;;  %v14091_v0 = vcombine.low %v5817_v52, %v5821_v17  ;;  %v5861_v42 = vld [vmem:[%s15311_s10 + $0x1868] sm:$0xff] }
 0x5fb   : > { %v5869_v52 = vld [vmem:[%s15311_s10 + $0x18a8] sm:$0xff] }
 0x5fc   : > { %11482 = vmatpush1.bf16.msra.mxu0 %v14033_v60  ;;  %11810 = vmatpush1.bf16.msra.mxu1 %v14035_v61  ;;  %v5828_v60 = vld [vmem:[%s15311_s10 + $0x1760] sm:$0xff]  ;;  %v5825_v61 = vld [vmem:[%s15311_s10 + $0x1748] sm:$0xff] }
 0x5fd   : > { %11483 = vmatprep.subr.bf16.mxu0 %v14042_v62  ;;  %11811 = vmatprep.subr.bf16.mxu1 %v14044_v63  ;;  %v5829_v62 = vld [vmem:[%s15311_s10 + $0x1768] sm:$0xff]  ;;  %v14089_v63 = vcombine.low %v5816_v51, %v5820_v15  ;;  %v14098_v1 = vcombine.high %v5824_v57, %v5828_v60  ;;  %v15885_v51 = vpack.c.bf16 %v5061_v43, %v5061_v43 }
 0x5fe   : > { %v14100_v2 = vcombine.high %v5825_v61, %v5829_v62  ;;  %v14099_v31 = vcombine.low %v5825_v61, %v5829_v62  ;;  %v5865_v15 = vld [vmem:[%s15311_s10 + $0x1888] sm:$0xff] }
 0x5ff   : > { %v5877_v61 = vld [vmem:[%s15311_s10 + $0x18e8] sm:$0xff] }
 0x600   : > { %11484 = vmatpush1.bf16.msra.mxu0 %v14041_v3  ;;  %11812 = vmatpush1.bf16.msra.mxu1 %v14043_v5  ;;  %v5836_v3 = vld [vmem:[%s15311_s10 + $0x17a0] sm:$0xff]  ;;  %v5833_v5 = vld [vmem:[%s15311_s10 + $0x1788] sm:$0xff] }
 0x601   : > { %11485 = vmatprep.subr.bf16.mxu0 %v14050_v7  ;;  %11813 = vmatprep.subr.bf16.mxu1 %v14052_v8  ;;  %v5837_v7 = vld [vmem:[%s15311_s10 + $0x17a8] sm:$0xff]  ;;  %v14097_v8 = vcombine.low %v5824_v57, %v5828_v60  ;;  %v14106_v9 = vcombine.high %v5832_v24, %v5836_v3  ;;  %v5876_v57 = vld [vmem:[%s15311_s10 + $0x18e0] sm:$0xff] }
 0x602   : > { %v14108_v10 = vcombine.high %v5833_v5, %v5837_v7  ;;  %v14107_v27 = vcombine.low %v5833_v5, %v5837_v7  ;;  %v5873_v60 = vld [vmem:[%s15311_s10 + $0x18c8] sm:$0xff] }
 0x603   : > { %v5885_v5 = vld [vmem:[%s15311_s10 + $0x1928] sm:$0xff] }
 0x604   : > { %11486 = vmatpush1.bf16.msra.mxu0 %v14049_v16  ;;  %11814 = vmatpush1.bf16.msra.mxu1 %v14051_v18  ;;  %v5844_v16 = vld [vmem:[%s15311_s10 + $0x17e0] sm:$0xff]  ;;  %v5841_v18 = vld [vmem:[%s15311_s10 + $0x17c8] sm:$0xff] }
 0x605   : > { %11487 = vmatprep.subr.bf16.mxu0 %v14058_v19  ;;  %11815 = vmatprep.subr.bf16.mxu1 %v14060_v26  ;;  %v5845_v19 = vld [vmem:[%s15311_s10 + $0x17e8] sm:$0xff]  ;;  %v14105_v26 = vcombine.low %v5832_v24, %v5836_v3  ;;  %v14114_v28 = vcombine.high %v5840_v12, %v5844_v16  ;;  %v5884_v24 = vld [vmem:[%s15311_s10 + $0x1920] sm:$0xff] }
 0x606   : > { %v14116_v29 = vcombine.high %v5841_v18, %v5845_v19  ;;  %v14115_v38 = vcombine.low %v5841_v18, %v5845_v19  ;;  %v5881_v3 = vld [vmem:[%s15311_s10 + $0x1908] sm:$0xff] }
 0x607   : > { %v5893_v18 = vld [vmem:[%s15311_s10 + $0x1968] sm:$0xff] }
 0x608   : > { %11488 = vmatpush1.bf16.msra.mxu0 %v14057_v33  ;;  %11816 = vmatpush1.bf16.msra.mxu1 %v14059_v34  ;;  %v5852_v33 = vld [vmem:[%s15311_s10 + $0x1820] sm:$0xff]  ;;  %v5849_v34 = vld [vmem:[%s15311_s10 + $0x1808] sm:$0xff] }
 0x609   : > { %11489 = vmatprep.subr.bf16.mxu0 %v14066_v35  ;;  %11817 = vmatprep.subr.bf16.mxu1 %v14068_v37  ;;  %v5853_v35 = vld [vmem:[%s15311_s10 + $0x1828] sm:$0xff]  ;;  %v14113_v37 = vcombine.low %v5840_v12, %v5844_v16  ;;  %v14122_v39 = vcombine.high %v5848_v30, %v5852_v33  ;;  %v14121_v45 = vcombine.low %v5848_v30, %v5852_v33  ;;  %v5892_v12 = vld [vmem:[%s15311_s10 + $0x1960] sm:$0xff] }
 0x60a   : > { %v14124_v55 = vcombine.high %v5849_v34, %v5853_v35  ;;  %v14123_v46 = vcombine.low %v5849_v34, %v5853_v35  ;;  %v5889_v16 = vld [vmem:[%s15311_s10 + $0x1948] sm:$0xff]  ;;  %v5900_v30 = vld [vmem:[%s15311_s10 + $0x19a0] sm:$0xff] }
 0x60b   : > { %v5897_v33 = vld [vmem:[%s15311_s10 + $0x1988] sm:$0xff] }
 0x60c   : > { %11490 = vmatpush1.bf16.msra.mxu0 %v14065_v40  ;;  %11818 = vmatpush1.bf16.msra.mxu1 %v14067_v56  ;;  %v5856_v40 = vld [vmem:[%s15311_s10 + $0x1840] sm:$0xff]  ;;  %v5901_v34 = vld [vmem:[%s15311_s10 + $0x19a8] sm:$0xff] }
 0x60d   : > { %11491 = vmatprep.subr.bf16.mxu0 %v14074_v58  ;;  %11819 = vmatprep.subr.bf16.mxu1 %v14076_v59  ;;  %v5860_v56 = vld [vmem:[%s15311_s10 + $0x1860] sm:$0xff]  ;;  %v15879_v58 = vpack.c.bf16 %v5058_v44, %v5058_v44  ;;  %v5857_v59 = vld [vmem:[%s15311_s10 + $0x1848] sm:$0xff] }
 0x60e   : > { %v14129_v17 = vcombine.low %v5856_v40, %v5860_v56 }
 0x610   : > { %11492 = vmatpush1.bf16.msra.mxu0 %v14073_v47  ;;  %11820 = vmatpush1.bf16.msra.mxu1 %v14075_v48  ;;  %v14130_v47 = vcombine.high %v5856_v40, %v5860_v56  ;;  %v14132_v48 = vcombine.high %v5857_v59, %v5861_v42  ;;  %v5905_v40 = vld [vmem:[%s15311_s10 + $0x19c8] sm:$0xff] }
 0x611   : > { %11493 = vmatprep.subr.bf16.mxu0 %v14082_v11  ;;  %11821 = vmatprep.subr.bf16.mxu1 %v14084_v50  ;;  %v5864_v11 = vld [vmem:[%s15311_s10 + $0x1880] sm:$0xff]  ;;  %v5909_v56 = vld [vmem:[%s15311_s10 + $0x19e8] sm:$0xff] }
 0x612   : > { %v5868_v50 = vld [vmem:[%s15311_s10 + $0x18a0] sm:$0xff] }
 0x613   : > { %v14137_v62 = vcombine.low %v5864_v11, %v5868_v50 }
 0x614   : > { %11494 = vmatpush1.bf16.msra.mxu0 %v14081_v20  ;;  %11822 = vmatpush1.bf16.msra.mxu1 %v14083_v53  ;;  %v14131_v20 = vcombine.low %v5857_v59, %v5861_v42  ;;  %v14138_v53 = vcombine.high %v5864_v11, %v5868_v50  ;;  %v14171_v42 = vcombine.low %v5897_v33, %v5901_v34  ;;  %v5917_v11 = vld [vmem:[%s15311_s10 + $0x1a28] sm:$0xff] }
 0x615   : > { %11495 = vmatprep.subr.bf16.mxu0 %v14090_v21  ;;  %11823 = vmatprep.subr.bf16.mxu1 %v14092_v54  ;;  %v14140_v21 = vcombine.high %v5865_v15, %v5869_v52  ;;  %v5872_v54 = vld [vmem:[%s15311_s10 + $0x18c0] sm:$0xff] }
 0x616   : > { %v14145_v7 = vcombine.low %v5872_v54, %v5876_v57 }
 0x618   : > { %11496 = vmatpush1.bf16.msra.mxu0 %v14089_v63  ;;  %11824 = vmatpush1.bf16.msra.mxu1 %v14091_v0  ;;  %v14139_v63 = vcombine.low %v5865_v15, %v5869_v52  ;;  %v14146_v0 = vcombine.high %v5872_v54, %v5876_v57  ;;  %v14179_v15 = vcombine.low %v5905_v40, %v5909_v56  ;;  %v5925_v54 = vld [vmem:[%s15311_s10 + $0x1a68] sm:$0xff] }
 0x619   : > { %11497 = vmatprep.subr.bf16.mxu0 %v14098_v1  ;;  %11825 = vmatprep.subr.bf16.mxu1 %v14100_v2  ;;  %v14148_v1 = vcombine.high %v5873_v60, %v5877_v61  ;;  %v5880_v2 = vld [vmem:[%s15311_s10 + $0x1900] sm:$0xff] }
 0x61a   : > { %v14153_v19 = vcombine.low %v5880_v2, %v5884_v24 }
 0x61c   : > { %11498 = vmatpush1.bf16.msra.mxu0 %v14097_v8  ;;  %11826 = vmatpush1.bf16.msra.mxu1 %v14099_v31  ;;  %v14147_v8 = vcombine.low %v5873_v60, %v5877_v61  ;;  %v14154_v31 = vcombine.high %v5880_v2, %v5884_v24  ;;  %v5933_v2 = vld [vmem:[%s15311_s10 + $0x1aa8] sm:$0xff] }
 0x61d   : > { %11499 = vmatprep.subr.bf16.mxu0 %v14106_v9  ;;  %11827 = vmatprep.subr.bf16.mxu1 %v14108_v10  ;;  %v14156_v9 = vcombine.high %v5881_v3, %v5885_v5  ;;  %v5888_v10 = vld [vmem:[%s15311_s10 + $0x1940] sm:$0xff] }
 0x61e   : > { %v14161_v35 = vcombine.low %v5888_v10, %v5892_v12 }
 0x620   : > { %11500 = vmatpush1.bf16.msra.mxu0 %v14105_v26  ;;  %11828 = vmatpush1.bf16.msra.mxu1 %v14107_v27  ;;  %v14155_v26 = vcombine.low %v5881_v3, %v5885_v5  ;;  %v14162_v27 = vcombine.high %v5888_v10, %v5892_v12  ;;  %v5941_v10 = vld [vmem:[%s15311_s10 + $0x1ae8] sm:$0xff] }
 0x621   : > { %11501 = vmatprep.subr.bf16.mxu0 %v14114_v28  ;;  %11829 = vmatprep.subr.bf16.mxu1 %v14116_v29  ;;  %v14164_v28 = vcombine.high %v5889_v16, %v5893_v18  ;;  %v5896_v29 = vld [vmem:[%s15311_s10 + $0x1980] sm:$0xff] }
 0x622   : > { %v14170_v44 = vcombine.high %v5896_v29, %v5900_v30  ;;  %v14169_v59 = vcombine.low %v5896_v29, %v5900_v30  ;;  %v5949_v29 = vld [vmem:[%s15311_s10 + $0x1b28] sm:$0xff] }
 0x624   : > { %11502 = vmatpush1.bf16.msra.mxu0 %v14113_v37  ;;  %11830 = vmatpush1.bf16.msra.mxu1 %v14115_v38  ;;  %v14163_v37 = vcombine.low %v5889_v16, %v5893_v18  ;;  %v14172_v38 = vcombine.high %v5897_v33, %v5901_v34 }
 0x625   : > { %11512 = vmatprep.subr.bf16.mxu0 %v14122_v39  ;;  %11840 = vmatprep.subr.bf16.mxu1 %v14124_v55  ;;  %v5904_v39 = vld [vmem:[%s15311_s10 + $0x19c0] sm:$0xff] }
 0x626   : > { %v5908_v55 = vld [vmem:[%s15311_s10 + $0x19e0] sm:$0xff] }
 0x627   : > { %11504 = vmatmul.mubr.bf16.vlgmr.msra.gmra.mrb[0].mxu0 %v15879_v58  ;;  %11832 = vmatmul.mubr.bf16.vlgmr.msra.gmra.mrb[0].mxu1 %v15879_v58  ;;  %v14178_v43 = vcombine.high %v5904_v39, %v5908_v55  ;;  %v14177_v50 = vcombine.low %v5904_v39, %v5908_v55  ;;  %v5957_v39 = vld [vmem:[%s15311_s10 + $0x1b68] sm:$0xff] }
 0x628   : > { %11513 = vmatpush1.bf16.msra.mxu0 %v14121_v45  ;;  %11841 = vmatpush1.bf16.msra.mxu1 %v14123_v46  ;;  %v14180_v45 = vcombine.high %v5905_v40, %v5909_v56  ;;  %v5912_v46 = vld [vmem:[%s15311_s10 + $0x1a00] sm:$0xff] }
 0x629   : > { %11514 = vmatprep.subr.bf16.mxu0 %v14130_v47  ;;  %11842 = vmatprep.subr.bf16.mxu1 %v14132_v48  ;;  %v5916_v47 = vld [vmem:[%s15311_s10 + $0x1a20] sm:$0xff]  ;;  %v5913_v48 = vld [vmem:[%s15311_s10 + $0x1a08] sm:$0xff] }
 0x62a   : > { %11544 = vmatprep.mubr.bf16.mxu0 %v15885_v51  ;;  %11872 = vmatprep.mubr.bf16.mxu1 %v15885_v51  ;;  %v14186_v52 = vcombine.high %v5912_v46, %v5916_v47  ;;  %v14185_v57 = vcombine.low %v5912_v46, %v5916_v47  ;;  %v14187_v60 = vcombine.low %v5913_v48, %v5917_v11  ;;  %v5965_v46 = vld [vmem:[%s15311_s10 + $0x1ba8] sm:$0xff] }
 0x62c   : > { %11515 = vmatpush1.bf16.msra.mxu0 %v14129_v17  ;;  %11843 = vmatpush1.bf16.msra.mxu1 %v14131_v20  ;;  %v14188_v17 = vcombine.high %v5913_v48, %v5917_v11  ;;  %v5920_v20 = vld [vmem:[%s15311_s10 + $0x1a40] sm:$0xff] }
 0x62d   : > { %11516 = vmatprep.subr.bf16.mxu0 %v14138_v53  ;;  %11844 = vmatprep.subr.bf16.mxu1 %v14140_v21  ;;  %v5924_v53 = vld [vmem:[%s15311_s10 + $0x1a60] sm:$0xff]  ;;  %v5921_v21 = vld [vmem:[%s15311_s10 + $0x1a48] sm:$0xff] }
 0x62e   : > { %v14194_v61 = vcombine.high %v5920_v20, %v5924_v53  ;;  %v14193_v24 = vcombine.low %v5920_v20, %v5924_v53  ;;  %v14195_v3 = vcombine.low %v5921_v21, %v5925_v54  ;;  %v5973_v20 = vld [vmem:[%s15311_s10 + $0x1be8] sm:$0xff] }
 0x630   : > { %11517 = vmatpush1.bf16.msra.mxu0 %v14137_v62  ;;  %11845 = vmatpush1.bf16.msra.mxu1 %v14139_v63  ;;  %v14196_v62 = vcombine.high %v5921_v21, %v5925_v54  ;;  %v5928_v63 = vld [vmem:[%s15311_s10 + $0x1a80] sm:$0xff] }
 0x631   : > { %11518 = vmatprep.subr.bf16.mxu0 %v14146_v0  ;;  %11846 = vmatprep.subr.bf16.mxu1 %v14148_v1  ;;  %v5932_v0 = vld [vmem:[%s15311_s10 + $0x1aa0] sm:$0xff]  ;;  %v5929_v1 = vld [vmem:[%s15311_s10 + $0x1a88] sm:$0xff] }
 0x632   : > { %v14202_v5 = vcombine.high %v5928_v63, %v5932_v0  ;;  %v14201_v12 = vcombine.low %v5928_v63, %v5932_v0  ;;  %v14203_v16 = vcombine.low %v5929_v1, %v5933_v2  ;;  %v5981_v63 = vld [vmem:[%s15311_s10 + $0x1c28] sm:$0xff] }
 0x634   : > { %11519 = vmatpush1.bf16.msra.mxu0 %v14145_v7  ;;  %11847 = vmatpush1.bf16.msra.mxu1 %v14147_v8  ;;  %v14204_v7 = vcombine.high %v5929_v1, %v5933_v2  ;;  %v5936_v8 = vld [vmem:[%s15311_s10 + $0x1ac0] sm:$0xff]  ;;  %v5060_v1 = vld [vmem:[#allocation2 + $0x60] sm:$0xff] }
 0x635   : > { %11520 = vmatprep.subr.bf16.mxu0 %v14154_v31  ;;  %11848 = vmatprep.subr.bf16.mxu1 %v14156_v9  ;;  %v5940_v31 = vld [vmem:[%s15311_s10 + $0x1ae0] sm:$0xff]  ;;  %v5937_v9 = vld [vmem:[%s15311_s10 + $0x1ac8] sm:$0xff] }
 0x636   : > { %v14210_v18 = vcombine.high %v5936_v8, %v5940_v31  ;;  %v14209_v30 = vcombine.low %v5936_v8, %v5940_v31  ;;  %v14211_v33 = vcombine.low %v5937_v9, %v5941_v10  ;;  %v15951_v8 = vpack.c.bf16 %v5060_v1, %v5060_v1  ;;  %v5985_v31 = vld [vmem:[%s15311_s10 + $0x1c48] sm:$0xff] }
 0x638   : > { %11521 = vmatpush1.bf16.msra.mxu0 %v14153_v19  ;;  %11849 = vmatpush1.bf16.msra.mxu1 %v14155_v26  ;;  %v14212_v19 = vcombine.high %v5937_v9, %v5941_v10  ;;  %v5944_v26 = vld [vmem:[%s15311_s10 + $0x1b00] sm:$0xff]  ;;  %v5989_v9 = vld [vmem:[%s15311_s10 + $0x1c68] sm:$0xff] }
 0x639   : > { %11522 = vmatprep.subr.bf16.mxu0 %v14162_v27  ;;  %11850 = vmatprep.subr.bf16.mxu1 %v14164_v28  ;;  %v5948_v27 = vld [vmem:[%s15311_s10 + $0x1b20] sm:$0xff]  ;;  %v5945_v28 = vld [vmem:[%s15311_s10 + $0x1b08] sm:$0xff] }
 0x63a   : > { %v14218_v34 = vcombine.high %v5944_v26, %v5948_v27  ;;  %v14217_v55 = vcombine.low %v5944_v26, %v5948_v27  ;;  %v14219_v40 = vcombine.low %v5945_v28, %v5949_v29  ;;  %v5063_v10 = vld [vmem:[#allocation2 + $0x78] sm:$0xff] }
 0x63b   : > { %v5992_v26 = vld [vmem:[%s15311_s10 + $0x1c80] sm:$0xff] }
 0x63c   : > { %11523 = vmatpush1.bf16.msra.mxu0 %v14161_v35  ;;  %11851 = vmatpush1.bf16.msra.mxu1 %v14163_v37  ;;  %v14220_v35 = vcombine.high %v5945_v28, %v5949_v29  ;;  %v5952_v37 = vld [vmem:[%s15311_s10 + $0x1b40] sm:$0xff]  ;;  %v15957_v28 = vpack.c.bf16 %v5063_v10, %v5063_v10  ;;  %v5993_v29 = vld [vmem:[%s15311_s10 + $0x1c88] sm:$0xff] }
 0x63d   : > { %11524 = vmatprep.subr.bf16.mxu0 %v14170_v44  ;;  %11852 = vmatprep.subr.bf16.mxu1 %v14172_v38  ;;  %v5956_v44 = vld [vmem:[%s15311_s10 + $0x1b60] sm:$0xff]  ;;  %v5953_v38 = vld [vmem:[%s15311_s10 + $0x1b48] sm:$0xff] }
 0x63e   : > { %v14226_v56 = vcombine.high %v5952_v37, %v5956_v44  ;;  %v14225_v47 = vcombine.low %v5952_v37, %v5956_v44  ;;  %v14227_v48 = vcombine.low %v5953_v38, %v5957_v39  ;;  %v5996_v27 = vld [vmem:[%s15311_s10 + $0x1ca0] sm:$0xff] }
 0x63f   : > { %v6000_v44 = vld [vmem:[%s15311_s10 + $0x1cc0] sm:$0xff] }
 0x640   : > { %11525 = vmatpush1.bf16.msra.mxu0 %v14169_v59  ;;  %11853 = vmatpush1.bf16.msra.mxu1 %v14171_v42  ;;  %v14228_v59 = vcombine.high %v5953_v38, %v5957_v39  ;;  %v5960_v42 = vld [vmem:[%s15311_s10 + $0x1b80] sm:$0xff]  ;;  %v6001_v39 = vld [vmem:[%s15311_s10 + $0x1cc8] sm:$0xff] }
 0x641   : > { %11526 = vmatprep.subr.bf16.mxu0 %v14178_v43  ;;  %11854 = vmatprep.subr.bf16.mxu1 %v14180_v45  ;;  %v5964_v43 = vld [vmem:[%s15311_s10 + $0x1ba0] sm:$0xff]  ;;  %v5961_v45 = vld [vmem:[%s15311_s10 + $0x1b88] sm:$0xff] }
 0x642   : > { %v14234_v11 = vcombine.high %v5960_v42, %v5964_v43  ;;  %v14233_v53 = vcombine.low %v5960_v42, %v5964_v43  ;;  %v14235_v21 = vcombine.low %v5961_v45, %v5965_v46  ;;  %v6004_v38 = vld [vmem:[%s15311_s10 + $0x1ce0] sm:$0xff] }
 0x643   : > { %v6008_v43 = vld [vmem:[%s15311_s10 + $0x1d00] sm:$0xff] }
 0x644   : > { %11527 = vmatpush1.bf16.msra.mxu0 %v14177_v50  ;;  %11855 = vmatpush1.bf16.msra.mxu1 %v14179_v15  ;;  %v14236_v50 = vcombine.high %v5961_v45, %v5965_v46  ;;  %v5968_v15 = vld [vmem:[%s15311_s10 + $0x1bc0] sm:$0xff]  ;;  %v6009_v46 = vld [vmem:[%s15311_s10 + $0x1d08] sm:$0xff] }
 0x645   : > { %11528 = vmatprep.subr.bf16.mxu0 %v14186_v52  ;;  %11856 = vmatprep.subr.bf16.mxu1 %v14188_v17  ;;  %v5972_v52 = vld [vmem:[%s15311_s10 + $0x1be0] sm:$0xff]  ;;  %v5969_v17 = vld [vmem:[%s15311_s10 + $0x1bc8] sm:$0xff] }
 0x646   : > { %v14242_v54 = vcombine.high %v5968_v15, %v5972_v52  ;;  %v14241_v0 = vcombine.low %v5968_v15, %v5972_v52  ;;  %v14243_v2 = vcombine.low %v5969_v17, %v5973_v20  ;;  %v6012_v45 = vld [vmem:[%s15311_s10 + $0x1d20] sm:$0xff] }
 0x647   : > { %v6016_v52 = vld [vmem:[%s15311_s10 + $0x1d40] sm:$0xff] }
 0x648   : > { %11529 = vmatpush1.bf16.msra.mxu0 %v14185_v57  ;;  %11857 = vmatpush1.bf16.msra.mxu1 %v14187_v60  ;;  %v14244_v57 = vcombine.high %v5969_v17, %v5973_v20  ;;  %v5976_v60 = vld [vmem:[%s15311_s10 + $0x1c00] sm:$0xff]  ;;  %v6017_v20 = vld [vmem:[%s15311_s10 + $0x1d48] sm:$0xff] }
 0x649   : > { %11530 = vmatprep.subr.bf16.mxu0 %v14194_v61  ;;  %11858 = vmatprep.subr.bf16.mxu1 %v14196_v62  ;;  %v5980_v61 = vld [vmem:[%s15311_s10 + $0x1c20] sm:$0xff]  ;;  %v5977_v62 = vld [vmem:[%s15311_s10 + $0x1c08] sm:$0xff] }
 0x64a   : > { %v6020_v17 = vld [vmem:[%s15311_s10 + $0x1d60] sm:$0xff] }
 0x64b   : > { %v14289_v1 = vcombine.low %v6016_v52, %v6020_v17 }
 0x64c   : > { %11531 = vmatpush1.bf16.msra.mxu0 %v14193_v24  ;;  %11859 = vmatpush1.bf16.msra.mxu1 %v14195_v3  ;;  %v14250_v24 = vcombine.high %v5976_v60, %v5980_v61  ;;  %v14252_v3 = vcombine.high %v5977_v62, %v5981_v63 }
 0x64d   : > { %11532 = vmatprep.subr.bf16.mxu0 %v14202_v5  ;;  %11860 = vmatprep.subr.bf16.mxu1 %v14204_v7  ;;  %v5984_v5 = vld [vmem:[%s15311_s10 + $0x1c40] sm:$0xff] }
 0x64e   : > { %v5988_v7 = vld [vmem:[%s15311_s10 + $0x1c60] sm:$0xff] }
 0x650   : > { %11533 = vmatpush1.bf16.msra.mxu0 %v14201_v12  ;;  %11861 = vmatpush1.bf16.msra.mxu1 %v14203_v16  ;;  %v14249_v12 = vcombine.low %v5976_v60, %v5980_v61  ;;  %v14251_v16 = vcombine.low %v5977_v62, %v5981_v63  ;;  %v6024_v61 = vld [vmem:[%s15311_s10 + $0x1d80] sm:$0xff]  ;;  %v6025_v63 = vld [vmem:[%s15311_s10 + $0x1d88] sm:$0xff] }
 0x651   : > { %11534 = vmatprep.subr.bf16.mxu0 %v14210_v18  ;;  %11862 = vmatprep.subr.bf16.mxu1 %v14212_v19  ;;  %v14258_v18 = vcombine.high %v5984_v5, %v5988_v7  ;;  %v14260_v19 = vcombine.high %v5985_v31, %v5989_v9  ;;  %v6028_v62 = vld [vmem:[%s15311_s10 + $0x1da0] sm:$0xff] }
 0x652   : > { %v14297_v10 = vcombine.low %v6024_v61, %v6028_v62 }
 0x654   : > { %11535 = vmatpush1.bf16.msra.mxu0 %v14209_v30  ;;  %11863 = vmatpush1.bf16.msra.mxu1 %v14211_v33  ;;  %v5997_v30 = vld [vmem:[%s15311_s10 + $0x1ca8] sm:$0xff]  ;;  %v14257_v33 = vcombine.low %v5984_v5, %v5988_v7  ;;  %v6032_v5 = vld [vmem:[%s15311_s10 + $0x1dc0] sm:$0xff] }
 0x655   : > { %11536 = vmatprep.subr.bf16.mxu0 %v14218_v34  ;;  %11864 = vmatprep.subr.bf16.mxu1 %v14220_v35  ;;  %v14259_v34 = vcombine.low %v5985_v31, %v5989_v9  ;;  %v14266_v35 = vcombine.high %v5992_v26, %v5996_v27  ;;  %v14268_v37 = vcombine.high %v5993_v29, %v5997_v30  ;;  %v6036_v7 = vld [vmem:[%s15311_s10 + $0x1de0] sm:$0xff]  ;;  %v6033_v31 = vld [vmem:[%s15311_s10 + $0x1dc8] sm:$0xff] }
 0x656   : > { %v6037_v9 = vld [vmem:[%s15311_s10 + $0x1de8] sm:$0xff] }
 0x658   : > { %11537 = vmatpush1.bf16.msra.mxu0 %v14217_v55  ;;  %11865 = vmatpush1.bf16.msra.mxu1 %v14219_v40  ;;  %v6005_v55 = vld [vmem:[%s15311_s10 + $0x1ce8] sm:$0xff]  ;;  %v14265_v40 = vcombine.low %v5992_v26, %v5996_v27  ;;  %v6044_v26 = vld [vmem:[%s15311_s10 + $0x1e20] sm:$0xff] }
 0x659   : > { %11538 = vmatprep.subr.bf16.mxu0 %v14226_v56  ;;  %11866 = vmatprep.subr.bf16.mxu1 %v14228_v59  ;;  %v14267_v56 = vcombine.low %v5993_v29, %v5997_v30  ;;  %v14274_v59 = vcombine.high %v6000_v44, %v6004_v38  ;;  %v14276_v42 = vcombine.high %v6001_v39, %v6005_v55  ;;  %v6041_v27 = vld [vmem:[%s15311_s10 + $0x1e08] sm:$0xff] }
 0x65a   : > { %v6045_v29 = vld [vmem:[%s15311_s10 + $0x1e28] sm:$0xff]  ;;  %v14305_v30 = vcombine.low %v6032_v5, %v6036_v7 }
 0x65c   : > { %11539 = vmatpush1.bf16.msra.mxu0 %v14225_v47  ;;  %11867 = vmatpush1.bf16.msra.mxu1 %v14227_v48  ;;  %v6013_v47 = vld [vmem:[%s15311_s10 + $0x1d28] sm:$0xff]  ;;  %v14273_v48 = vcombine.low %v6000_v44, %v6004_v38  ;;  %v6052_v44 = vld [vmem:[%s15311_s10 + $0x1e60] sm:$0xff] }
 0x65d   : > { %11540 = vmatprep.subr.bf16.mxu0 %v14234_v11  ;;  %11868 = vmatprep.subr.bf16.mxu1 %v14236_v50  ;;  %v14275_v11 = vcombine.low %v6001_v39, %v6005_v55  ;;  %v14282_v50 = vcombine.high %v6008_v43, %v6012_v45  ;;  %v14284_v15 = vcombine.high %v6009_v46, %v6013_v47  ;;  %v6049_v38 = vld [vmem:[%s15311_s10 + $0x1e48] sm:$0xff] }
 0x65e   : > { %v6053_v39 = vld [vmem:[%s15311_s10 + $0x1e68] sm:$0xff] }
 0x660   : > { %11541 = vmatpush1.bf16.msra.mxu0 %v14233_v53  ;;  %11869 = vmatpush1.bf16.msra.mxu1 %v14235_v21  ;;  %v6021_v53 = vld [vmem:[%s15311_s10 + $0x1d68] sm:$0xff]  ;;  %v14281_v21 = vcombine.low %v6008_v43, %v6012_v45  ;;  %v6060_v43 = vld [vmem:[%s15311_s10 + $0x1ea0] sm:$0xff] }
 0x661   : > { %11542 = vmatprep.subr.bf16.mxu0 %v14242_v54  ;;  %11870 = vmatprep.subr.bf16.mxu1 %v14244_v57  ;;  %v14283_v54 = vcombine.low %v6009_v46, %v6013_v47  ;;  %v14290_v57 = vcombine.high %v6016_v52, %v6020_v17  ;;  %v14292_v60 = vcombine.high %v6017_v20, %v6021_v53  ;;  %v6057_v45 = vld [vmem:[%s15311_s10 + $0x1e88] sm:$0xff]  ;;  %v6068_v52 = vld [vmem:[%s15311_s10 + $0x1ee0] sm:$0xff] }
 0x662   : > { %v6061_v46 = vld [vmem:[%s15311_s10 + $0x1ea8] sm:$0xff] }
 0x663   : > { %v6065_v17 = vld [vmem:[%s15311_s10 + $0x1ec8] sm:$0xff] }
 0x664   : > { %11543 = vmatpush1.bf16.msra.mxu0 %v14241_v0  ;;  %11871 = vmatpush1.bf16.msra.mxu1 %v14243_v2  ;;  %v6029_v0 = vld [vmem:[%s15311_s10 + $0x1da8] sm:$0xff]  ;;  %v14291_v2 = vcombine.low %v6017_v20, %v6021_v53 }
 0x665   : > { %11553 = vmatprep.subr.bf16.mxu0 %v14250_v24  ;;  %11881 = vmatprep.subr.bf16.mxu1 %v14252_v3  ;;  %v14298_v24 = vcombine.high %v6024_v61, %v6028_v62  ;;  %v14300_v3 = vcombine.high %v6025_v63, %v6029_v0  ;;  %v6069_v20 = vld [vmem:[%s15311_s10 + $0x1ee8] sm:$0xff]  ;;  %v6076_v61 = vld [vmem:[%s15311_s10 + $0x1f20] sm:$0xff] }
 0x666   : > { %v6073_v62 = vld [vmem:[%s15311_s10 + $0x1f08] sm:$0xff] }
 0x667   : > { %11545 = vmatmul.mubr.bf16.vlgmr.msra.gmra.mrb[0].mxu0 %v15951_v8  ;;  %11873 = vmatmul.mubr.bf16.vlgmr.msra.gmra.mrb[0].mxu1 %v15951_v8 }
 0x668   : > { %11554 = vmatpush1.bf16.msra.mxu0 %v14249_v12  ;;  %11882 = vmatpush1.bf16.msra.mxu1 %v14251_v16  ;;  %v14299_v12 = vcombine.low %v6025_v63, %v6029_v0  ;;  %v14306_v16 = vcombine.high %v6032_v5, %v6036_v7  ;;  %v6077_v63 = vld [vmem:[%s15311_s10 + $0x1f28] sm:$0xff]  ;;  %v6084_v5 = vld [vmem:[%s15311_s10 + $0x1f60] sm:$0xff] }
 0x669   : > { %11555 = vmatprep.subr.bf16.mxu0 %v14258_v18  ;;  %11883 = vmatprep.subr.bf16.mxu1 %v14260_v19  ;;  %v14308_v18 = vcombine.high %v6033_v31, %v6037_v9  ;;  %v6040_v19 = vld [vmem:[%s15311_s10 + $0x1e00] sm:$0xff]  ;;  %v6081_v7 = vld [vmem:[%s15311_s10 + $0x1f48] sm:$0xff] }
 0x66a   : > { %11585 = vmatprep.mubr.bf16.mxu0 %v15957_v28  ;;  %11913 = vmatprep.mubr.bf16.mxu1 %v15957_v28  ;;  %v14313_v55 = vcombine.low %v6040_v19, %v6044_v26 }
 0x66c   : > { %11556 = vmatpush1.bf16.msra.mxu0 %v14257_v33  ;;  %11884 = vmatpush1.bf16.msra.mxu1 %v14259_v34  ;;  %v14307_v33 = vcombine.low %v6033_v31, %v6037_v9  ;;  %v14314_v34 = vcombine.high %v6040_v19, %v6044_v26  ;;  %v6085_v31 = vld [vmem:[%s15311_s10 + $0x1f68] sm:$0xff]  ;;  %v6092_v19 = vld [vmem:[%s15311_s10 + $0x1fa0] sm:$0xff] }
 0x66d   : > { %11557 = vmatprep.subr.bf16.mxu0 %v14266_v35  ;;  %11885 = vmatprep.subr.bf16.mxu1 %v14268_v37  ;;  %v14316_v35 = vcombine.high %v6041_v27, %v6045_v29  ;;  %v6048_v37 = vld [vmem:[%s15311_s10 + $0x1e40] sm:$0xff]  ;;  %v6089_v26 = vld [vmem:[%s15311_s10 + $0x1f88] sm:$0xff] }
 0x66e   : > { %v14321_v47 = vcombine.low %v6048_v37, %v6052_v44 }
 0x670   : > { %11558 = vmatpush1.bf16.msra.mxu0 %v14265_v40  ;;  %11886 = vmatpush1.bf16.msra.mxu1 %v14267_v56  ;;  %v14315_v40 = vcombine.low %v6041_v27, %v6045_v29  ;;  %v14322_v56 = vcombine.high %v6048_v37, %v6052_v44  ;;  %v6093_v27 = vld [vmem:[%s15311_s10 + $0x1fa8] sm:$0xff]  ;;  %v6100_v37 = vld [vmem:[%s15311_s10 + $0x1fe0] sm:$0xff] }
 0x671   : > { %11559 = vmatprep.subr.bf16.mxu0 %v14274_v59  ;;  %11887 = vmatprep.subr.bf16.mxu1 %v14276_v42  ;;  %v14324_v59 = vcombine.high %v6049_v38, %v6053_v39  ;;  %v6056_v42 = vld [vmem:[%s15311_s10 + $0x1e80] sm:$0xff]  ;;  %v6097_v44 = vld [vmem:[%s15311_s10 + $0x1fc8] sm:$0xff] }
 0x672   : > { %v14329_v53 = vcombine.low %v6056_v42, %v6060_v43 }
 0x674   : > { %11560 = vmatpush1.bf16.msra.mxu0 %v14273_v48  ;;  %11888 = vmatpush1.bf16.msra.mxu1 %v14275_v11  ;;  %v14323_v48 = vcombine.low %v6049_v38, %v6053_v39  ;;  %v14330_v11 = vcombine.high %v6056_v42, %v6060_v43  ;;  %v6101_v38 = vld [vmem:[%s15311_s10 + $0x1fe8] sm:$0xff]  ;;  %v5086_v42 = vld [vmem:[%s15311_s10 + $0x30] sm:$0xff]  ;;  %v5083_v43 = vld [vmem:[%s15311_s10 + $0x18] sm:$0xff] }
 0x675   : > { %11561 = vmatprep.subr.bf16.mxu0 %v14282_v50  ;;  %11889 = vmatprep.subr.bf16.mxu1 %v14284_v15  ;;  %v14332_v50 = vcombine.high %v6057_v45, %v6061_v46  ;;  %v6064_v15 = vld [vmem:[%s15311_s10 + $0x1ec0] sm:$0xff] }
 0x676   : > { %v14337_v0 = vcombine.low %v6064_v15, %v6068_v52 }
 0x678   : > { %11562 = vmatpush1.bf16.msra.mxu0 %v14281_v21  ;;  %11890 = vmatpush1.bf16.msra.mxu1 %v14283_v54  ;;  %v14331_v21 = vcombine.low %v6057_v45, %v6061_v46  ;;  %v14338_v54 = vcombine.high %v6064_v15, %v6068_v52  ;;  %v5087_v45 = vld [vmem:[%s15311_s10 + $0x38] sm:$0xff]  ;;  %v5090_v15 = vld [vmem:[%s15311_s10 + $0x50] sm:$0xff] }
 0x679   : > { %11563 = vmatprep.subr.bf16.mxu0 %v14290_v57  ;;  %11891 = vmatprep.subr.bf16.mxu1 %v14292_v60  ;;  %v14340_v57 = vcombine.high %v6065_v17, %v6069_v20  ;;  %v6072_v60 = vld [vmem:[%s15311_s10 + $0x1f00] sm:$0xff]  ;;  %v5094_v52 = vld [vmem:[%s15311_s10 + $0x70] sm:$0xff] }
 0x67a   : > { %v14345_v9 = vcombine.low %v6072_v60, %v6076_v61 }
 0x67c   : > { %11564 = vmatpush1.bf16.msra.mxu0 %v14289_v1  ;;  %11892 = vmatpush1.bf16.msra.mxu1 %v14291_v2  ;;  %v14339_v1 = vcombine.low %v6065_v17, %v6069_v20  ;;  %v14346_v2 = vcombine.high %v6072_v60, %v6076_v61  ;;  %v5091_v20 = vld [vmem:[%s15311_s10 + $0x58] sm:$0xff]  ;;  %v5098_v61 = vld [vmem:[%s15311_s10 + $0x90] sm:$0xff] }
 0x67d   : > { %11565 = vmatprep.subr.bf16.mxu0 %v14298_v24  ;;  %11893 = vmatprep.subr.bf16.mxu1 %v14300_v3  ;;  %v14348_v24 = vcombine.high %v6073_v62, %v6077_v63  ;;  %v6080_v3 = vld [vmem:[%s15311_s10 + $0x1f40] sm:$0xff] }
 0x67e   : > { %v14353_v29 = vcombine.low %v6080_v3, %v6084_v5 }
 0x680   : > { %11566 = vmatpush1.bf16.msra.mxu0 %v14297_v10  ;;  %11894 = vmatpush1.bf16.msra.mxu1 %v14299_v12  ;;  %v14347_v10 = vcombine.low %v6073_v62, %v6077_v63  ;;  %v14354_v12 = vcombine.high %v6080_v3, %v6084_v5  ;;  %v5102_v62 = vld [vmem:[%s15311_s10 + $0xb0] sm:$0xff]  ;;  %v5099_v63 = vld [vmem:[%s15311_s10 + $0x98] sm:$0xff] }
 0x681   : > { %11567 = vmatprep.subr.bf16.mxu0 %v14306_v16  ;;  %11895 = vmatprep.subr.bf16.mxu1 %v14308_v18  ;;  %v14356_v16 = vcombine.high %v6081_v7, %v6085_v31  ;;  %v6088_v18 = vld [vmem:[%s15311_s10 + $0x1f80] sm:$0xff]  ;;  %v5106_v5 = vld [vmem:[%s15311_s10 + $0xd0] sm:$0xff] }
 0x682   : > { %v14361_v39 = vcombine.low %v6088_v18, %v6092_v19 }
 0x684   : > { %11568 = vmatpush1.bf16.msra.mxu0 %v14305_v30  ;;  %11896 = vmatpush1.bf16.msra.mxu1 %v14307_v33  ;;  %v14355_v30 = vcombine.low %v6081_v7, %v6085_v31  ;;  %v14362_v33 = vcombine.high %v6088_v18, %v6092_v19  ;;  %v5110_v7 = vld [vmem:[%s15311_s10 + $0xf0] sm:$0xff]  ;;  %v5107_v31 = vld [vmem:[%s15311_s10 + $0xd8] sm:$0xff] }
 0x685   : > { %11569 = vmatprep.subr.bf16.mxu0 %v14314_v34  ;;  %11897 = vmatprep.subr.bf16.mxu1 %v14316_v35  ;;  %v14364_v34 = vcombine.high %v6089_v26, %v6093_v27  ;;  %v6096_v35 = vld [vmem:[%s15311_s10 + $0x1fc0] sm:$0xff]  ;;  %v5114_v19 = vld [vmem:[%s15311_s10 + $0x110] sm:$0xff] }
 0x686   : > { %v14369_v46 = vcombine.low %v6096_v35, %v6100_v37 }
 0x688   : > { %11570 = vmatpush1.bf16.msra.mxu0 %v14313_v55  ;;  %11898 = vmatpush1.bf16.msra.mxu1 %v14315_v40  ;;  %v14363_v55 = vcombine.low %v6089_v26, %v6093_v27  ;;  %v14370_v40 = vcombine.high %v6096_v35, %v6100_v37  ;;  %v5118_v26 = vld [vmem:[%s15311_s10 + $0x130] sm:$0xff]  ;;  %v5115_v27 = vld [vmem:[%s15311_s10 + $0x118] sm:$0xff] }
 0x689   : > { %11571 = vmatprep.subr.bf16.mxu0 %v14322_v56  ;;  %11899 = vmatprep.subr.bf16.mxu1 %v14324_v59  ;;  %v14372_v56 = vcombine.high %v6097_v44, %v6101_v38  ;;  %v5082_v59 = vld [vmem:[%s15311_s10 + $0x10] sm:$0xff] }
 0x68a   : > { %v5122_v35 = vld [vmem:[%s15311_s10 + $0x150] sm:$0xff] }
 0x68b   : > { %v5126_v37 = vld [vmem:[%s15311_s10 + $0x170] sm:$0xff] }
 0x68c   : > { %11572 = vmatpush1.bf16.msra.mxu0 %v14321_v47  ;;  %11900 = vmatpush1.bf16.msra.mxu1 %v14323_v48  ;;  %v5062_v47 = vld [vmem:[#allocation2 + $0x70] sm:$0xff]  ;;  %v14371_v48 = vcombine.low %v6097_v44, %v6101_v38 }
 0x68d   : > { %11573 = vmatprep.subr.bf16.mxu0 %v14330_v11  ;;  %11901 = vmatprep.subr.bf16.mxu1 %v14332_v50  ;;  %v13358_v11 = vcombine.high %v5082_v59, %v5086_v42  ;;  %v13360_v50 = vcombine.high %v5083_v43, %v5087_v45  ;;  %v16023_v17 = vpack.c.bf16 %v5062_v47, %v5062_v47  ;;  %v5123_v44 = vld [vmem:[%s15311_s10 + $0x158] sm:$0xff] }
 0x68e   : > { %v5127_v38 = vld [vmem:[%s15311_s10 + $0x178] sm:$0xff] }
 0x68f   : > { %v13399_v47 = vcombine.low %v5123_v44, %v5127_v38 }
 0x690   : > { %11574 = vmatpush1.bf16.msra.mxu0 %v14329_v53  ;;  %11902 = vmatpush1.bf16.msra.mxu1 %v14331_v21  ;;  %v5095_v53 = vld [vmem:[%s15311_s10 + $0x78] sm:$0xff]  ;;  %v13357_v21 = vcombine.low %v5082_v59, %v5086_v42  ;;  %v5130_v59 = vld [vmem:[%s15311_s10 + $0x190] sm:$0xff] }
 0x691   : > { %11575 = vmatprep.subr.bf16.mxu0 %v14338_v54  ;;  %11903 = vmatprep.subr.bf16.mxu1 %v14340_v57  ;;  %v13359_v54 = vcombine.low %v5083_v43, %v5087_v45  ;;  %v13366_v57 = vcombine.high %v5090_v15, %v5094_v52  ;;  %v13368_v60 = vcombine.high %v5091_v20, %v5095_v53  ;;  %v5134_v42 = vld [vmem:[%s15311_s10 + $0x1b0] sm:$0xff]  ;;  %v5131_v43 = vld [vmem:[%s15311_s10 + $0x198] sm:$0xff] }
 0x692   : > { %v5135_v45 = vld [vmem:[%s15311_s10 + $0x1b8] sm:$0xff] }
 0x694   : > { %11576 = vmatpush1.bf16.msra.mxu0 %v14337_v0  ;;  %11904 = vmatpush1.bf16.msra.mxu1 %v14339_v1  ;;  %v5103_v0 = vld [vmem:[%s15311_s10 + $0xb8] sm:$0xff]  ;;  %v13365_v1 = vcombine.low %v5090_v15, %v5094_v52  ;;  %v5142_v15 = vld [vmem:[%s15311_s10 + $0x1f0] sm:$0xff] }
 0x695   : > { %11577 = vmatprep.subr.bf16.mxu0 %v14346_v2  ;;  %11905 = vmatprep.subr.bf16.mxu1 %v14348_v24  ;;  %v13367_v2 = vcombine.low %v5091_v20, %v5095_v53  ;;  %v13374_v24 = vcombine.high %v5098_v61, %v5102_v62  ;;  %v13376_v3 = vcombine.high %v5099_v63, %v5103_v0  ;;  %v5139_v52 = vld [vmem:[%s15311_s10 + $0x1d8] sm:$0xff] }
 0x696   : > { %v5143_v20 = vld [vmem:[%s15311_s10 + $0x1f8] sm:$0xff]  ;;  %v13405_v53 = vcombine.low %v5130_v59, %v5134_v42 }
 0x698   : > { %11578 = vmatpush1.bf16.msra.mxu0 %v14345_v9  ;;  %11906 = vmatpush1.bf16.msra.mxu1 %v14347_v10  ;;  %v5111_v9 = vld [vmem:[%s15311_s10 + $0xf8] sm:$0xff]  ;;  %v13373_v10 = vcombine.low %v5098_v61, %v5102_v62  ;;  %v5150_v61 = vld [vmem:[%s15311_s10 + $0x230] sm:$0xff] }
 0x699   : > { %11579 = vmatprep.subr.bf16.mxu0 %v14354_v12  ;;  %11907 = vmatprep.subr.bf16.mxu1 %v14356_v16  ;;  %v13375_v12 = vcombine.low %v5099_v63, %v5103_v0  ;;  %v13382_v16 = vcombine.high %v5106_v5, %v5110_v7  ;;  %v13384_v18 = vcombine.high %v5107_v31, %v5111_v9  ;;  %v5147_v62 = vld [vmem:[%s15311_s10 + $0x218] sm:$0xff] }
 0x69a   : > { %v5151_v63 = vld [vmem:[%s15311_s10 + $0x238] sm:$0xff] }
 0x69c   : > { %11580 = vmatpush1.bf16.msra.mxu0 %v14353_v29  ;;  %11908 = vmatpush1.bf16.msra.mxu1 %v14355_v30  ;;  %v5119_v29 = vld [vmem:[%s15311_s10 + $0x138] sm:$0xff]  ;;  %v13381_v30 = vcombine.low %v5106_v5, %v5110_v7  ;;  %v5158_v5 = vld [vmem:[%s15311_s10 + $0x270] sm:$0xff] }
 0x69d   : > { %11581 = vmatprep.subr.bf16.mxu0 %v14362_v33  ;;  %11909 = vmatprep.subr.bf16.mxu1 %v14364_v34  ;;  %v13390_v33 = vcombine.high %v5114_v19, %v5118_v26  ;;  %v13392_v34 = vcombine.high %v5115_v27, %v5119_v29  ;;  %v5155_v7 = vld [vmem:[%s15311_s10 + $0x258] sm:$0xff] }
 0x6a0   : > { %11582 = vmatpush1.bf16.msra.mxu0 %v14361_v39  ;;  %11910 = vmatpush1.bf16.msra.mxu1 %v14363_v55  ;;  %v13389_v39 = vcombine.low %v5114_v19, %v5118_v26  ;;  %v13391_v55 = vcombine.low %v5115_v27, %v5119_v29  ;;  %v5166_v19 = vld [vmem:[%s15311_s10 + $0x2b0] sm:$0xff]  ;;  %v5163_v26 = vld [vmem:[%s15311_s10 + $0x298] sm:$0xff] }
 0x6a1   : > { %11583 = vmatprep.subr.bf16.mxu0 %v14370_v40  ;;  %11911 = vmatprep.subr.bf16.mxu1 %v14372_v56  ;;  %v13398_v40 = vcombine.high %v5122_v35, %v5126_v37  ;;  %v13400_v56 = vcombine.high %v5123_v44, %v5127_v38  ;;  %v5167_v27 = vld [vmem:[%s15311_s10 + $0x2b8] sm:$0xff] }
 0x6a2   : > { %v5175_v44 = vld [vmem:[%s15311_s10 + $0x2f8] sm:$0xff] }
 0x6a4   : > { %11584 = vmatpush1.bf16.msra.mxu0 %v14369_v46  ;;  %11912 = vmatpush1.bf16.msra.mxu1 %v14371_v48  ;;  %v13397_v46 = vcombine.low %v5122_v35, %v5126_v37  ;;  %v13406_v48 = vcombine.high %v5130_v59, %v5134_v42  ;;  %v5174_v35 = vld [vmem:[%s15311_s10 + $0x2f0] sm:$0xff]  ;;  %v5171_v37 = vld [vmem:[%s15311_s10 + $0x2d8] sm:$0xff] }
 0x6a5   : > { %11922 = vmatprep.subr.bf16.mxu0 %v13358_v11  ;;  %12250 = vmatprep.subr.bf16.mxu1 %v13360_v50  ;;  %v13408_v11 = vcombine.high %v5131_v43, %v5135_v45  ;;  %v5138_v50 = vld [vmem:[%s15311_s10 + $0x1d0] sm:$0xff]  ;;  %v5179_v42 = vld [vmem:[%s15311_s10 + $0x318] sm:$0xff] }
 0x6a6   : > { %v13413_v0 = vcombine.low %v5138_v50, %v5142_v15  ;;  %v5182_v59 = vld [vmem:[%s15311_s10 + $0x330] sm:$0xff] }
 0x6a7   : > { %11586 = vmatmul.mubr.bf16.vlgmr.msra.gmra.mrb[0].mxu0 %v16023_v17  ;;  %11914 = vmatmul.mubr.bf16.vlgmr.msra.gmra.mrb[0].mxu1 %v16023_v17 }
 0x6a8   : > { %11923 = vmatpush1.bf16.msra.mxu0 %v13357_v21  ;;  %12251 = vmatpush1.bf16.msra.mxu1 %v13359_v54  ;;  %v13407_v21 = vcombine.low %v5131_v43, %v5135_v45  ;;  %v13414_v54 = vcombine.high %v5138_v50, %v5142_v15  ;;  %v5183_v43 = vld [vmem:[%s15311_s10 + $0x338] sm:$0xff]  ;;  %v5190_v50 = vld [vmem:[%s15311_s10 + $0x370] sm:$0xff] }
 0x6a9   : > { %11924 = vmatprep.subr.bf16.mxu0 %v13366_v57  ;;  %12252 = vmatprep.subr.bf16.mxu1 %v13368_v60  ;;  %v13416_v57 = vcombine.high %v5139_v52, %v5143_v20  ;;  %v5146_v60 = vld [vmem:[%s15311_s10 + $0x210] sm:$0xff]  ;;  %v5187_v15 = vld [vmem:[%s15311_s10 + $0x358] sm:$0xff] }
 0x6aa   : > { %11954 = vmatprep.mubr.bf16.mxu0 %v15475_v23  ;;  %12282 = vmatprep.mubr.bf16.mxu1 %v15475_v23  ;;  %v13383_v23 = vcombine.low %v5107_v31, %v5111_v9  ;;  %v5159_v31 = vld [vmem:[%s15311_s10 + $0x278] sm:$0xff]  ;;  %v13421_v9 = vcombine.low %v5146_v60, %v5150_v61 }
 0x6ac   : > { %11925 = vmatpush1.bf16.msra.mxu0 %v13365_v1  ;;  %12253 = vmatpush1.bf16.msra.mxu1 %v13367_v2  ;;  %v13415_v1 = vcombine.low %v5139_v52, %v5143_v20  ;;  %v13422_v2 = vcombine.high %v5146_v60, %v5150_v61  ;;  %v5191_v52 = vld [vmem:[%s15311_s10 + $0x378] sm:$0xff]  ;;  %v5198_v60 = vld [vmem:[%s15311_s10 + $0x3b0] sm:$0xff] }
 0x6ad   : > { %11926 = vmatprep.subr.bf16.mxu0 %v13374_v24  ;;  %12254 = vmatprep.subr.bf16.mxu1 %v13376_v3  ;;  %v13424_v24 = vcombine.high %v5147_v62, %v5151_v63  ;;  %v5154_v3 = vld [vmem:[%s15311_s10 + $0x250] sm:$0xff]  ;;  %v5195_v61 = vld [vmem:[%s15311_s10 + $0x398] sm:$0xff] }
 0x6ae   : > { %v13429_v29 = vcombine.low %v5154_v3, %v5158_v5 }
 0x6b0   : > { %11927 = vmatpush1.bf16.msra.mxu0 %v13373_v10  ;;  %12255 = vmatpush1.bf16.msra.mxu1 %v13375_v12  ;;  %v13423_v10 = vcombine.low %v5147_v62, %v5151_v63  ;;  %v13430_v12 = vcombine.high %v5154_v3, %v5158_v5  ;;  %v5199_v62 = vld [vmem:[%s15311_s10 + $0x3b8] sm:$0xff]  ;;  %v5206_v3 = vld [vmem:[%s15311_s10 + $0x3f0] sm:$0xff] }
 0x6b1   : > { %11928 = vmatprep.subr.bf16.mxu0 %v13382_v16  ;;  %12256 = vmatprep.subr.bf16.mxu1 %v13384_v18  ;;  %v13432_v16 = vcombine.high %v5155_v7, %v5159_v31  ;;  %v5162_v18 = vld [vmem:[%s15311_s10 + $0x290] sm:$0xff]  ;;  %v5203_v5 = vld [vmem:[%s15311_s10 + $0x3d8] sm:$0xff] }
 0x6b2   : > { %v13437_v38 = vcombine.low %v5162_v18, %v5166_v19 }
 0x6b4   : > { %11929 = vmatpush1.bf16.msra.mxu0 %v13381_v30  ;;  %12257 = vmatpush1.bf16.msra.mxu1 %v13383_v23  ;;  %v13431_v30 = vcombine.low %v5155_v7, %v5159_v31  ;;  %v13438_v23 = vcombine.high %v5162_v18, %v5166_v19  ;;  %v5207_v7 = vld [vmem:[%s15311_s10 + $0x3f8] sm:$0xff]  ;;  %v5214_v18 = vld [vmem:[%s15311_s10 + $0x430] sm:$0xff] }
 0x6b5   : > { %11930 = vmatprep.subr.bf16.mxu0 %v13390_v33  ;;  %12258 = vmatprep.subr.bf16.mxu1 %v13392_v34  ;;  %v13440_v33 = vcombine.high %v5163_v26, %v5167_v27  ;;  %v5170_v34 = vld [vmem:[%s15311_s10 + $0x2d0] sm:$0xff]  ;;  %v5211_v19 = vld [vmem:[%s15311_s10 + $0x418] sm:$0xff] }
 0x6b6   : > { %v13445_v45 = vcombine.low %v5170_v34, %v5174_v35 }
 0x6b8   : > { %11931 = vmatpush1.bf16.msra.mxu0 %v13389_v39  ;;  %12259 = vmatpush1.bf16.msra.mxu1 %v13391_v55  ;;  %v13439_v39 = vcombine.low %v5163_v26, %v5167_v27  ;;  %v13446_v55 = vcombine.high %v5170_v34, %v5174_v35  ;;  %v5215_v26 = vld [vmem:[%s15311_s10 + $0x438] sm:$0xff]  ;;  %v5222_v34 = vld [vmem:[%s15311_s10 + $0x470] sm:$0xff] }
 0x6b9   : > { %11932 = vmatprep.subr.bf16.mxu0 %v13398_v40  ;;  %12260 = vmatprep.subr.bf16.mxu1 %v13400_v56  ;;  %v13448_v40 = vcombine.high %v5171_v37, %v5175_v44  ;;  %v5178_v56 = vld [vmem:[%s15311_s10 + $0x310] sm:$0xff]  ;;  %v5219_v35 = vld [vmem:[%s15311_s10 + $0x458] sm:$0xff] }
 0x6ba   : > { %v13453_v20 = vcombine.low %v5178_v56, %v5182_v59 }
 0x6bc   : > { %11933 = vmatpush1.bf16.msra.mxu0 %v13397_v46  ;;  %12261 = vmatpush1.bf16.msra.mxu1 %v13399_v47  ;;  %v13447_v46 = vcombine.low %v5171_v37, %v5175_v44  ;;  %v13454_v47 = vcombine.high %v5178_v56, %v5182_v59  ;;  %v5223_v37 = vld [vmem:[%s15311_s10 + $0x478] sm:$0xff]  ;;  %v5230_v56 = vld [vmem:[%s15311_s10 + $0x4b0] sm:$0xff] }
 0x6bd   : > { %11934 = vmatprep.subr.bf16.mxu0 %v13406_v48  ;;  %12262 = vmatprep.subr.bf16.mxu1 %v13408_v11  ;;  %v13456_v48 = vcombine.high %v5179_v42, %v5183_v43  ;;  %v5186_v11 = vld [vmem:[%s15311_s10 + $0x350] sm:$0xff]  ;;  %v5227_v59 = vld [vmem:[%s15311_s10 + $0x498] sm:$0xff] }
 0x6be   : > { %v13461_v63 = vcombine.low %v5186_v11, %v5190_v50 }
 0x6c0   : > { %11935 = vmatpush1.bf16.msra.mxu0 %v13405_v53  ;;  %12263 = vmatpush1.bf16.msra.mxu1 %v13407_v21  ;;  %v13455_v53 = vcombine.low %v5179_v42, %v5183_v43  ;;  %v13462_v21 = vcombine.high %v5186_v11, %v5190_v50  ;;  %v5231_v42 = vld [vmem:[%s15311_s10 + $0x4b8] sm:$0xff]  ;;  %v5238_v11 = vld [vmem:[%s15311_s10 + $0x4f0] sm:$0xff] }
 0x6c1   : > { %11936 = vmatprep.subr.bf16.mxu0 %v13414_v54  ;;  %12264 = vmatprep.subr.bf16.mxu1 %v13416_v57  ;;  %v13464_v54 = vcombine.high %v5187_v15, %v5191_v52  ;;  %v5194_v57 = vld [vmem:[%s15311_s10 + $0x390] sm:$0xff]  ;;  %v5235_v50 = vld [vmem:[%s15311_s10 + $0x4d8] sm:$0xff] }
 0x6c2   : > { %v13469_v31 = vcombine.low %v5194_v57, %v5198_v60 }
 0x6c4   : > { %11937 = vmatpush1.bf16.msra.mxu0 %v13413_v0  ;;  %12265 = vmatpush1.bf16.msra.mxu1 %v13415_v1  ;;  %v13463_v0 = vcombine.low %v5187_v15, %v5191_v52  ;;  %v13470_v1 = vcombine.high %v5194_v57, %v5198_v60  ;;  %v5239_v15 = vld [vmem:[%s15311_s10 + $0x4f8] sm:$0xff]  ;;  %v13503_v52 = vcombine.low %v5227_v59, %v5231_v42 }
 0x6c5   : > { %11938 = vmatprep.subr.bf16.mxu0 %v13422_v2  ;;  %12266 = vmatprep.subr.bf16.mxu1 %v13424_v24  ;;  %v13472_v2 = vcombine.high %v5195_v61, %v5199_v62  ;;  %v5202_v24 = vld [vmem:[%s15311_s10 + $0x3d0] sm:$0xff]  ;;  %v5243_v57 = vld [vmem:[%s15311_s10 + $0x518] sm:$0xff] }
 0x6c6   : > { %v13477_v27 = vcombine.low %v5202_v24, %v5206_v3  ;;  %v5247_v60 = vld [vmem:[%s15311_s10 + $0x538] sm:$0xff] }
 0x6c8   : > { %11939 = vmatpush1.bf16.msra.mxu0 %v13421_v9  ;;  %12267 = vmatpush1.bf16.msra.mxu1 %v13423_v10  ;;  %v13471_v9 = vcombine.low %v5195_v61, %v5199_v62  ;;  %v13478_v10 = vcombine.high %v5202_v24, %v5206_v3  ;;  %v5255_v24 = vld [vmem:[%s15311_s10 + $0x578] sm:$0xff] }
 0x6c9   : > { %11940 = vmatprep.subr.bf16.mxu0 %v13430_v12  ;;  %12268 = vmatprep.subr.bf16.mxu1 %v13432_v16  ;;  %v13480_v12 = vcombine.high %v5203_v5, %v5207_v7  ;;  %v5210_v16 = vld [vmem:[%s15311_s10 + $0x410] sm:$0xff] }
 0x6ca   : > { %v13485_v44 = vcombine.low %v5210_v16, %v5214_v18 }
 0x6cc   : > { %11941 = vmatpush1.bf16.msra.mxu0 %v13429_v29  ;;  %12269 = vmatpush1.bf16.msra.mxu1 %v13431_v30  ;;  %v13479_v29 = vcombine.low %v5203_v5, %v5207_v7  ;;  %v13486_v30 = vcombine.high %v5210_v16, %v5214_v18  ;;  %v13519_v5 = vcombine.low %v5243_v57, %v5247_v60  ;;  %v5263_v16 = vld [vmem:[%s15311_s10 + $0x5b8] sm:$0xff] }
 0x6cd   : > { %11942 = vmatprep.subr.bf16.mxu0 %v13438_v23  ;;  %12270 = vmatprep.subr.bf16.mxu1 %v13440_v33  ;;  %v13488_v23 = vcombine.high %v5211_v19, %v5215_v26  ;;  %v5218_v33 = vld [vmem:[%s15311_s10 + $0x450] sm:$0xff] }
 0x6ce   : > { %v13493_v43 = vcombine.low %v5218_v33, %v5222_v34 }
 0x6d0   : > { %11943 = vmatpush1.bf16.msra.mxu0 %v13437_v38  ;;  %12271 = vmatpush1.bf16.msra.mxu1 %v13439_v39  ;;  %v13487_v38 = vcombine.low %v5211_v19, %v5215_v26  ;;  %v13494_v39 = vcombine.high %v5218_v33, %v5222_v34  ;;  %v5271_v33 = vld [vmem:[%s15311_s10 + $0x5f8] sm:$0xff] }
 0x6d1   : > { %11944 = vmatprep.subr.bf16.mxu0 %v13446_v55  ;;  %12272 = vmatprep.subr.bf16.mxu1 %v13448_v40  ;;  %v13496_v55 = vcombine.high %v5219_v35, %v5223_v37  ;;  %v5226_v40 = vld [vmem:[%s15311_s10 + $0x490] sm:$0xff] }
 0x6d4   : > { %11945 = vmatpush1.bf16.msra.mxu0 %v13445_v45  ;;  %12273 = vmatpush1.bf16.msra.mxu1 %v13447_v46  ;;  %v13495_v45 = vcombine.low %v5219_v35, %v5223_v37  ;;  %v13502_v46 = vcombine.high %v5226_v40, %v5230_v56 }
 0x6d5   : > { %11946 = vmatprep.subr.bf16.mxu0 %v13454_v47  ;;  %12274 = vmatprep.subr.bf16.mxu1 %v13456_v48  ;;  %v13504_v47 = vcombine.high %v5227_v59, %v5231_v42  ;;  %v5234_v48 = vld [vmem:[%s15311_s10 + $0x4d0] sm:$0xff] }
 0x6d6   : > { %v13509_v61 = vcombine.low %v5234_v48, %v5238_v11 }
 0x6d8   : > { %11947 = vmatpush1.bf16.msra.mxu0 %v13453_v20  ;;  %12275 = vmatpush1.bf16.msra.mxu1 %v13455_v53  ;;  %v13510_v20 = vcombine.high %v5234_v48, %v5238_v11  ;;  %v13512_v53 = vcombine.high %v5235_v50, %v5239_v15  ;;  %v5287_v48 = vld [vmem:[%s15311_s10 + $0x678] sm:$0xff] }
 0x6d9   : > { %11948 = vmatprep.subr.bf16.mxu0 %v13462_v21  ;;  %12276 = vmatprep.subr.bf16.mxu1 %v13464_v54  ;;  %v5242_v21 = vld [vmem:[%s15311_s10 + $0x510] sm:$0xff] }
 0x6da   : > { %v5246_v54 = vld [vmem:[%s15311_s10 + $0x530] sm:$0xff] }
 0x6db   : > { %v13518_v62 = vcombine.high %v5242_v21, %v5246_v54  ;;  %v13517_v3 = vcombine.low %v5242_v21, %v5246_v54  ;;  %v5295_v21 = vld [vmem:[%s15311_s10 + $0x6b8] sm:$0xff] }
 0x6dc   : > { %11949 = vmatpush1.bf16.msra.mxu0 %v13461_v63  ;;  %12277 = vmatpush1.bf16.msra.mxu1 %v13463_v0  ;;  %v13520_v63 = vcombine.high %v5243_v57, %v5247_v60  ;;  %v5250_v0 = vld [vmem:[%s15311_s10 + $0x550] sm:$0xff] }
 0x6dd   : > { %11950 = vmatprep.subr.bf16.mxu0 %v13470_v1  ;;  %12278 = vmatprep.subr.bf16.mxu1 %v13472_v2  ;;  %v5254_v1 = vld [vmem:[%s15311_s10 + $0x570] sm:$0xff]  ;;  %v5251_v2 = vld [vmem:[%s15311_s10 + $0x558] sm:$0xff] }
 0x6de   : > { %v13526_v7 = vcombine.high %v5250_v0, %v5254_v1  ;;  %v13525_v18 = vcombine.low %v5250_v0, %v5254_v1  ;;  %v13527_v19 = vcombine.low %v5251_v2, %v5255_v24  ;;  %v5303_v0 = vld [vmem:[%s15311_s10 + $0x6f8] sm:$0xff] }
 0x6e0   : > { %11951 = vmatpush1.bf16.msra.mxu0 %v13469_v31  ;;  %12279 = vmatpush1.bf16.msra.mxu1 %v13471_v9  ;;  %v13528_v31 = vcombine.high %v5251_v2, %v5255_v24  ;;  %v5258_v9 = vld [vmem:[%s15311_s10 + $0x590] sm:$0xff] }
 0x6e1   : > { %11952 = vmatprep.subr.bf16.mxu0 %v13478_v10  ;;  %12280 = vmatprep.subr.bf16.mxu1 %v13480_v12  ;;  %v5262_v10 = vld [vmem:[%s15311_s10 + $0x5b0] sm:$0xff]  ;;  %v5259_v12 = vld [vmem:[%s15311_s10 + $0x598] sm:$0xff] }
 0x6e2   : > { %v13534_v26 = vcombine.high %v5258_v9, %v5262_v10  ;;  %v13533_v34 = vcombine.low %v5258_v9, %v5262_v10  ;;  %v13535_v35 = vcombine.low %v5259_v12, %v5263_v16  ;;  %v5311_v9 = vld [vmem:[%s15311_s10 + $0x738] sm:$0xff] }
 0x6e4   : > { %11953 = vmatpush1.bf16.msra.mxu0 %v13477_v27  ;;  %12281 = vmatpush1.bf16.msra.mxu1 %v13479_v29  ;;  %v13536_v27 = vcombine.high %v5259_v12, %v5263_v16  ;;  %v5266_v29 = vld [vmem:[%s15311_s10 + $0x5d0] sm:$0xff] }
 0x6e5   : > { %11963 = vmatprep.subr.bf16.mxu0 %v13486_v30  ;;  %12291 = vmatprep.subr.bf16.mxu1 %v13488_v23  ;;  %v5270_v30 = vld [vmem:[%s15311_s10 + $0x5f0] sm:$0xff]  ;;  %v5267_v23 = vld [vmem:[%s15311_s10 + $0x5d8] sm:$0xff] }
 0x6e6   : > { %v13542_v37 = vcombine.high %v5266_v29, %v5270_v30  ;;  %v13543_v59 = vcombine.low %v5267_v23, %v5271_v33 }
 0x6e7   : > { %11955 = vmatmul.mubr.bf16.vlgmr.msra.gmra.mrb[4].mxu0 %v15519_v4  ;;  %12283 = vmatmul.mubr.bf16.vlgmr.msra.gmra.mrb[4].mxu1 %v15519_v4  ;;  %v13501_v4 = vcombine.low %v5226_v40, %v5230_v56  ;;  %v5279_v40 = vld [vmem:[%s15311_s10 + $0x638] sm:$0xff]  ;;  %v13541_v56 = vcombine.low %v5266_v29, %v5270_v30 }
 0x6e8   : > { %11964 = vmatpush1.bf16.msra.mxu0 %v13485_v44  ;;  %12292 = vmatpush1.bf16.msra.mxu1 %v13487_v38  ;;  %v13544_v44 = vcombine.high %v5267_v23, %v5271_v33  ;;  %v5274_v38 = vld [vmem:[%s15311_s10 + $0x610] sm:$0xff]  ;;  %v5319_v29 = vld [vmem:[%s15311_s10 + $0x778] sm:$0xff] }
 0x6e9   : > { %11965 = vmatprep.subr.bf16.mxu0 %v13494_v39  ;;  %12293 = vmatprep.subr.bf16.mxu1 %v13496_v55  ;;  %v5278_v39 = vld [vmem:[%s15311_s10 + $0x630] sm:$0xff]  ;;  %v5275_v55 = vld [vmem:[%s15311_s10 + $0x618] sm:$0xff] }
 0x6ea   : > { %11995 = vmatprep.mubr.bf16.mxu0 %v15525_v14  ;;  %12323 = vmatprep.mubr.bf16.mxu1 %v15525_v14  ;;  %v13511_v14 = vcombine.low %v5235_v50, %v5239_v15  ;;  %v13550_v42 = vcombine.high %v5274_v38, %v5278_v39  ;;  %v13549_v11 = vcombine.low %v5274_v38, %v5278_v39  ;;  %v5327_v38 = vld [vmem:[%s15311_s10 + $0x7b8] sm:$0xff] }
 0x6eb   : > { %v13551_v50 = vcombine.low %v5275_v55, %v5279_v40 }
 0x6ec   : > { %11966 = vmatpush1.bf16.msra.mxu0 %v13493_v43  ;;  %12294 = vmatpush1.bf16.msra.mxu1 %v13495_v45  ;;  %v13552_v43 = vcombine.high %v5275_v55, %v5279_v40  ;;  %v5282_v45 = vld [vmem:[%s15311_s10 + $0x650] sm:$0xff] }
 0x6ed   : > { %11967 = vmatprep.subr.bf16.mxu0 %v13502_v46  ;;  %12295 = vmatprep.subr.bf16.mxu1 %v13504_v47  ;;  %v5286_v46 = vld [vmem:[%s15311_s10 + $0x670] sm:$0xff]  ;;  %v5283_v47 = vld [vmem:[%s15311_s10 + $0x658] sm:$0xff] }
 0x6ee   : > { %v13558_v15 = vcombine.high %v5282_v45, %v5286_v46  ;;  %v13557_v54 = vcombine.low %v5282_v45, %v5286_v46  ;;  %v13559_v57 = vcombine.low %v5283_v47, %v5287_v48  ;;  %v5335_v45 = vld [vmem:[%s15311_s10 + $0x7f8] sm:$0xff] }
 0x6f0   : > { %11968 = vmatpush1.bf16.msra.mxu0 %v13501_v4  ;;  %12296 = vmatpush1.bf16.msra.mxu1 %v13503_v52  ;;  %v13560_v4 = vcombine.high %v5283_v47, %v5287_v48  ;;  %v5290_v52 = vld [vmem:[%s15311_s10 + $0x690] sm:$0xff] }
 0x6f1   : > { %11969 = vmatprep.subr.bf16.mxu0 %v13510_v20  ;;  %12297 = vmatprep.subr.bf16.mxu1 %v13512_v53  ;;  %v5294_v20 = vld [vmem:[%s15311_s10 + $0x6b0] sm:$0xff]  ;;  %v5291_v53 = vld [vmem:[%s15311_s10 + $0x698] sm:$0xff] }
 0x6f2   : > { %v13566_v60 = vcombine.high %v5290_v52, %v5294_v20  ;;  %v13565_v1 = vcombine.low %v5290_v52, %v5294_v20  ;;  %v13567_v2 = vcombine.low %v5291_v53, %v5295_v21  ;;  %v5343_v52 = vld [vmem:[%s15311_s10 + $0x838] sm:$0xff] }
 0x6f4   : > { %11970 = vmatpush1.bf16.msra.mxu0 %v13509_v61  ;;  %12298 = vmatpush1.bf16.msra.mxu1 %v13511_v14  ;;  %v13568_v61 = vcombine.high %v5291_v53, %v5295_v21  ;;  %v5298_v14 = vld [vmem:[%s15311_s10 + $0x6d0] sm:$0xff] }
 0x6f5   : > { %11971 = vmatprep.subr.bf16.mxu0 %v13518_v62  ;;  %12299 = vmatprep.subr.bf16.mxu1 %v13520_v63  ;;  %v5302_v62 = vld [vmem:[%s15311_s10 + $0x6f0] sm:$0xff]  ;;  %v5299_v63 = vld [vmem:[%s15311_s10 + $0x6d8] sm:$0xff] }
 0x6f6   : > { %v13574_v24 = vcombine.high %v5298_v14, %v5302_v62  ;;  %v13573_v10 = vcombine.low %v5298_v14, %v5302_v62  ;;  %v13575_v12 = vcombine.low %v5299_v63, %v5303_v0  ;;  %v5351_v14 = vld [vmem:[%s15311_s10 + $0x878] sm:$0xff] }
 0x6f8   : > { %11972 = vmatpush1.bf16.msra.mxu0 %v13517_v3  ;;  %12300 = vmatpush1.bf16.msra.mxu1 %v13519_v5  ;;  %v13576_v3 = vcombine.high %v5299_v63, %v5303_v0  ;;  %v5306_v5 = vld [vmem:[%s15311_s10 + $0x710] sm:$0xff] }
 0x6f9   : > { %11973 = vmatprep.subr.bf16.mxu0 %v13526_v7  ;;  %12301 = vmatprep.subr.bf16.mxu1 %v13528_v31  ;;  %v5310_v7 = vld [vmem:[%s15311_s10 + $0x730] sm:$0xff]  ;;  %v5307_v31 = vld [vmem:[%s15311_s10 + $0x718] sm:$0xff] }
 0x6fa   : > { %v13582_v16 = vcombine.high %v5306_v5, %v5310_v7  ;;  %v13581_v30 = vcombine.low %v5306_v5, %v5310_v7  ;;  %v13583_v23 = vcombine.low %v5307_v31, %v5311_v9  ;;  %v5359_v5 = vld [vmem:[%s15311_s10 + $0x8b8] sm:$0xff] }
 0x6fc   : > { %11974 = vmatpush1.bf16.msra.mxu0 %v13525_v18  ;;  %12302 = vmatpush1.bf16.msra.mxu1 %v13527_v19  ;;  %v13584_v18 = vcombine.high %v5307_v31, %v5311_v9  ;;  %v5314_v19 = vld [vmem:[%s15311_s10 + $0x750] sm:$0xff] }
 0x6fd   : > { %11975 = vmatprep.subr.bf16.mxu0 %v13534_v26  ;;  %12303 = vmatprep.subr.bf16.mxu1 %v13536_v27  ;;  %v5318_v26 = vld [vmem:[%s15311_s10 + $0x770] sm:$0xff]  ;;  %v5315_v27 = vld [vmem:[%s15311_s10 + $0x758] sm:$0xff] }
 0x6fe   : > { %v13590_v33 = vcombine.high %v5314_v19, %v5318_v26  ;;  %v13589_v39 = vcombine.low %v5314_v19, %v5318_v26  ;;  %v13591_v55 = vcombine.low %v5315_v27, %v5319_v29  ;;  %v5367_v19 = vld [vmem:[%s15311_s10 + $0x8f8] sm:$0xff] }
 0x700   : > { %11976 = vmatpush1.bf16.msra.mxu0 %v13533_v34  ;;  %12304 = vmatpush1.bf16.msra.mxu1 %v13535_v35  ;;  %v13592_v34 = vcombine.high %v5315_v27, %v5319_v29  ;;  %v5322_v35 = vld [vmem:[%s15311_s10 + $0x790] sm:$0xff] }
 0x701   : > { %11977 = vmatprep.subr.bf16.mxu0 %v13542_v37  ;;  %12305 = vmatprep.subr.bf16.mxu1 %v13544_v44  ;;  %v5326_v37 = vld [vmem:[%s15311_s10 + $0x7b0] sm:$0xff]  ;;  %v5323_v44 = vld [vmem:[%s15311_s10 + $0x798] sm:$0xff] }
 0x702   : > { %v13598_v40 = vcombine.high %v5322_v35, %v5326_v37  ;;  %v13597_v46 = vcombine.low %v5322_v35, %v5326_v37  ;;  %v13599_v47 = vcombine.low %v5323_v44, %v5327_v38 }
 0x704   : > { %11978 = vmatpush1.bf16.msra.mxu0 %v13541_v56  ;;  %12306 = vmatpush1.bf16.msra.mxu1 %v13543_v59  ;;  %v13600_v56 = vcombine.high %v5323_v44, %v5327_v38  ;;  %v5330_v59 = vld [vmem:[%s15311_s10 + $0x7d0] sm:$0xff] }
 0x705   : > { %11979 = vmatprep.subr.bf16.mxu0 %v13550_v42  ;;  %12307 = vmatprep.subr.bf16.mxu1 %v13552_v43  ;;  %v5334_v42 = vld [vmem:[%s15311_s10 + $0x7f0] sm:$0xff]  ;;  %v5331_v43 = vld [vmem:[%s15311_s10 + $0x7d8] sm:$0xff] }
 0x706   : > { %v13606_v48 = vcombine.high %v5330_v59, %v5334_v42  ;;  %v13605_v20 = vcombine.low %v5330_v59, %v5334_v42  ;;  %v13607_v53 = vcombine.low %v5331_v43, %v5335_v45  ;;  %v5378_v38 = vld [vmem:[%s15311_s10 + $0x950] sm:$0xff] }
 0x708   : > { %11980 = vmatpush1.bf16.msra.mxu0 %v13549_v11  ;;  %12308 = vmatpush1.bf16.msra.mxu1 %v13551_v50  ;;  %v13608_v11 = vcombine.high %v5331_v43, %v5335_v45  ;;  %v5338_v50 = vld [vmem:[%s15311_s10 + $0x810] sm:$0xff] }
 0x709   : > { %11981 = vmatprep.subr.bf16.mxu0 %v13558_v15  ;;  %12309 = vmatprep.subr.bf16.mxu1 %v13560_v4  ;;  %v5342_v15 = vld [vmem:[%s15311_s10 + $0x830] sm:$0xff]  ;;  %v5339_v4 = vld [vmem:[%s15311_s10 + $0x818] sm:$0xff] }
 0x70a   : > { %v13614_v21 = vcombine.high %v5338_v50, %v5342_v15  ;;  %v13613_v62 = vcombine.low %v5338_v50, %v5342_v15  ;;  %v13615_v63 = vcombine.low %v5339_v4, %v5343_v52  ;;  %v5386_v45 = vld [vmem:[%s15311_s10 + $0x990] sm:$0xff] }
 0x70c   : > { %11982 = vmatpush1.bf16.msra.mxu0 %v13557_v54  ;;  %12310 = vmatpush1.bf16.msra.mxu1 %v13559_v57  ;;  %v13616_v54 = vcombine.high %v5339_v4, %v5343_v52  ;;  %v5346_v57 = vld [vmem:[%s15311_s10 + $0x850] sm:$0xff] }
 0x70d   : > { %11983 = vmatprep.subr.bf16.mxu0 %v13566_v60  ;;  %12311 = vmatprep.subr.bf16.mxu1 %v13568_v61  ;;  %v5350_v60 = vld [vmem:[%s15311_s10 + $0x870] sm:$0xff]  ;;  %v5347_v61 = vld [vmem:[%s15311_s10 + $0x858] sm:$0xff] }
 0x70e   : > { %v13622_v0 = vcombine.high %v5346_v57, %v5350_v60  ;;  %v13621_v7 = vcombine.low %v5346_v57, %v5350_v60  ;;  %v13623_v31 = vcombine.low %v5347_v61, %v5351_v14  ;;  %v5394_v52 = vld [vmem:[%s15311_s10 + $0x9d0] sm:$0xff] }
 0x710   : > { %11984 = vmatpush1.bf16.msra.mxu0 %v13565_v1  ;;  %12312 = vmatpush1.bf16.msra.mxu1 %v13567_v2  ;;  %v13624_v1 = vcombine.high %v5347_v61, %v5351_v14  ;;  %v5354_v2 = vld [vmem:[%s15311_s10 + $0x890] sm:$0xff] }
 0x711   : > { %11985 = vmatprep.subr.bf16.mxu0 %v13574_v24  ;;  %12313 = vmatprep.subr.bf16.mxu1 %v13576_v3  ;;  %v5358_v24 = vld [vmem:[%s15311_s10 + $0x8b0] sm:$0xff]  ;;  %v5355_v3 = vld [vmem:[%s15311_s10 + $0x898] sm:$0xff] }
 0x712   : > { %v13630_v9 = vcombine.high %v5354_v2, %v5358_v24  ;;  %v13631_v26 = vcombine.low %v5355_v3, %v5359_v5  ;;  %v5402_v14 = vld [vmem:[%s15311_s10 + $0xa10] sm:$0xff] }
 0x714   : > { %11986 = vmatpush1.bf16.msra.mxu0 %v13573_v10  ;;  %12314 = vmatpush1.bf16.msra.mxu1 %v13575_v12  ;;  %v13632_v10 = vcombine.high %v5355_v3, %v5359_v5  ;;  %v5362_v12 = vld [vmem:[%s15311_s10 + $0x8d0] sm:$0xff] }
 0x715   : > { %11987 = vmatprep.subr.bf16.mxu0 %v13582_v16  ;;  %12315 = vmatprep.subr.bf16.mxu1 %v13584_v18  ;;  %v5366_v16 = vld [vmem:[%s15311_s10 + $0x8f0] sm:$0xff]  ;;  %v5363_v18 = vld [vmem:[%s15311_s10 + $0x8d8] sm:$0xff] }
 0x716   : > { %v13638_v27 = vcombine.high %v5362_v12, %v5366_v16  ;;  %v13640_v29 = vcombine.high %v5363_v18, %v5367_v19  ;;  %v13637_v35 = vcombine.low %v5362_v12, %v5366_v16  ;;  %v5410_v5 = vld [vmem:[%s15311_s10 + $0xa50] sm:$0xff] }
 0x718   : > { %11988 = vmatpush1.bf16.msra.mxu0 %v13581_v30  ;;  %12316 = vmatpush1.bf16.msra.mxu1 %v13583_v23  ;;  %v5370_v30 = vld [vmem:[%s15311_s10 + $0x910] sm:$0xff] }
 0x719   : > { %11989 = vmatprep.subr.bf16.mxu0 %v13590_v33  ;;  %12317 = vmatprep.subr.bf16.mxu1 %v13592_v34  ;;  %v5374_v23 = vld [vmem:[%s15311_s10 + $0x930] sm:$0xff]  ;;  %v5371_v33 = vld [vmem:[%s15311_s10 + $0x918] sm:$0xff] }
 0x71a   : > { %v5375_v34 = vld [vmem:[%s15311_s10 + $0x938] sm:$0xff]  ;;  %v13646_v37 = vcombine.high %v5370_v30, %v5374_v23 }
 0x71b   : > { %v13648_v44 = vcombine.high %v5371_v33, %v5375_v34  ;;  %v13647_v59 = vcombine.low %v5371_v33, %v5375_v34  ;;  %v5426_v34 = vld [vmem:[%s15311_s10 + $0xad0] sm:$0xff] }
 0x71c   : > { %11990 = vmatpush1.bf16.msra.mxu0 %v13589_v39  ;;  %12318 = vmatpush1.bf16.msra.mxu1 %v13591_v55  ;;  %v5382_v39 = vld [vmem:[%s15311_s10 + $0x970] sm:$0xff]  ;;  %v5379_v55 = vld [vmem:[%s15311_s10 + $0x958] sm:$0xff] }
 0x71d   : > { %11991 = vmatprep.subr.bf16.mxu0 %v13598_v40  ;;  %12319 = vmatprep.subr.bf16.mxu1 %v13600_v56  ;;  %v5383_v40 = vld [vmem:[%s15311_s10 + $0x978] sm:$0xff]  ;;  %v13645_v56 = vcombine.low %v5370_v30, %v5374_v23  ;;  %v13654_v42 = vcombine.high %v5378_v38, %v5382_v39 }
 0x71e   : > { %v13656_v43 = vcombine.high %v5379_v55, %v5383_v40  ;;  %v13655_v50 = vcombine.low %v5379_v55, %v5383_v40  ;;  %v5434_v40 = vld [vmem:[%s15311_s10 + $0xb10] sm:$0xff] }
 0x720   : > { %11992 = vmatpush1.bf16.msra.mxu0 %v13597_v46  ;;  %12320 = vmatpush1.bf16.msra.mxu1 %v13599_v47  ;;  %v5390_v46 = vld [vmem:[%s15311_s10 + $0x9b0] sm:$0xff]  ;;  %v5387_v47 = vld [vmem:[%s15311_s10 + $0x998] sm:$0xff] }
 0x721   : > { %11993 = vmatprep.subr.bf16.mxu0 %v13606_v48  ;;  %12321 = vmatprep.subr.bf16.mxu1 %v13608_v11  ;;  %v5391_v48 = vld [vmem:[%s15311_s10 + $0x9b8] sm:$0xff]  ;;  %v13653_v11 = vcombine.low %v5378_v38, %v5382_v39  ;;  %v13662_v15 = vcombine.high %v5386_v45, %v5390_v46 }
 0x722   : > { %v13664_v4 = vcombine.high %v5387_v47, %v5391_v48  ;;  %v13663_v57 = vcombine.low %v5387_v47, %v5391_v48  ;;  %v5442_v48 = vld [vmem:[%s15311_s10 + $0xb50] sm:$0xff] }
 0x724   : > { %11994 = vmatpush1.bf16.msra.mxu0 %v13605_v20  ;;  %12322 = vmatpush1.bf16.msra.mxu1 %v13607_v53  ;;  %v5398_v20 = vld [vmem:[%s15311_s10 + $0x9f0] sm:$0xff]  ;;  %v5395_v53 = vld [vmem:[%s15311_s10 + $0x9d8] sm:$0xff] }
 0x725   : > { %12004 = vmatprep.subr.bf16.mxu0 %v13614_v21  ;;  %12332 = vmatprep.subr.bf16.mxu1 %v13616_v54  ;;  %v5399_v21 = vld [vmem:[%s15311_s10 + $0x9f8] sm:$0xff]  ;;  %v13661_v54 = vcombine.low %v5386_v45, %v5390_v46  ;;  %v13670_v60 = vcombine.high %v5394_v52, %v5398_v20 }
 0x726   : > { %v13672_v61 = vcombine.high %v5395_v53, %v5399_v21 }
 0x727   : > { %11996 = vmatmul.mubr.bf16.vlgmr.msra.gmra.mrb[4].mxu0 %v15591_v13  ;;  %12324 = vmatmul.mubr.bf16.vlgmr.msra.gmra.mrb[4].mxu1 %v15591_v13  ;;  %v13629_v13 = vcombine.low %v5354_v2, %v5358_v24  ;;  %v13671_v2 = vcombine.low %v5395_v53, %v5399_v21  ;;  %v5450_v21 = vld [vmem:[%s15311_s10 + $0xb90] sm:$0xff] }
 0x728   : > { %12005 = vmatpush1.bf16.msra.mxu0 %v13613_v62  ;;  %12333 = vmatpush1.bf16.msra.mxu1 %v13615_v63  ;;  %v5406_v62 = vld [vmem:[%s15311_s10 + $0xa30] sm:$0xff]  ;;  %v5403_v63 = vld [vmem:[%s15311_s10 + $0xa18] sm:$0xff] }
 0x729   : > { %12006 = vmatprep.subr.bf16.mxu0 %v13622_v0  ;;  %12334 = vmatprep.subr.bf16.mxu1 %v13624_v1  ;;  %v5407_v0 = vld [vmem:[%s15311_s10 + $0xa38] sm:$0xff]  ;;  %v13669_v1 = vcombine.low %v5394_v52, %v5398_v20  ;;  %v13678_v24 = vcombine.high %v5402_v14, %v5406_v62 }
 0x72a   : > { %12036 = vmatprep.mubr.bf16.mxu0 %v15597_v32  ;;  %12364 = vmatprep.mubr.bf16.mxu1 %v15597_v32  ;;  %v13639_v32 = vcombine.low %v5363_v18, %v5367_v19  ;;  %v13680_v3 = vcombine.high %v5403_v63, %v5407_v0  ;;  %v13679_v12 = vcombine.low %v5403_v63, %v5407_v0  ;;  %v5418_v19 = vld [vmem:[%s15311_s10 + $0xa90] sm:$0xff] }
 0x72b   : > { %v5458_v0 = vld [vmem:[%s15311_s10 + $0xbd0] sm:$0xff] }
 0x72c   : > { %12007 = vmatpush1.bf16.msra.mxu0 %v13621_v7  ;;  %12335 = vmatpush1.bf16.msra.mxu1 %v13623_v31  ;;  %v5414_v7 = vld [vmem:[%s15311_s10 + $0xa70] sm:$0xff]  ;;  %v5411_v31 = vld [vmem:[%s15311_s10 + $0xa58] sm:$0xff] }
 0x72d   : > { %12008 = vmatprep.subr.bf16.mxu0 %v13630_v9  ;;  %12336 = vmatprep.subr.bf16.mxu1 %v13632_v10  ;;  %v5415_v9 = vld [vmem:[%s15311_s10 + $0xa78] sm:$0xff]  ;;  %v13677_v10 = vcombine.low %v5402_v14, %v5406_v62  ;;  %v13686_v16 = vcombine.high %v5410_v5, %v5414_v7 }
 0x72e   : > { %v13688_v18 = vcombine.high %v5411_v31, %v5415_v9  ;;  %v13687_v30 = vcombine.low %v5411_v31, %v5415_v9  ;;  %v5466_v9 = vld [vmem:[%s15311_s10 + $0xc10] sm:$0xff] }
 0x730   : > { %12009 = vmatpush1.bf16.msra.mxu0 %v13629_v13  ;;  %12337 = vmatpush1.bf16.msra.mxu1 %v13631_v26  ;;  %v5422_v13 = vld [vmem:[%s15311_s10 + $0xab0] sm:$0xff]  ;;  %v5419_v26 = vld [vmem:[%s15311_s10 + $0xa98] sm:$0xff] }
 0x731   : > { %12010 = vmatprep.subr.bf16.mxu0 %v13638_v27  ;;  %12338 = vmatprep.subr.bf16.mxu1 %v13640_v29  ;;  %v5423_v27 = vld [vmem:[%s15311_s10 + $0xab8] sm:$0xff]  ;;  %v13685_v29 = vcombine.low %v5410_v5, %v5414_v7  ;;  %v13694_v23 = vcombine.high %v5418_v19, %v5422_v13 }
 0x732   : > { %v13696_v33 = vcombine.high %v5419_v26, %v5423_v27  ;;  %v13695_v38 = vcombine.low %v5419_v26, %v5423_v27  ;;  %v5474_v27 = vld [vmem:[%s15311_s10 + $0xc50] sm:$0xff] }
 0x734   : > { %12011 = vmatpush1.bf16.msra.mxu0 %v13637_v35  ;;  %12339 = vmatpush1.bf16.msra.mxu1 %v13639_v32  ;;  %v5430_v35 = vld [vmem:[%s15311_s10 + $0xaf0] sm:$0xff]  ;;  %v5427_v32 = vld [vmem:[%s15311_s10 + $0xad8] sm:$0xff] }
 0x735   : > { %12012 = vmatprep.subr.bf16.mxu0 %v13646_v37  ;;  %12340 = vmatprep.subr.bf16.mxu1 %v13648_v44  ;;  %v5431_v37 = vld [vmem:[%s15311_s10 + $0xaf8] sm:$0xff]  ;;  %v13693_v44 = vcombine.low %v5418_v19, %v5422_v13  ;;  %v13702_v39 = vcombine.high %v5426_v34, %v5430_v35 }
 0x736   : > { %v13704_v55 = vcombine.high %v5427_v32, %v5431_v37  ;;  %v13703_v45 = vcombine.low %v5427_v32, %v5431_v37  ;;  %v5482_v37 = vld [vmem:[%s15311_s10 + $0xc90] sm:$0xff] }
 0x738   : > { %12013 = vmatpush1.bf16.msra.mxu0 %v13645_v56  ;;  %12341 = vmatpush1.bf16.msra.mxu1 %v13647_v59  ;;  %v5438_v56 = vld [vmem:[%s15311_s10 + $0xb30] sm:$0xff]  ;;  %v5435_v59 = vld [vmem:[%s15311_s10 + $0xb18] sm:$0xff] }
 0x739   : > { %12014 = vmatprep.subr.bf16.mxu0 %v13654_v42  ;;  %12342 = vmatprep.subr.bf16.mxu1 %v13656_v43  ;;  %v5439_v42 = vld [vmem:[%s15311_s10 + $0xb38] sm:$0xff]  ;;  %v13701_v43 = vcombine.low %v5426_v34, %v5430_v35  ;;  %v13710_v46 = vcombine.high %v5434_v40, %v5438_v56 }
 0x73a   : > { %v13712_v47 = vcombine.high %v5435_v59, %v5439_v42  ;;  %v13711_v52 = vcombine.low %v5435_v59, %v5439_v42  ;;  %v5490_v42 = vld [vmem:[%s15311_s10 + $0xcd0] sm:$0xff] }
 0x73c   : > { %12015 = vmatpush1.bf16.msra.mxu0 %v13653_v11  ;;  %12343 = vmatpush1.bf16.msra.mxu1 %v13655_v50  ;;  %v5446_v11 = vld [vmem:[%s15311_s10 + $0xb70] sm:$0xff]  ;;  %v5443_v50 = vld [vmem:[%s15311_s10 + $0xb58] sm:$0xff] }
 0x73d   : > { %12016 = vmatprep.subr.bf16.mxu0 %v13662_v15  ;;  %12344 = vmatprep.subr.bf16.mxu1 %v13664_v4  ;;  %v5447_v15 = vld [vmem:[%s15311_s10 + $0xb78] sm:$0xff]  ;;  %v13709_v4 = vcombine.low %v5434_v40, %v5438_v56  ;;  %v13718_v20 = vcombine.high %v5442_v48, %v5446_v11 }
 0x73e   : > { %v13720_v53 = vcombine.high %v5443_v50, %v5447_v15  ;;  %v13719_v14 = vcombine.low %v5443_v50, %v5447_v15  ;;  %v5498_v15 = vld [vmem:[%s15311_s10 + $0xd10] sm:$0xff] }
 0x740   : > { %12017 = vmatpush1.bf16.msra.mxu0 %v13661_v54  ;;  %12345 = vmatpush1.bf16.msra.mxu1 %v13663_v57  ;;  %v5454_v54 = vld [vmem:[%s15311_s10 + $0xbb0] sm:$0xff]  ;;  %v5451_v57 = vld [vmem:[%s15311_s10 + $0xb98] sm:$0xff] }
 0x741   : > { %12018 = vmatprep.subr.bf16.mxu0 %v13670_v60  ;;  %12346 = vmatprep.subr.bf16.mxu1 %v13672_v61  ;;  %v5455_v60 = vld [vmem:[%s15311_s10 + $0xbb8] sm:$0xff]  ;;  %v13717_v61 = vcombine.low %v5442_v48, %v5446_v11  ;;  %v13726_v62 = vcombine.high %v5450_v21, %v5454_v54 }
 0x742   : > { %v13728_v63 = vcombine.high %v5451_v57, %v5455_v60  ;;  %v13727_v5 = vcombine.low %v5451_v57, %v5455_v60  ;;  %v5506_v60 = vld [vmem:[%s15311_s10 + $0xd50] sm:$0xff] }
 0x744   : > { %12019 = vmatpush1.bf16.msra.mxu0 %v13669_v1  ;;  %12347 = vmatpush1.bf16.msra.mxu1 %v13671_v2  ;;  %v5462_v1 = vld [vmem:[%s15311_s10 + $0xbf0] sm:$0xff]  ;;  %v5459_v2 = vld [vmem:[%s15311_s10 + $0xbd8] sm:$0xff] }
 0x745   : > { %12020 = vmatprep.subr.bf16.mxu0 %v13678_v24  ;;  %12348 = vmatprep.subr.bf16.mxu1 %v13680_v3  ;;  %v5463_v24 = vld [vmem:[%s15311_s10 + $0xbf8] sm:$0xff]  ;;  %v13725_v3 = vcombine.low %v5450_v21, %v5454_v54  ;;  %v13734_v7 = vcombine.high %v5458_v0, %v5462_v1 }
 0x746   : > { %v13736_v31 = vcombine.high %v5459_v2, %v5463_v24  ;;  %v13735_v19 = vcombine.low %v5459_v2, %v5463_v24 }
 0x748   : > { %12021 = vmatpush1.bf16.msra.mxu0 %v13677_v10  ;;  %12349 = vmatpush1.bf16.msra.mxu1 %v13679_v12  ;;  %v5470_v10 = vld [vmem:[%s15311_s10 + $0xc30] sm:$0xff]  ;;  %v5467_v12 = vld [vmem:[%s15311_s10 + $0xc18] sm:$0xff] }
 0x749   : > { %12022 = vmatprep.subr.bf16.mxu0 %v13686_v16  ;;  %12350 = vmatprep.subr.bf16.mxu1 %v13688_v18  ;;  %v5471_v16 = vld [vmem:[%s15311_s10 + $0xc38] sm:$0xff]  ;;  %v13733_v18 = vcombine.low %v5458_v0, %v5462_v1  ;;  %v13742_v13 = vcombine.high %v5466_v9, %v5470_v10  ;;  %v6104_v1 = vld [vmem:[%s370_s12] sm:$0xff] }
 0x74a   : > { %v13744_v26 = vcombine.high %v5467_v12, %v5471_v16  ;;  %v13743_v34 = vcombine.low %v5467_v12, %v5471_v16  ;;  %v5515_v16 = vld [vmem:[%s15311_s10 + $0xd98] sm:$0xff] }
 0x74c   : > { %12023 = vmatpush1.bf16.msra.mxu0 %v13685_v29  ;;  %12351 = vmatpush1.bf16.msra.mxu1 %v13687_v30  ;;  %v5478_v29 = vld [vmem:[%s15311_s10 + $0xc70] sm:$0xff]  ;;  %v5475_v30 = vld [vmem:[%s15311_s10 + $0xc58] sm:$0xff] }
 0x74d   : > { %12024 = vmatprep.subr.bf16.mxu0 %v13694_v23  ;;  %12352 = vmatprep.subr.bf16.mxu1 %v13696_v33  ;;  %v5479_v23 = vld [vmem:[%s15311_s10 + $0xc78] sm:$0xff]  ;;  %v13741_v33 = vcombine.low %v5466_v9, %v5470_v10  ;;  %v13750_v35 = vcombine.high %v5474_v27, %v5478_v29  ;;  %v5514_v9 = vld [vmem:[%s15311_s10 + $0xd90] sm:$0xff] }
 0x74e   : > { %v13752_v32 = vcombine.high %v5475_v30, %v5479_v23  ;;  %v13751_v40 = vcombine.low %v5475_v30, %v5479_v23  ;;  %v5518_v10 = vld [vmem:[%s15311_s10 + $0xdb0] sm:$0xff] }
 0x74f   : > { %v13790_v30 = vcombine.high %v5514_v9, %v5518_v10 }
 0x750   : > { %12025 = vmatpush1.bf16.msra.mxu0 %v13693_v44  ;;  %12353 = vmatpush1.bf16.msra.mxu1 %v13695_v38  ;;  %v5486_v44 = vld [vmem:[%s15311_s10 + $0xcb0] sm:$0xff]  ;;  %v5483_v38 = vld [vmem:[%s15311_s10 + $0xc98] sm:$0xff] }
 0x751   : > { %12026 = vmatprep.subr.bf16.mxu0 %v13702_v39  ;;  %12354 = vmatprep.subr.bf16.mxu1 %v13704_v55  ;;  %v5487_v39 = vld [vmem:[%s15311_s10 + $0xcb8] sm:$0xff]  ;;  %v13749_v55 = vcombine.low %v5474_v27, %v5478_v29  ;;  %v13758_v56 = vcombine.high %v5482_v37, %v5486_v44 }
 0x752   : > { %v13760_v59 = vcombine.high %v5483_v38, %v5487_v39  ;;  %v13759_v48 = vcombine.low %v5483_v38, %v5487_v39  ;;  %v5523_v38 = vld [vmem:[%s15311_s10 + $0xdd8] sm:$0xff] }
 0x753   : > { %v5527_v39 = vld [vmem:[%s15311_s10 + $0xdf8] sm:$0xff] }
 0x754   : > { %12027 = vmatpush1.bf16.msra.mxu0 %v13701_v43  ;;  %12355 = vmatpush1.bf16.msra.mxu1 %v13703_v45  ;;  %v5494_v43 = vld [vmem:[%s15311_s10 + $0xcf0] sm:$0xff]  ;;  %v5491_v45 = vld [vmem:[%s15311_s10 + $0xcd8] sm:$0xff] }
 0x755   : > { %12028 = vmatprep.subr.bf16.mxu0 %v13710_v46  ;;  %12356 = vmatprep.subr.bf16.mxu1 %v13712_v47  ;;  %v5495_v46 = vld [vmem:[%s15311_s10 + $0xcf8] sm:$0xff]  ;;  %v6106_v47 = vlaneseq  ;;  %v13766_v11 = vcombine.high %v5490_v42, %v5494_v43 }
 0x756   : > { %v13768_v50 = vcombine.high %v5491_v45, %v5495_v46  ;;  %v13767_v21 = vcombine.low %v5491_v45, %v5495_v46 }
 0x758   : > { %12029 = vmatpush1.bf16.msra.mxu0 %v13709_v4  ;;  %12357 = vmatpush1.bf16.msra.mxu1 %v13711_v52  ;;  %v5502_v4 = vld [vmem:[%s15311_s10 + $0xd30] sm:$0xff]  ;;  %v5499_v52 = vld [vmem:[%s15311_s10 + $0xd18] sm:$0xff] }
 0x759   : > { %12030 = vmatprep.subr.bf16.mxu0 %v13718_v20  ;;  %12358 = vmatprep.subr.bf16.mxu1 %v13720_v53  ;;  %v5503_v20 = vld [vmem:[%s15311_s10 + $0xd38] sm:$0xff]  ;;  %v16247_v53 = vshrl.u32 %v6106_v47, 7  ;;  %v13774_v54 = vcombine.high %v5498_v15, %v5502_v4  ;;  %v13773_v0 = vcombine.low %v5498_v15, %v5502_v4  ;;  %v5534_v15 = vld [vmem:[%s15311_s10 + $0xe30] sm:$0xff] }
 0x75a   : > { %v13776_v57 = vcombine.high %v5499_v52, %v5503_v20  ;;  %v5531_v4 = vld [vmem:[%s15311_s10 + $0xe18] sm:$0xff] }
 0x75b   : > { %v6116_v2 = vsub.s32 2, %v16247_v53  ;;  %v6112_v24 = vsub.s32 1, %v16247_v53 }
 0x75c   : > { %12031 = vmatpush1.bf16.msra.mxu0 %v13717_v61  ;;  %12359 = vmatpush1.bf16.msra.mxu1 %v13719_v14  ;;  %v5510_v61 = vld [vmem:[%s15311_s10 + $0xd70] sm:$0xff]  ;;  %v6108_v14 = vsub.s32 0, %v16247_v53 }
 0x75d   : > { %12032 = vmatprep.subr.bf16.mxu0 %v13726_v62  ;;  %12360 = vmatprep.subr.bf16.mxu1 %v13728_v63  ;;  %v5507_v62 = vld [vmem:[%s15311_s10 + $0xd58] sm:$0xff] }
 0x75e   : > { %v5511_v63 = vld [vmem:[%s15311_s10 + $0xd78] sm:$0xff]  ;;  %v6109_v12 = vrot.slane %v6104_v1, %v6108_v14 }
 0x75f   : > { %v13783_v29 = vcombine.low %v5507_v62, %v5511_v63  ;;  %v5543_v14 = vld [vmem:[%s15311_s10 + $0xe78] sm:$0xff] }
 0x760   : > { %12033 = vmatpush1.bf16.msra.mxu0 %v13725_v3  ;;  %12361 = vmatpush1.bf16.msra.mxu1 %v13727_v5  ;;  %v13775_v3 = vcombine.low %v5499_v52, %v5503_v20  ;;  %v6120_v5 = vsub.s32 3, %v16247_v53  ;;  %v5535_v52 = vld [vmem:[%s15311_s10 + $0xe38] sm:$0xff] }
 0x761   : > { %12034 = vmatprep.subr.bf16.mxu0 %v13734_v7  ;;  %12362 = vmatprep.subr.bf16.mxu1 %v13736_v31  ;;  %v13782_v7 = vcombine.high %v5506_v60, %v5510_v61  ;;  %v13784_v31 = vcombine.high %v5507_v62, %v5511_v63  ;;  %v13807_v63 = vcombine.low %v5531_v4, %v5535_v52 }
 0x762   : > { %v6121_v27 = vrot.slane %v6104_v1, %v6120_v5  ;;  %v5547_v5 = vld [vmem:[%s15311_s10 + $0xe98] sm:$0xff] }
 0x764   : > { %12035 = vmatpush1.bf16.msra.mxu0 %v13733_v18  ;;  %12363 = vmatpush1.bf16.msra.mxu1 %v13735_v19  ;;  %v5519_v18 = vld [vmem:[%s15311_s10 + $0xdb8] sm:$0xff]  ;;  %v6117_v19 = vrot.slane %v6104_v1, %v6116_v2  ;;  %v5546_v2 = vld [vmem:[%s15311_s10 + $0xe90] sm:$0xff] }
 0x765   : > { %12045 = vmatprep.subr.bf16.mxu0 %v13742_v13  ;;  %12373 = vmatprep.subr.bf16.mxu1 %v13744_v26  ;;  %v6113_v13 = vrot.slane %v6104_v1, %v6112_v24  ;;  %v13781_v26 = vcombine.low %v5506_v60, %v5510_v61  ;;  %v13791_v47 = vcombine.low %v5515_v16, %v5519_v18  ;;  %v5542_v60 = vld [vmem:[%s15311_s10 + $0xe70] sm:$0xff]  ;;  %v5539_v61 = vld [vmem:[%s15311_s10 + $0xe58] sm:$0xff] }
 0x766   : > { %v13816_v1 = vcombine.high %v5539_v61, %v5543_v14  ;;  %v5550_v24 = vld [vmem:[%s15311_s10 + $0xeb0] sm:$0xff] }
 0x767   : > { %12037 = vmatmul.mubr.bf16.vlgmr.msra.gmra.mrb[4].mxu0 %v15663_v36  ;;  %12365 = vmatmul.mubr.bf16.vlgmr.msra.gmra.mrb[4].mxu1 %v15663_v36  ;;  %v13757_v36 = vcombine.low %v5482_v37, %v5486_v44 }
 0x768   : > { %12046 = vmatpush1.bf16.msra.mxu0 %v13741_v33  ;;  %12374 = vmatpush1.bf16.msra.mxu1 %v13743_v34  ;;  %v13792_v33 = vcombine.high %v5515_v16, %v5519_v18  ;;  %v5522_v34 = vld [vmem:[%s15311_s10 + $0xdd0] sm:$0xff]  ;;  %v13822_v16 = vcombine.high %v5546_v2, %v5550_v24 }
 0x769   : > { %12047 = vmatprep.subr.bf16.mxu0 %v13750_v35  ;;  %12375 = vmatprep.subr.bf16.mxu1 %v13752_v32  ;;  %v5526_v35 = vld [vmem:[%s15311_s10 + $0xdf0] sm:$0xff] }
 0x76a   : > { %12077 = vmatprep.mubr.bf16.mxu0 %v15669_v41  ;;  %12405 = vmatprep.mubr.bf16.mxu1 %v15669_v41  ;;  %v13765_v41 = vcombine.low %v5490_v42, %v5494_v43  ;;  %v13789_v42 = vcombine.low %v5514_v9, %v5518_v10  ;;  %v13797_v20 = vcombine.low %v5522_v34, %v5526_v35 }
 0x76c   : > { %12048 = vmatpush1.bf16.msra.mxu0 %v13749_v55  ;;  %12376 = vmatpush1.bf16.msra.mxu1 %v13751_v40 }
 0x76d   : > { %12049 = vmatprep.subr.bf16.mxu0 %v13758_v56  ;;  %12377 = vmatprep.subr.bf16.mxu1 %v13760_v59 }
 0x770   : > { %12050 = vmatpush1.bf16.msra.mxu0 %v13757_v36  ;;  %12378 = vmatpush1.bf16.msra.mxu1 %v13759_v48  ;;  %v13798_v36 = vcombine.high %v5522_v34, %v5526_v35  ;;  %v5562_v35 = vld [vmem:[%s15311_s10 + $0xf10] sm:$0xff] }
 0x771   : > { %12051 = vmatprep.subr.bf16.mxu0 %v13766_v11  ;;  %12379 = vmatprep.subr.bf16.mxu1 %v13768_v50  ;;  %v13800_v11 = vcombine.high %v5523_v38, %v5527_v39  ;;  %v5530_v50 = vld [vmem:[%s15311_s10 + $0xe10] sm:$0xff] }
 0x772   : > { %v13805_v62 = vcombine.low %v5530_v50, %v5534_v15 }
 0x774   : > { %12052 = vmatpush1.bf16.msra.mxu0 %v13765_v41  ;;  %12380 = vmatpush1.bf16.msra.mxu1 %v13767_v21  ;;  %v13799_v41 = vcombine.low %v5523_v38, %v5527_v39  ;;  %v13806_v21 = vcombine.high %v5530_v50, %v5534_v15  ;;  %v5579_v50 = vld [vmem:[%s15311_s10 + $0xf98] sm:$0xff] }
 0x775   : > { %12053 = vmatprep.subr.bf16.mxu0 %v13774_v54  ;;  %12381 = vmatprep.subr.bf16.mxu1 %v13776_v57  ;;  %v13808_v54 = vcombine.high %v5531_v4, %v5535_v52  ;;  %v5538_v57 = vld [vmem:[%s15311_s10 + $0xe50] sm:$0xff]  ;;  %v5583_v15 = vld [vmem:[%s15311_s10 + $0xfb8] sm:$0xff] }
 0x776   : > { %v13813_v9 = vcombine.low %v5538_v57, %v5542_v60 }
 0x778   : > { %12054 = vmatpush1.bf16.msra.mxu0 %v13773_v0  ;;  %12382 = vmatpush1.bf16.msra.mxu1 %v13775_v3  ;;  %v13814_v0 = vcombine.high %v5538_v57, %v5542_v60  ;;  %v5587_v57 = vld [vmem:[%s15311_s10 + $0xfd8] sm:$0xff] }
 0x779   : > { %12055 = vmatprep.subr.bf16.mxu0 %v13782_v7  ;;  %12383 = vmatprep.subr.bf16.mxu1 %v13784_v31  ;;  %v5551_v7 = vld [vmem:[%s15311_s10 + $0xeb8] sm:$0xff] }
 0x77a   : > { %v11587_v23 = vpop.f32.mrb[0].mxu0  ;;  %v11915_v37 = vpop.f32.mrb[0].mxu1  ;;  %v5591_v60 = vld [vmem:[%s15311_s10 + $0xff8] sm:$0xff] }
 0x77b   : > { %v14429_v32 = vadd.f32 %v11587_v23, %v6109_v12  ;;  %v11589_v44 = vpop.f32.mrb[1].mxu0  ;;  %v14431_v55 = vadd.f32 %v11915_v37, %v6117_v19  ;;  %v11917_v56 = vpop.f32.mrb[1].mxu1  ;;  %v13815_v12 = vcombine.low %v5539_v61, %v5543_v14  ;;  %v13824_v19 = vcombine.high %v5547_v5, %v5551_v7  ;;  %v5563_v37 = vld [vmem:[%s15311_s10 + $0xf18] sm:$0xff] }
 0x77c   : > { %v14430_v40 = vadd.f32 %v11589_v44, %v6113_v13  ;;  %v11591_v59 = vpop.f32.mrb[2].mxu0  ;;  %12056 = vmatpush1.bf16.msra.mxu0 %v13781_v26  ;;  %v14432_v43 = vadd.f32 %v11917_v56, %v6121_v27  ;;  %v11919_v45 = vpop.f32.mrb[2].mxu1  ;;  %12384 = vmatpush1.bf16.msra.mxu1 %v13783_v29  ;;  %v5554_v13 = vld [vmem:[%s15311_s10 + $0xed0] sm:$0xff]  ;;  %v5555_v27 = vld [vmem:[%s15311_s10 + $0xed8] sm:$0xff]  ;;  %v13823_v23 = vcombine.low %v5547_v5, %v5551_v7 }
 0x77d   : > { %14787 = vtanh.f32 %v14429_v32  ;;  %v11592_v46 = vpop.f32.mrb[3].mxu0  ;;  %12057 = vmatprep.subr.bf16.mxu0 %v13790_v30  ;;  %v11920_v48 = vpop.f32.mrb[3].mxu1  ;;  %12385 = vmatprep.subr.bf16.mxu1 %v13792_v33  ;;  %v5558_v26 = vld [vmem:[%s15311_s10 + $0xef0] sm:$0xff]  ;;  %v5559_v29 = vld [vmem:[%s15311_s10 + $0xef8] sm:$0xff]  ;;  %v13821_v30 = vcombine.low %v5546_v2, %v5550_v24  ;;  %v13855_v14 = vcombine.low %v5579_v50, %v5583_v15  ;;  %v13863_v5 = vcombine.low %v5587_v57, %v5591_v60 }
 0x77e   : > { %14789 = vtanh.f32 %v14431_v55  ;;  %v13830_v33 = vcombine.high %v5554_v13, %v5558_v26  ;;  %v13832_v34 = vcombine.high %v5555_v27, %v5559_v29  ;;  %v5566_v32 = vld [vmem:[%s15311_s10 + $0xf30] sm:$0xff]  ;;  %v5567_v44 = vld [vmem:[%s15311_s10 + $0xf38] sm:$0xff]  ;;  %v13829_v38 = vcombine.low %v5554_v13, %v5558_v26 }
 0x77f   : > { %14791 = vtanh.f32 %v14430_v40  ;;  %v13831_v39 = vcombine.low %v5555_v27, %v5559_v29  ;;  %v13838_v55 = vcombine.high %v5562_v35, %v5566_v32  ;;  %v13840_v40 = vcombine.high %v5563_v37, %v5567_v44  ;;  %v5570_v56 = vld [vmem:[%s15311_s10 + $0xf50] sm:$0xff]  ;;  %v5595_v2 = vld [vmem:[%s15311_s10 + $0x1018] sm:$0xff] }
 0x780   : > { %14793 = vtanh.f32 %v14432_v43  ;;  %12058 = vmatpush1.bf16.msra.mxu0 %v13789_v42  ;;  %12386 = vmatpush1.bf16.msra.mxu1 %v13791_v47  ;;  %v5574_v59 = vld [vmem:[%s15311_s10 + $0xf70] sm:$0xff]  ;;  %v5571_v42 = vld [vmem:[%s15311_s10 + $0xf58] sm:$0xff]  ;;  %v13837_v45 = vcombine.low %v5562_v35, %v5566_v32  ;;  %v13839_v46 = vcombine.low %v5563_v37, %v5567_v44 }
 0x781   : > { %12059 = vmatprep.subr.bf16.mxu0 %v13798_v36  ;;  %12387 = vmatprep.subr.bf16.mxu1 %v13800_v11  ;;  %v5575_v43 = vld [vmem:[%s15311_s10 + $0xf78] sm:$0xff]  ;;  %v13846_v47 = vcombine.high %v5570_v56, %v5574_v59  ;;  %v5578_v48 = vld [vmem:[%s15311_s10 + $0xf90] sm:$0xff]  ;;  %v13845_v4 = vcombine.low %v5570_v56, %v5574_v59 }
 0x782   : > { %v13848_v36 = vcombine.high %v5571_v42, %v5575_v43  ;;  %v5582_v11 = vld [vmem:[%s15311_s10 + $0xfb0] sm:$0xff]  ;;  %v13847_v52 = vcombine.low %v5571_v42, %v5575_v43  ;;  %v5599_v24 = vld [vmem:[%s15311_s10 + $0x1038] sm:$0xff] }
 0x783   : > { %v13853_v61 = vcombine.low %v5578_v48, %v5582_v11  ;;  %v5610_v27 = vld [vmem:[%s15311_s10 + $0x1090] sm:$0xff]  ;;  %v5627_v43 = vld [vmem:[%s15311_s10 + $0x1118] sm:$0xff] }
 0x784   : > { %12060 = vmatpush1.bf16.msra.mxu0 %v13797_v20  ;;  %12388 = vmatpush1.bf16.msra.mxu1 %v13799_v41  ;;  %v13854_v20 = vcombine.high %v5578_v48, %v5582_v11  ;;  %v13856_v41 = vcombine.high %v5579_v50, %v5583_v15  ;;  %v5614_v29 = vld [vmem:[%s15311_s10 + $0x10b0] sm:$0xff]  ;;  %v5635_v50 = vld [vmem:[%s15311_s10 + $0x1158] sm:$0xff] }
 0x785   : > { %12061 = vmatprep.subr.bf16.mxu0 %v13806_v21  ;;  %12389 = vmatprep.subr.bf16.mxu1 %v13808_v54  ;;  %v5586_v21 = vld [vmem:[%s15311_s10 + $0xfd0] sm:$0xff]  ;;  %v13886_v35 = vcombine.high %v5610_v27, %v5614_v29  ;;  %v5639_v15 = vld [vmem:[%s15311_s10 + $0x1178] sm:$0xff] }
 0x786   : > { %v5590_v54 = vld [vmem:[%s15311_s10 + $0xff0] sm:$0xff] }
 0x787   : > { %v14788_v3 = vpop.eup %14787  ;;  %v5618_v37 = vld [vmem:[%s15311_s10 + $0x10d0] sm:$0xff] }
 0x788   : > { %v14790_v31 = vpop.eup %14789  ;;  %12586 = vst [vmem:[%s15323_s2] sm:$0xff] %v14788_v3  ;;  %12062 = vmatpush1.bf16.msra.mxu0 %v13805_v62  ;;  %12390 = vmatpush1.bf16.msra.mxu1 %v13807_v63  ;;  %v13862_v62 = vcombine.high %v5586_v21, %v5590_v54  ;;  %v13864_v63 = vcombine.high %v5587_v57, %v5591_v60  ;;  %v5622_v44 = vld [vmem:[%s15311_s10 + $0x10f0] sm:$0xff]  ;;  %v5643_v57 = vld [vmem:[%s15311_s10 + $0x1198] sm:$0xff] }
 0x789   : > { %v14792_v10 = vpop.eup %14791  ;;  %12588 = vst [vmem:[%s15323_s2 + $0x10] sm:$0xff] %v14790_v31  ;;  %12063 = vmatprep.subr.bf16.mxu0 %v13814_v0  ;;  %12391 = vmatprep.subr.bf16.mxu1 %v13816_v1  ;;  %v5594_v0 = vld [vmem:[%s15311_s10 + $0x1010] sm:$0xff]  ;;  %v13861_v3 = vcombine.low %v5586_v21, %v5590_v54  ;;  %v13872_v31 = vcombine.high %v5595_v2, %v5599_v24  ;;  %v5647_v60 = vld [vmem:[%s15311_s10 + $0x11b8] sm:$0xff] }
 0x78a   : > { %v14794_v18 = vpop.eup %14793  ;;  %12587 = vst [vmem:[%s15323_s2 + $0x8] sm:$0xff] %v14792_v10  ;;  %v5598_v1 = vld [vmem:[%s15311_s10 + $0x1030] sm:$0xff] }
 0x78b   : > { %12589 = vst [vmem:[%s15323_s2 + $0x18] sm:$0xff] %v14794_v18  ;;  %v13870_v7 = vcombine.high %v5594_v0, %v5598_v1  ;;  %v5606_v10 = vld [vmem:[%s15311_s10 + $0x1070] sm:$0xff]  ;;  %v13869_v18 = vcombine.low %v5594_v0, %v5598_v1 }
 0x78c   : > { %12064 = vmatpush1.bf16.msra.mxu0 %v13813_v9  ;;  %12392 = vmatpush1.bf16.msra.mxu1 %v13815_v12  ;;  %v5602_v9 = vld [vmem:[%s15311_s10 + $0x1050] sm:$0xff]  ;;  %v5603_v12 = vld [vmem:[%s15311_s10 + $0x1058] sm:$0xff] }
 0x78d   : > { %12065 = vmatprep.subr.bf16.mxu0 %v13822_v16  ;;  %12393 = vmatprep.subr.bf16.mxu1 %v13824_v19  ;;  %v5607_v16 = vld [vmem:[%s15311_s10 + $0x1078] sm:$0xff]  ;;  %v13871_v19 = vcombine.low %v5595_v2, %v5599_v24  ;;  %v13878_v13 = vcombine.high %v5602_v9, %v5606_v10  ;;  %v5626_v59 = vld [vmem:[%s15311_s10 + $0x1110] sm:$0xff] }
 0x78e   : > { %v13880_v26 = vcombine.high %v5603_v12, %v5607_v16  ;;  %v5630_v42 = vld [vmem:[%s15311_s10 + $0x1130] sm:$0xff]  ;;  %v5651_v2 = vld [vmem:[%s15311_s10 + $0x11d8] sm:$0xff] }
 0x78f   : > { %v5634_v48 = vld [vmem:[%s15311_s10 + $0x1150] sm:$0xff]  ;;  %v5655_v24 = vld [vmem:[%s15311_s10 + $0x11f8] sm:$0xff] }
 0x790   : > { %12066 = vmatpush1.bf16.msra.mxu0 %v13821_v30  ;;  %12394 = vmatpush1.bf16.msra.mxu1 %v13823_v23  ;;  %v5611_v30 = vld [vmem:[%s15311_s10 + $0x1098] sm:$0xff]  ;;  %v5638_v11 = vld [vmem:[%s15311_s10 + $0x1170] sm:$0xff] }
 0x791   : > { %12067 = vmatprep.subr.bf16.mxu0 %v13830_v33  ;;  %12395 = vmatprep.subr.bf16.mxu1 %v13832_v34  ;;  %v5615_v23 = vld [vmem:[%s15311_s10 + $0x10b8] sm:$0xff]  ;;  %v13877_v33 = vcombine.low %v5602_v9, %v5606_v10  ;;  %v13879_v34 = vcombine.low %v5603_v12, %v5607_v16  ;;  %v5642_v21 = vld [vmem:[%s15311_s10 + $0x1190] sm:$0xff] }
 0x792   : > { %v13888_v32 = vcombine.high %v5611_v30, %v5615_v23  ;;  %v5646_v54 = vld [vmem:[%s15311_s10 + $0x11b0] sm:$0xff]  ;;  %v5659_v12 = vld [vmem:[%s15311_s10 + $0x1218] sm:$0xff] }
 0x793   : > { %v5650_v0 = vld [vmem:[%s15311_s10 + $0x11d0] sm:$0xff]  ;;  %v5663_v16 = vld [vmem:[%s15311_s10 + $0x1238] sm:$0xff] }
 0x794   : > { %12068 = vmatpush1.bf16.msra.mxu0 %v13829_v38  ;;  %12396 = vmatpush1.bf16.msra.mxu1 %v13831_v39  ;;  %v5619_v38 = vld [vmem:[%s15311_s10 + $0x10d8] sm:$0xff]  ;;  %v5654_v1 = vld [vmem:[%s15311_s10 + $0x11f0] sm:$0xff] }
 0x795   : > { %12069 = vmatprep.subr.bf16.mxu0 %v13838_v55  ;;  %12397 = vmatprep.subr.bf16.mxu1 %v13840_v40  ;;  %v5623_v39 = vld [vmem:[%s15311_s10 + $0x10f8] sm:$0xff]  ;;  %v13887_v55 = vcombine.low %v5611_v30, %v5615_v23  ;;  %v13894_v40 = vcombine.high %v5618_v37, %v5622_v44  ;;  %v5658_v9 = vld [vmem:[%s15311_s10 + $0x1210] sm:$0xff] }
 0x796   : > { %v13896_v56 = vcombine.high %v5619_v38, %v5623_v39  ;;  %v5662_v10 = vld [vmem:[%s15311_s10 + $0x1230] sm:$0xff]  ;;  %v5667_v30 = vld [vmem:[%s15311_s10 + $0x1258] sm:$0xff] }
 0x797   : > { %v5671_v23 = vld [vmem:[%s15311_s10 + $0x1278] sm:$0xff] }
 0x798   : > { %12070 = vmatpush1.bf16.msra.mxu0 %v13837_v45  ;;  %12398 = vmatpush1.bf16.msra.mxu1 %v13839_v46  ;;  %v5631_v45 = vld [vmem:[%s15311_s10 + $0x1138] sm:$0xff]  ;;  %v13893_v46 = vcombine.low %v5618_v37, %v5622_v44  ;;  %v5674_v37 = vld [vmem:[%s15311_s10 + $0x1290] sm:$0xff] }
 0x799   : > { %12071 = vmatprep.subr.bf16.mxu0 %v13846_v47  ;;  %12399 = vmatprep.subr.bf16.mxu1 %v13848_v36  ;;  %v13902_v47 = vcombine.high %v5626_v59, %v5630_v42  ;;  %v13904_v36 = vcombine.high %v5627_v43, %v5631_v45  ;;  %v5678_v44 = vld [vmem:[%s15311_s10 + $0x12b0] sm:$0xff] }
 0x79c   : > { %12072 = vmatpush1.bf16.msra.mxu0 %v13845_v4  ;;  %12400 = vmatpush1.bf16.msra.mxu1 %v13847_v52  ;;  %v13901_v4 = vcombine.low %v5626_v59, %v5630_v42  ;;  %v13903_v52 = vcombine.low %v5627_v43, %v5631_v45  ;;  %v5682_v59 = vld [vmem:[%s15311_s10 + $0x12d0] sm:$0xff]  ;;  %v5683_v43 = vld [vmem:[%s15311_s10 + $0x12d8] sm:$0xff] }
 0x79d   : > { %12073 = vmatprep.subr.bf16.mxu0 %v13854_v20  ;;  %12401 = vmatprep.subr.bf16.mxu1 %v13856_v41  ;;  %v13910_v20 = vcombine.high %v5634_v48, %v5638_v11  ;;  %v13912_v41 = vcombine.high %v5635_v50, %v5639_v15  ;;  %v5686_v42 = vld [vmem:[%s15311_s10 + $0x12f0] sm:$0xff]  ;;  %v5687_v45 = vld [vmem:[%s15311_s10 + $0x12f8] sm:$0xff] }
 0x7a0   : > { %12074 = vmatpush1.bf16.msra.mxu0 %v13853_v61  ;;  %12402 = vmatpush1.bf16.msra.mxu1 %v13855_v14  ;;  %v13909_v61 = vcombine.low %v5634_v48, %v5638_v11  ;;  %v13911_v14 = vcombine.low %v5635_v50, %v5639_v15  ;;  %v5690_v48 = vld [vmem:[%s15311_s10 + $0x1310] sm:$0xff]  ;;  %v5691_v50 = vld [vmem:[%s15311_s10 + $0x1318] sm:$0xff] }
 0x7a1   : > { %12075 = vmatprep.subr.bf16.mxu0 %v13862_v62  ;;  %12403 = vmatprep.subr.bf16.mxu1 %v13864_v63  ;;  %v13918_v62 = vcombine.high %v5642_v21, %v5646_v54  ;;  %v13920_v63 = vcombine.high %v5643_v57, %v5647_v60  ;;  %v5694_v11 = vld [vmem:[%s15311_s10 + $0x1330] sm:$0xff]  ;;  %v5695_v15 = vld [vmem:[%s15311_s10 + $0x1338] sm:$0xff] }
 0x7a4   : > { %12076 = vmatpush1.bf16.msra.mxu0 %v13861_v3  ;;  %12404 = vmatpush1.bf16.msra.mxu1 %v13863_v5  ;;  %v13917_v3 = vcombine.low %v5642_v21, %v5646_v54  ;;  %v13919_v5 = vcombine.low %v5643_v57, %v5647_v60  ;;  %v5698_v21 = vld [vmem:[%s15311_s10 + $0x1350] sm:$0xff]  ;;  %v5699_v57 = vld [vmem:[%s15311_s10 + $0x1358] sm:$0xff] }
 0x7a5   : > { %12086 = vmatprep.subr.bf16.mxu0 %v13870_v7  ;;  %12414 = vmatprep.subr.bf16.mxu1 %v13872_v31  ;;  %v13926_v7 = vcombine.high %v5650_v0, %v5654_v1  ;;  %v13928_v31 = vcombine.high %v5651_v2, %v5655_v24  ;;  %v5702_v54 = vld [vmem:[%s15311_s10 + $0x1370] sm:$0xff]  ;;  %v5703_v60 = vld [vmem:[%s15311_s10 + $0x1378] sm:$0xff] }
 0x7a7   : > { %12078 = vmatmul.mubr.bf16.vlgmr.msra.gmra.mrb[4].mxu0 %v15735_v49  ;;  %12406 = vmatmul.mubr.bf16.vlgmr.msra.gmra.mrb[4].mxu1 %v15735_v49  ;;  %v13885_v49 = vcombine.low %v5610_v27, %v5614_v29  ;;  %v5666_v27 = vld [vmem:[%s15311_s10 + $0x1250] sm:$0xff] }
 0x7a8   : > { %12087 = vmatpush1.bf16.msra.mxu0 %v13869_v18  ;;  %12415 = vmatpush1.bf16.msra.mxu1 %v13871_v19  ;;  %v13925_v18 = vcombine.low %v5650_v0, %v5654_v1  ;;  %v13927_v19 = vcombine.low %v5651_v2, %v5655_v24  ;;  %v5670_v29 = vld [vmem:[%s15311_s10 + $0x1270] sm:$0xff]  ;;  %v5707_v2 = vld [vmem:[%s15311_s10 + $0x1398] sm:$0xff] }
 0x7a9   : > { %12088 = vmatprep.subr.bf16.mxu0 %v13878_v13  ;;  %12416 = vmatprep.subr.bf16.mxu1 %v13880_v26  ;;  %v13934_v13 = vcombine.high %v5658_v9, %v5662_v10  ;;  %v13936_v26 = vcombine.high %v5659_v12, %v5663_v16  ;;  %v5706_v0 = vld [vmem:[%s15311_s10 + $0x1390] sm:$0xff]  ;;  %v5711_v24 = vld [vmem:[%s15311_s10 + $0x13b8] sm:$0xff] }
 0x7aa   : > { %12118 = vmatprep.mubr.bf16.mxu0 %v15741_v25  ;;  %12446 = vmatprep.mubr.bf16.mxu1 %v15741_v25  ;;  %v13895_v25 = vcombine.low %v5619_v38, %v5623_v39  ;;  %v5675_v38 = vld [vmem:[%s15311_s10 + $0x1298] sm:$0xff]  ;;  %v5710_v1 = vld [vmem:[%s15311_s10 + $0x13b0] sm:$0xff] }
 0x7ab   : > { %v5679_v39 = vld [vmem:[%s15311_s10 + $0x12b8] sm:$0xff] }
 0x7ac   : > { %12089 = vmatpush1.bf16.msra.mxu0 %v13877_v33  ;;  %12417 = vmatpush1.bf16.msra.mxu1 %v13879_v34  ;;  %v13933_v33 = vcombine.low %v5658_v9, %v5662_v10  ;;  %v13935_v34 = vcombine.low %v5659_v12, %v5663_v16  ;;  %v5714_v9 = vld [vmem:[%s15311_s10 + $0x13d0] sm:$0xff]  ;;  %v5715_v12 = vld [vmem:[%s15311_s10 + $0x13d8] sm:$0xff] }
 0x7ad   : > { %12090 = vmatprep.subr.bf16.mxu0 %v13886_v35  ;;  %12418 = vmatprep.subr.bf16.mxu1 %v13888_v32  ;;  %v13942_v35 = vcombine.high %v5666_v27, %v5670_v29  ;;  %v13944_v32 = vcombine.high %v5667_v30, %v5671_v23  ;;  %v5718_v10 = vld [vmem:[%s15311_s10 + $0x13f0] sm:$0xff]  ;;  %v5719_v16 = vld [vmem:[%s15311_s10 + $0x13f8] sm:$0xff] }
 0x7b0   : > { %12091 = vmatpush1.bf16.msra.mxu0 %v13885_v49  ;;  %12419 = vmatpush1.bf16.msra.mxu1 %v13887_v55  ;;  %v13941_v49 = vcombine.low %v5666_v27, %v5670_v29  ;;  %v13943_v55 = vcombine.low %v5667_v30, %v5671_v23  ;;  %v5722_v27 = vld [vmem:[%s15311_s10 + $0x1410] sm:$0xff]  ;;  %v5723_v30 = vld [vmem:[%s15311_s10 + $0x1418] sm:$0xff] }
 0x7b1   : > { %12092 = vmatprep.subr.bf16.mxu0 %v13894_v40  ;;  %12420 = vmatprep.subr.bf16.mxu1 %v13896_v56  ;;  %v13950_v40 = vcombine.high %v5674_v37, %v5678_v44  ;;  %v13952_v56 = vcombine.high %v5675_v38, %v5679_v39  ;;  %v5726_v29 = vld [vmem:[%s15311_s10 + $0x1430] sm:$0xff]  ;;  %v5727_v23 = vld [vmem:[%s15311_s10 + $0x1438] sm:$0xff] }
 0x7b4   : > { %12093 = vmatpush1.bf16.msra.mxu0 %v13893_v46  ;;  %12421 = vmatpush1.bf16.msra.mxu1 %v13895_v25  ;;  %v13949_v46 = vcombine.low %v5674_v37, %v5678_v44  ;;  %v13951_v25 = vcombine.low %v5675_v38, %v5679_v39  ;;  %v5730_v37 = vld [vmem:[%s15311_s10 + $0x1450] sm:$0xff]  ;;  %v5731_v38 = vld [vmem:[%s15311_s10 + $0x1458] sm:$0xff] }
 0x7b5   : > { %12094 = vmatprep.subr.bf16.mxu0 %v13902_v47  ;;  %12422 = vmatprep.subr.bf16.mxu1 %v13904_v36  ;;  %v13958_v47 = vcombine.high %v5682_v59, %v5686_v42  ;;  %v13960_v36 = vcombine.high %v5683_v43, %v5687_v45  ;;  %v5734_v44 = vld [vmem:[%s15311_s10 + $0x1470] sm:$0xff]  ;;  %v5735_v39 = vld [vmem:[%s15311_s10 + $0x1478] sm:$0xff] }
 0x7b8   : > { %12095 = vmatpush1.bf16.msra.mxu0 %v13901_v4  ;;  %12423 = vmatpush1.bf16.msra.mxu1 %v13903_v52  ;;  %v13957_v4 = vcombine.low %v5682_v59, %v5686_v42  ;;  %v13959_v52 = vcombine.low %v5683_v43, %v5687_v45  ;;  %v5738_v59 = vld [vmem:[%s15311_s10 + $0x1490] sm:$0xff]  ;;  %v5739_v43 = vld [vmem:[%s15311_s10 + $0x1498] sm:$0xff] }
 0x7b9   : > { %12096 = vmatprep.subr.bf16.mxu0 %v13910_v20  ;;  %12424 = vmatprep.subr.bf16.mxu1 %v13912_v41  ;;  %v13966_v20 = vcombine.high %v5690_v48, %v5694_v11  ;;  %v13968_v41 = vcombine.high %v5691_v50, %v5695_v15  ;;  %v5742_v42 = vld [vmem:[%s15311_s10 + $0x14b0] sm:$0xff]  ;;  %v5743_v45 = vld [vmem:[%s15311_s10 + $0x14b8] sm:$0xff] }
 0x7bc   : > { %12097 = vmatpush1.bf16.msra.mxu0 %v13909_v61  ;;  %12425 = vmatpush1.bf16.msra.mxu1 %v13911_v14  ;;  %v13965_v61 = vcombine.low %v5690_v48, %v5694_v11  ;;  %v13967_v14 = vcombine.low %v5691_v50, %v5695_v15  ;;  %v5746_v48 = vld [vmem:[%s15311_s10 + $0x14d0] sm:$0xff]  ;;  %v5747_v50 = vld [vmem:[%s15311_s10 + $0x14d8] sm:$0xff] }
 0x7bd   : > { %12098 = vmatprep.subr.bf16.mxu0 %v13918_v62  ;;  %12426 = vmatprep.subr.bf16.mxu1 %v13920_v63  ;;  %v13974_v62 = vcombine.high %v5698_v21, %v5702_v54  ;;  %v13976_v63 = vcombine.high %v5699_v57, %v5703_v60  ;;  %v5750_v11 = vld [vmem:[%s15311_s10 + $0x14f0] sm:$0xff]  ;;  %v5751_v15 = vld [vmem:[%s15311_s10 + $0x14f8] sm:$0xff] }
 0x7c0   : > { %12099 = vmatpush1.bf16.msra.mxu0 %v13917_v3  ;;  %12427 = vmatpush1.bf16.msra.mxu1 %v13919_v5  ;;  %v13973_v3 = vcombine.low %v5698_v21, %v5702_v54  ;;  %v13975_v5 = vcombine.low %v5699_v57, %v5703_v60  ;;  %v5758_v21 = vld [vmem:[%s15311_s10 + $0x1530] sm:$0xff]  ;;  %v5755_v54 = vld [vmem:[%s15311_s10 + $0x1518] sm:$0xff]  ;;  %v14021_v60 = vcombine.low %v5746_v48, %v5750_v11 }
 0x7c1   : > { %12100 = vmatprep.subr.bf16.mxu0 %v13926_v7  ;;  %12428 = vmatprep.subr.bf16.mxu1 %v13928_v31  ;;  %v13982_v7 = vcombine.high %v5706_v0, %v5710_v1  ;;  %v13984_v31 = vcombine.high %v5707_v2, %v5711_v24  ;;  %v5759_v57 = vld [vmem:[%s15311_s10 + $0x1538] sm:$0xff] }
 0x7c4   : > { %12101 = vmatpush1.bf16.msra.mxu0 %v13925_v18  ;;  %12429 = vmatpush1.bf16.msra.mxu1 %v13927_v19  ;;  %v13981_v18 = vcombine.low %v5706_v0, %v5710_v1  ;;  %v13983_v19 = vcombine.low %v5707_v2, %v5711_v24  ;;  %v5763_v0 = vld [vmem:[%s15311_s10 + $0x1558] sm:$0xff]  ;;  %v14031_v24 = vcombine.low %v5755_v54, %v5759_v57 }
 0x7c5   : > { %12102 = vmatprep.subr.bf16.mxu0 %v13934_v13  ;;  %12430 = vmatprep.subr.bf16.mxu1 %v13936_v26  ;;  %v13990_v13 = vcombine.high %v5714_v9, %v5718_v10  ;;  %v13992_v26 = vcombine.high %v5715_v12, %v5719_v16  ;;  %v5767_v1 = vld [vmem:[%s15311_s10 + $0x1578] sm:$0xff] }
 0x7c8   : > { %12103 = vmatpush1.bf16.msra.mxu0 %v13933_v33  ;;  %12431 = vmatpush1.bf16.msra.mxu1 %v13935_v34  ;;  %v13989_v33 = vcombine.low %v5714_v9, %v5718_v10  ;;  %v13991_v34 = vcombine.low %v5715_v12, %v5719_v16  ;;  %v5771_v9 = vld [vmem:[%s15311_s10 + $0x1598] sm:$0xff]  ;;  %v14039_v16 = vcombine.low %v5763_v0, %v5767_v1 }
 0x7c9   : > { %12104 = vmatprep.subr.bf16.mxu0 %v13942_v35  ;;  %12432 = vmatprep.subr.bf16.mxu1 %v13944_v32  ;;  %v13998_v35 = vcombine.high %v5722_v27, %v5726_v29  ;;  %v14000_v32 = vcombine.high %v5723_v30, %v5727_v23  ;;  %v5775_v10 = vld [vmem:[%s15311_s10 + $0x15b8] sm:$0xff] }
 0x7cc   : > { %12105 = vmatpush1.bf16.msra.mxu0 %v13941_v49  ;;  %12433 = vmatpush1.bf16.msra.mxu1 %v13943_v55  ;;  %v13997_v49 = vcombine.low %v5722_v27, %v5726_v29  ;;  %v13999_v55 = vcombine.low %v5723_v30, %v5727_v23  ;;  %v5779_v27 = vld [vmem:[%s15311_s10 + $0x15d8] sm:$0xff]  ;;  %v14047_v23 = vcombine.low %v5771_v9, %v5775_v10 }
 0x7cd   : > { %12106 = vmatprep.subr.bf16.mxu0 %v13950_v40  ;;  %12434 = vmatprep.subr.bf16.mxu1 %v13952_v56  ;;  %v14006_v40 = vcombine.high %v5730_v37, %v5734_v44  ;;  %v14008_v56 = vcombine.high %v5731_v38, %v5735_v39  ;;  %v5783_v29 = vld [vmem:[%s15311_s10 + $0x15f8] sm:$0xff] }
 0x7d0   : > { %12107 = vmatpush1.bf16.msra.mxu0 %v13949_v46  ;;  %12435 = vmatpush1.bf16.msra.mxu1 %v13951_v25  ;;  %v14005_v46 = vcombine.low %v5730_v37, %v5734_v44  ;;  %v14007_v25 = vcombine.low %v5731_v38, %v5735_v39  ;;  %v5787_v37 = vld [vmem:[%s15311_s10 + $0x1618] sm:$0xff]  ;;  %v14055_v39 = vcombine.low %v5779_v27, %v5783_v29 }
 0x7d1   : > { %12108 = vmatprep.subr.bf16.mxu0 %v13958_v47  ;;  %12436 = vmatprep.subr.bf16.mxu1 %v13960_v36  ;;  %v14014_v47 = vcombine.high %v5738_v59, %v5742_v42  ;;  %v14016_v36 = vcombine.high %v5739_v43, %v5743_v45  ;;  %v5791_v44 = vld [vmem:[%s15311_s10 + $0x1638] sm:$0xff] }
 0x7d4   : > { %12109 = vmatpush1.bf16.msra.mxu0 %v13957_v4  ;;  %12437 = vmatpush1.bf16.msra.mxu1 %v13959_v52  ;;  %v14015_v4 = vcombine.low %v5739_v43, %v5743_v45  ;;  %v14022_v52 = vcombine.high %v5746_v48, %v5750_v11  ;;  %v14063_v45 = vcombine.low %v5787_v37, %v5791_v44  ;;  %v5803_v48 = vld [vmem:[%s15311_s10 + $0x1698] sm:$0xff] }
 0x7d5   : > { %12110 = vmatprep.subr.bf16.mxu0 %v13966_v20  ;;  %12438 = vmatprep.subr.bf16.mxu1 %v13968_v41  ;;  %v14024_v20 = vcombine.high %v5747_v50, %v5751_v15  ;;  %v5754_v41 = vld [vmem:[%s15311_s10 + $0x1510] sm:$0xff]  ;;  %v5807_v11 = vld [vmem:[%s15311_s10 + $0x16b8] sm:$0xff] }
 0x7d6   : > { %v14029_v2 = vcombine.low %v5754_v41, %v5758_v21 }
 0x7d8   : > { %12111 = vmatpush1.bf16.msra.mxu0 %v13965_v61  ;;  %12439 = vmatpush1.bf16.msra.mxu1 %v13967_v14  ;;  %v14030_v61 = vcombine.high %v5754_v41, %v5758_v21  ;;  %v14032_v14 = vcombine.high %v5755_v54, %v5759_v57  ;;  %v5811_v41 = vld [vmem:[%s15311_s10 + $0x16d8] sm:$0xff]  ;;  %v14079_v57 = vcombine.low %v5803_v48, %v5807_v11 }
 0x7d9   : > { %12112 = vmatprep.subr.bf16.mxu0 %v13974_v62  ;;  %12440 = vmatprep.subr.bf16.mxu1 %v13976_v63  ;;  %v5762_v62 = vld [vmem:[%s15311_s10 + $0x1550] sm:$0xff]  ;;  %v5815_v21 = vld [vmem:[%s15311_s10 + $0x16f8] sm:$0xff] }
 0x7da   : > { %v5766_v63 = vld [vmem:[%s15311_s10 + $0x1570] sm:$0xff] }
 0x7db   : > { %v14037_v12 = vcombine.low %v5762_v62, %v5766_v63 }
 0x7dc   : > { %12113 = vmatpush1.bf16.msra.mxu0 %v13973_v3  ;;  %12441 = vmatpush1.bf16.msra.mxu1 %v13975_v5  ;;  %v14038_v3 = vcombine.high %v5762_v62, %v5766_v63  ;;  %v14040_v5 = vcombine.high %v5763_v0, %v5767_v1  ;;  %v5819_v62 = vld [vmem:[%s15311_s10 + $0x1718] sm:$0xff]  ;;  %v14087_v1 = vcombine.low %v5811_v41, %v5815_v21 }
 0x7dd   : > { %12114 = vmatprep.subr.bf16.mxu0 %v13982_v7  ;;  %12442 = vmatprep.subr.bf16.mxu1 %v13984_v31  ;;  %v5770_v7 = vld [vmem:[%s15311_s10 + $0x1590] sm:$0xff]  ;;  %v5823_v63 = vld [vmem:[%s15311_s10 + $0x1738] sm:$0xff] }
 0x7de   : > { %v5774_v31 = vld [vmem:[%s15311_s10 + $0x15b0] sm:$0xff] }
 0x7df   : > { %v14045_v30 = vcombine.low %v5770_v7, %v5774_v31 }
 0x7e0   : > { %12115 = vmatpush1.bf16.msra.mxu0 %v13981_v18  ;;  %12443 = vmatpush1.bf16.msra.mxu1 %v13983_v19  ;;  %v14046_v18 = vcombine.high %v5770_v7, %v5774_v31  ;;  %v14048_v19 = vcombine.high %v5771_v9, %v5775_v10  ;;  %v5827_v7 = vld [vmem:[%s15311_s10 + $0x1758] sm:$0xff]  ;;  %v14095_v10 = vcombine.low %v5819_v62, %v5823_v63 }
 0x7e1   : > { %12116 = vmatprep.subr.bf16.mxu0 %v13990_v13  ;;  %12444 = vmatprep.subr.bf16.mxu1 %v13992_v26  ;;  %v5778_v13 = vld [vmem:[%s15311_s10 + $0x15d0] sm:$0xff]  ;;  %v5831_v31 = vld [vmem:[%s15311_s10 + $0x1778] sm:$0xff] }
 0x7e2   : > { %v5782_v26 = vld [vmem:[%s15311_s10 + $0x15f0] sm:$0xff] }
 0x7e3   : > { %v14053_v38 = vcombine.low %v5778_v13, %v5782_v26 }
 0x7e4   : > { %12117 = vmatpush1.bf16.msra.mxu0 %v13989_v33  ;;  %12445 = vmatpush1.bf16.msra.mxu1 %v13991_v34  ;;  %v14054_v33 = vcombine.high %v5778_v13, %v5782_v26  ;;  %v14056_v34 = vcombine.high %v5779_v27, %v5783_v29  ;;  %v5835_v13 = vld [vmem:[%s15311_s10 + $0x1798] sm:$0xff]  ;;  %v14103_v29 = vcombine.low %v5827_v7, %v5831_v31 }
 0x7e5   : > { %12127 = vmatprep.subr.bf16.mxu0 %v13998_v35  ;;  %12455 = vmatprep.subr.bf16.mxu1 %v14000_v32  ;;  %v5786_v35 = vld [vmem:[%s15311_s10 + $0x1610] sm:$0xff]  ;;  %v5839_v26 = vld [vmem:[%s15311_s10 + $0x17b8] sm:$0xff] }
 0x7e6   : > { %v5790_v32 = vld [vmem:[%s15311_s10 + $0x1630] sm:$0xff] }
 0x7e7   : > { %12119 = vmatmul.mubr.bf16.vlgmr.msra.gmra.mrb[4].mxu0 %v15807_v6  ;;  %12447 = vmatmul.mubr.bf16.vlgmr.msra.gmra.mrb[4].mxu1 %v15807_v6  ;;  %v14013_v6 = vcombine.low %v5738_v59, %v5742_v42  ;;  %v5795_v59 = vld [vmem:[%s15311_s10 + $0x1658] sm:$0xff]  ;;  %v14061_v43 = vcombine.low %v5786_v35, %v5790_v32 }
 0x7e8   : > { %12128 = vmatpush1.bf16.msra.mxu0 %v13997_v49  ;;  %12456 = vmatpush1.bf16.msra.mxu1 %v13999_v55  ;;  %v14062_v49 = vcombine.high %v5786_v35, %v5790_v32  ;;  %v14064_v55 = vcombine.high %v5787_v37, %v5791_v44  ;;  %v5799_v42 = vld [vmem:[%s15311_s10 + $0x1678] sm:$0xff]  ;;  %v14111_v44 = vcombine.low %v5835_v13, %v5839_v26 }
 0x7e9   : > { %12129 = vmatprep.subr.bf16.mxu0 %v14006_v40  ;;  %12457 = vmatprep.subr.bf16.mxu1 %v14008_v56  ;;  %v5794_v40 = vld [vmem:[%s15311_s10 + $0x1650] sm:$0xff]  ;;  %v5843_v35 = vld [vmem:[%s15311_s10 + $0x17d8] sm:$0xff] }
 0x7ea   : > { %12159 = vmatprep.mubr.bf16.mxu0 %v15813_v22  ;;  %12487 = vmatprep.mubr.bf16.mxu1 %v15813_v22  ;;  %v14023_v22 = vcombine.low %v5747_v50, %v5751_v15  ;;  %v5798_v56 = vld [vmem:[%s15311_s10 + $0x1670] sm:$0xff]  ;;  %v14071_v15 = vcombine.low %v5795_v59, %v5799_v42  ;;  %v5847_v32 = vld [vmem:[%s15311_s10 + $0x17f8] sm:$0xff] }
 0x7eb   : > { %v14069_v50 = vcombine.low %v5794_v40, %v5798_v56 }
 0x7ec   : > { %12130 = vmatpush1.bf16.msra.mxu0 %v14005_v46  ;;  %12458 = vmatpush1.bf16.msra.mxu1 %v14007_v25  ;;  %v14070_v46 = vcombine.high %v5794_v40, %v5798_v56  ;;  %v14072_v25 = vcombine.high %v5795_v59, %v5799_v42  ;;  %v5851_v40 = vld [vmem:[%s15311_s10 + $0x1818] sm:$0xff]  ;;  %v14119_v42 = vcombine.low %v5843_v35, %v5847_v32 }
 0x7ed   : > { %12131 = vmatprep.subr.bf16.mxu0 %v14014_v47  ;;  %12459 = vmatprep.subr.bf16.mxu1 %v14016_v36  ;;  %v5802_v47 = vld [vmem:[%s15311_s10 + $0x1690] sm:$0xff]  ;;  %v5855_v56 = vld [vmem:[%s15311_s10 + $0x1838] sm:$0xff] }
 0x7ee   : > { %v5806_v36 = vld [vmem:[%s15311_s10 + $0x16b0] sm:$0xff] }
 0x7ef   : > { %v14077_v54 = vcombine.low %v5802_v47, %v5806_v36 }
 0x7f0   : > { %12132 = vmatpush1.bf16.msra.mxu0 %v14013_v6  ;;  %12460 = vmatpush1.bf16.msra.mxu1 %v14015_v4  ;;  %v14078_v6 = vcombine.high %v5802_v47, %v5806_v36  ;;  %v14080_v4 = vcombine.high %v5803_v48, %v5807_v11  ;;  %v5859_v47 = vld [vmem:[%s15311_s10 + $0x1858] sm:$0xff]  ;;  %v14127_v11 = vcombine.low %v5851_v40, %v5855_v56 }
 0x7f1   : > { %12133 = vmatprep.subr.bf16.mxu0 %v14022_v52  ;;  %12461 = vmatprep.subr.bf16.mxu1 %v14024_v20  ;;  %v5810_v52 = vld [vmem:[%s15311_s10 + $0x16d0] sm:$0xff]  ;;  %v5863_v36 = vld [vmem:[%s15311_s10 + $0x1878] sm:$0xff] }
 0x7f2   : > { %v5814_v20 = vld [vmem:[%s15311_s10 + $0x16f0] sm:$0xff] }
 0x7f3   : > { %v14085_v0 = vcombine.low %v5810_v52, %v5814_v20 }
 0x7f4   : > { %12134 = vmatpush1.bf16.msra.mxu0 %v14021_v60  ;;  %12462 = vmatpush1.bf16.msra.mxu1 %v14023_v22  ;;  %v14086_v60 = vcombine.high %v5810_v52, %v5814_v20  ;;  %v14088_v22 = vcombine.high %v5811_v41, %v5815_v21  ;;  %v5867_v52 = vld [vmem:[%s15311_s10 + $0x1898] sm:$0xff]  ;;  %v14135_v21 = vcombine.low %v5859_v47, %v5863_v36 }
 0x7f5   : > { %12135 = vmatprep.subr.bf16.mxu0 %v14030_v61  ;;  %12463 = vmatprep.subr.bf16.mxu1 %v14032_v14  ;;  %v5818_v61 = vld [vmem:[%s15311_s10 + $0x1710] sm:$0xff]  ;;  %v5871_v20 = vld [vmem:[%s15311_s10 + $0x18b8] sm:$0xff] }
 0x7f6   : > { %v5822_v14 = vld [vmem:[%s15311_s10 + $0x1730] sm:$0xff] }
 0x7f7   : > { %v14093_v9 = vcombine.low %v5818_v61, %v5822_v14 }
 0x7f8   : > { %12136 = vmatpush1.bf16.msra.mxu0 %v14029_v2  ;;  %12464 = vmatpush1.bf16.msra.mxu1 %v14031_v24  ;;  %v14094_v2 = vcombine.high %v5818_v61, %v5822_v14  ;;  %v14096_v24 = vcombine.high %v5819_v62, %v5823_v63  ;;  %v5875_v61 = vld [vmem:[%s15311_s10 + $0x18d8] sm:$0xff]  ;;  %v14143_v62 = vcombine.low %v5867_v52, %v5871_v20 }
 0x7f9   : > { %12137 = vmatprep.subr.bf16.mxu0 %v14038_v3  ;;  %12465 = vmatprep.subr.bf16.mxu1 %v14040_v5  ;;  %v5826_v3 = vld [vmem:[%s15311_s10 + $0x1750] sm:$0xff]  ;;  %v5879_v14 = vld [vmem:[%s15311_s10 + $0x18f8] sm:$0xff] }
 0x7fa   : > { %v5830_v5 = vld [vmem:[%s15311_s10 + $0x1770] sm:$0xff] }
 0x7fb   : > { %v14101_v27 = vcombine.low %v5826_v3, %v5830_v5 }
 0x7fc   : > { %12138 = vmatpush1.bf16.msra.mxu0 %v14037_v12  ;;  %12466 = vmatpush1.bf16.msra.mxu1 %v14039_v16  ;;  %v14102_v12 = vcombine.high %v5826_v3, %v5830_v5  ;;  %v14104_v16 = vcombine.high %v5827_v7, %v5831_v31  ;;  %v5887_v3 = vld [vmem:[%s15311_s10 + $0x1938] sm:$0xff] }
 0x7fd   : > { %12139 = vmatprep.subr.bf16.mxu0 %v14046_v18  ;;  %12467 = vmatprep.subr.bf16.mxu1 %v14048_v19  ;;  %v5834_v18 = vld [vmem:[%s15311_s10 + $0x1790] sm:$0xff] }
 0x7fe   : > { %v5838_v19 = vld [vmem:[%s15311_s10 + $0x17b0] sm:$0xff] }
 0x7ff   : > { %v14109_v37 = vcombine.low %v5834_v18, %v5838_v19 }
 0x800   : > { %12140 = vmatpush1.bf16.msra.mxu0 %v14045_v30  ;;  %12468 = vmatpush1.bf16.msra.mxu1 %v14047_v23  ;;  %v14110_v30 = vcombine.high %v5834_v18, %v5838_v19  ;;  %v14112_v23 = vcombine.high %v5835_v13, %v5839_v26 }
 0x801   : > { %12141 = vmatprep.subr.bf16.mxu0 %v14054_v33  ;;  %12469 = vmatprep.subr.bf16.mxu1 %v14056_v34  ;;  %v5842_v33 = vld [vmem:[%s15311_s10 + $0x17d0] sm:$0xff] }
 0x802   : > { %v5846_v34 = vld [vmem:[%s15311_s10 + $0x17f0] sm:$0xff] }
 0x803   : > { %v14117_v59 = vcombine.low %v5842_v33, %v5846_v34 }
 0x804   : > { %12142 = vmatpush1.bf16.msra.mxu0 %v14053_v38  ;;  %12470 = vmatpush1.bf16.msra.mxu1 %v14055_v39  ;;  %v14118_v38 = vcombine.high %v5842_v33, %v5846_v34  ;;  %v14120_v39 = vcombine.high %v5843_v35, %v5847_v32 }
 0x805   : > { %12143 = vmatprep.subr.bf16.mxu0 %v14062_v49  ;;  %12471 = vmatprep.subr.bf16.mxu1 %v14064_v55  ;;  %v5850_v49 = vld [vmem:[%s15311_s10 + $0x1810] sm:$0xff] }
 0x806   : > { %v5854_v55 = vld [vmem:[%s15311_s10 + $0x1830] sm:$0xff] }
 0x807   : > { %v14125_v48 = vcombine.low %v5850_v49, %v5854_v55 }
 0x808   : > { %12144 = vmatpush1.bf16.msra.mxu0 %v14061_v43  ;;  %12472 = vmatpush1.bf16.msra.mxu1 %v14063_v45  ;;  %v14126_v43 = vcombine.high %v5850_v49, %v5854_v55  ;;  %v14128_v45 = vcombine.high %v5851_v40, %v5855_v56 }
 0x809   : > { %12145 = vmatprep.subr.bf16.mxu0 %v14070_v46  ;;  %12473 = vmatprep.subr.bf16.mxu1 %v14072_v25  ;;  %v5858_v46 = vld [vmem:[%s15311_s10 + $0x1850] sm:$0xff] }
 0x80a   : > { %v5862_v25 = vld [vmem:[%s15311_s10 + $0x1870] sm:$0xff] }
 0x80b   : > { %v14133_v41 = vcombine.low %v5858_v46, %v5862_v25 }
 0x80c   : > { %12146 = vmatpush1.bf16.msra.mxu0 %v14069_v50  ;;  %12474 = vmatpush1.bf16.msra.mxu1 %v14071_v15  ;;  %v14134_v50 = vcombine.high %v5858_v46, %v5862_v25  ;;  %v14136_v15 = vcombine.high %v5859_v47, %v5863_v36 }
 0x80d   : > { %12147 = vmatprep.subr.bf16.mxu0 %v14078_v6  ;;  %12475 = vmatprep.subr.bf16.mxu1 %v14080_v4  ;;  %v5866_v6 = vld [vmem:[%s15311_s10 + $0x1890] sm:$0xff] }
 0x80e   : > { %v5870_v4 = vld [vmem:[%s15311_s10 + $0x18b0] sm:$0xff] }
 0x810   : > { %12148 = vmatpush1.bf16.msra.mxu0 %v14077_v54  ;;  %12476 = vmatpush1.bf16.msra.mxu1 %v14079_v57  ;;  %v14142_v54 = vcombine.high %v5866_v6, %v5870_v4  ;;  %v14144_v57 = vcombine.high %v5867_v52, %v5871_v20 }
 0x811   : > { %12149 = vmatprep.subr.bf16.mxu0 %v14086_v60  ;;  %12477 = vmatprep.subr.bf16.mxu1 %v14088_v22  ;;  %v5874_v60 = vld [vmem:[%s15311_s10 + $0x18d0] sm:$0xff] }
 0x812   : > { %v5878_v22 = vld [vmem:[%s15311_s10 + $0x18f0] sm:$0xff] }
 0x813   : > { %v14150_v63 = vcombine.high %v5874_v60, %v5878_v22  ;;  %v14149_v5 = vcombine.low %v5874_v60, %v5878_v22 }
 0x814   : > { %12150 = vmatpush1.bf16.msra.mxu0 %v14085_v0  ;;  %12478 = vmatpush1.bf16.msra.mxu1 %v14087_v1  ;;  %v14152_v0 = vcombine.high %v5875_v61, %v5879_v14  ;;  %v5882_v1 = vld [vmem:[%s15311_s10 + $0x1910] sm:$0xff] }
 0x815   : > { %12151 = vmatprep.subr.bf16.mxu0 %v14094_v2  ;;  %12479 = vmatprep.subr.bf16.mxu1 %v14096_v24  ;;  %v5886_v2 = vld [vmem:[%s15311_s10 + $0x1930] sm:$0xff]  ;;  %v5883_v24 = vld [vmem:[%s15311_s10 + $0x1918] sm:$0xff] }
 0x816   : > { %v14158_v7 = vcombine.high %v5882_v1, %v5886_v2  ;;  %v14160_v31 = vcombine.high %v5883_v24, %v5887_v3  ;;  %v14157_v18 = vcombine.low %v5882_v1, %v5886_v2  ;;  %v14159_v19 = vcombine.low %v5883_v24, %v5887_v3 }
 0x818   : > { %12152 = vmatpush1.bf16.msra.mxu0 %v14093_v9  ;;  %12480 = vmatpush1.bf16.msra.mxu1 %v14095_v10  ;;  %v5890_v9 = vld [vmem:[%s15311_s10 + $0x1950] sm:$0xff] }
 0x819   : > { %12153 = vmatprep.subr.bf16.mxu0 %v14102_v12  ;;  %12481 = vmatprep.subr.bf16.mxu1 %v14104_v16  ;;  %v5894_v10 = vld [vmem:[%s15311_s10 + $0x1970] sm:$0xff]  ;;  %v5891_v12 = vld [vmem:[%s15311_s10 + $0x1958] sm:$0xff] }
 0x81a   : > { %v5895_v16 = vld [vmem:[%s15311_s10 + $0x1978] sm:$0xff]  ;;  %v14166_v13 = vcombine.high %v5890_v9, %v5894_v10  ;;  %v14165_v33 = vcombine.low %v5890_v9, %v5894_v10 }
 0x81b   : > { %v14168_v26 = vcombine.high %v5891_v12, %v5895_v16  ;;  %v14167_v34 = vcombine.low %v5891_v12, %v5895_v16 }
 0x81c   : > { %12154 = vmatpush1.bf16.msra.mxu0 %v14101_v27  ;;  %12482 = vmatpush1.bf16.msra.mxu1 %v14103_v29  ;;  %v5898_v27 = vld [vmem:[%s15311_s10 + $0x1990] sm:$0xff] }
 0x81d   : > { %12155 = vmatprep.subr.bf16.mxu0 %v14110_v30  ;;  %12483 = vmatprep.subr.bf16.mxu1 %v14112_v23  ;;  %v5902_v29 = vld [vmem:[%s15311_s10 + $0x19b0] sm:$0xff]  ;;  %v5899_v30 = vld [vmem:[%s15311_s10 + $0x1998] sm:$0xff] }
 0x81e   : > { %v5903_v23 = vld [vmem:[%s15311_s10 + $0x19b8] sm:$0xff]  ;;  %v14174_v35 = vcombine.high %v5898_v27, %v5902_v29  ;;  %v14173_v49 = vcombine.low %v5898_v27, %v5902_v29 }
 0x81f   : > { %v14176_v32 = vcombine.high %v5899_v30, %v5903_v23  ;;  %v14175_v55 = vcombine.low %v5899_v30, %v5903_v23 }
 0x820   : > { %12156 = vmatpush1.bf16.msra.mxu0 %v14109_v37  ;;  %12484 = vmatpush1.bf16.msra.mxu1 %v14111_v44  ;;  %v5906_v37 = vld [vmem:[%s15311_s10 + $0x19d0] sm:$0xff] }
 0x821   : > { %12157 = vmatprep.subr.bf16.mxu0 %v14118_v38  ;;  %12485 = vmatprep.subr.bf16.mxu1 %v14120_v39  ;;  %v5910_v44 = vld [vmem:[%s15311_s10 + $0x19f0] sm:$0xff]  ;;  %v5907_v38 = vld [vmem:[%s15311_s10 + $0x19d8] sm:$0xff] }
 0x822   : > { %v5911_v39 = vld [vmem:[%s15311_s10 + $0x19f8] sm:$0xff]  ;;  %v14182_v40 = vcombine.high %v5906_v37, %v5910_v44  ;;  %v14181_v46 = vcombine.low %v5906_v37, %v5910_v44 }
 0x823   : > { %v14184_v56 = vcombine.high %v5907_v38, %v5911_v39  ;;  %v14183_v25 = vcombine.low %v5907_v38, %v5911_v39 }
 0x824   : > { %12158 = vmatpush1.bf16.msra.mxu0 %v14117_v59  ;;  %12486 = vmatpush1.bf16.msra.mxu1 %v14119_v42  ;;  %v5914_v59 = vld [vmem:[%s15311_s10 + $0x1a10] sm:$0xff] }
 0x825   : > { %12168 = vmatprep.subr.bf16.mxu0 %v14126_v43  ;;  %12496 = vmatprep.subr.bf16.mxu1 %v14128_v45  ;;  %v5918_v42 = vld [vmem:[%s15311_s10 + $0x1a30] sm:$0xff]  ;;  %v5915_v43 = vld [vmem:[%s15311_s10 + $0x1a18] sm:$0xff] }
 0x826   : > { %v5919_v45 = vld [vmem:[%s15311_s10 + $0x1a38] sm:$0xff]  ;;  %v14190_v47 = vcombine.high %v5914_v59, %v5918_v42 }
 0x827   : > { %12160 = vmatmul.mubr.bf16.vlgmr.msra.gmra.mrb[4].mxu0 %v15879_v58  ;;  %12488 = vmatmul.mubr.bf16.vlgmr.msra.gmra.mrb[4].mxu1 %v15879_v58  ;;  %v14141_v58 = vcombine.low %v5866_v6, %v5870_v4  ;;  %v14192_v36 = vcombine.high %v5915_v43, %v5919_v45  ;;  %v14189_v6 = vcombine.low %v5914_v59, %v5918_v42 }
 0x828   : > { %12169 = vmatpush1.bf16.msra.mxu0 %v14125_v48  ;;  %12497 = vmatpush1.bf16.msra.mxu1 %v14127_v11  ;;  %v5922_v48 = vld [vmem:[%s15311_s10 + $0x1a50] sm:$0xff]  ;;  %v14191_v4 = vcombine.low %v5915_v43, %v5919_v45 }
 0x829   : > { %12170 = vmatprep.subr.bf16.mxu0 %v14134_v50  ;;  %12498 = vmatprep.subr.bf16.mxu1 %v14136_v15  ;;  %v5926_v11 = vld [vmem:[%s15311_s10 + $0x1a70] sm:$0xff]  ;;  %v5923_v50 = vld [vmem:[%s15311_s10 + $0x1a58] sm:$0xff] }
 0x82a   : > { %12200 = vmatprep.mubr.bf16.mxu0 %v15885_v51  ;;  %12528 = vmatprep.mubr.bf16.mxu1 %v15885_v51  ;;  %v14151_v51 = vcombine.low %v5875_v61, %v5879_v14  ;;  %v5927_v15 = vld [vmem:[%s15311_s10 + $0x1a78] sm:$0xff]  ;;  %v14198_v52 = vcombine.high %v5922_v48, %v5926_v11  ;;  %v14197_v60 = vcombine.low %v5922_v48, %v5926_v11 }
 0x82b   : > { %v14200_v20 = vcombine.high %v5923_v50, %v5927_v15  ;;  %v14199_v22 = vcombine.low %v5923_v50, %v5927_v15 }
 0x82c   : > { %12171 = vmatpush1.bf16.msra.mxu0 %v14133_v41  ;;  %12499 = vmatpush1.bf16.msra.mxu1 %v14135_v21  ;;  %v5930_v41 = vld [vmem:[%s15311_s10 + $0x1a90] sm:$0xff] }
 0x82d   : > { %12172 = vmatprep.subr.bf16.mxu0 %v14142_v54  ;;  %12500 = vmatprep.subr.bf16.mxu1 %v14144_v57  ;;  %v5934_v21 = vld [vmem:[%s15311_s10 + $0x1ab0] sm:$0xff]  ;;  %v5931_v54 = vld [vmem:[%s15311_s10 + $0x1a98] sm:$0xff] }
 0x82e   : > { %v5935_v57 = vld [vmem:[%s15311_s10 + $0x1ab8] sm:$0xff]  ;;  %v14206_v61 = vcombine.high %v5930_v41, %v5934_v21  ;;  %v14205_v1 = vcombine.low %v5930_v41, %v5934_v21 }
 0x82f   : > { %v14208_v14 = vcombine.high %v5931_v54, %v5935_v57  ;;  %v14207_v2 = vcombine.low %v5931_v54, %v5935_v57 }
 0x830   : > { %12173 = vmatpush1.bf16.msra.mxu0 %v14141_v58  ;;  %12501 = vmatpush1.bf16.msra.mxu1 %v14143_v62  ;;  %v5938_v58 = vld [vmem:[%s15311_s10 + $0x1ad0] sm:$0xff] }
 0x831   : > { %12174 = vmatprep.subr.bf16.mxu0 %v14150_v63  ;;  %12502 = vmatprep.subr.bf16.mxu1 %v14152_v0  ;;  %v5942_v62 = vld [vmem:[%s15311_s10 + $0x1af0] sm:$0xff]  ;;  %v5939_v63 = vld [vmem:[%s15311_s10 + $0x1ad8] sm:$0xff] }
 0x832   : > { %v5943_v0 = vld [vmem:[%s15311_s10 + $0x1af8] sm:$0xff]  ;;  %v14214_v24 = vcombine.high %v5938_v58, %v5942_v62  ;;  %v14213_v9 = vcombine.low %v5938_v58, %v5942_v62 }
 0x833   : > { %v14216_v3 = vcombine.high %v5939_v63, %v5943_v0  ;;  %v14215_v10 = vcombine.low %v5939_v63, %v5943_v0 }
 0x834   : > { %12175 = vmatpush1.bf16.msra.mxu0 %v14149_v5  ;;  %12503 = vmatpush1.bf16.msra.mxu1 %v14151_v51  ;;  %v5946_v5 = vld [vmem:[%s15311_s10 + $0x1b10] sm:$0xff] }
 0x835   : > { %12176 = vmatprep.subr.bf16.mxu0 %v14158_v7  ;;  %12504 = vmatprep.subr.bf16.mxu1 %v14160_v31  ;;  %v5950_v51 = vld [vmem:[%s15311_s10 + $0x1b30] sm:$0xff]  ;;  %v5947_v7 = vld [vmem:[%s15311_s10 + $0x1b18] sm:$0xff] }
 0x836   : > { %v5951_v31 = vld [vmem:[%s15311_s10 + $0x1b38] sm:$0xff]  ;;  %v14222_v12 = vcombine.high %v5946_v5, %v5950_v51  ;;  %v14221_v27 = vcombine.low %v5946_v5, %v5950_v51 }
 0x837   : > { %v14224_v16 = vcombine.high %v5947_v7, %v5951_v31  ;;  %v14223_v29 = vcombine.low %v5947_v7, %v5951_v31  ;;  %v6010_v31 = vld [vmem:[%s15311_s10 + $0x1d10] sm:$0xff] }
 0x838   : > { %12177 = vmatpush1.bf16.msra.mxu0 %v14157_v18  ;;  %12505 = vmatpush1.bf16.msra.mxu1 %v14159_v19  ;;  %v5954_v18 = vld [vmem:[%s15311_s10 + $0x1b50] sm:$0xff] }
 0x839   : > { %12178 = vmatprep.subr.bf16.mxu0 %v14166_v13  ;;  %12506 = vmatprep.subr.bf16.mxu1 %v14168_v26  ;;  %v5958_v19 = vld [vmem:[%s15311_s10 + $0x1b70] sm:$0xff]  ;;  %v5955_v13 = vld [vmem:[%s15311_s10 + $0x1b58] sm:$0xff] }
 0x83a   : > { %v5959_v26 = vld [vmem:[%s15311_s10 + $0x1b78] sm:$0xff]  ;;  %v14230_v30 = vcombine.high %v5954_v18, %v5958_v19  ;;  %v14229_v37 = vcombine.low %v5954_v18, %v5958_v19 }
 0x83b   : > { %v14232_v23 = vcombine.high %v5955_v13, %v5959_v26  ;;  %v14231_v44 = vcombine.low %v5955_v13, %v5959_v26  ;;  %v6018_v13 = vld [vmem:[%s15311_s10 + $0x1d50] sm:$0xff] }
 0x83c   : > { %12179 = vmatpush1.bf16.msra.mxu0 %v14165_v33  ;;  %12507 = vmatpush1.bf16.msra.mxu1 %v14167_v34  ;;  %v5962_v33 = vld [vmem:[%s15311_s10 + $0x1b90] sm:$0xff] }
 0x83d   : > { %12180 = vmatprep.subr.bf16.mxu0 %v14174_v35  ;;  %12508 = vmatprep.subr.bf16.mxu1 %v14176_v32  ;;  %v5966_v34 = vld [vmem:[%s15311_s10 + $0x1bb0] sm:$0xff]  ;;  %v5963_v35 = vld [vmem:[%s15311_s10 + $0x1b98] sm:$0xff] }
 0x83e   : > { %v5967_v32 = vld [vmem:[%s15311_s10 + $0x1bb8] sm:$0xff]  ;;  %v14238_v38 = vcombine.high %v5962_v33, %v5966_v34  ;;  %v14237_v59 = vcombine.low %v5962_v33, %v5966_v34  ;;  %v6022_v26 = vld [vmem:[%s15311_s10 + $0x1d70] sm:$0xff] }
 0x83f   : > { %v14240_v39 = vcombine.high %v5963_v35, %v5967_v32  ;;  %v14239_v42 = vcombine.low %v5963_v35, %v5967_v32  ;;  %v14294_v33 = vcombine.high %v6018_v13, %v6022_v26  ;;  %v6026_v35 = vld [vmem:[%s15311_s10 + $0x1d90] sm:$0xff] }
 0x840   : > { %12181 = vmatpush1.bf16.msra.mxu0 %v14173_v49  ;;  %12509 = vmatpush1.bf16.msra.mxu1 %v14175_v55  ;;  %v5970_v49 = vld [vmem:[%s15311_s10 + $0x1bd0] sm:$0xff] }
 0x841   : > { %12182 = vmatprep.subr.bf16.mxu0 %v14182_v40  ;;  %12510 = vmatprep.subr.bf16.mxu1 %v14184_v56  ;;  %v5974_v55 = vld [vmem:[%s15311_s10 + $0x1bf0] sm:$0xff]  ;;  %v5971_v40 = vld [vmem:[%s15311_s10 + $0x1bd8] sm:$0xff] }
 0x842   : > { %v5975_v56 = vld [vmem:[%s15311_s10 + $0x1bf8] sm:$0xff]  ;;  %v14246_v43 = vcombine.high %v5970_v49, %v5974_v55  ;;  %v14245_v48 = vcombine.low %v5970_v49, %v5974_v55  ;;  %v6030_v32 = vld [vmem:[%s15311_s10 + $0x1db0] sm:$0xff] }
 0x843   : > { %v14248_v45 = vcombine.high %v5971_v40, %v5975_v56  ;;  %v14247_v11 = vcombine.low %v5971_v40, %v5975_v56  ;;  %v14302_v49 = vcombine.high %v6026_v35, %v6030_v32  ;;  %v6034_v40 = vld [vmem:[%s15311_s10 + $0x1dd0] sm:$0xff] }
 0x844   : > { %12183 = vmatpush1.bf16.msra.mxu0 %v14181_v46  ;;  %12511 = vmatpush1.bf16.msra.mxu1 %v14183_v25  ;;  %v5978_v46 = vld [vmem:[%s15311_s10 + $0x1c10] sm:$0xff] }
 0x845   : > { %12184 = vmatprep.subr.bf16.mxu0 %v14190_v47  ;;  %12512 = vmatprep.subr.bf16.mxu1 %v14192_v36  ;;  %v5982_v25 = vld [vmem:[%s15311_s10 + $0x1c30] sm:$0xff]  ;;  %v5979_v47 = vld [vmem:[%s15311_s10 + $0x1c18] sm:$0xff] }
 0x846   : > { %v5983_v36 = vld [vmem:[%s15311_s10 + $0x1c38] sm:$0xff]  ;;  %v14254_v50 = vcombine.high %v5978_v46, %v5982_v25  ;;  %v14253_v41 = vcombine.low %v5978_v46, %v5982_v25  ;;  %v6038_v56 = vld [vmem:[%s15311_s10 + $0x1df0] sm:$0xff] }
 0x847   : > { %v14256_v15 = vcombine.high %v5979_v47, %v5983_v36  ;;  %v14255_v21 = vcombine.low %v5979_v47, %v5983_v36  ;;  %v14310_v46 = vcombine.high %v6034_v40, %v6038_v56  ;;  %v6042_v47 = vld [vmem:[%s15311_s10 + $0x1e10] sm:$0xff] }
 0x848   : > { %12185 = vmatpush1.bf16.msra.mxu0 %v14189_v6  ;;  %12513 = vmatpush1.bf16.msra.mxu1 %v14191_v4  ;;  %v5986_v6 = vld [vmem:[%s15311_s10 + $0x1c50] sm:$0xff] }
 0x849   : > { %12186 = vmatprep.subr.bf16.mxu0 %v14198_v52  ;;  %12514 = vmatprep.subr.bf16.mxu1 %v14200_v20  ;;  %v5990_v4 = vld [vmem:[%s15311_s10 + $0x1c70] sm:$0xff]  ;;  %v5987_v52 = vld [vmem:[%s15311_s10 + $0x1c58] sm:$0xff] }
 0x84a   : > { %v5991_v20 = vld [vmem:[%s15311_s10 + $0x1c78] sm:$0xff]  ;;  %v14262_v54 = vcombine.high %v5986_v6, %v5990_v4  ;;  %v14261_v58 = vcombine.low %v5986_v6, %v5990_v4  ;;  %v6046_v36 = vld [vmem:[%s15311_s10 + $0x1e30] sm:$0xff] }
 0x84b   : > { %v14264_v57 = vcombine.high %v5987_v52, %v5991_v20  ;;  %v14263_v62 = vcombine.low %v5987_v52, %v5991_v20  ;;  %v14318_v6 = vcombine.high %v6042_v47, %v6046_v36  ;;  %v6050_v52 = vld [vmem:[%s15311_s10 + $0x1e50] sm:$0xff] }
 0x84c   : > { %12187 = vmatpush1.bf16.msra.mxu0 %v14197_v60  ;;  %12515 = vmatpush1.bf16.msra.mxu1 %v14199_v22  ;;  %v5994_v60 = vld [vmem:[%s15311_s10 + $0x1c90] sm:$0xff] }
 0x84d   : > { %12188 = vmatprep.subr.bf16.mxu0 %v14206_v61  ;;  %12516 = vmatprep.subr.bf16.mxu1 %v14208_v14  ;;  %v5998_v22 = vld [vmem:[%s15311_s10 + $0x1cb0] sm:$0xff]  ;;  %v5995_v61 = vld [vmem:[%s15311_s10 + $0x1c98] sm:$0xff] }
 0x84e   : > { %v5999_v14 = vld [vmem:[%s15311_s10 + $0x1cb8] sm:$0xff]  ;;  %v14270_v63 = vcombine.high %v5994_v60, %v5998_v22  ;;  %v6054_v20 = vld [vmem:[%s15311_s10 + $0x1e70] sm:$0xff] }
 0x84f   : > { %v14272_v0 = vcombine.high %v5995_v61, %v5999_v14  ;;  %v14271_v5 = vcombine.low %v5995_v61, %v5999_v14  ;;  %v6058_v61 = vld [vmem:[%s15311_s10 + $0x1e90] sm:$0xff] }
 0x850   : > { %12189 = vmatpush1.bf16.msra.mxu0 %v14205_v1  ;;  %12517 = vmatpush1.bf16.msra.mxu1 %v14207_v2  ;;  %v6002_v1 = vld [vmem:[%s15311_s10 + $0x1cd0] sm:$0xff] }
 0x851   : > { %12190 = vmatprep.subr.bf16.mxu0 %v14214_v24  ;;  %12518 = vmatprep.subr.bf16.mxu1 %v14216_v3  ;;  %v6006_v2 = vld [vmem:[%s15311_s10 + $0x1cf0] sm:$0xff]  ;;  %v6003_v24 = vld [vmem:[%s15311_s10 + $0x1cd8] sm:$0xff] }
 0x852   : > { %v6007_v3 = vld [vmem:[%s15311_s10 + $0x1cf8] sm:$0xff]  ;;  %v14278_v51 = vcombine.high %v6002_v1, %v6006_v2  ;;  %v6062_v14 = vld [vmem:[%s15311_s10 + $0x1eb0] sm:$0xff] }
 0x853   : > { %v14280_v7 = vcombine.high %v6003_v24, %v6007_v3 }
 0x854   : > { %12191 = vmatpush1.bf16.msra.mxu0 %v14213_v9  ;;  %12519 = vmatpush1.bf16.msra.mxu1 %v14215_v10  ;;  %v6014_v9 = vld [vmem:[%s15311_s10 + $0x1d30] sm:$0xff]  ;;  %v6011_v10 = vld [vmem:[%s15311_s10 + $0x1d18] sm:$0xff] }
 0x855   : > { %12192 = vmatprep.subr.bf16.mxu0 %v14222_v12  ;;  %12520 = vmatprep.subr.bf16.mxu1 %v14224_v16  ;;  %v6015_v12 = vld [vmem:[%s15311_s10 + $0x1d38] sm:$0xff]  ;;  %v14277_v16 = vcombine.low %v6002_v1, %v6006_v2  ;;  %v14286_v18 = vcombine.high %v6010_v31, %v6014_v9  ;;  %v14334_v1 = vcombine.high %v6058_v61, %v6062_v14 }
 0x856   : > { %v14288_v19 = vcombine.high %v6011_v10, %v6015_v12 }
 0x858   : > { %12193 = vmatpush1.bf16.msra.mxu0 %v14221_v27  ;;  %12521 = vmatpush1.bf16.msra.mxu1 %v14223_v29  ;;  %v6019_v27 = vld [vmem:[%s15311_s10 + $0x1d58] sm:$0xff] }
 0x859   : > { %12194 = vmatprep.subr.bf16.mxu0 %v14230_v30  ;;  %12522 = vmatprep.subr.bf16.mxu1 %v14232_v23  ;;  %v6023_v29 = vld [vmem:[%s15311_s10 + $0x1d78] sm:$0xff]  ;;  %v14285_v30 = vcombine.low %v6010_v31, %v6014_v9  ;;  %v14287_v23 = vcombine.low %v6011_v10, %v6015_v12  ;;  %v6074_v10 = vld [vmem:[%s15311_s10 + $0x1f10] sm:$0xff] }
 0x85a   : > { %v14296_v34 = vcombine.high %v6019_v27, %v6023_v29  ;;  %v6078_v12 = vld [vmem:[%s15311_s10 + $0x1f30] sm:$0xff] }
 0x85c   : > { %12195 = vmatpush1.bf16.msra.mxu0 %v14229_v37  ;;  %12523 = vmatpush1.bf16.msra.mxu1 %v14231_v44  ;;  %v6027_v37 = vld [vmem:[%s15311_s10 + $0x1d98] sm:$0xff] }
 0x85d   : > { %12196 = vmatprep.subr.bf16.mxu0 %v14238_v38  ;;  %12524 = vmatprep.subr.bf16.mxu1 %v14240_v39  ;;  %v6031_v44 = vld [vmem:[%s15311_s10 + $0x1db8] sm:$0xff]  ;;  %v14293_v38 = vcombine.low %v6018_v13, %v6022_v26  ;;  %v14295_v39 = vcombine.low %v6019_v27, %v6023_v29  ;;  %v14350_v13 = vcombine.high %v6074_v10, %v6078_v12  ;;  %v6082_v27 = vld [vmem:[%s15311_s10 + $0x1f50] sm:$0xff] }
 0x85e   : > { %v14304_v55 = vcombine.high %v6027_v37, %v6031_v44  ;;  %v6086_v29 = vld [vmem:[%s15311_s10 + $0x1f70] sm:$0xff] }
 0x860   : > { %12197 = vmatpush1.bf16.msra.mxu0 %v14237_v59  ;;  %12525 = vmatpush1.bf16.msra.mxu1 %v14239_v42  ;;  %v6035_v59 = vld [vmem:[%s15311_s10 + $0x1dd8] sm:$0xff] }
 0x861   : > { %12198 = vmatprep.subr.bf16.mxu0 %v14246_v43  ;;  %12526 = vmatprep.subr.bf16.mxu1 %v14248_v45  ;;  %v6039_v42 = vld [vmem:[%s15311_s10 + $0x1df8] sm:$0xff]  ;;  %v14301_v43 = vcombine.low %v6026_v35, %v6030_v32  ;;  %v14303_v45 = vcombine.low %v6027_v37, %v6031_v44  ;;  %v14358_v35 = vcombine.high %v6082_v27, %v6086_v29  ;;  %v6090_v37 = vld [vmem:[%s15311_s10 + $0x1f90] sm:$0xff] }
 0x862   : > { %v14312_v25 = vcombine.high %v6035_v59, %v6039_v42  ;;  %v6094_v44 = vld [vmem:[%s15311_s10 + $0x1fb0] sm:$0xff] }
 0x864   : > { %12199 = vmatpush1.bf16.msra.mxu0 %v14245_v48  ;;  %12527 = vmatpush1.bf16.msra.mxu1 %v14247_v11  ;;  %v6043_v48 = vld [vmem:[%s15311_s10 + $0x1e18] sm:$0xff] }
 0x865   : > { %12209 = vmatprep.subr.bf16.mxu0 %v14254_v50  ;;  %12537 = vmatprep.subr.bf16.mxu1 %v14256_v15  ;;  %v6047_v11 = vld [vmem:[%s15311_s10 + $0x1e38] sm:$0xff]  ;;  %v14309_v50 = vcombine.low %v6034_v40, %v6038_v56  ;;  %v14311_v15 = vcombine.low %v6035_v59, %v6039_v42  ;;  %v14366_v40 = vcombine.high %v6090_v37, %v6094_v44  ;;  %v6098_v59 = vld [vmem:[%s15311_s10 + $0x1fd0] sm:$0xff] }
 0x866   : > { %v14320_v4 = vcombine.high %v6043_v48, %v6047_v11  ;;  %v6102_v42 = vld [vmem:[%s15311_s10 + $0x1ff0] sm:$0xff] }
 0x867   : > { %12201 = vmatmul.mubr.bf16.vlgmr.msra.gmra.mrb[4].mxu0 %v15951_v8  ;;  %12529 = vmatmul.mubr.bf16.vlgmr.msra.gmra.mrb[4].mxu1 %v15951_v8  ;;  %v14269_v8 = vcombine.low %v5994_v60, %v5998_v22  ;;  %v14326_v60 = vcombine.high %v6050_v52, %v6054_v20 }
 0x868   : > { %12210 = vmatpush1.bf16.msra.mxu0 %v14253_v41  ;;  %12538 = vmatpush1.bf16.msra.mxu1 %v14255_v21  ;;  %v6051_v41 = vld [vmem:[%s15311_s10 + $0x1e58] sm:$0xff] }
 0x869   : > { %12211 = vmatprep.subr.bf16.mxu0 %v14262_v54  ;;  %12539 = vmatprep.subr.bf16.mxu1 %v14264_v57  ;;  %v6055_v21 = vld [vmem:[%s15311_s10 + $0x1e78] sm:$0xff]  ;;  %v14317_v54 = vcombine.low %v6042_v47, %v6046_v36  ;;  %v14319_v57 = vcombine.low %v6043_v48, %v6047_v11  ;;  %v14374_v47 = vcombine.high %v6098_v59, %v6102_v42 }
 0x86a   : > { %12241 = vmatprep.mubr.bf16.mxu0 %v15957_v28  ;;  %12569 = vmatprep.mubr.bf16.mxu1 %v15957_v28  ;;  %v14279_v28 = vcombine.low %v6003_v24, %v6007_v3  ;;  %v14328_v22 = vcombine.high %v6051_v41, %v6055_v21  ;;  %v6066_v24 = vld [vmem:[%s15311_s10 + $0x1ed0] sm:$0xff]  ;;  %v14373_v48 = vcombine.low %v6098_v59, %v6102_v42 }
 0x86b   : > { %v6070_v3 = vld [vmem:[%s15311_s10 + $0x1ef0] sm:$0xff] }
 0x86c   : > { %12212 = vmatpush1.bf16.msra.mxu0 %v14261_v58  ;;  %12540 = vmatpush1.bf16.msra.mxu1 %v14263_v62  ;;  %v6059_v58 = vld [vmem:[%s15311_s10 + $0x1e98] sm:$0xff]  ;;  %v14342_v31 = vcombine.high %v6066_v24, %v6070_v3 }
 0x86d   : > { %12213 = vmatprep.subr.bf16.mxu0 %v14270_v63  ;;  %12541 = vmatprep.subr.bf16.mxu1 %v14272_v0  ;;  %v6063_v62 = vld [vmem:[%s15311_s10 + $0x1eb8] sm:$0xff]  ;;  %v14325_v63 = vcombine.low %v6050_v52, %v6054_v20  ;;  %v14327_v0 = vcombine.low %v6051_v41, %v6055_v21  ;;  %v14803_v52 = vld [vmem:[%s370_s12] sm:$0xff] }
 0x86e   : > { %v14336_v2 = vcombine.high %v6059_v58, %v6063_v62 }
 0x870   : > { %12214 = vmatpush1.bf16.msra.mxu0 %v14269_v8  ;;  %12542 = vmatpush1.bf16.msra.mxu1 %v14271_v5  ;;  %v6067_v8 = vld [vmem:[%s15311_s10 + $0x1ed8] sm:$0xff] }
 0x871   : > { %12215 = vmatprep.subr.bf16.mxu0 %v14278_v51  ;;  %12543 = vmatprep.subr.bf16.mxu1 %v14280_v7  ;;  %v6071_v5 = vld [vmem:[%s15311_s10 + $0x1ef8] sm:$0xff]  ;;  %v14333_v51 = vcombine.low %v6058_v61, %v6062_v14  ;;  %v14335_v7 = vcombine.low %v6059_v58, %v6063_v62 }
 0x872   : > { %v14344_v9 = vcombine.high %v6067_v8, %v6071_v5 }
 0x874   : > { %12216 = vmatpush1.bf16.msra.mxu0 %v14277_v16  ;;  %12544 = vmatpush1.bf16.msra.mxu1 %v14279_v28  ;;  %v6075_v16 = vld [vmem:[%s15311_s10 + $0x1f18] sm:$0xff] }
 0x875   : > { %12217 = vmatprep.subr.bf16.mxu0 %v14286_v18  ;;  %12545 = vmatprep.subr.bf16.mxu1 %v14288_v19  ;;  %v6079_v28 = vld [vmem:[%s15311_s10 + $0x1f38] sm:$0xff]  ;;  %v14341_v18 = vcombine.low %v6066_v24, %v6070_v3  ;;  %v14343_v19 = vcombine.low %v6067_v8, %v6071_v5 }
 0x876   : > { %v14352_v26 = vcombine.high %v6075_v16, %v6079_v28 }
 0x878   : > { %12218 = vmatpush1.bf16.msra.mxu0 %v14285_v30  ;;  %12546 = vmatpush1.bf16.msra.mxu1 %v14287_v23  ;;  %v6083_v30 = vld [vmem:[%s15311_s10 + $0x1f58] sm:$0xff] }
 0x879   : > { %12219 = vmatprep.subr.bf16.mxu0 %v14294_v33  ;;  %12547 = vmatprep.subr.bf16.mxu1 %v14296_v34  ;;  %v6087_v23 = vld [vmem:[%s15311_s10 + $0x1f78] sm:$0xff]  ;;  %v14349_v33 = vcombine.low %v6074_v10, %v6078_v12  ;;  %v14351_v34 = vcombine.low %v6075_v16, %v6079_v28 }
 0x87a   : > { %v14360_v32 = vcombine.high %v6083_v30, %v6087_v23 }
 0x87c   : > { %12220 = vmatpush1.bf16.msra.mxu0 %v14293_v38  ;;  %12548 = vmatpush1.bf16.msra.mxu1 %v14295_v39  ;;  %v6091_v38 = vld [vmem:[%s15311_s10 + $0x1f98] sm:$0xff] }
 0x87d   : > { %12221 = vmatprep.subr.bf16.mxu0 %v14302_v49  ;;  %12549 = vmatprep.subr.bf16.mxu1 %v14304_v55  ;;  %v6095_v39 = vld [vmem:[%s15311_s10 + $0x1fb8] sm:$0xff]  ;;  %v14357_v49 = vcombine.low %v6082_v27, %v6086_v29  ;;  %v14359_v55 = vcombine.low %v6083_v30, %v6087_v23 }
 0x87e   : > { %v14368_v56 = vcombine.high %v6091_v38, %v6095_v39 }
 0x880   : > { %12222 = vmatpush1.bf16.msra.mxu0 %v14301_v43  ;;  %12550 = vmatpush1.bf16.msra.mxu1 %v14303_v45  ;;  %v6099_v43 = vld [vmem:[%s15311_s10 + $0x1fd8] sm:$0xff] }
 0x881   : > { %12223 = vmatprep.subr.bf16.mxu0 %v14310_v46  ;;  %12551 = vmatprep.subr.bf16.mxu1 %v14312_v25  ;;  %v6103_v45 = vld [vmem:[%s15311_s10 + $0x1ff8] sm:$0xff]  ;;  %v14365_v46 = vcombine.low %v6090_v37, %v6094_v44  ;;  %v14367_v25 = vcombine.low %v6091_v38, %v6095_v39 }
 0x882   : > { %v14376_v36 = vcombine.high %v6099_v43, %v6103_v45  ;;  %v14375_v11 = vcombine.low %v6099_v43, %v6103_v45 }
 0x884   : > { %12224 = vmatpush1.bf16.msra.mxu0 %v14309_v50  ;;  %12552 = vmatpush1.bf16.msra.mxu1 %v14311_v15  ;;  %v6124_v50 = vsub.s32 4, %v16247_v53  ;;  %v6132_v15 = vsub.s32 6, %v16247_v53 }
 0x885   : > { %12225 = vmatprep.subr.bf16.mxu0 %v14318_v6  ;;  %12553 = vmatprep.subr.bf16.mxu1 %v14320_v4  ;;  %v6128_v6 = vsub.s32 5, %v16247_v53  ;;  %v6136_v4 = vsub.s32 7, %v16247_v53 }
 0x886   : > { %v6125_v20 = vrot.slane %v14803_v52, %v6124_v50  ;;  %v6133_v41 = vrot.slane %v14803_v52, %v6132_v15 }
 0x887   : > { %v6129_v21 = vrot.slane %v14803_v52, %v6128_v6 }
 0x888   : > { %12226 = vmatpush1.bf16.msra.mxu0 %v14317_v54  ;;  %12554 = vmatpush1.bf16.msra.mxu1 %v14319_v57  ;;  %v6137_v54 = vrot.slane %v14803_v52, %v6136_v4 }
 0x889   : > { %12227 = vmatprep.subr.bf16.mxu0 %v14326_v60  ;;  %12555 = vmatprep.subr.bf16.mxu1 %v14328_v22 }
 0x88c   : > { %12228 = vmatpush1.bf16.msra.mxu0 %v14325_v63  ;;  %12556 = vmatpush1.bf16.msra.mxu1 %v14327_v0 }
 0x88d   : > { %12229 = vmatprep.subr.bf16.mxu0 %v14334_v1  ;;  %12557 = vmatprep.subr.bf16.mxu1 %v14336_v2 }
 0x890   : > { %12230 = vmatpush1.bf16.msra.mxu0 %v14333_v51  ;;  %12558 = vmatpush1.bf16.msra.mxu1 %v14335_v7 }
 0x891   : > { %12231 = vmatprep.subr.bf16.mxu0 %v14342_v31  ;;  %12559 = vmatprep.subr.bf16.mxu1 %v14344_v9 }
 0x894   : > { %12232 = vmatpush1.bf16.msra.mxu0 %v14341_v18  ;;  %12560 = vmatpush1.bf16.msra.mxu1 %v14343_v19 }
 0x895   : > { %12233 = vmatprep.subr.bf16.mxu0 %v14350_v13  ;;  %12561 = vmatprep.subr.bf16.mxu1 %v14352_v26 }
 0x898   : > { %12234 = vmatpush1.bf16.msra.mxu0 %v14349_v33  ;;  %12562 = vmatpush1.bf16.msra.mxu1 %v14351_v34 }
 0x899   : > { %12235 = vmatprep.subr.bf16.mxu0 %v14358_v35  ;;  %12563 = vmatprep.subr.bf16.mxu1 %v14360_v32 }
 0x89c   : > { %12236 = vmatpush1.bf16.msra.mxu0 %v14357_v49  ;;  %12564 = vmatpush1.bf16.msra.mxu1 %v14359_v55 }
 0x89d   : > { %12237 = vmatprep.subr.bf16.mxu0 %v14366_v40  ;;  %12565 = vmatprep.subr.bf16.mxu1 %v14368_v56 }
 0x8a0   : > { %12238 = vmatpush1.bf16.msra.mxu0 %v14365_v46  ;;  %12566 = vmatpush1.bf16.msra.mxu1 %v14367_v25 }
 0x8a1   : > { %12239 = vmatprep.subr.bf16.mxu0 %v14374_v47  ;;  %12567 = vmatprep.subr.bf16.mxu1 %v14376_v36 }
 0x8a4   : > { %12240 = vmatpush1.bf16.msra.mxu0 %v14373_v48  ;;  %12568 = vmatpush1.bf16.msra.mxu1 %v14375_v11 }
 0x8a7   : > { %12242 = vmatmul.mubr.bf16.vlgmr.msra.gmra.mrb[4].mxu0 %v16023_v17  ;;  %12570 = vmatmul.mubr.bf16.vlgmr.msra.gmra.mrb[4].mxu1 %v16023_v17 }
 0x97a   : > { %v12243_v57 = vpop.f32.mrb[4].mxu0  ;;  %v12571_v22 = vpop.f32.mrb[4].mxu1 }
 0x97b   : > { %v14433_v60 = vadd.f32 %v12243_v57, %v6125_v20  ;;  %v12245_v61 = vpop.f32.mrb[5].mxu0  ;;  %v14435_v17 = vadd.f32 %v12571_v22, %v6133_v41  ;;  %v12573_v58 = vpop.f32.mrb[5].mxu1 }
 0x97c   : > { %v14434_v14 = vadd.f32 %v12245_v61, %v6129_v21  ;;  %v12247_v62 = vpop.f32.mrb[6].mxu0  ;;  %v14436_v53 = vadd.f32 %v12573_v58, %v6137_v54  ;;  %v12575_v63 = vpop.f32.mrb[6].mxu1 }
 0x97d   : > { %14795 = vtanh.f32 %v14433_v60  ;;  %v12248_v0 = vpop.f32.mrb[7].mxu0  ;;  %v12576_v1 = vpop.f32.mrb[7].mxu1 }
 0x97e   : > { %14797 = vtanh.f32 %v14435_v17 }
 0x97f   : > { %14799 = vtanh.f32 %v14434_v14 }
 0x980   : > { %14801 = vtanh.f32 %v14436_v53 }
 0x987   : > { %v14796_v2 = vpop.eup %14795 }
 0x988   : > { %v14798_v24 = vpop.eup %14797  ;;  %12590 = vst [vmem:[%s15323_s2 + $0x20] sm:$0xff] %v14796_v2 }
 0x989   : > { %v14800_v3 = vpop.eup %14799  ;;  %12592 = vst [vmem:[%s15323_s2 + $0x30] sm:$0xff] %v14798_v24 }
 0x98a   : > { %v14802_v8 = vpop.eup %14801  ;;  %12591 = vst [vmem:[%s15323_s2 + $0x28] sm:$0xff] %v14800_v3 }
 0x98b   : > { %12593 = vst [vmem:[%s15323_s2 + $0x38] sm:$0xff] %v14802_v8 }
 0x98c PF: > { %s16651_s30 = sld [smem:[#allocation16_spill]]  ;;  %s16652_s13 = sld [smem:[#allocation17_spill]] }
 0x98d   : > { %s16653_s27 = smov %s15014_s28  ;;  %s16654_s28 = smov %s15018_s29 }
 0x992   : > { %p18_p9 = scmp.ge.s32.totalorder %s16651_s30, 4   ;;  %s16655_s29 = smov %s16652_s13 }
 0x994   :  { %20 = sbr.rel (!%p18_p9) target bundleno = 9 (0x9), region = 122 }
 0x99b   :  { %12616 = vsyncpa [#allocation4], 1 }
 0x99c   :  { %12618 = vsyncpa [#allocation4 + $0x1], 1 }
 0x99d   :  { %12619 = vsyncpa [#allocation6], 1 }
 0x99e   :  { %12620 = vsyncpa [#allocation9], 1 }

</bundles_post_ra>
